<compile_context>
chip_gen: v7x
topology: tpu7x:2x2x1
jax: 0.10.0
libtpu: 0.0.40
codegen_flags: <defaults>
</compile_context>

<pallas_src>
import jax
import jax.numpy as jnp
from jax.experimental import pallas as pl
from jax.experimental.pallas import tpu as pltpu


def _critic_kernel(x_ref, w0_ref, wh_ref, b_ref, wp_ref, bp_ref, out_ref):
    """One batch tile of the Critic MLP.

    x_ref  : (TB, IN)  f32  activations for this batch tile (streamed)
    w0_ref : (IN, H)   f32  first-layer weight, stored (in, out)   (resident)
    wh_ref : (4, H, H) bf16 hidden-layer weights, layers 1..4      (resident)
    b_ref  : (5, H)    f32  biases for layers 0..4                 (resident)
    wp_ref : (1, H)    f32  postprocess weight row                 (resident)
    bp_ref : (1,)      f32  postprocess bias (SMEM scalar)
    out_ref: (1, TB)   f32  critic value per row, batch on lanes
    """
    in_dim = x_ref.shape[1]
    x = x_ref[...]                                       # (TB, IN) f32

    # ---- Layer 0: Linear(IN, H) + ReLU -------------------------------------
    if in_dim <= 32:
        # VPU path: IN broadcast multiply-adds in f32.  Keeps the K-padded
        # (IN -> 128) matmul off the MXU, which is the saturated unit once the
        # hidden layers run in bf16.
        h = b_ref[0:1, :]                                # (1, H), broadcasts
        for k in range(in_dim):
            h = h + x[:, k:k + 1] * w0_ref[k:k + 1, :]
    else:
        h = jnp.dot(x.astype(jnp.bfloat16),
                    w0_ref[...].astype(jnp.bfloat16),
                    preferred_element_type=jnp.float32) + b_ref[0:1, :]
    h = jnp.maximum(h, 0.0)

    # ---- Layers 1..3: Linear(H, H) + ReLU (bf16 MXU, f32 accumulate) -------
    for l in range(3):
        h = jnp.maximum(
            jnp.dot(h.astype(jnp.bfloat16), wh_ref[l],
                    preferred_element_type=jnp.float32)
            + b_ref[l + 1:l + 2, :], 0.0)

    # ---- Layer 4: Linear(H, H) + Tanh (tanh stays f32 on the EUP) ----------
    h = jnp.tanh(
        jnp.dot(h.astype(jnp.bfloat16), wh_ref[3],
                preferred_element_type=jnp.float32)
        + b_ref[4:5, :])

    # ---- postprocess: Linear(H, 1) as VPU multiply + lane reduction --------
    # (avoids a 1-column MXU matmul); lane-dense (1, TB) store of the batch.
    v = jnp.sum(h * wp_ref[...], axis=-1) + bp_ref[0]    # (TB,) f32
    out_ref[0, :] = v.astype(out_ref.dtype)


def _choose_batch_tile(B, block_rows):
    """Lane-aligned batch tile (multiple of 128); at least two tiles whenever
    B > 128 so both v7x TensorCores get a share of the 'parallel' grid axis."""
    if B <= 128:
        return B
    half = -(-B // 2)                 # ceil(B / 2)
    half = -(-half // 128) * 128      # round up to a multiple of 128
    return min(block_rows, half)


def critic_forward(x, params, *, block_rows=1024):
    """x: (B, input_len) f32; params: coalesced weight dict (see init_params).

    Returns the critic value per row, shape (B,) f32.
    """
    B, in_dim = x.shape
    H = params["w0"].shape[1]
    assert block_rows % 128 == 0, "block_rows must be a multiple of 128"
    tb = _choose_batch_tile(B, block_rows)
    grid = (pl.cdiv(B, tb),)

    # Scheduler hint: the kernel itself is tiny at these sizes; let XLA overlap
    # it with surrounding PPO-step work.
    flops = 2 * B * (in_dim * H + 4 * H * H + H)
    bytes_accessed = (
        int(x.size) * x.dtype.itemsize
        + sum(int(params[k].size) * params[k].dtype.itemsize
              for k in ("w0", "wh", "b", "wp", "bp"))
        + B * 4)
    cost = pl.CostEstimate(flops=flops, transcendentals=B * H,
                           bytes_accessed=bytes_accessed)

    out = pl.pallas_call(
        _critic_kernel,
        out_shape=jax.ShapeDtypeStruct((1, B), jnp.float32),
        grid=grid,
        in_specs=[
            # activations: streamed over batch tiles
            pl.BlockSpec((tb, in_dim), lambda i: (i, 0)),
            # parameters: same block every grid step -> VMEM-resident
            pl.BlockSpec((in_dim, H), lambda i: (0, 0)),
            pl.BlockSpec((4, H, H), lambda i: (0, 0, 0)),
            pl.BlockSpec((5, H), lambda i: (0, 0)),
            pl.BlockSpec((1, H), lambda i: (0, 0)),
            # scalar postprocess bias lives in SMEM
            pl.BlockSpec(memory_space=pltpu.MemorySpace.SMEM),
        ],
        out_specs=pl.BlockSpec((1, tb), lambda i: (0, i)),
        compiler_params=pltpu.CompilerParams(
            dimension_semantics=("parallel",)),
        cost_estimate=cost,
    )(x, params["w0"], params["wh"], params["b"], params["wp"], params["bp"])

    # (1, B) -> (B,)  == the PyTorch module's .squeeze(-1)
    return out[0]


def init_params(key, input_len, hidden_dim):
    """Deterministic init mimicking PyTorch Linear default U[-1/sqrt(fan_in), +].

    Weights are stored (in_features, out_features); the four hidden (H,H)
    weights are stacked and pre-cast to bf16 (MXU-native on all generations),
    the five layer biases are stacked (f32), wp is a (1,H) f32 row and bp is a
    (1,) f32 scalar — matching the coalesced kernel operands.
    """
    def linear(k, fan_in, fan_out):
        kw, kb = jax.random.split(k)
        bound = float(fan_in) ** -0.5
        w = jax.random.uniform(kw, (fan_in, fan_out), jnp.float32, -bound, bound)
        b = jax.random.uniform(kb, (fan_out,), jnp.float32, -bound, bound)
        return w, b

    keys = jax.random.split(key, 6)
    w0, b0 = linear(keys[0], input_len, hidden_dim)
    hidden_w, hidden_b = [], [b0]
    for l in range(4):
        w, b = linear(keys[1 + l], hidden_dim, hidden_dim)
        hidden_w.append(w)
        hidden_b.append(b)
    wp, bp = linear(keys[5], hidden_dim, 1)

    return {
        "w0": w0,                                            # (IN, H)   f32
        "wh": jnp.stack(hidden_w, 0).astype(jnp.bfloat16),   # (4, H, H) bf16
        "b": jnp.stack(hidden_b, 0),                         # (5, H)    f32
        "wp": wp.T,                                          # (1, H)    f32
        "bp": bp,                                            # (1,)      f32
    }


def critic_reference(x, params):
    """Pure-JAX reference mirroring the kernel's mixed-precision math
    (f32 layer 0, bf16 hidden-layer matmuls with f32 accumulation)."""
    h = jnp.maximum(
        jnp.dot(x, params["w0"], precision=jax.lax.Precision.HIGHEST)
        + params["b"][0], 0.0)
    for l in range(3):
        h = jnp.maximum(
            jnp.dot(h.astype(jnp.bfloat16), params["wh"][l],
                    preferred_element_type=jnp.float32)
            + params["b"][l + 1], 0.0)
    h = jnp.tanh(
        jnp.dot(h.astype(jnp.bfloat16), params["wh"][3],
                preferred_element_type=jnp.float32)
        + params["b"][4])
    return jnp.sum(h * params["wp"], axis=-1) + params["bp"][0]


if __name__ == "__main__":
    INPUT_LEN, HIDDEN = 16, 128   # lane-aligned hidden width

    key = jax.random.PRNGKey(0)
    key, kx = jax.random.split(key)
    params = init_params(key, INPUT_LEN, HIDDEN)

    # B=512: two even 256-row tiles (keeps both v7x TensorCores busy).
    # B=300: ragged final tile (exercises masked writeback of the last block).
    for B in (512, 300):
        x = jax.random.normal(jax.random.fold_in(kx, B), (B, INPUT_LEN),
                              jnp.float32)
        out = jax.block_until_ready(critic_forward(x, params))
        ref = critic_reference(x, params)
        assert out.shape == (B,), out.shape
        assert bool(jnp.all(jnp.isfinite(out)))
        assert jnp.allclose(out, ref, atol=5e-3, rtol=5e-3), (
            float(jnp.max(jnp.abs(out - ref))))

    print("KERNEL_OK")
</pallas_src>

<mosaic_0001>
module attributes {stable_mosaic.version = 11 : i64} {
  func.func @_critic_kernel(%arg0: i32, %arg1: memref<256x16xf32, #tpu.memory_space<vmem>>, %arg2: memref<16x128xf32, #tpu.memory_space<vmem>>, %arg3: memref<4x128x128xbf16, #tpu.memory_space<vmem>>, %arg4: memref<5x128xf32, #tpu.memory_space<vmem>>, %arg5: memref<1x128xf32, #tpu.memory_space<vmem>>, %arg6: memref<1xf32, #tpu.memory_space<smem>>, %arg7: memref<1x256xf32, #tpu.memory_space<vmem>>) attributes {dimension_semantics = [#tpu.dimension_semantics<parallel>], iteration_bounds = array<i64: 2>, scalar_prefetch = 0 : i64, scratch_operands = 0 : i64, tpu.core_type = #tpu.core_type<tc>, window_params = [{transform_indices = @transform_0, window_bounds = array<i64: 256, 16>}, {pipeline_mode = #tpu.pipeline_mode<synchronous>, transform_indices = @transform_1, window_bounds = array<i64: 16, 128>}, {pipeline_mode = #tpu.pipeline_mode<synchronous>, transform_indices = @transform_2, window_bounds = array<i64: 4, 128, 128>}, {pipeline_mode = #tpu.pipeline_mode<synchronous>, transform_indices = @transform_3, window_bounds = array<i64: 5, 128>}, {pipeline_mode = #tpu.pipeline_mode<synchronous>, transform_indices = @transform_4, window_bounds = array<i64: 1, 128>}, {transform_indices = @transform_5, window_bounds = array<i64: 1>}, {transform_indices = @transform_6, window_bounds = array<i64: 1, 256>}]} {
    %c0 = arith.constant 0 : index
    %c0_0 = arith.constant 0 : index
    %0 = vector.load %arg1[%c0, %c0_0] : memref<256x16xf32, #tpu.memory_space<vmem>>, vector<256x16xf32>
    %c0_1 = arith.constant 0 : index
    %c0_2 = arith.constant 0 : index
    %1 = vector.load %arg4[%c0_1, %c0_2] : memref<5x128xf32, #tpu.memory_space<vmem>>, vector<1x128xf32>
    %2 = vector.extract_strided_slice %0 {offsets = [0, 0], sizes = [256, 1], strides = [1, 1]} : vector<256x16xf32> to vector<256x1xf32>
    %c0_3 = arith.constant 0 : index
    %c0_4 = arith.constant 0 : index
    %3 = vector.load %arg2[%c0_3, %c0_4] : memref<16x128xf32, #tpu.memory_space<vmem>>, vector<1x128xf32>
    %4 = vector.broadcast %2 : vector<256x1xf32> to vector<256x128xf32>
    %5 = vector.broadcast %3 : vector<1x128xf32> to vector<256x128xf32>
    %6 = arith.mulf %4, %5 : vector<256x128xf32>
    %7 = vector.broadcast %1 : vector<1x128xf32> to vector<256x128xf32>
    %8 = arith.addf %7, %6 : vector<256x128xf32>
    %9 = vector.extract_strided_slice %0 {offsets = [0, 1], sizes = [256, 1], strides = [1, 1]} : vector<256x16xf32> to vector<256x1xf32>
    %c1 = arith.constant 1 : index
    %c0_5 = arith.constant 0 : index
    %10 = vector.load %arg2[%c1, %c0_5] : memref<16x128xf32, #tpu.memory_space<vmem>>, vector<1x128xf32>
    %11 = vector.broadcast %9 : vector<256x1xf32> to vector<256x128xf32>
    %12 = vector.broadcast %10 : vector<1x128xf32> to vector<256x128xf32>
    %13 = arith.mulf %11, %12 : vector<256x128xf32>
    %14 = arith.addf %8, %13 : vector<256x128xf32>
    %15 = vector.extract_strided_slice %0 {offsets = [0, 2], sizes = [256, 1], strides = [1, 1]} : vector<256x16xf32> to vector<256x1xf32>
    %c2 = arith.constant 2 : index
    %c0_6 = arith.constant 0 : index
    %16 = vector.load %arg2[%c2, %c0_6] : memref<16x128xf32, #tpu.memory_space<vmem>>, vector<1x128xf32>
    %17 = vector.broadcast %15 : vector<256x1xf32> to vector<256x128xf32>
    %18 = vector.broadcast %16 : vector<1x128xf32> to vector<256x128xf32>
    %19 = arith.mulf %17, %18 : vector<256x128xf32>
    %20 = arith.addf %14, %19 : vector<256x128xf32>
    %21 = vector.extract_strided_slice %0 {offsets = [0, 3], sizes = [256, 1], strides = [1, 1]} : vector<256x16xf32> to vector<256x1xf32>
    %c3 = arith.constant 3 : index
    %c0_7 = arith.constant 0 : index
    %22 = vector.load %arg2[%c3, %c0_7] : memref<16x128xf32, #tpu.memory_space<vmem>>, vector<1x128xf32>
    %23 = vector.broadcast %21 : vector<256x1xf32> to vector<256x128xf32>
    %24 = vector.broadcast %22 : vector<1x128xf32> to vector<256x128xf32>
    %25 = arith.mulf %23, %24 : vector<256x128xf32>
    %26 = arith.addf %20, %25 : vector<256x128xf32>
    %27 = vector.extract_strided_slice %0 {offsets = [0, 4], sizes = [256, 1], strides = [1, 1]} : vector<256x16xf32> to vector<256x1xf32>
    %c4 = arith.constant 4 : index
    %c0_8 = arith.constant 0 : index
    %28 = vector.load %arg2[%c4, %c0_8] : memref<16x128xf32, #tpu.memory_space<vmem>>, vector<1x128xf32>
    %29 = vector.broadcast %27 : vector<256x1xf32> to vector<256x128xf32>
    %30 = vector.broadcast %28 : vector<1x128xf32> to vector<256x128xf32>
    %31 = arith.mulf %29, %30 : vector<256x128xf32>
    %32 = arith.addf %26, %31 : vector<256x128xf32>
    %33 = vector.extract_strided_slice %0 {offsets = [0, 5], sizes = [256, 1], strides = [1, 1]} : vector<256x16xf32> to vector<256x1xf32>
    %c5 = arith.constant 5 : index
    %c0_9 = arith.constant 0 : index
    %34 = vector.load %arg2[%c5, %c0_9] : memref<16x128xf32, #tpu.memory_space<vmem>>, vector<1x128xf32>
    %35 = vector.broadcast %33 : vector<256x1xf32> to vector<256x128xf32>
    %36 = vector.broadcast %34 : vector<1x128xf32> to vector<256x128xf32>
    %37 = arith.mulf %35, %36 : vector<256x128xf32>
    %38 = arith.addf %32, %37 : vector<256x128xf32>
    %39 = vector.extract_strided_slice %0 {offsets = [0, 6], sizes = [256, 1], strides = [1, 1]} : vector<256x16xf32> to vector<256x1xf32>
    %c6 = arith.constant 6 : index
    %c0_10 = arith.constant 0 : index
    %40 = vector.load %arg2[%c6, %c0_10] : memref<16x128xf32, #tpu.memory_space<vmem>>, vector<1x128xf32>
    %41 = vector.broadcast %39 : vector<256x1xf32> to vector<256x128xf32>
    %42 = vector.broadcast %40 : vector<1x128xf32> to vector<256x128xf32>
    %43 = arith.mulf %41, %42 : vector<256x128xf32>
    %44 = arith.addf %38, %43 : vector<256x128xf32>
    %45 = vector.extract_strided_slice %0 {offsets = [0, 7], sizes = [256, 1], strides = [1, 1]} : vector<256x16xf32> to vector<256x1xf32>
    %c7 = arith.constant 7 : index
    %c0_11 = arith.constant 0 : index
    %46 = vector.load %arg2[%c7, %c0_11] : memref<16x128xf32, #tpu.memory_space<vmem>>, vector<1x128xf32>
    %47 = vector.broadcast %45 : vector<256x1xf32> to vector<256x128xf32>
    %48 = vector.broadcast %46 : vector<1x128xf32> to vector<256x128xf32>
    %49 = arith.mulf %47, %48 : vector<256x128xf32>
    %50 = arith.addf %44, %49 : vector<256x128xf32>
    %51 = vector.extract_strided_slice %0 {offsets = [0, 8], sizes = [256, 1], strides = [1, 1]} : vector<256x16xf32> to vector<256x1xf32>
    %c8 = arith.constant 8 : index
    %c0_12 = arith.constant 0 : index
    %52 = vector.load %arg2[%c8, %c0_12] : memref<16x128xf32, #tpu.memory_space<vmem>>, vector<1x128xf32>
    %53 = vector.broadcast %51 : vector<256x1xf32> to vector<256x128xf32>
    %54 = vector.broadcast %52 : vector<1x128xf32> to vector<256x128xf32>
    %55 = arith.mulf %53, %54 : vector<256x128xf32>
    %56 = arith.addf %50, %55 : vector<256x128xf32>
    %57 = vector.extract_strided_slice %0 {offsets = [0, 9], sizes = [256, 1], strides = [1, 1]} : vector<256x16xf32> to vector<256x1xf32>
    %c9 = arith.constant 9 : index
    %c0_13 = arith.constant 0 : index
    %58 = vector.load %arg2[%c9, %c0_13] : memref<16x128xf32, #tpu.memory_space<vmem>>, vector<1x128xf32>
    %59 = vector.broadcast %57 : vector<256x1xf32> to vector<256x128xf32>
    %60 = vector.broadcast %58 : vector<1x128xf32> to vector<256x128xf32>
    %61 = arith.mulf %59, %60 : vector<256x128xf32>
    %62 = arith.addf %56, %61 : vector<256x128xf32>
    %63 = vector.extract_strided_slice %0 {offsets = [0, 10], sizes = [256, 1], strides = [1, 1]} : vector<256x16xf32> to vector<256x1xf32>
    %c10 = arith.constant 10 : index
    %c0_14 = arith.constant 0 : index
    %64 = vector.load %arg2[%c10, %c0_14] : memref<16x128xf32, #tpu.memory_space<vmem>>, vector<1x128xf32>
    %65 = vector.broadcast %63 : vector<256x1xf32> to vector<256x128xf32>
    %66 = vector.broadcast %64 : vector<1x128xf32> to vector<256x128xf32>
    %67 = arith.mulf %65, %66 : vector<256x128xf32>
    %68 = arith.addf %62, %67 : vector<256x128xf32>
    %69 = vector.extract_strided_slice %0 {offsets = [0, 11], sizes = [256, 1], strides = [1, 1]} : vector<256x16xf32> to vector<256x1xf32>
    %c11 = arith.constant 11 : index
    %c0_15 = arith.constant 0 : index
    %70 = vector.load %arg2[%c11, %c0_15] : memref<16x128xf32, #tpu.memory_space<vmem>>, vector<1x128xf32>
    %71 = vector.broadcast %69 : vector<256x1xf32> to vector<256x128xf32>
    %72 = vector.broadcast %70 : vector<1x128xf32> to vector<256x128xf32>
    %73 = arith.mulf %71, %72 : vector<256x128xf32>
    %74 = arith.addf %68, %73 : vector<256x128xf32>
    %75 = vector.extract_strided_slice %0 {offsets = [0, 12], sizes = [256, 1], strides = [1, 1]} : vector<256x16xf32> to vector<256x1xf32>
    %c12 = arith.constant 12 : index
    %c0_16 = arith.constant 0 : index
    %76 = vector.load %arg2[%c12, %c0_16] : memref<16x128xf32, #tpu.memory_space<vmem>>, vector<1x128xf32>
    %77 = vector.broadcast %75 : vector<256x1xf32> to vector<256x128xf32>
    %78 = vector.broadcast %76 : vector<1x128xf32> to vector<256x128xf32>
    %79 = arith.mulf %77, %78 : vector<256x128xf32>
    %80 = arith.addf %74, %79 : vector<256x128xf32>
    %81 = vector.extract_strided_slice %0 {offsets = [0, 13], sizes = [256, 1], strides = [1, 1]} : vector<256x16xf32> to vector<256x1xf32>
    %c13 = arith.constant 13 : index
    %c0_17 = arith.constant 0 : index
    %82 = vector.load %arg2[%c13, %c0_17] : memref<16x128xf32, #tpu.memory_space<vmem>>, vector<1x128xf32>
    %83 = vector.broadcast %81 : vector<256x1xf32> to vector<256x128xf32>
    %84 = vector.broadcast %82 : vector<1x128xf32> to vector<256x128xf32>
    %85 = arith.mulf %83, %84 : vector<256x128xf32>
    %86 = arith.addf %80, %85 : vector<256x128xf32>
    %87 = vector.extract_strided_slice %0 {offsets = [0, 14], sizes = [256, 1], strides = [1, 1]} : vector<256x16xf32> to vector<256x1xf32>
    %c14 = arith.constant 14 : index
    %c0_18 = arith.constant 0 : index
    %88 = vector.load %arg2[%c14, %c0_18] : memref<16x128xf32, #tpu.memory_space<vmem>>, vector<1x128xf32>
    %89 = vector.broadcast %87 : vector<256x1xf32> to vector<256x128xf32>
    %90 = vector.broadcast %88 : vector<1x128xf32> to vector<256x128xf32>
    %91 = arith.mulf %89, %90 : vector<256x128xf32>
    %92 = arith.addf %86, %91 : vector<256x128xf32>
    %93 = vector.extract_strided_slice %0 {offsets = [0, 15], sizes = [256, 1], strides = [1, 1]} : vector<256x16xf32> to vector<256x1xf32>
    %c15 = arith.constant 15 : index
    %c0_19 = arith.constant 0 : index
    %94 = vector.load %arg2[%c15, %c0_19] : memref<16x128xf32, #tpu.memory_space<vmem>>, vector<1x128xf32>
    %95 = vector.broadcast %93 : vector<256x1xf32> to vector<256x128xf32>
    %96 = vector.broadcast %94 : vector<1x128xf32> to vector<256x128xf32>
    %97 = arith.mulf %95, %96 : vector<256x128xf32>
    %98 = arith.addf %92, %97 : vector<256x128xf32>
    %cst = arith.constant 0.000000e+00 : f32
    %99 = vector.broadcast %cst : f32 to vector<256x128xf32>
    %100 = arith.maximumf %98, %99 : vector<256x128xf32>
    %101 = arith.truncf %100 : vector<256x128xf32> to vector<256x128xbf16>
    %c0_20 = arith.constant 0 : index
    %c0_21 = arith.constant 0 : index
    %c0_22 = arith.constant 0 : index
    %102 = vector.load %arg3[%c0_20, %c0_21, %c0_22] : memref<4x128x128xbf16, #tpu.memory_space<vmem>>, vector<1x128x128xbf16>
    %103 = vector.shape_cast %102 : vector<1x128x128xbf16> to vector<128x128xbf16>
    %cst_23 = arith.constant dense<0.000000e+00> : vector<256x128xf32>
    %104 = tpu.matmul %101, %103, %cst_23 {dimension_numbers = #tpu.dot_dimension_numbers<[1], [0], [0], [1], [0, 0, 1, 1], [], []>} : vector<256x128xbf16>, vector<128x128xbf16>, vector<256x128xf32> -> vector<256x128xf32>
    %c1_24 = arith.constant 1 : index
    %c0_25 = arith.constant 0 : index
    %105 = vector.load %arg4[%c1_24, %c0_25] : memref<5x128xf32, #tpu.memory_space<vmem>>, vector<1x128xf32>
    %106 = vector.broadcast %105 : vector<1x128xf32> to vector<256x128xf32>
    %107 = arith.addf %104, %106 : vector<256x128xf32>
    %cst_26 = arith.constant 0.000000e+00 : f32
    %108 = vector.broadcast %cst_26 : f32 to vector<256x128xf32>
    %109 = arith.maximumf %107, %108 : vector<256x128xf32>
    %110 = arith.truncf %109 : vector<256x128xf32> to vector<256x128xbf16>
    %c1_27 = arith.constant 1 : index
    %c0_28 = arith.constant 0 : index
    %c0_29 = arith.constant 0 : index
    %111 = vector.load %arg3[%c1_27, %c0_28, %c0_29] : memref<4x128x128xbf16, #tpu.memory_space<vmem>>, vector<1x128x128xbf16>
    %112 = vector.shape_cast %111 : vector<1x128x128xbf16> to vector<128x128xbf16>
    %cst_30 = arith.constant dense<0.000000e+00> : vector<256x128xf32>
    %113 = tpu.matmul %110, %112, %cst_30 {dimension_numbers = #tpu.dot_dimension_numbers<[1], [0], [0], [1], [0, 0, 1, 1], [], []>} : vector<256x128xbf16>, vector<128x128xbf16>, vector<256x128xf32> -> vector<256x128xf32>
    %c2_31 = arith.constant 2 : index
    %c0_32 = arith.constant 0 : index
    %114 = vector.load %arg4[%c2_31, %c0_32] : memref<5x128xf32, #tpu.memory_space<vmem>>, vector<1x128xf32>
    %115 = vector.broadcast %114 : vector<1x128xf32> to vector<256x128xf32>
    %116 = arith.addf %113, %115 : vector<256x128xf32>
    %cst_33 = arith.constant 0.000000e+00 : f32
    %117 = vector.broadcast %cst_33 : f32 to vector<256x128xf32>
    %118 = arith.maximumf %116, %117 : vector<256x128xf32>
    %119 = arith.truncf %118 : vector<256x128xf32> to vector<256x128xbf16>
    %c2_34 = arith.constant 2 : index
    %c0_35 = arith.constant 0 : index
    %c0_36 = arith.constant 0 : index
    %120 = vector.load %arg3[%c2_34, %c0_35, %c0_36] : memref<4x128x128xbf16, #tpu.memory_space<vmem>>, vector<1x128x128xbf16>
    %121 = vector.shape_cast %120 : vector<1x128x128xbf16> to vector<128x128xbf16>
    %cst_37 = arith.constant dense<0.000000e+00> : vector<256x128xf32>
    %122 = tpu.matmul %119, %121, %cst_37 {dimension_numbers = #tpu.dot_dimension_numbers<[1], [0], [0], [1], [0, 0, 1, 1], [], []>} : vector<256x128xbf16>, vector<128x128xbf16>, vector<256x128xf32> -> vector<256x128xf32>
    %c3_38 = arith.constant 3 : index
    %c0_39 = arith.constant 0 : index
    %123 = vector.load %arg4[%c3_38, %c0_39] : memref<5x128xf32, #tpu.memory_space<vmem>>, vector<1x128xf32>
    %124 = vector.broadcast %123 : vector<1x128xf32> to vector<256x128xf32>
    %125 = arith.addf %122, %124 : vector<256x128xf32>
    %cst_40 = arith.constant 0.000000e+00 : f32
    %126 = vector.broadcast %cst_40 : f32 to vector<256x128xf32>
    %127 = arith.maximumf %125, %126 : vector<256x128xf32>
    %128 = arith.truncf %127 : vector<256x128xf32> to vector<256x128xbf16>
    %c3_41 = arith.constant 3 : index
    %c0_42 = arith.constant 0 : index
    %c0_43 = arith.constant 0 : index
    %129 = vector.load %arg3[%c3_41, %c0_42, %c0_43] : memref<4x128x128xbf16, #tpu.memory_space<vmem>>, vector<1x128x128xbf16>
    %130 = vector.shape_cast %129 : vector<1x128x128xbf16> to vector<128x128xbf16>
    %cst_44 = arith.constant dense<0.000000e+00> : vector<256x128xf32>
    %131 = tpu.matmul %128, %130, %cst_44 {dimension_numbers = #tpu.dot_dimension_numbers<[1], [0], [0], [1], [0, 0, 1, 1], [], []>} : vector<256x128xbf16>, vector<128x128xbf16>, vector<256x128xf32> -> vector<256x128xf32>
    %c4_45 = arith.constant 4 : index
    %c0_46 = arith.constant 0 : index
    %132 = vector.load %arg4[%c4_45, %c0_46] : memref<5x128xf32, #tpu.memory_space<vmem>>, vector<1x128xf32>
    %133 = vector.broadcast %132 : vector<1x128xf32> to vector<256x128xf32>
    %134 = arith.addf %131, %133 : vector<256x128xf32>
    %135 = math.tanh %134 : vector<256x128xf32>
    %c0_47 = arith.constant 0 : index
    %c0_48 = arith.constant 0 : index
    %136 = vector.load %arg5[%c0_47, %c0_48] : memref<1x128xf32, #tpu.memory_space<vmem>>, vector<1x128xf32>
    %137 = vector.broadcast %136 : vector<1x128xf32> to vector<256x128xf32>
    %138 = arith.mulf %135, %137 : vector<256x128xf32>
    %cst_49 = arith.constant dense<0.000000e+00> : vector<256xf32>
    %139 = vector.multi_reduction <add>, %138, %cst_49 [1] : vector<256x128xf32> to vector<256xf32>
    %c0_50 = arith.constant 0 : index
    %140 = memref.load %arg6[%c0_50] : memref<1xf32, #tpu.memory_space<smem>>
    %141 = vector.broadcast %140 : f32 to vector<256xf32>
    %142 = arith.addf %139, %141 : vector<256xf32>
    %c0_51 = arith.constant 0 : index
    %c0_52 = arith.constant 0 : index
    %143 = vector.load %arg7[%c0_51, %c0_52] : memref<1x256xf32, #tpu.memory_space<vmem>>, vector<1x256xf32>
    %144 = vector.shape_cast %143 : vector<1x256xf32> to vector<256xf32>
    %145 = vector.shape_cast %142 : vector<256xf32> to vector<1x256xf32>
    tpu.vector_store %arg7[%c0_51, %c0_52], %145 {strides = array<i32>} : memref<1x256xf32, #tpu.memory_space<vmem>>, vector<1x256xf32>,
    return
  }
  func.func @transform_0(%arg0: i32) -> (i32, i32) {
    %c0_i32 = arith.constant 0 : i32
    %c0_i32_0 = arith.constant 0 : i32
    return %arg0, %c0_i32 : i32, i32
  }
  func.func @transform_1(%arg0: i32) -> (i32, i32) {
    %c0_i32 = arith.constant 0 : i32
    %c0_i32_0 = arith.constant 0 : i32
    %c0_i32_1 = arith.constant 0 : i32
    return %c0_i32, %c0_i32_0 : i32, i32
  }
  func.func @transform_2(%arg0: i32) -> (i32, i32, i32) {
    %c0_i32 = arith.constant 0 : i32
    %c0_i32_0 = arith.constant 0 : i32
    %c0_i32_1 = arith.constant 0 : i32
    %c0_i32_2 = arith.constant 0 : i32
    return %c0_i32, %c0_i32_0, %c0_i32_1 : i32, i32, i32
  }
  func.func @transform_3(%arg0: i32) -> (i32, i32) {
    %c0_i32 = arith.constant 0 : i32
    %c0_i32_0 = arith.constant 0 : i32
    %c0_i32_1 = arith.constant 0 : i32
    return %c0_i32, %c0_i32_0 : i32, i32
  }
  func.func @transform_4(%arg0: i32) -> (i32, i32) {
    %c0_i32 = arith.constant 0 : i32
    %c0_i32_0 = arith.constant 0 : i32
    %c0_i32_1 = arith.constant 0 : i32
    return %c0_i32, %c0_i32_0 : i32, i32
  }
  func.func @transform_5(%arg0: i32) -> i32 {
    %c0_i32 = arith.constant 0 : i32
    %c0_i32_0 = arith.constant 0 : i32
    return %c0_i32 : i32
  }
  func.func @transform_6(%arg0: i32) -> (i32, i32) {
    %c0_i32 = arith.constant 0 : i32
    %c0_i32_0 = arith.constant 0 : i32
    return %c0_i32, %arg0 : i32, i32
  }
}

</mosaic_0001>

<bundles_post_ra>
// kernel: tpu_custom_call.1
= control target key start
LH: loop header
LB: loop body
LE: loop exit
PB: predicated region body
PF: predicated region fallthrough
CT: control target
= control target key end

     0   :  { %s13043_s0 = inlined_call_operand.vmem [shape: f32[512,16], index: 0, kind: input, shape index: {}]   ;;  %s13044_s1 = inlined_call_operand.vmem [shape: f32[16,128], index: 1, kind: input, shape index: {}]   ;;  %s13045_s2 = inlined_call_operand.vmem [shape: bf16[4,128,128], index: 2, kind: input, shape index: {}]   ;;  %s13046_s3 = inlined_call_operand.vmem [shape: f32[5,128], index: 3, kind: input, shape index: {}]   ;;  %s13047_s4 = inlined_call_operand.vmem [shape: f32[1,128], index: 4, kind: input, shape index: {}]   ;;  %s13048_s5 = inlined_call_operand.<no memory space> [shape: f32[1], index: 5, kind: input, shape index: {}]   ;;  %s13049_s6 = inlined_call_operand.hbm [shape: f32[1,512], index: 6, kind: output, shape index: {}]  }
   0x1   :  { %11 = sst [smem:[#allocation2]] %s13048_s5 }
   0x2   :  { %12 = vsyncpa [#allocation4], 0 }
   0x3   :  { %14 = vsyncpa [#allocation4 + $0x1], 0  ;;  %s8667_s23 = smov 0   ;;  %s8669_s24 = smov 0  }
   0x4   :  { %s8671_s25 = smov 0   ;;  %s8673_s26 = smov 0  }
   0x5 LB: > { %s7764_s5 = sadd.s32 4294967295, %s8609_s26   ;;  %s7765_s27 = sadd.s32 4294967294, %s8609_s26   ;;  %s8609_s26 = sphi %s8673_s26, %s13823_s26   ;;  %s8605_s25 = sphi %s8671_s25, %s13822_s25   ;;  %s8601_s24 = sphi %s8669_s24, %s13821_s24   ;;  %s8597_s23 = sphi %s8667_s23, %s13820_s23  }
   0x6   : > { %s8690_s28 = sadd.s32 1, %s8609_s26   ;;  %s158_s29 = sadd.s32 1, %s8605_s25 }
   0x7   : > { %s155_s30 = ssub.s32 %s8609_s26, %s8690_s28  ;;  %p168_p0 = scmp.ne.s32.totalorder %s8605_s25, %s8601_s24 }
   0x8   : > { %p156_p1 = scmp.eq.s32.totalorder %s155_s30, 0  ;;  %p169_p2 = scmp.eq.s32.totalorder %s7764_s5, 1 }
   0x9   : > { %p174_p3 = scmp.ne.s32.totalorder %s8601_s24, %s8597_s23  ;;  %p175_p4 = scmp.eq.s32.totalorder %s7765_s27, 1 }
   0xa   : > { %s8700_s7 = scalar_select %p156_p1, %s8605_s25, %s158_s29  }
   0xb   : > { %p8702_p5 = por %p169_p2, %p168_p0  ;;  %p8706_p6 = por %p175_p4, %p174_p3 }
   0xc   : > { %p7768_p7 = scmp.ge.s32.totalorder %s8609_s26, 1  ;;  %p217_p8 = scmp.lt.s32.totalorder %s8609_s26, 3 }
   0xe   : > { %p218_p9 = pnand %p7768_p7, %p217_p8 }
  0x10   : > { %221 = sbr.rel (%p218_p9) target bundleno = 2664 (0xa68), region = 44 }
  0x17   : > { %s8712_s10 = sshll.u32 %s7764_s5, 5  ;;  %v13050_v0 = vmov 0   ;;  %v8612_v33 = vmov 1   ;;  %v8613_v36 = vmov 2   ;;  %v8922_v47 = vld [vmem:[%s13044_s1] ss:$0 sm:$0xff] }
  0x18   : > { %8225 = vset.pattern.permute.xlu1 %v13050_v0  ;;  %8224 = vset.pattern.permute.xlu0 %v13050_v0  ;;  %p248_p10 = scmp.lt.s32.totalorder %s8712_s10, 63  ;;  %v8929_v52 = vld [vmem:[%s13046_s3] ss:$0 sm:$0xff]  ;;  %s4726_s13 = sld [smem:[#allocation2]]  ;;  %vm7491_vm0 = vcmask 130112   ;;  %vm7498_vm1 = vcmask 195712  }
  0x19   : > { %vm7505_vm2 = vcmask 261312   ;;  %vm7512_vm3 = vcmask 326912   ;;  %vm7519_vm4 = vcmask 392512   ;;  %vm7526_vm5 = vcmask 458112   ;;  %s244_s14 = sand.u32 1, %s8601_s24   ;;  %s12999_s21 = scalar_lea.hbm %s13049_s6, %s8712_s10 }
  0x1a   : > { %s249_s11 = scalar_select %p248_p10, %s8712_s10, 63  ;;  %vm7533_vm6 = vcmask 523712   ;;  %vm7540_vm7 = vcmask 589312   ;;  %vm7547_vm8 = vcmask 654912   ;;  %vm7554_vm9 = vcmask 720512  }
  0x1b   : > { %vm7561_vm10 = vcmask 786112   ;;  %vm7568_vm11 = vcmask 851712   ;;  %vm7575_vm12 = vcmask 917312   ;;  %vm7582_vm13 = vcmask 982912   ;;  %s7769_s16 = sshll.u32 %s244_s14, 1  ;;  %s7692_s22 = scalar_lea.sflag [#allocation4], %s244_s14 }
  0x1c   : > { %s7771_s12 = sshll.u32 %s249_s11, 3  ;;  %vm7589_vm14 = vcmask 1048512   ;;  %s246_s17 = scalar_lea.vmem [#allocation3], %s7769_s16 }
  0x1d   : > { %s8721_s15 = scalar_lea.vmem %s13043_s0, %s7771_s12  ;;  %s7706_s18 = sshll.u32 %s246_s17, 4  ;;  %s13001_s18 = int_to_ptr.vmem [resolvable:$true] %s7706_s18 }
  0x1e   : > { %v8724_v1 = vld [vmem:[%s8721_s15 + $0x10] sm:$0xff]  ;;  %v8727_v2 = vld [vmem:[%s8721_s15] sm:$0xff]  ;;  %v8732_v3 = vld [vmem:[%s8721_s15 + $0x18] sm:$0xff]  ;;  %s8547_s5 = scalar_lea.vmem %s13001_s18, 32  ;;  %s8628_s27 = smov [#allocation3]  }
  0x1f   : > { %301 = vperm.xlu1 %8225, %v8724_v1   ;;  %291 = vperm.xlu0 %8224, %v8727_v2   ;;  %v8735_v4 = vld [vmem:[%s8721_s15 + $0x8] sm:$0xff]  ;;  %v8743_v6 = vld [vmem:[%s8721_s15 + $0x20] sm:$0xff]  ;;  %v8748_v7 = vld [vmem:[%s8721_s15 + $0x38] sm:$0xff]  ;;  %p8548_p11 = scmp.ne.s32.totalorder %s13001_s18, %s8547_s5  ;;  %s8551_s29 = sshll.u32 %s8628_s27, 4  ;;  %s8552_s29 = int_to_ptr.vmem [resolvable:$false] %s8551_s29 }
  0x20   : > { %v8740_v5 = vld [vmem:[%s8721_s15 + $0x28] sm:$0xff]  ;;  %v8751_v8 = vld [vmem:[%s8721_s15 + $0x30] sm:$0xff]  ;;  %v8757_v10 = vld [vmem:[%s8721_s15 + $0x40] sm:$0xff]  ;;  %s8553_s30 = scalar_lea.vmem %s8552_s29, 64  ;;  %p8554_p0 = scmp.lt.s32.totalorder %s13001_s18, %s8552_s29 }
  0x21   : > { %v8754_v9 = vld [vmem:[%s8721_s15 + $0x48] sm:$0xff]  ;;  %v8762_v11 = vld [vmem:[%s8721_s15 + $0x58] sm:$0xff]  ;;  %v8765_v12 = vld [vmem:[%s8721_s15 + $0x50] sm:$0xff]  ;;  %p8549_p12 = pnand %p8548_p11, %p8702_p5  ;;  %p8555_p1 = scmp.lt.s32.totalorder %s8553_s30, %s8547_s5 }
  0x22   : > { %v8770_v13 = vld [vmem:[%s8721_s15 + $0x68] sm:$0xff]  ;;  %v8773_v14 = vld [vmem:[%s8721_s15 + $0x60] sm:$0xff]  ;;  %v8778_v15 = vld [vmem:[%s8721_s15 + $0x78] sm:$0xff] }
  0x23   : > { %306 = vperm.xlu1 %8225, %v8732_v3   ;;  %296 = vperm.xlu0 %8224, %v8735_v4   ;;  %v8781_v16 = vld [vmem:[%s8721_s15 + $0x70] sm:$0xff]  ;;  %v8788_v17 = vld [vmem:[%s8721_s15 + $0x88] sm:$0xff]  ;;  %v8791_v18 = vld [vmem:[%s8721_s15 + $0x80] sm:$0xff]  ;;  %p8550_p13 = pneg %p8549_p12  ;;  %p8556_p2 = por %p8555_p1, %p8554_p0 }
  0x24   : > { %v8796_v19 = vld [vmem:[%s8721_s15 + $0x98] sm:$0xff]  ;;  %v8799_v20 = vld [vmem:[%s8721_s15 + $0x90] sm:$0xff]  ;;  %v8804_v21 = vld [vmem:[%s8721_s15 + $0xa8] sm:$0xff] }
  0x25   : > { %v8807_v22 = vld [vmem:[%s8721_s15 + $0xa0] sm:$0xff]  ;;  %v8812_v23 = vld [vmem:[%s8721_s15 + $0xb8] sm:$0xff]  ;;  %v8815_v24 = vld [vmem:[%s8721_s15 + $0xb0] sm:$0xff]  ;;  %p8557_p3 = pnand %p8556_p2, %p8550_p13 }
  0x26   : > { %v8820_v25 = vld [vmem:[%s8721_s15 + $0xc8] sm:$0xff]  ;;  %v8823_v26 = vld [vmem:[%s8721_s15 + $0xc0] sm:$0xff]  ;;  %v8828_v27 = vld [vmem:[%s8721_s15 + $0xd8] sm:$0xff] }
  0x27   : > { %316 = vperm.xlu1 %8225, %v8740_v5   ;;  %311 = vperm.xlu0 %8224, %v8743_v6   ;;  %v8831_v28 = vld [vmem:[%s8721_s15 + $0xd0] sm:$0xff]  ;;  %v8836_v29 = vld [vmem:[%s8721_s15 + $0xe8] sm:$0xff]  ;;  %v8839_v30 = vld [vmem:[%s8721_s15 + $0xe0] sm:$0xff] }
  0x28   : > { %v8844_v31 = vld [vmem:[%s8721_s15 + $0xf8] sm:$0xff]  ;;  %v8847_v32 = vld [vmem:[%s8721_s15 + $0xf0] sm:$0xff] }
  0x2b   : > { %326 = vperm.xlu1 %8225, %v8748_v7   ;;  %321 = vperm.xlu0 %8224, %v8751_v8  }
  0x2f   : > { %336 = vperm.xlu1 %8225, %v8754_v9   ;;  %331 = vperm.xlu0 %8224, %v8757_v10  }
  0x33   : > { %346 = vperm.xlu1 %8225, %v8762_v11   ;;  %341 = vperm.xlu0 %8224, %v8765_v12  }
  0x37   : > { %356 = vperm.xlu1 %8225, %v8770_v13   ;;  %351 = vperm.xlu0 %8224, %v8773_v14  }
  0x3b   : > { %366 = vperm.xlu1 %8225, %v8778_v15   ;;  %361 = vperm.xlu0 %8224, %v8781_v16  }
  0x3f   : > { %376 = vperm.xlu1 %8225, %v8788_v17   ;;  %371 = vperm.xlu0 %8224, %v8791_v18  }
  0x43   : > { %386 = vperm.xlu1 %8225, %v8796_v19   ;;  %381 = vperm.xlu0 %8224, %v8799_v20  }
  0x47   : > { %396 = vperm.xlu1 %8225, %v8804_v21   ;;  %391 = vperm.xlu0 %8224, %v8807_v22  }
  0x4b   : > { %406 = vperm.xlu1 %8225, %v8812_v23   ;;  %401 = vperm.xlu0 %8224, %v8815_v24  }
  0x4f   : > { %416 = vperm.xlu1 %8225, %v8820_v25   ;;  %411 = vperm.xlu0 %8224, %v8823_v26  }
  0x53   : > { %426 = vperm.xlu1 %8225, %v8828_v27   ;;  %421 = vperm.xlu0 %8224, %v8831_v28  }
  0x57   : > { %436 = vperm.xlu1 %8225, %v8836_v29   ;;  %431 = vperm.xlu0 %8224, %v8839_v30  }
  0x5b   : > { %446 = vperm.xlu1 %8225, %v8844_v31   ;;  %441 = vperm.xlu0 %8224, %v8847_v32  }
  0x5f   : > { %8227 = vset.pattern.permute.xlu1 %v8612_v33  ;;  %8226 = vset.pattern.permute.xlu0 %v8612_v33 }
  0x60   : > { %527 = vperm.xlu1 %8227, %v8735_v4   ;;  %523 = vperm.xlu0 %8226, %v8727_v2  }
  0x64   : > { %531 = vperm.xlu1 %8227, %v8724_v1   ;;  %535 = vperm.xlu0 %8226, %v8732_v3  }
  0x68   : > { %539 = vperm.xlu1 %8227, %v8743_v6   ;;  %543 = vperm.xlu0 %8226, %v8740_v5  }
  0x6c   : > { %547 = vperm.xlu1 %8227, %v8751_v8   ;;  %551 = vperm.xlu0 %8226, %v8748_v7  }
  0x70   : > { %555 = vperm.xlu1 %8227, %v8757_v10   ;;  %559 = vperm.xlu0 %8226, %v8754_v9  }
  0x74   : > { %563 = vperm.xlu1 %8227, %v8765_v12   ;;  %567 = vperm.xlu0 %8226, %v8762_v11  }
  0x78   : > { %571 = vperm.xlu1 %8227, %v8773_v14   ;;  %575 = vperm.xlu0 %8226, %v8770_v13  }
  0x7c   : > { %579 = vperm.xlu1 %8227, %v8781_v16   ;;  %583 = vperm.xlu0 %8226, %v8778_v15  }
  0x80   : > { %587 = vperm.xlu1 %8227, %v8791_v18   ;;  %591 = vperm.xlu0 %8226, %v8788_v17  }
  0x84   : > { %595 = vperm.xlu1 %8227, %v8799_v20   ;;  %599 = vperm.xlu0 %8226, %v8796_v19  }
  0x88   : > { %603 = vperm.xlu1 %8227, %v8807_v22   ;;  %607 = vperm.xlu0 %8226, %v8804_v21  }
  0x8c   : > { %611 = vperm.xlu1 %8227, %v8815_v24   ;;  %615 = vperm.xlu0 %8226, %v8812_v23  }
  0x90   : > { %619 = vperm.xlu1 %8227, %v8823_v26   ;;  %623 = vperm.xlu0 %8226, %v8820_v25  }
  0x94   : > { %627 = vperm.xlu1 %8227, %v8831_v28   ;;  %631 = vperm.xlu0 %8226, %v8828_v27  }
  0x98   : > { %635 = vperm.xlu1 %8227, %v8839_v30   ;;  %639 = vperm.xlu0 %8226, %v8836_v29  }
  0x9c   : > { %643 = vperm.xlu1 %8227, %v8847_v32   ;;  %647 = vperm.xlu0 %8226, %v8844_v31  }
  0x9e   : > { %v8883_v34 = vpop.permute.xlu1 %301  ;;  %v8885_v35 = vpop.permute.xlu0 %291 }
  0x9f   : > { %13097 = vst [vmem:[#allocation6_spill] sm:$0xff] %v8883_v34 }
  0xa0   : > { %8228 = vset.pattern.permute.xlu1 %v8613_v36  ;;  %8229 = vset.pattern.permute.xlu0 %v8613_v36 }
  0xa1   : > { %720 = vperm.xlu1 %8228, %v8727_v2   ;;  %724 = vperm.xlu0 %8229, %v8735_v4  }
  0xa2   : > { %v8889_v37 = vpop.permute.xlu1 %306  ;;  %v8891_v38 = vpop.permute.xlu0 %296 }
  0xa3   : > { %13098 = vst [vmem:[#allocation7_spill] sm:$0xff] %v8889_v37  ;;  %13099 = vst [vmem:[#allocation8_spill] sm:$0xff] %v8891_v38 }
  0xa5   : > { %728 = vperm.xlu1 %8228, %v8724_v1   ;;  %736 = vperm.xlu0 %8229, %v8743_v6  }
  0xa6   : > { %v8895_v39 = vpop.permute.xlu1 %316  ;;  %v8897_v40 = vpop.permute.xlu0 %311 }
  0xa7   : > { %13100 = vst [vmem:[#allocation9_spill] sm:$0xff] %v8895_v39  ;;  %13101 = vst [vmem:[#allocation10_spill] sm:$0xff] %v8897_v40 }
  0xa9   : > { %732 = vperm.xlu1 %8228, %v8732_v3   ;;  %744 = vperm.xlu0 %8229, %v8751_v8  }
  0xaa   : > { %v8901_v41 = vpop.permute.xlu1 %326  ;;  %v8903_v42 = vpop.permute.xlu0 %321 }
  0xab   : > { %13102 = vst [vmem:[#allocation11_spill] sm:$0xff] %v8901_v41  ;;  %13103 = vst [vmem:[#allocation12_spill] sm:$0xff] %v8903_v42 }
  0xad   : > { %740 = vperm.xlu1 %8228, %v8740_v5   ;;  %752 = vperm.xlu0 %8229, %v8757_v10  }
  0xae   : > { %v8907_v43 = vpop.permute.xlu1 %336  ;;  %v8909_v44 = vpop.permute.xlu0 %331 }
  0xaf   : > { %13104 = vst [vmem:[#allocation13_spill] sm:$0xff] %v8907_v43  ;;  %13105 = vst [vmem:[#allocation14_spill] sm:$0xff] %v8909_v44 }
  0xb1   : > { %748 = vperm.xlu1 %8228, %v8748_v7   ;;  %760 = vperm.xlu0 %8229, %v8765_v12  }
  0xb2   : > { %v8913_v45 = vpop.permute.xlu1 %346  ;;  %v8915_v46 = vpop.permute.xlu0 %341 }
  0xb3   : > { %13106 = vst [vmem:[#allocation15_spill] sm:$0xff] %v8913_v45  ;;  %13107 = vst [vmem:[#allocation16_spill] sm:$0xff] %v8915_v46 }
  0xb5   : > { %756 = vperm.xlu1 %8228, %v8754_v9   ;;  %768 = vperm.xlu0 %8229, %v8773_v14  }
  0xb6   : > { %v357_v48 = vpop.permute.xlu1 %356  ;;  %v352_v49 = vpop.permute.xlu0 %351 }
  0xb7   : > { %v466_v50 = vmul.f32 %v8922_v47, %v357_v48  ;;  %v465_v51 = vmul.f32 %v8922_v47, %v352_v49 }
  0xb9   : > { %v8932_v53 = vadd.f32 %v8929_v52, %v466_v50  ;;  %v8935_v54 = vadd.f32 %v8929_v52, %v465_v51  ;;  %764 = vperm.xlu1 %8228, %v8762_v11   ;;  %776 = vperm.xlu0 %8229, %v8781_v16  }
  0xba   : > { %v367_v55 = vpop.permute.xlu1 %366  ;;  %v362_v56 = vpop.permute.xlu0 %361 }
  0xbb   : > { %v468_v57 = vmul.f32 %v8922_v47, %v367_v55  ;;  %v467_v58 = vmul.f32 %v8922_v47, %v362_v56 }
  0xbd   : > { %v8942_v59 = vadd.f32 %v8929_v52, %v468_v57  ;;  %v8945_v60 = vadd.f32 %v8929_v52, %v467_v58  ;;  %772 = vperm.xlu1 %8228, %v8770_v13   ;;  %784 = vperm.xlu0 %8229, %v8791_v18  }
  0xbe   : > { %v377_v61 = vpop.permute.xlu1 %376  ;;  %v372_v62 = vpop.permute.xlu0 %371 }
  0xbf   : > { %v470_v63 = vmul.f32 %v8922_v47, %v377_v61  ;;  %v469_v33 = vmul.f32 %v8922_v47, %v372_v62 }
  0xc1   : > { %v8952_v36 = vadd.f32 %v8929_v52, %v470_v63  ;;  %v8955_v48 = vadd.f32 %v8929_v52, %v469_v33  ;;  %780 = vperm.xlu1 %8228, %v8778_v15   ;;  %792 = vperm.xlu0 %8229, %v8799_v20  }
  0xc2   : > { %v387_v49 = vpop.permute.xlu1 %386  ;;  %v382_v50 = vpop.permute.xlu0 %381 }
  0xc3   : > { %v472_v51 = vmul.f32 %v8922_v47, %v387_v49  ;;  %v471_v55 = vmul.f32 %v8922_v47, %v382_v50 }
  0xc5   : > { %v8962_v56 = vadd.f32 %v8929_v52, %v472_v51  ;;  %v8965_v57 = vadd.f32 %v8929_v52, %v471_v55  ;;  %788 = vperm.xlu1 %8228, %v8788_v17   ;;  %800 = vperm.xlu0 %8229, %v8807_v22  }
  0xc6   : > { %v397_v58 = vpop.permute.xlu1 %396  ;;  %v392_v61 = vpop.permute.xlu0 %391 }
  0xc7   : > { %v474_v62 = vmul.f32 %v8922_v47, %v397_v58  ;;  %v473_v63 = vmul.f32 %v8922_v47, %v392_v61 }
  0xc9   : > { %v8972_v33 = vadd.f32 %v8929_v52, %v474_v62  ;;  %v8975_v49 = vadd.f32 %v8929_v52, %v473_v63  ;;  %796 = vperm.xlu1 %8228, %v8796_v19   ;;  %808 = vperm.xlu0 %8229, %v8815_v24  }
  0xca   : > { %v407_v50 = vpop.permute.xlu1 %406  ;;  %v402_v51 = vpop.permute.xlu0 %401 }
  0xcb   : > { %v476_v55 = vmul.f32 %v8922_v47, %v407_v50  ;;  %v475_v0 = vmul.f32 %v8922_v47, %v402_v51 }
  0xcd   : > { %v8982_v58 = vadd.f32 %v8929_v52, %v476_v55  ;;  %v8985_v61 = vadd.f32 %v8929_v52, %v475_v0  ;;  %804 = vperm.xlu1 %8228, %v8804_v21   ;;  %816 = vperm.xlu0 %8229, %v8823_v26  }
  0xce   : > { %v417_v62 = vpop.permute.xlu1 %416  ;;  %v412_v63 = vpop.permute.xlu0 %411 }
  0xcf   : > { %v478_v46 = vmul.f32 %v8922_v47, %v417_v62  ;;  %v477_v45 = vmul.f32 %v8922_v47, %v412_v63 }
  0xd1   : > { %v8992_v50 = vadd.f32 %v8929_v52, %v478_v46  ;;  %v8995_v51 = vadd.f32 %v8929_v52, %v477_v45  ;;  %812 = vperm.xlu1 %8228, %v8812_v23   ;;  %824 = vperm.xlu0 %8229, %v8831_v28  }
  0xd2   : > { %v427_v0 = vpop.permute.xlu1 %426  ;;  %v422_v55 = vpop.permute.xlu0 %421 }
  0xd3   : > { %v480_v44 = vmul.f32 %v8922_v47, %v427_v0  ;;  %v479_v43 = vmul.f32 %v8922_v47, %v422_v55 }
  0xd5   : > { %v9002_v62 = vadd.f32 %v8929_v52, %v480_v44  ;;  %v9005_v63 = vadd.f32 %v8929_v52, %v479_v43  ;;  %820 = vperm.xlu1 %8228, %v8820_v25   ;;  %832 = vperm.xlu0 %8229, %v8839_v30  }
  0xd6   : > { %v437_v45 = vpop.permute.xlu1 %436  ;;  %v432_v46 = vpop.permute.xlu0 %431 }
  0xd7   : > { %v482_v42 = vmul.f32 %v8922_v47, %v437_v45  ;;  %v481_v41 = vmul.f32 %v8922_v47, %v432_v46 }
  0xd9   : > { %v9012_v0 = vadd.f32 %v8929_v52, %v482_v42  ;;  %v9015_v55 = vadd.f32 %v8929_v52, %v481_v41  ;;  %828 = vperm.xlu1 %8228, %v8828_v27   ;;  %840 = vperm.xlu0 %8229, %v8847_v32   ;;  %v8614_v41 = vmov 3  }
  0xda   : > { %v447_v43 = vpop.permute.xlu1 %446  ;;  %v442_v44 = vpop.permute.xlu0 %441 }
  0xdb   : > { %v484_v40 = vmul.f32 %v8922_v47, %v447_v43  ;;  %v483_v39 = vmul.f32 %v8922_v47, %v442_v44 }
  0xdd   : > { %v9022_v45 = vadd.f32 %v8929_v52, %v484_v40  ;;  %v9025_v46 = vadd.f32 %v8929_v52, %v483_v39  ;;  %836 = vperm.xlu1 %8228, %v8836_v29   ;;  %8230 = vset.pattern.permute.xlu0 %v8614_v41 }
  0xde   : > { %917 = vperm.xlu0 %8230, %v8727_v2  }
  0xdf   : > { %v9029_v42 = vpop.permute.xlu1 %527  ;;  %v9031_v37 = vpop.permute.xlu0 %523 }
  0xe0   : > { %13108 = vst [vmem:[#allocation17_spill] sm:$0xff] %v9029_v42  ;;  %13109 = vst [vmem:[#allocation18_spill] sm:$0xff] %v9031_v37 }
  0xe1   : > { %844 = vperm.xlu1 %8228, %v8844_v31  }
  0xe2   : > { %929 = vperm.xlu0 %8230, %v8732_v3  }
  0xe3   : > { %v9035_v47 = vpop.permute.xlu1 %531  ;;  %v9037_v40 = vpop.permute.xlu0 %535 }
  0xe4   : > { %13110 = vst [vmem:[#allocation19_spill] sm:$0xff] %v9035_v47  ;;  %13111 = vst [vmem:[#allocation20_spill] sm:$0xff] %v9037_v40 }
  0xe5   : > { %8231 = vset.pattern.permute.xlu1 %v8614_v41 }
  0xe6   : > { %921 = vperm.xlu1 %8231, %v8735_v4   ;;  %937 = vperm.xlu0 %8230, %v8740_v5  }
  0xe7   : > { %v9041_v39 = vpop.permute.xlu1 %539  ;;  %v9043_v52 = vpop.permute.xlu0 %543 }
  0xe8   : > { %13112 = vst [vmem:[#allocation21_spill] sm:$0xff] %v9041_v39  ;;  %13113 = vst [vmem:[#allocation22_spill] sm:$0xff] %v9043_v52 }
  0xea   : > { %925 = vperm.xlu1 %8231, %v8724_v1   ;;  %945 = vperm.xlu0 %8230, %v8748_v7  }
  0xeb   : > { %v9047_v43 = vpop.permute.xlu1 %547  ;;  %v9049_v44 = vpop.permute.xlu0 %551 }
  0xec   : > { %13114 = vst [vmem:[#allocation23_spill] sm:$0xff] %v9047_v43  ;;  %13115 = vst [vmem:[#allocation24_spill] sm:$0xff] %v9049_v44  ;;  %v9068_v44 = vld [vmem:[%s13044_s1 + $0x1] ss:$0 sm:$0xff] }
  0xee   : > { %933 = vperm.xlu1 %8231, %v8743_v6   ;;  %953 = vperm.xlu0 %8230, %v8754_v9  }
  0xef   : > { %v9053_v41 = vpop.permute.xlu1 %555  ;;  %v9055_v40 = vpop.permute.xlu0 %559 }
  0xf0   : > { %13116 = vst [vmem:[#allocation25_spill] sm:$0xff] %v9053_v41  ;;  %13117 = vst [vmem:[#allocation26_spill] sm:$0xff] %v9055_v40 }
  0xf2   : > { %941 = vperm.xlu1 %8231, %v8751_v8   ;;  %961 = vperm.xlu0 %8230, %v8762_v11  }
  0xf3   : > { %v9059_v52 = vpop.permute.xlu1 %563  ;;  %v9061_v39 = vpop.permute.xlu0 %567 }
  0xf4   : > { %13118 = vst [vmem:[#allocation27_spill] sm:$0xff] %v9059_v52  ;;  %13119 = vst [vmem:[#allocation28_spill] sm:$0xff] %v9061_v39 }
  0xf6   : > { %949 = vperm.xlu1 %8231, %v8757_v10   ;;  %969 = vperm.xlu0 %8230, %v8770_v13  }
  0xf7   : > { %v572_v41 = vpop.permute.xlu1 %571  ;;  %v576_v43 = vpop.permute.xlu0 %575 }
  0xf8   : > { %v666_v40 = vmul.f32 %v9068_v44, %v572_v41  ;;  %v667_v47 = vmul.f32 %v9068_v44, %v576_v43 }
  0xfa   : > { %v9073_v37 = vadd.f32 %v666_v40, %v8935_v54  ;;  %v9076_v39 = vadd.f32 %v667_v47, %v8932_v53  ;;  %957 = vperm.xlu1 %8231, %v8765_v12   ;;  %977 = vperm.xlu0 %8230, %v8778_v15  }
  0xfb   : > { %v580_v52 = vpop.permute.xlu1 %579  ;;  %v584_v42 = vpop.permute.xlu0 %583 }
  0xfc   : > { %v668_v34 = vmul.f32 %v9068_v44, %v580_v52  ;;  %v669_v38 = vmul.f32 %v9068_v44, %v584_v42 }
  0xfe   : > { %v9083_v41 = vadd.f32 %v668_v34, %v8945_v60  ;;  %v9086_v43 = vadd.f32 %v669_v38, %v8942_v59  ;;  %965 = vperm.xlu1 %8231, %v8773_v14   ;;  %985 = vperm.xlu0 %8230, %v8788_v17  }
  0xff   : > { %v588_v53 = vpop.permute.xlu1 %587  ;;  %v592_v54 = vpop.permute.xlu0 %591 }
 0x100   : > { %v670_v47 = vmul.f32 %v9068_v44, %v588_v53  ;;  %v671_v40 = vmul.f32 %v9068_v44, %v592_v54 }
 0x102   : > { %v9093_v52 = vadd.f32 %v670_v47, %v8955_v48  ;;  %v9096_v42 = vadd.f32 %v671_v40, %v8952_v36  ;;  %973 = vperm.xlu1 %8231, %v8781_v16   ;;  %993 = vperm.xlu0 %8230, %v8796_v19  }
 0x103   : > { %v596_v34 = vpop.permute.xlu1 %595  ;;  %v600_v38 = vpop.permute.xlu0 %599 }
 0x104   : > { %v672_v59 = vmul.f32 %v9068_v44, %v596_v34  ;;  %v673_v60 = vmul.f32 %v9068_v44, %v600_v38 }
 0x106   : > { %v9103_v53 = vadd.f32 %v672_v59, %v8965_v57  ;;  %v9106_v54 = vadd.f32 %v673_v60, %v8962_v56  ;;  %981 = vperm.xlu1 %8231, %v8791_v18   ;;  %1001 = vperm.xlu0 %8230, %v8804_v21  }
 0x107   : > { %v604_v36 = vpop.permute.xlu1 %603  ;;  %v608_v48 = vpop.permute.xlu0 %607 }
 0x108   : > { %v674_v47 = vmul.f32 %v9068_v44, %v604_v36  ;;  %v675_v40 = vmul.f32 %v9068_v44, %v608_v48 }
 0x10a   : > { %v9113_v34 = vadd.f32 %v674_v47, %v8975_v49  ;;  %v9116_v38 = vadd.f32 %v675_v40, %v8972_v33  ;;  %989 = vperm.xlu1 %8231, %v8799_v20   ;;  %1009 = vperm.xlu0 %8230, %v8812_v23  }
 0x10b   : > { %v612_v56 = vpop.permute.xlu1 %611  ;;  %v616_v57 = vpop.permute.xlu0 %615 }
 0x10c   : > { %v676_v59 = vmul.f32 %v9068_v44, %v612_v56  ;;  %v677_v60 = vmul.f32 %v9068_v44, %v616_v57 }
 0x10e   : > { %v9123_v36 = vadd.f32 %v676_v59, %v8985_v61  ;;  %v9126_v48 = vadd.f32 %v677_v60, %v8982_v58  ;;  %997 = vperm.xlu1 %8231, %v8807_v22   ;;  %1017 = vperm.xlu0 %8230, %v8820_v25  }
 0x10f   : > { %v620_v33 = vpop.permute.xlu1 %619  ;;  %v624_v49 = vpop.permute.xlu0 %623 }
 0x110   : > { %v678_v47 = vmul.f32 %v9068_v44, %v620_v33  ;;  %v679_v40 = vmul.f32 %v9068_v44, %v624_v49 }
 0x112   : > { %v9133_v56 = vadd.f32 %v678_v47, %v8995_v51  ;;  %v9136_v57 = vadd.f32 %v679_v40, %v8992_v50  ;;  %1005 = vperm.xlu1 %8231, %v8815_v24   ;;  %1025 = vperm.xlu0 %8230, %v8828_v27  }
 0x113   : > { %v628_v58 = vpop.permute.xlu1 %627  ;;  %v632_v61 = vpop.permute.xlu0 %631 }
 0x114   : > { %v680_v59 = vmul.f32 %v9068_v44, %v628_v58  ;;  %v681_v60 = vmul.f32 %v9068_v44, %v632_v61 }
 0x116   : > { %v9143_v33 = vadd.f32 %v680_v59, %v9005_v63  ;;  %v9146_v49 = vadd.f32 %v681_v60, %v9002_v62  ;;  %1013 = vperm.xlu1 %8231, %v8823_v26   ;;  %1033 = vperm.xlu0 %8230, %v8836_v29  }
 0x117   : > { %v636_v50 = vpop.permute.xlu1 %635  ;;  %v640_v51 = vpop.permute.xlu0 %639 }
 0x118   : > { %v682_v47 = vmul.f32 %v9068_v44, %v636_v50  ;;  %v683_v40 = vmul.f32 %v9068_v44, %v640_v51 }
 0x11a   : > { %v9153_v58 = vadd.f32 %v682_v47, %v9015_v55  ;;  %v9156_v61 = vadd.f32 %v683_v40, %v9012_v0  ;;  %1021 = vperm.xlu1 %8231, %v8831_v28   ;;  %1041 = vperm.xlu0 %8230, %v8844_v31   ;;  %v8615_v0 = vmov 4  }
 0x11b   : > { %v644_v62 = vpop.permute.xlu1 %643  ;;  %v648_v63 = vpop.permute.xlu0 %647 }
 0x11c   : > { %v684_v59 = vmul.f32 %v9068_v44, %v644_v62  ;;  %v685_v60 = vmul.f32 %v9068_v44, %v648_v63 }
 0x11e   : > { %v9163_v50 = vadd.f32 %v684_v59, %v9025_v46  ;;  %v9166_v51 = vadd.f32 %v685_v60, %v9022_v45  ;;  %1029 = vperm.xlu1 %8231, %v8839_v30   ;;  %8233 = vset.pattern.permute.xlu0 %v8615_v0 }
 0x11f   : > { %1118 = vperm.xlu0 %8233, %v8735_v4  }
 0x120   : > { %v9170_v55 = vpop.permute.xlu1 %720  ;;  %v9172_v47 = vpop.permute.xlu0 %724 }
 0x122   : > { %1037 = vperm.xlu1 %8231, %v8847_v32  }
 0x123   : > { %1130 = vperm.xlu0 %8233, %v8743_v6  }
 0x124   : > { %v9176_v44 = vpop.permute.xlu1 %728  ;;  %v9178_v46 = vpop.permute.xlu0 %736 }
 0x125   : > { %13120 = vst [vmem:[#allocation29_spill] sm:$0xff] %v9176_v44  ;;  %13121 = vst [vmem:[#allocation30_spill] sm:$0xff] %v9178_v46 }
 0x126   : > { %8232 = vset.pattern.permute.xlu1 %v8615_v0  ;;  %v9203_v0 = vld [vmem:[%s13044_s1 + $0x2] ss:$0 sm:$0xff] }
 0x127   : > { %1114 = vperm.xlu1 %8232, %v8727_v2   ;;  %1138 = vperm.xlu0 %8233, %v8751_v8  }
 0x128   : > { %v9182_v45 = vpop.permute.xlu1 %732  ;;  %v9184_v40 = vpop.permute.xlu0 %744 }
 0x129   : > { %13122 = vst [vmem:[#allocation31_spill] sm:$0xff] %v9182_v45  ;;  %13123 = vst [vmem:[#allocation32_spill] sm:$0xff] %v9184_v40 }
 0x12b   : > { %1122 = vperm.xlu1 %8232, %v8724_v1   ;;  %1146 = vperm.xlu0 %8233, %v8757_v10  }
 0x12c   : > { %v9188_v62 = vpop.permute.xlu1 %740  ;;  %v9190_v63 = vpop.permute.xlu0 %752 }
 0x12d   : > { %13124 = vst [vmem:[#allocation33_spill] sm:$0xff] %v9188_v62  ;;  %13125 = vst [vmem:[#allocation34_spill] sm:$0xff] %v9190_v63 }
 0x12f   : > { %1126 = vperm.xlu1 %8232, %v8732_v3   ;;  %1154 = vperm.xlu0 %8233, %v8765_v12  }
 0x130   : > { %v9194_v59 = vpop.permute.xlu1 %748  ;;  %v9196_v60 = vpop.permute.xlu0 %760 }
 0x131   : > { %13126 = vst [vmem:[#allocation35_spill] sm:$0xff] %v9194_v59  ;;  %13127 = vst [vmem:[#allocation36_spill] sm:$0xff] %v9196_v60 }
 0x133   : > { %1134 = vperm.xlu1 %8232, %v8740_v5   ;;  %1162 = vperm.xlu0 %8233, %v8773_v14  }
 0x134   : > { %v9205_v62 = vpop.permute.xlu1 %756  ;;  %v769_v63 = vpop.permute.xlu0 %768 }
 0x135   : > { %13128 = vst [vmem:[#allocation37_spill] sm:$0xff] %v9205_v62  ;;  %v863_v40 = vmul.f32 %v9203_v0, %v769_v63 }
 0x137   : > { %v9209_v45 = vadd.f32 %v863_v40, %v9073_v37  ;;  %1142 = vperm.xlu1 %8232, %v8748_v7   ;;  %1170 = vperm.xlu0 %8233, %v8781_v16  }
 0x138   : > { %v9213_v60 = vpop.permute.xlu1 %764  ;;  %v777_v59 = vpop.permute.xlu0 %776 }
 0x139   : > { %13129 = vst [vmem:[#allocation38_spill] sm:$0xff] %v9209_v45  ;;  %13130 = vst [vmem:[#allocation39_spill] sm:$0xff] %v9213_v60  ;;  %v865_v46 = vmul.f32 %v9203_v0, %v777_v59 }
 0x13b   : > { %v9217_v44 = vadd.f32 %v865_v46, %v9083_v41  ;;  %1150 = vperm.xlu1 %8232, %v8754_v9   ;;  %1178 = vperm.xlu0 %8233, %v8791_v18  }
 0x13c   : > { %v773_v63 = vpop.permute.xlu1 %772  ;;  %v785_v62 = vpop.permute.xlu0 %784 }
 0x13d   : > { %13131 = vst [vmem:[#allocation40_spill] sm:$0xff] %v9217_v44  ;;  %v864_v37 = vmul.f32 %v9203_v0, %v773_v63  ;;  %v867_v40 = vmul.f32 %v9203_v0, %v785_v62 }
 0x13f   : > { %v9224_v45 = vadd.f32 %v864_v37, %v9076_v39  ;;  %v9227_v60 = vadd.f32 %v867_v40, %v9093_v52  ;;  %1158 = vperm.xlu1 %8232, %v8762_v11   ;;  %1186 = vperm.xlu0 %8233, %v8799_v20  }
 0x140   : > { %v781_v41 = vpop.permute.xlu1 %780  ;;  %v793_v46 = vpop.permute.xlu0 %792 }
 0x141   : > { %13132 = vst [vmem:[#allocation41_spill] sm:$0xff] %v9224_v45  ;;  %13133 = vst [vmem:[#allocation42_spill] sm:$0xff] %v9227_v60  ;;  %v866_v59 = vmul.f32 %v9203_v0, %v781_v41  ;;  %v869_v44 = vmul.f32 %v9203_v0, %v793_v46  ;;  %v9475_v45 = vld [vmem:[%s8721_s15 + $0x38] sm:$0xff] }
 0x143   : > { %v9234_v63 = vadd.f32 %v866_v59, %v9086_v43  ;;  %v9237_v62 = vadd.f32 %v869_v44, %v9103_v53  ;;  %1166 = vperm.xlu1 %8232, %v8770_v13   ;;  %1194 = vperm.xlu0 %8233, %v8807_v22  }
 0x144   : > { %v789_v39 = vpop.permute.xlu1 %788  ;;  %v801_v52 = vpop.permute.xlu0 %800 }
 0x145   : > { %13134 = vst [vmem:[#allocation43_spill] sm:$0xff] %v9234_v63  ;;  %13135 = vst [vmem:[#allocation44_spill] sm:$0xff] %v9237_v62  ;;  %v868_v37 = vmul.f32 %v9203_v0, %v789_v39  ;;  %v871_v40 = vmul.f32 %v9203_v0, %v801_v52  ;;  %v9440_v62 = vld [vmem:[%s8721_s15 + $0x50] sm:$0xff] }
 0x147   : > { %v9244_v41 = vadd.f32 %v868_v37, %v9096_v42  ;;  %v9247_v46 = vadd.f32 %v871_v40, %v9113_v34  ;;  %1174 = vperm.xlu1 %8232, %v8778_v15   ;;  %1202 = vperm.xlu0 %8233, %v8815_v24  }
 0x148   : > { %v797_v43 = vpop.permute.xlu1 %796  ;;  %v809_v53 = vpop.permute.xlu0 %808 }
 0x149   : > { %13136 = vst [vmem:[#allocation45_spill] sm:$0xff] %v9244_v41  ;;  %13137 = vst [vmem:[#allocation46_spill] sm:$0xff] %v9247_v46  ;;  %v870_v44 = vmul.f32 %v9203_v0, %v797_v43  ;;  %v873_v59 = vmul.f32 %v9203_v0, %v809_v53  ;;  %v9448_v41 = vld [vmem:[%s8721_s15 + $0x10] sm:$0xff] }
 0x14b   : > { %v9254_v39 = vadd.f32 %v870_v44, %v9106_v54  ;;  %v9257_v52 = vadd.f32 %v873_v59, %v9123_v36  ;;  %1182 = vperm.xlu1 %8232, %v8788_v17   ;;  %1210 = vperm.xlu0 %8233, %v8823_v26  }
 0x14c   : > { %v805_v42 = vpop.permute.xlu1 %804  ;;  %v817_v34 = vpop.permute.xlu0 %816 }
 0x14d   : > { %13138 = vst [vmem:[#allocation47_spill] sm:$0xff] %v9254_v39  ;;  %13139 = vst [vmem:[#allocation48_spill] sm:$0xff] %v9257_v52  ;;  %v872_v37 = vmul.f32 %v9203_v0, %v805_v42  ;;  %v875_v40 = vmul.f32 %v9203_v0, %v817_v34  ;;  %v9436_v39 = vld [vmem:[%s8721_s15] sm:$0xff] }
 0x14f   : > { %v9264_v43 = vadd.f32 %v872_v37, %v9116_v38  ;;  %v9267_v53 = vadd.f32 %v875_v40, %v9133_v56  ;;  %1190 = vperm.xlu1 %8232, %v8796_v19   ;;  %1218 = vperm.xlu0 %8233, %v8831_v28  }
 0x150   : > { %v813_v54 = vpop.permute.xlu1 %812  ;;  %v825_v36 = vpop.permute.xlu0 %824 }
 0x151   : > { %13140 = vst [vmem:[#allocation49_spill] sm:$0xff] %v9264_v43  ;;  %13141 = vst [vmem:[#allocation50_spill] sm:$0xff] %v9267_v53  ;;  %v874_v44 = vmul.f32 %v9203_v0, %v813_v54  ;;  %v877_v59 = vmul.f32 %v9203_v0, %v825_v36 }
 0x153   : > { %v9274_v42 = vadd.f32 %v874_v44, %v9126_v48  ;;  %v9277_v34 = vadd.f32 %v877_v59, %v9143_v33  ;;  %1198 = vperm.xlu1 %8232, %v8804_v21   ;;  %1226 = vperm.xlu0 %8233, %v8839_v30  }
 0x154   : > { %v821_v38 = vpop.permute.xlu1 %820  ;;  %v833_v56 = vpop.permute.xlu0 %832 }
 0x155   : > { %13142 = vst [vmem:[#allocation51_spill] sm:$0xff] %v9274_v42  ;;  %13143 = vst [vmem:[#allocation52_spill] sm:$0xff] %v9277_v34  ;;  %v876_v37 = vmul.f32 %v9203_v0, %v821_v38  ;;  %v879_v40 = vmul.f32 %v9203_v0, %v833_v56  ;;  %v13054_v34 = vmov 15  }
 0x157   : > { %v9284_v54 = vadd.f32 %v876_v37, %v9136_v57  ;;  %v9287_v36 = vadd.f32 %v879_v40, %v9153_v58  ;;  %1206 = vperm.xlu1 %8232, %v8812_v23   ;;  %1234 = vperm.xlu0 %8233, %v8847_v32   ;;  %v8616_v57 = vmov 5  }
 0x158   : > { %v829_v48 = vpop.permute.xlu1 %828  ;;  %v841_v33 = vpop.permute.xlu0 %840 }
 0x159   : > { %13144 = vst [vmem:[#allocation53_spill] sm:$0xff] %v9284_v54  ;;  %13145 = vst [vmem:[#allocation54_spill] sm:$0xff] %v9287_v36  ;;  %v878_v44 = vmul.f32 %v9203_v0, %v829_v48  ;;  %v881_v59 = vmul.f32 %v9203_v0, %v841_v33 }
 0x15b   : > { %v9294_v38 = vadd.f32 %v878_v44, %v9146_v49  ;;  %v9297_v56 = vadd.f32 %v881_v59, %v9163_v50  ;;  %1214 = vperm.xlu1 %8232, %v8820_v25   ;;  %8234 = vset.pattern.permute.xlu0 %v8616_v57 }
 0x15c   : > { %v837_v58 = vpop.permute.xlu1 %836  ;;  %1311 = vperm.xlu0 %8234, %v8727_v2  }
 0x15d   : > { %13146 = vst [vmem:[#allocation55_spill] sm:$0xff] %v9294_v38  ;;  %13147 = vst [vmem:[#allocation56_spill] sm:$0xff] %v9297_v56  ;;  %v880_v37 = vmul.f32 %v9203_v0, %v837_v58  ;;  %v9302_v40 = vpop.permute.xlu0 %917 }
 0x15f   : > { %v9305_v48 = vadd.f32 %v880_v37, %v9156_v61  ;;  %1222 = vperm.xlu1 %8232, %v8828_v27  }
 0x160   : > { %v845_v49 = vpop.permute.xlu1 %844  ;;  %1323 = vperm.xlu0 %8234, %v8732_v3  }
 0x161   : > { %13148 = vst [vmem:[#allocation57_spill] sm:$0xff] %v9305_v48  ;;  %v882_v50 = vmul.f32 %v9203_v0, %v845_v49  ;;  %v9310_v33 = vpop.permute.xlu0 %929  ;;  %v13056_v48 = vmov 8  }
 0x163   : > { %v9313_v44 = vadd.f32 %v882_v50, %v9166_v51  ;;  %1230 = vperm.xlu1 %8232, %v8836_v29  }
 0x164   : > { %1331 = vperm.xlu0 %8234, %v8740_v5  }
 0x165   : > { %13149 = vst [vmem:[#allocation58_spill] sm:$0xff] %v9313_v44  ;;  %v9317_v2 = vpop.permute.xlu1 %921  ;;  %v9319_v61 = vpop.permute.xlu0 %937 }
 0x167   : > { %1238 = vperm.xlu1 %8232, %v8844_v31  }
 0x168   : > { %1339 = vperm.xlu0 %8234, %v8748_v7  }
 0x169   : > { %v9323_v3 = vpop.permute.xlu1 %925  ;;  %v9325_v0 = vpop.permute.xlu0 %945 }
 0x16b   : > { %8235 = vset.pattern.permute.xlu1 %v8616_v57 }
 0x16c   : > { %1315 = vperm.xlu1 %8235, %v8735_v4   ;;  %1347 = vperm.xlu0 %8234, %v8754_v9  }
 0x16d   : > { %v9329_v51 = vpop.permute.xlu1 %933  ;;  %v9331_v5 = vpop.permute.xlu0 %953 }
 0x170   : > { %1319 = vperm.xlu1 %8235, %v8724_v1   ;;  %1355 = vperm.xlu0 %8234, %v8762_v11  }
 0x171   : > { %v9335_v59 = vpop.permute.xlu1 %941  ;;  %v9337_v7 = vpop.permute.xlu0 %961 }
 0x174   : > { %1327 = vperm.xlu1 %8235, %v8743_v6   ;;  %1363 = vperm.xlu0 %8234, %v8770_v13  }
 0x175   : > { %v9341_v57 = vpop.permute.xlu1 %949  ;;  %v9343_v4 = vpop.permute.xlu0 %969 }
 0x176   : > { %13150 = vst [vmem:[#allocation59_spill] sm:$0xff] %v9343_v4  ;;  %v9493_v4 = vld [vmem:[%s8721_s15 + $0x58] sm:$0xff] }
 0x178   : > { %1335 = vperm.xlu1 %8235, %v8751_v8   ;;  %1371 = vperm.xlu0 %8234, %v8778_v15  }
 0x179   : > { %v9347_v9 = vpop.permute.xlu1 %957  ;;  %v9349_v1 = vpop.permute.xlu0 %977 }
 0x17a   : > { %13151 = vst [vmem:[#allocation60_spill] sm:$0xff] %v9349_v1  ;;  %v9466_v1 = vld [vmem:[%s8721_s15 + $0x28] sm:$0xff] }
 0x17c   : > { %1343 = vperm.xlu1 %8235, %v8757_v10   ;;  %1379 = vperm.xlu0 %8234, %v8788_v17  }
 0x17d   : > { %v9353_v11 = vpop.permute.xlu1 %965  ;;  %v9355_v6 = vpop.permute.xlu0 %985 }
 0x17e   : > { %13152 = vst [vmem:[#allocation61_spill] sm:$0xff] %v9353_v11  ;;  %13153 = vst [vmem:[#allocation62_spill] sm:$0xff] %v9355_v6  ;;  %v9457_v6 = vld [vmem:[%s8721_s15 + $0x18] sm:$0xff]  ;;  %v9502_v11 = vld [vmem:[%s8721_s15 + $0x68] sm:$0xff] }
 0x180   : > { %1351 = vperm.xlu1 %8235, %v8765_v12   ;;  %1387 = vperm.xlu0 %8234, %v8796_v19  }
 0x181   : > { %v9359_v13 = vpop.permute.xlu1 %973  ;;  %v9361_v8 = vpop.permute.xlu0 %993 }
 0x182   : > { %13154 = vst [vmem:[#allocation63_spill] sm:$0xff] %v9359_v13  ;;  %13155 = vst [vmem:[#allocation64_spill] sm:$0xff] %v9361_v8 }
 0x184   : > { %1359 = vperm.xlu1 %8235, %v8773_v14   ;;  %1395 = vperm.xlu0 %8234, %v8804_v21  }
 0x185   : > { %v9365_v15 = vpop.permute.xlu1 %981  ;;  %v9367_v10 = vpop.permute.xlu0 %1001 }
 0x186   : > { %13156 = vst [vmem:[#allocation65_spill] sm:$0xff] %v9365_v15  ;;  %13157 = vst [vmem:[#allocation66_spill] sm:$0xff] %v9367_v10 }
 0x188   : > { %1367 = vperm.xlu1 %8235, %v8781_v16   ;;  %1403 = vperm.xlu0 %8234, %v8812_v23  }
 0x189   : > { %v9371_v58 = vpop.permute.xlu1 %989  ;;  %v9373_v12 = vpop.permute.xlu0 %1009 }
 0x18a   : > { %13158 = vst [vmem:[#allocation67_spill] sm:$0xff] %v9371_v58  ;;  %13159 = vst [vmem:[#allocation68_spill] sm:$0xff] %v9373_v12  ;;  %v9412_v12 = vld [vmem:[%s8721_s15 + $0x20] sm:$0xff] }
 0x18c   : > { %1375 = vperm.xlu1 %8235, %v8791_v18   ;;  %1411 = vperm.xlu0 %8234, %v8820_v25  }
 0x18d   : > { %v9377_v37 = vpop.permute.xlu1 %997  ;;  %v9379_v49 = vpop.permute.xlu0 %1017 }
 0x18e   : > { %13160 = vst [vmem:[#allocation69_spill] sm:$0xff] %v9377_v37  ;;  %13161 = vst [vmem:[#allocation70_spill] sm:$0xff] %v9379_v49  ;;  %v9403_v49 = vld [vmem:[%s8721_s15 + $0x8] sm:$0xff] }
 0x190   : > { %1383 = vperm.xlu1 %8235, %v8799_v20   ;;  %1419 = vperm.xlu0 %8234, %v8828_v27  }
 0x191   : > { %v9383_v50 = vpop.permute.xlu1 %1005  ;;  %v9385_v56 = vpop.permute.xlu0 %1025 }
 0x192   : > { %13162 = vst [vmem:[#allocation71_spill] sm:$0xff] %v9385_v56  ;;  %v8617_v56 = vmov 6  }
 0x194   : > { %1391 = vperm.xlu1 %8235, %v8807_v22   ;;  %1427 = vperm.xlu0 %8234, %v8836_v29  }
 0x195   : > { %v9389_v44 = vpop.permute.xlu1 %1013  ;;  %v9391_v36 = vpop.permute.xlu0 %1033 }
 0x196   : > { %13163 = vst [vmem:[#allocation72_spill] sm:$0xff] %v9389_v44 }
 0x198   : > { %1399 = vperm.xlu1 %8235, %v8815_v24   ;;  %1435 = vperm.xlu0 %8234, %v8844_v31  }
 0x199   : > { %v9395_v38 = vpop.permute.xlu1 %1021  ;;  %v9397_v54 = vpop.permute.xlu0 %1041 }
 0x19a   : > { %13164 = vst [vmem:[#allocation73_spill] sm:$0xff] %v9397_v54 }
 0x19c   : > { %1407 = vperm.xlu1 %8235, %v8823_v26   ;;  %8237 = vset.pattern.permute.xlu0 %v8617_v56 }
 0x19d   : > { %v9400_v53 = vpop.permute.xlu1 %1029  ;;  %1512 = vperm.xlu0 %8237, %v9403_v49  }
 0x19e   : > { %13165 = vst [vmem:[#allocation74_spill] sm:$0xff] %v9400_v53  ;;  %v9406_v44 = vpop.permute.xlu0 %1118  ;;  %v9419_v53 = vld [vmem:[%s8721_s15 + $0x30] sm:$0xff] }
 0x1a0   : > { %1415 = vperm.xlu1 %8235, %v8831_v28  }
 0x1a1   : > { %v9409_v42 = vpop.permute.xlu1 %1037  ;;  %1524 = vperm.xlu0 %8237, %v9412_v12  }
 0x1a2   : > { %13166 = vst [vmem:[#allocation75_spill] sm:$0xff] %v9409_v42  ;;  %v9415_v54 = vpop.permute.xlu0 %1130  ;;  %v9428_v42 = vld [vmem:[%s8721_s15 + $0x40] sm:$0xff] }
 0x1a4   : > { %1423 = vperm.xlu1 %8235, %v8839_v30  }
 0x1a5   : > { %1532 = vperm.xlu0 %8237, %v9419_v53  }
 0x1a6   : > { %v9422_v43 = vpop.permute.xlu1 %1114  ;;  %v9424_v46 = vpop.permute.xlu0 %1138 }
 0x1a7   : > { %13167 = vst [vmem:[#allocation76_spill] sm:$0xff] %v9424_v46 }
 0x1a8   : > { %1431 = vperm.xlu1 %8235, %v8847_v32  }
 0x1a9   : > { %1540 = vperm.xlu0 %8237, %v9428_v42  }
 0x1aa   : > { %v9431_v10 = vpop.permute.xlu1 %1122  ;;  %v9433_v37 = vpop.permute.xlu0 %1146 }
 0x1ab   : > { %13168 = vst [vmem:[#allocation77_spill] sm:$0xff] %v9431_v10  ;;  %13169 = vst [vmem:[#allocation78_spill] sm:$0xff] %v9433_v37 }
 0x1ac   : > { %8236 = vset.pattern.permute.xlu1 %v8617_v56 }
 0x1ad   : > { %1508 = vperm.xlu1 %8236, %v9436_v39   ;;  %1548 = vperm.xlu0 %8237, %v9440_v62  }
 0x1ae   : > { %v9443_v8 = vpop.permute.xlu1 %1126  ;;  %v9445_v58 = vpop.permute.xlu0 %1154 }
 0x1af   : > { %13170 = vst [vmem:[#allocation79_spill] sm:$0xff] %v9443_v8  ;;  %13171 = vst [vmem:[#allocation80_spill] sm:$0xff] %v9445_v58  ;;  %v13304_v8 = vmov 15  }
 0x1b1   : > { %1516 = vperm.xlu1 %8236, %v9448_v41   ;;  %1556 = vperm.xlu0 %8237, %v8773_v14  }
 0x1b2   : > { %v9452_v56 = vpop.permute.xlu1 %1134  ;;  %v9454_v60 = vpop.permute.xlu0 %1162 }
 0x1b3   : > { %13172 = vst [vmem:[#allocation81_spill] sm:$0xff] %v9452_v56  ;;  %13173 = vst [vmem:[#allocation82_spill] sm:$0xff] %v9454_v60  ;;  %v9484_v60 = vld [vmem:[%s8721_s15 + $0x48] sm:$0xff] }
 0x1b5   : > { %1520 = vperm.xlu1 %8236, %v9457_v6   ;;  %1564 = vperm.xlu0 %8237, %v8781_v16  }
 0x1b6   : > { %v9461_v15 = vpop.permute.xlu1 %1142  ;;  %v9463_v63 = vpop.permute.xlu0 %1170 }
 0x1b7   : > { %13174 = vst [vmem:[#allocation83_spill] sm:$0xff] %v9461_v15  ;;  %13175 = vst [vmem:[#allocation84_spill] sm:$0xff] %v9463_v63  ;;  %v13062_v15 = vmov 11  }
 0x1b9   : > { %1528 = vperm.xlu1 %8236, %v9466_v1   ;;  %1572 = vperm.xlu0 %8237, %v8791_v18  }
 0x1ba   : > { %v9470_v14 = vpop.permute.xlu1 %1150  ;;  %v9472_v13 = vpop.permute.xlu0 %1178 }
 0x1bb   : > { %13176 = vst [vmem:[#allocation85_spill] sm:$0xff] %v9470_v14  ;;  %13177 = vst [vmem:[#allocation86_spill] sm:$0xff] %v9472_v13 }
 0x1bd   : > { %1536 = vperm.xlu1 %8236, %v9475_v45   ;;  %1580 = vperm.xlu0 %8237, %v8799_v20  }
 0x1be   : > { %v9479_v16 = vpop.permute.xlu1 %1158  ;;  %v9481_v63 = vpop.permute.xlu0 %1186 }
 0x1bf   : > { %13178 = vst [vmem:[#allocation87_spill] sm:$0xff] %v9479_v16  ;;  %13179 = vst [vmem:[#allocation88_spill] sm:$0xff] %v9481_v63 }
 0x1c1   : > { %1544 = vperm.xlu1 %8236, %v9484_v60   ;;  %1588 = vperm.xlu0 %8237, %v8807_v22  }
 0x1c2   : > { %v9488_v18 = vpop.permute.xlu1 %1166  ;;  %v9490_v13 = vpop.permute.xlu0 %1194 }
 0x1c3   : > { %13180 = vst [vmem:[#allocation89_spill] sm:$0xff] %v9488_v18  ;;  %13181 = vst [vmem:[#allocation90_spill] sm:$0xff] %v9490_v13  ;;  %v9511_v13 = vld [vmem:[%s8721_s15 + $0x78] sm:$0xff] }
 0x1c5   : > { %1552 = vperm.xlu1 %8236, %v9493_v4   ;;  %1596 = vperm.xlu0 %8237, %v8815_v24  }
 0x1c6   : > { %v9497_v20 = vpop.permute.xlu1 %1174  ;;  %v9499_v63 = vpop.permute.xlu0 %1202 }
 0x1c7   : > { %13182 = vst [vmem:[#allocation91_spill] sm:$0xff] %v9497_v20  ;;  %13183 = vst [vmem:[#allocation92_spill] sm:$0xff] %v9499_v63 }
 0x1c9   : > { %1560 = vperm.xlu1 %8236, %v9502_v11   ;;  %1604 = vperm.xlu0 %8237, %v8823_v26  }
 0x1ca   : > { %v9506_v22 = vpop.permute.xlu1 %1182  ;;  %v9508_v18 = vpop.permute.xlu0 %1210 }
 0x1cb   : > { %13184 = vst [vmem:[#allocation93_spill] sm:$0xff] %v9506_v22  ;;  %13185 = vst [vmem:[#allocation94_spill] sm:$0xff] %v9508_v18 }
 0x1cd   : > { %1568 = vperm.xlu1 %8236, %v9511_v13   ;;  %1612 = vperm.xlu0 %8237, %v8831_v28   ;;  %v8618_v28 = vmov 7  }
 0x1ce   : > { %v9515_v24 = vpop.permute.xlu1 %1190  ;;  %v9517_v20 = vpop.permute.xlu0 %1218 }
 0x1cf   : > { %13186 = vst [vmem:[#allocation95_spill] sm:$0xff] %v9515_v24  ;;  %13187 = vst [vmem:[#allocation96_spill] sm:$0xff] %v9517_v20  ;;  %v9665_v20 = vld [vmem:[%s8721_s15 + $0xb0] sm:$0xff] }
 0x1d1   : > { %1576 = vperm.xlu1 %8236, %v8788_v17   ;;  %1620 = vperm.xlu0 %8237, %v8839_v30  }
 0x1d2   : > { %v9521_v63 = vpop.permute.xlu1 %1198  ;;  %v9523_v26 = vpop.permute.xlu0 %1226 }
 0x1d3   : > { %13188 = vst [vmem:[#allocation97_spill] sm:$0xff] %v9521_v63  ;;  %13189 = vst [vmem:[#allocation98_spill] sm:$0xff] %v9523_v26 }
 0x1d5   : > { %1584 = vperm.xlu1 %8236, %v8796_v19   ;;  %1628 = vperm.xlu0 %8237, %v8847_v32  }
 0x1d6   : > { %v9527_v18 = vpop.permute.xlu1 %1206  ;;  %v9529_v22 = vpop.permute.xlu0 %1234 }
 0x1d7   : > { %13190 = vst [vmem:[#allocation99_spill] sm:$0xff] %v9527_v18  ;;  %13191 = vst [vmem:[#allocation100_spill] sm:$0xff] %v9529_v22 }
 0x1d9   : > { %1592 = vperm.xlu1 %8236, %v8804_v21   ;;  %8238 = vset.pattern.permute.xlu0 %v8618_v28 }
 0x1da   : > { %v9532_v24 = vpop.permute.xlu1 %1214  ;;  %1705 = vperm.xlu0 %8238, %v9436_v39  }
 0x1db   : > { %13192 = vst [vmem:[#allocation101_spill] sm:$0xff] %v9532_v24  ;;  %v9535_v17 = vpop.permute.xlu0 %1311 }
 0x1dc   : > { %13193 = vst [vmem:[#allocation102_spill] sm:$0xff] %v9535_v17  ;;  %v13052_v17 = vmov 14  }
 0x1dd   : > { %1600 = vperm.xlu1 %8236, %v8812_v23  }
 0x1de   : > { %v9538_v30 = vpop.permute.xlu1 %1222  ;;  %1717 = vperm.xlu0 %8238, %v9457_v6  }
 0x1df   : > { %13194 = vst [vmem:[#allocation103_spill] sm:$0xff] %v9538_v30  ;;  %v9541_v19 = vpop.permute.xlu0 %1323 }
 0x1e0   : > { %13195 = vst [vmem:[#allocation104_spill] sm:$0xff] %v9541_v19  ;;  %v8488_v19 = vld [vmem:[%s8721_s15 + $0xa0] sm:$0xff] }
 0x1e1   : > { %1608 = vperm.xlu1 %8236, %v8820_v25  }
 0x1e2   : > { %v9544_v32 = vpop.permute.xlu1 %1230  ;;  %1725 = vperm.xlu0 %8238, %v9466_v1  }
 0x1e3   : > { %13196 = vst [vmem:[#allocation105_spill] sm:$0xff] %v9544_v32  ;;  %v9547_v21 = vpop.permute.xlu0 %1331  ;;  %v9646_v32 = vld [vmem:[%s8721_s15 + $0x90] sm:$0xff] }
 0x1e4   : > { %13197 = vst [vmem:[#allocation106_spill] sm:$0xff] %v9547_v21  ;;  %v9638_v21 = vld [vmem:[%s8721_s15 + $0xe8] sm:$0xff] }
 0x1e5   : > { %1616 = vperm.xlu1 %8236, %v8828_v27  }
 0x1e6   : > { %v9550_v22 = vpop.permute.xlu1 %1238  ;;  %1733 = vperm.xlu0 %8238, %v9475_v45  }
 0x1e7   : > { %13198 = vst [vmem:[#allocation107_spill] sm:$0xff] %v9550_v22  ;;  %v9553_v23 = vpop.permute.xlu0 %1339 }
 0x1e8   : > { %13199 = vst [vmem:[#allocation108_spill] sm:$0xff] %v9553_v23  ;;  %v9634_v23 = vld [vmem:[%s8721_s15 + $0x80] sm:$0xff] }
 0x1e9   : > { %1624 = vperm.xlu1 %8236, %v8836_v29  }
 0x1ea   : > { %1741 = vperm.xlu0 %8238, %v9484_v60  }
 0x1eb   : > { %v9557_v26 = vpop.permute.xlu1 %1315  ;;  %v9559_v25 = vpop.permute.xlu0 %1347 }
 0x1ec   : > { %13200 = vst [vmem:[#allocation109_spill] sm:$0xff] %v9557_v26  ;;  %13201 = vst [vmem:[#allocation110_spill] sm:$0xff] %v9559_v25  ;;  %v9617_v25 = vld [vmem:[%s8721_s15 + $0xc8] sm:$0xff] }
 0x1ed   : > { %1632 = vperm.xlu1 %8236, %v8844_v31  }
 0x1ee   : > { %1749 = vperm.xlu0 %8238, %v9493_v4  }
 0x1ef   : > { %v9563_v27 = vpop.permute.xlu1 %1319  ;;  %v9565_v22 = vpop.permute.xlu0 %1355 }
 0x1f0   : > { %13202 = vst [vmem:[#allocation111_spill] sm:$0xff] %v9563_v27  ;;  %13203 = vst [vmem:[#allocation112_spill] sm:$0xff] %v9565_v22  ;;  %v8479_v22 = vld [vmem:[%s8721_s15 + $0xb8] sm:$0xff]  ;;  %v9613_v27 = vld [vmem:[%s8721_s15 + $0x60] sm:$0xff] }
 0x1f1   : > { %8239 = vset.pattern.permute.xlu1 %v8618_v28  ;;  %v9581_v28 = vld [vmem:[%s8721_s15 + $0x88] sm:$0xff] }
 0x1f2   : > { %1709 = vperm.xlu1 %8239, %v9403_v49   ;;  %1757 = vperm.xlu0 %8238, %v9502_v11  }
 0x1f3   : > { %v9569_v29 = vpop.permute.xlu1 %1327  ;;  %v9571_v30 = vpop.permute.xlu0 %1363 }
 0x1f4   : > { %13204 = vst [vmem:[#allocation113_spill] sm:$0xff] %v9569_v29  ;;  %13205 = vst [vmem:[#allocation114_spill] sm:$0xff] %v9571_v30  ;;  %v9590_v30 = vld [vmem:[%s8721_s15 + $0x98] sm:$0xff]  ;;  %v9599_v29 = vld [vmem:[%s8721_s15 + $0xa8] sm:$0xff] }
 0x1f6   : > { %1713 = vperm.xlu1 %8239, %v9448_v41   ;;  %1765 = vperm.xlu0 %8238, %v9511_v13  }
 0x1f7   : > { %v9575_v31 = vpop.permute.xlu1 %1335  ;;  %v9577_v24 = vpop.permute.xlu0 %1371 }
 0x1f8   : > { %13206 = vst [vmem:[#allocation115_spill] sm:$0xff] %v9575_v31  ;;  %13207 = vst [vmem:[#allocation116_spill] sm:$0xff] %v9577_v24 }
 0x1fa   : > { %1721 = vperm.xlu1 %8239, %v9412_v12   ;;  %1773 = vperm.xlu0 %8238, %v9581_v28  }
 0x1fb   : > { %v9584_v18 = vpop.permute.xlu1 %1343  ;;  %v9586_v63 = vpop.permute.xlu0 %1379 }
 0x1fc   : > { %13208 = vst [vmem:[#allocation117_spill] sm:$0xff] %v9584_v18  ;;  %13209 = vst [vmem:[#allocation118_spill] sm:$0xff] %v9586_v63 }
 0x1fe   : > { %1729 = vperm.xlu1 %8239, %v9419_v53   ;;  %1781 = vperm.xlu0 %8238, %v9590_v30  }
 0x1ff   : > { %v9593_v24 = vpop.permute.xlu1 %1351  ;;  %v9595_v31 = vpop.permute.xlu0 %1387 }
 0x200   : > { %13210 = vst [vmem:[#allocation119_spill] sm:$0xff] %v9593_v24  ;;  %13211 = vst [vmem:[#allocation120_spill] sm:$0xff] %v9595_v31 }
 0x202   : > { %1737 = vperm.xlu1 %8239, %v9428_v42   ;;  %1789 = vperm.xlu0 %8238, %v9599_v29  }
 0x203   : > { %v9602_v63 = vpop.permute.xlu1 %1359  ;;  %v9604_v18 = vpop.permute.xlu0 %1395 }
 0x204   : > { %13212 = vst [vmem:[#allocation121_spill] sm:$0xff] %v9602_v63  ;;  %13213 = vst [vmem:[#allocation122_spill] sm:$0xff] %v9604_v18 }
 0x206   : > { %1745 = vperm.xlu1 %8239, %v9440_v62   ;;  %1797 = vperm.xlu0 %8238, %v8479_v22   ;;  %v9625_v22 = vld [vmem:[%s8721_s15 + $0x70] sm:$0xff] }
 0x207   : > { %v9608_v24 = vpop.permute.xlu1 %1367  ;;  %v9610_v31 = vpop.permute.xlu0 %1403 }
 0x208   : > { %13214 = vst [vmem:[#allocation123_spill] sm:$0xff] %v9608_v24  ;;  %13215 = vst [vmem:[#allocation124_spill] sm:$0xff] %v9610_v31  ;;  %v8483_v24 = vld [vmem:[%s8721_s15 + $0xd8] sm:$0xff] }
 0x20a   : > { %1753 = vperm.xlu1 %8239, %v9613_v27   ;;  %1805 = vperm.xlu0 %8238, %v9617_v25  }
 0x20b   : > { %v9620_v18 = vpop.permute.xlu1 %1375  ;;  %v9622_v63 = vpop.permute.xlu0 %1411 }
 0x20c   : > { %13216 = vst [vmem:[#allocation125_spill] sm:$0xff] %v9620_v18  ;;  %13217 = vst [vmem:[#allocation126_spill] sm:$0xff] %v9622_v63 }
 0x20e   : > { %1761 = vperm.xlu1 %8239, %v9625_v22   ;;  %1813 = vperm.xlu0 %8238, %v8483_v24   ;;  %v9650_v24 = vld [vmem:[%s8721_s15 + $0xf8] sm:$0xff] }
 0x20f   : > { %v9629_v31 = vpop.permute.xlu1 %1383  ;;  %v9631_v26 = vpop.permute.xlu0 %1419 }
 0x210   : > { %13218 = vst [vmem:[#allocation127_spill] sm:$0xff] %v9629_v31  ;;  %13219 = vst [vmem:[#allocation128_spill] sm:$0xff] %v9631_v26 }
 0x212   : > { %1769 = vperm.xlu1 %8239, %v9634_v23   ;;  %1821 = vperm.xlu0 %8238, %v9638_v21  }
 0x213   : > { %v9641_v63 = vpop.permute.xlu1 %1391  ;;  %v9643_v18 = vpop.permute.xlu0 %1427 }
 0x214   : > { %13220 = vst [vmem:[#allocation129_spill] sm:$0xff] %v9641_v63  ;;  %13221 = vst [vmem:[#allocation130_spill] sm:$0xff] %v9643_v18 }
 0x216   : > { %1777 = vperm.xlu1 %8239, %v9646_v32   ;;  %1829 = vperm.xlu0 %8238, %v9650_v24  }
 0x217   : > { %v9653_v26 = vpop.permute.xlu1 %1399  ;;  %v9655_v31 = vpop.permute.xlu0 %1435 }
 0x218   : > { %13222 = vst [vmem:[#allocation131_spill] sm:$0xff] %v9653_v26  ;;  %13223 = vst [vmem:[#allocation132_spill] sm:$0xff] %v9655_v31  ;;  %v8490_v31 = vld [vmem:[%s8721_s15 + $0xc0] sm:$0xff] }
 0x21a   : > { %1785 = vperm.xlu1 %8239, %v8488_v19   ;;  %8251 = vset.pattern.permute.xlu0 %v13052_v17 }
 0x21b   : > { %v9659_v63 = vpop.permute.xlu1 %1407  ;;  %3088 = vperm.xlu0 %8251, %v9403_v49  }
 0x21c   : > { %13224 = vst [vmem:[#allocation133_spill] sm:$0xff] %v9659_v63  ;;  %v9662_v18 = vpop.permute.xlu0 %1512 }
 0x21d   : > { %13225 = vst [vmem:[#allocation134_spill] sm:$0xff] %v9662_v18  ;;  %v9680_v18 = vld [vmem:[%s8721_s15 + $0xd0] sm:$0xff] }
 0x21e   : > { %1793 = vperm.xlu1 %8239, %v9665_v20  }
 0x21f   : > { %v9668_v26 = vpop.permute.xlu1 %1415  ;;  %3092 = vperm.xlu0 %8251, %v9448_v41  }
 0x220   : > { %13226 = vst [vmem:[#allocation135_spill] sm:$0xff] %v9668_v26  ;;  %v9671_v19 = vpop.permute.xlu0 %1524 }
 0x221   : > { %13227 = vst [vmem:[#allocation136_spill] sm:$0xff] %v9671_v19  ;;  %v9689_v19 = vld [vmem:[%s8721_s15 + $0xe0] sm:$0xff] }
 0x222   : > { %1801 = vperm.xlu1 %8239, %v8490_v31  }
 0x223   : > { %v9674_v17 = vpop.permute.xlu1 %1423  ;;  %3108 = vperm.xlu0 %8251, %v9419_v53  }
 0x224   : > { %13228 = vst [vmem:[#allocation137_spill] sm:$0xff] %v9674_v17  ;;  %v9677_v63 = vpop.permute.xlu0 %1532 }
 0x225   : > { %13229 = vst [vmem:[#allocation138_spill] sm:$0xff] %v9677_v63  ;;  %v9698_v63 = vld [vmem:[%s8721_s15 + $0xf0] sm:$0xff] }
 0x226   : > { %1809 = vperm.xlu1 %8239, %v9680_v18  }
 0x227   : > { %v9683_v16 = vpop.permute.xlu1 %1431  ;;  %3124 = vperm.xlu0 %8251, %v9440_v62  }
 0x228   : > { %13230 = vst [vmem:[#allocation139_spill] sm:$0xff] %v9683_v16  ;;  %v9686_v26 = vpop.permute.xlu0 %1540 }
 0x229   : > { %13231 = vst [vmem:[#allocation140_spill] sm:$0xff] %v9686_v26 }
 0x22a   : > { %1817 = vperm.xlu1 %8239, %v9689_v19  }
 0x22b   : > { %3140 = vperm.xlu0 %8251, %v9625_v22  }
 0x22c   : > { %v9693_v31 = vpop.permute.xlu1 %1508  ;;  %v9695_v17 = vpop.permute.xlu0 %1548 }
 0x22d   : > { %13232 = vst [vmem:[#allocation141_spill] sm:$0xff] %v9693_v31  ;;  %13233 = vst [vmem:[#allocation142_spill] sm:$0xff] %v9695_v17 }
 0x22e   : > { %1825 = vperm.xlu1 %8239, %v9698_v63  }
 0x22f   : > { %8298 = vset.pattern.permute.xlu0 %v13054_v34 }
 0x230   : > { %v9702_v16 = vpop.permute.xlu1 %1516  ;;  %3285 = vperm.xlu0 %8298, %v9403_v49   ;;  %v9705_v26 = vpop.permute.xlu0 %1556 }
 0x231   : > { %13234 = vst [vmem:[#allocation143_spill] sm:$0xff] %v9702_v16  ;;  %13235 = vst [vmem:[#allocation144_spill] sm:$0xff] %v9705_v26 }
 0x232   : > { %8240 = vset.pattern.permute.xlu1 %v13056_v48 }
 0x233   : > { %1902 = vperm.xlu1 %8240, %v9436_v39  }
 0x234   : > { %v9709_v31 = vpop.permute.xlu1 %1520  ;;  %3289 = vperm.xlu0 %8298, %v9448_v41   ;;  %v9712_v17 = vpop.permute.xlu0 %1564 }
 0x235   : > { %13236 = vst [vmem:[#allocation145_spill] sm:$0xff] %v9709_v31  ;;  %13237 = vst [vmem:[#allocation146_spill] sm:$0xff] %v9712_v17 }
 0x237   : > { %1910 = vperm.xlu1 %8240, %v9448_v41  }
 0x238   : > { %v9715_v34 = vpop.permute.xlu1 %1528  ;;  %3305 = vperm.xlu0 %8298, %v9419_v53   ;;  %v9718_v16 = vpop.permute.xlu0 %1572 }
 0x239   : > { %13238 = vst [vmem:[#allocation147_spill] sm:$0xff] %v9715_v34  ;;  %13239 = vst [vmem:[#allocation148_spill] sm:$0xff] %v9718_v16 }
 0x23b   : > { %1914 = vperm.xlu1 %8240, %v9457_v6  }
 0x23c   : > { %v9721_v26 = vpop.permute.xlu1 %1536  ;;  %3321 = vperm.xlu0 %8298, %v9440_v62   ;;  %v9724_v48 = vpop.permute.xlu0 %1580 }
 0x23d   : > { %13240 = vst [vmem:[#allocation149_spill] sm:$0xff] %v9721_v26  ;;  %13241 = vst [vmem:[#allocation150_spill] sm:$0xff] %v9724_v48 }
 0x23f   : > { %1922 = vperm.xlu1 %8240, %v9466_v1  }
 0x240   : > { %v9727_v31 = vpop.permute.xlu1 %1544  ;;  %3337 = vperm.xlu0 %8298, %v9625_v22   ;;  %v9730_v17 = vpop.permute.xlu0 %1588 }
 0x241   : > { %13242 = vst [vmem:[#allocation151_spill] sm:$0xff] %v9727_v31  ;;  %13243 = vst [vmem:[#allocation152_spill] sm:$0xff] %v9730_v17  ;;  %v13249_v17 = vmov 8  }
 0x243   : > { %1930 = vperm.xlu1 %8240, %v9475_v45  }
 0x244   : > { %v9733_v34 = vpop.permute.xlu1 %1552  ;;  %3353 = vperm.xlu0 %8298, %v9646_v32   ;;  %v9736_v16 = vpop.permute.xlu0 %1596 }
 0x245   : > { %13244 = vst [vmem:[#allocation153_spill] sm:$0xff] %v9733_v34  ;;  %13245 = vst [vmem:[#allocation154_spill] sm:$0xff] %v9736_v16  ;;  %v13058_v34 = vmov 9  }
 0x247   : > { %1938 = vperm.xlu1 %8240, %v9484_v60  }
 0x248   : > { %v9739_v26 = vpop.permute.xlu1 %1560  ;;  %3369 = vperm.xlu0 %8298, %v9665_v20   ;;  %v9742_v48 = vpop.permute.xlu0 %1604 }
 0x249   : > { %13246 = vst [vmem:[#allocation155_spill] sm:$0xff] %v9739_v26  ;;  %13247 = vst [vmem:[#allocation156_spill] sm:$0xff] %v9742_v48 }
 0x24b   : > { %1946 = vperm.xlu1 %8240, %v9493_v4  }
 0x24c   : > { %v9745_v31 = vpop.permute.xlu1 %1568  ;;  %8335 = vset.pattern.permute.xlu0 %v13249_v17  ;;  %v9748_v14 = vpop.permute.xlu0 %1612 }
 0x24d   : > { %13248 = vst [vmem:[#allocation157_spill] sm:$0xff] %v9745_v31  ;;  %13250 = vst [vmem:[#allocation158_spill] sm:$0xff] %v9748_v14  ;;  %1906 = vperm.xlu0 %8335, %v9403_v49   ;;  %v13060_v14 = vmov 10  }
 0x24f   : > { %8241 = vset.pattern.permute.xlu1 %v13058_v34 }
 0x250   : > { %2103 = vperm.xlu1 %8241, %v9403_v49   ;;  %v9753_v26 = vpop.permute.xlu1 %1576  ;;  %v9755_v16 = vpop.permute.xlu0 %1620 }
 0x251   : > { %13251 = vst [vmem:[#allocation159_spill] sm:$0xff] %v9753_v26  ;;  %13252 = vst [vmem:[#allocation160_spill] sm:$0xff] %v9755_v16  ;;  %1918 = vperm.xlu0 %8335, %v9412_v12  }
 0x254   : > { %2107 = vperm.xlu1 %8241, %v9448_v41   ;;  %v9759_v48 = vpop.permute.xlu1 %1584  ;;  %v9761_v31 = vpop.permute.xlu0 %1628 }
 0x255   : > { %13253 = vst [vmem:[#allocation161_spill] sm:$0xff] %v9759_v48  ;;  %13254 = vst [vmem:[#allocation162_spill] sm:$0xff] %v9761_v31  ;;  %1926 = vperm.xlu0 %8335, %v9419_v53  }
 0x258   : > { %8242 = vset.pattern.permute.xlu1 %v13060_v14  ;;  %v9765_v34 = vpop.permute.xlu1 %1592 }
 0x259   : > { %13255 = vst [vmem:[#allocation163_spill] sm:$0xff] %v9765_v34  ;;  %2296 = vperm.xlu1 %8242, %v9436_v39   ;;  %1934 = vperm.xlu0 %8335, %v9428_v42   ;;  %v9769_v16 = vpop.permute.xlu0 %1705 }
 0x25a   : > { %13256 = vst [vmem:[#allocation164_spill] sm:$0xff] %v9769_v16  ;;  %v13066_v16 = vmov 13  }
 0x25c   : > { %v9771_v26 = vpop.permute.xlu1 %1600 }
 0x25d   : > { %13257 = vst [vmem:[#allocation165_spill] sm:$0xff] %v9771_v26  ;;  %2304 = vperm.xlu1 %8242, %v9448_v41   ;;  %1942 = vperm.xlu0 %8335, %v9440_v62   ;;  %v9775_v31 = vpop.permute.xlu0 %1717 }
 0x25e   : > { %13258 = vst [vmem:[#allocation166_spill] sm:$0xff] %v9775_v31 }
 0x260   : > { %v9777_v48 = vpop.permute.xlu1 %1608 }
 0x261   : > { %13259 = vst [vmem:[#allocation167_spill] sm:$0xff] %v9777_v48  ;;  %2308 = vperm.xlu1 %8242, %v9457_v6   ;;  %1954 = vperm.xlu0 %8335, %v9502_v11   ;;  %v9781_v14 = vpop.permute.xlu0 %1725 }
 0x262   : > { %13260 = vst [vmem:[#allocation168_spill] sm:$0xff] %v9781_v14 }
 0x264   : > { %v9783_v34 = vpop.permute.xlu1 %1616 }
 0x265   : > { %13261 = vst [vmem:[#allocation169_spill] sm:$0xff] %v9783_v34  ;;  %8243 = vset.pattern.permute.xlu1 %v13062_v15  ;;  %1958 = vperm.xlu0 %8335, %v9625_v22   ;;  %v9787_v26 = vpop.permute.xlu0 %1733  ;;  %v13064_v15 = vmov 12  }
 0x266   : > { %13262 = vst [vmem:[#allocation170_spill] sm:$0xff] %v9787_v26  ;;  %2497 = vperm.xlu1 %8243, %v9403_v49  }
 0x268   : > { %v9790_v31 = vpop.permute.xlu1 %1624 }
 0x269   : > { %13263 = vst [vmem:[#allocation171_spill] sm:$0xff] %v9790_v31  ;;  %1970 = vperm.xlu0 %8335, %v9581_v28   ;;  %v9793_v48 = vpop.permute.xlu0 %1741 }
 0x26a   : > { %13264 = vst [vmem:[#allocation172_spill] sm:$0xff] %v9793_v48  ;;  %2501 = vperm.xlu1 %8243, %v9448_v41  }
 0x26c   : > { %v9796_v14 = vpop.permute.xlu1 %1632 }
 0x26d   : > { %13265 = vst [vmem:[#allocation173_spill] sm:$0xff] %v9796_v14  ;;  %1974 = vperm.xlu0 %8335, %v9646_v32   ;;  %v9799_v34 = vpop.permute.xlu0 %1749 }
 0x26e   : > { %13266 = vst [vmem:[#allocation174_spill] sm:$0xff] %v9799_v34  ;;  %8244 = vset.pattern.permute.xlu1 %v13064_v15 }
 0x26f   : > { %2690 = vperm.xlu1 %8244, %v9436_v39  }
 0x271   : > { %v9803_v26 = vpop.permute.xlu1 %1709  ;;  %1986 = vperm.xlu0 %8335, %v9599_v29   ;;  %v9806_v31 = vpop.permute.xlu0 %1757 }
 0x272   : > { %13267 = vst [vmem:[#allocation175_spill] sm:$0xff] %v9803_v26  ;;  %13268 = vst [vmem:[#allocation176_spill] sm:$0xff] %v9806_v31  ;;  %v13273_v26 = vmov 9  }
 0x273   : > { %2698 = vperm.xlu1 %8244, %v9448_v41  }
 0x275   : > { %v9809_v48 = vpop.permute.xlu1 %1713  ;;  %1990 = vperm.xlu0 %8335, %v9665_v20   ;;  %v9812_v14 = vpop.permute.xlu0 %1765 }
 0x276   : > { %13269 = vst [vmem:[#allocation177_spill] sm:$0xff] %v9809_v48  ;;  %13270 = vst [vmem:[#allocation178_spill] sm:$0xff] %v9812_v14 }
 0x277   : > { %2702 = vperm.xlu1 %8244, %v9457_v6  }
 0x279   : > { %v9815_v34 = vpop.permute.xlu1 %1721  ;;  %2002 = vperm.xlu0 %8335, %v9617_v25   ;;  %v9818_v15 = vpop.permute.xlu0 %1773 }
 0x27a   : > { %13271 = vst [vmem:[#allocation179_spill] sm:$0xff] %v9815_v34  ;;  %13272 = vst [vmem:[#allocation180_spill] sm:$0xff] %v9818_v15 }
 0x27b   : > { %8245 = vset.pattern.permute.xlu1 %v13273_v26 }
 0x27c   : > { %2119 = vperm.xlu1 %8245, %v9466_v1  }
 0x27d   : > { %v9822_v31 = vpop.permute.xlu1 %1729  ;;  %2006 = vperm.xlu0 %8335, %v9680_v18   ;;  %v9825_v48 = vpop.permute.xlu0 %1781 }
 0x27e   : > { %13274 = vst [vmem:[#allocation181_spill] sm:$0xff] %v9822_v31  ;;  %13275 = vst [vmem:[#allocation182_spill] sm:$0xff] %v9825_v48 }
 0x280   : > { %8246 = vset.pattern.permute.xlu1 %v13066_v16 }
 0x281   : > { %2887 = vperm.xlu1 %8246, %v9436_v39   ;;  %v9829_v14 = vpop.permute.xlu1 %1737  ;;  %2018 = vperm.xlu0 %8335, %v9638_v21   ;;  %v9832_v15 = vpop.permute.xlu0 %1789 }
 0x282   : > { %13276 = vst [vmem:[#allocation183_spill] sm:$0xff] %v9829_v14  ;;  %13277 = vst [vmem:[#allocation184_spill] sm:$0xff] %v9832_v15 }
 0x285   : > { %8247 = vset.pattern.permute.xlu1 %v13273_v26  ;;  %v9835_v34 = vpop.permute.xlu1 %1745  ;;  %2022 = vperm.xlu0 %8335, %v9698_v63   ;;  %v9838_v31 = vpop.permute.xlu0 %1797 }
 0x286   : > { %13278 = vst [vmem:[#allocation185_spill] sm:$0xff] %v9835_v34  ;;  %13279 = vst [vmem:[#allocation186_spill] sm:$0xff] %v9838_v31  ;;  %2123 = vperm.xlu1 %8247, %v9419_v53   ;;  %v13284_v34 = vmov 13  }
 0x289   : > { %v9841_v48 = vpop.permute.xlu1 %1753  ;;  %8339 = vset.pattern.permute.xlu0 %v13273_v26  ;;  %v9844_v16 = vpop.permute.xlu0 %1805 }
 0x28a   : > { %13280 = vst [vmem:[#allocation187_spill] sm:$0xff] %v9841_v48  ;;  %13281 = vst [vmem:[#allocation188_spill] sm:$0xff] %v9844_v16  ;;  %2127 = vperm.xlu1 %8247, %v9475_v45   ;;  %2099 = vperm.xlu0 %8339, %v9436_v39   ;;  %v13287_v16 = vmov 10  }
 0x28d   : > { %v9848_v15 = vpop.permute.xlu1 %1761  ;;  %v9850_v14 = vpop.permute.xlu0 %1813 }
 0x28e   : > { %13282 = vst [vmem:[#allocation189_spill] sm:$0xff] %v9848_v15  ;;  %13283 = vst [vmem:[#allocation190_spill] sm:$0xff] %v9850_v14  ;;  %8248 = vset.pattern.permute.xlu1 %v13284_v34  ;;  %2111 = vperm.xlu0 %8339, %v9457_v6   ;;  %v13290_v14 = vmov 14  }
 0x28f   : > { %2899 = vperm.xlu1 %8248, %v9457_v6  }
 0x291   : > { %v9855_v31 = vpop.permute.xlu1 %1769  ;;  %v9857_v48 = vpop.permute.xlu0 %1821 }
 0x292   : > { %13285 = vst [vmem:[#allocation191_spill] sm:$0xff] %v9855_v31  ;;  %13286 = vst [vmem:[#allocation192_spill] sm:$0xff] %v9857_v48  ;;  %2115 = vperm.xlu0 %8339, %v9412_v12  }
 0x293   : > { %8249 = vset.pattern.permute.xlu1 %v13287_v16 }
 0x294   : > { %2316 = vperm.xlu1 %8249, %v9466_v1  }
 0x295   : > { %v9862_v56 = vpop.permute.xlu1 %1777  ;;  %v9864_v15 = vpop.permute.xlu0 %1829 }
 0x296   : > { %13288 = vst [vmem:[#allocation193_spill] sm:$0xff] %v9862_v56  ;;  %13289 = vst [vmem:[#allocation194_spill] sm:$0xff] %v9864_v15  ;;  %2135 = vperm.xlu0 %8339, %v9484_v60  }
 0x298   : > { %8250 = vset.pattern.permute.xlu1 %v13290_v14 }
 0x299   : > { %3084 = vperm.xlu1 %8250, %v9436_v39   ;;  %v9869_v52 = vpop.permute.xlu1 %1785 }
 0x29a   : > { %13291 = vst [vmem:[#allocation195_spill] sm:$0xff] %v9869_v52  ;;  %2139 = vperm.xlu0 %8339, %v9440_v62   ;;  %v9872_v31 = vpop.permute.xlu0 %3088 }
 0x29b   : > { %13292 = vst [vmem:[#allocation196_spill] sm:$0xff] %v9872_v31 }
 0x29d   : > { %8252 = vset.pattern.permute.xlu1 %v13287_v16  ;;  %v9875_v48 = vpop.permute.xlu1 %1793 }
 0x29e   : > { %13293 = vst [vmem:[#allocation197_spill] sm:$0xff] %v9875_v48  ;;  %2320 = vperm.xlu1 %8252, %v9419_v53   ;;  %2151 = vperm.xlu0 %8339, %v9502_v11   ;;  %v9879_v15 = vpop.permute.xlu0 %3092 }
 0x29f   : > { %13294 = vst [vmem:[#allocation198_spill] sm:$0xff] %v9879_v15  ;;  %v13301_v15 = vmov 11  }
 0x2a1   : > { %v9881_v56 = vpop.permute.xlu1 %1801 }
 0x2a2   : > { %13295 = vst [vmem:[#allocation199_spill] sm:$0xff] %v9881_v56  ;;  %2324 = vperm.xlu1 %8252, %v9475_v45   ;;  %2155 = vperm.xlu0 %8339, %v9625_v22   ;;  %v9885_v52 = vpop.permute.xlu0 %3108 }
 0x2a3   : > { %13296 = vst [vmem:[#allocation200_spill] sm:$0xff] %v9885_v52 }
 0x2a5   : > { %v9887_v58 = vpop.permute.xlu1 %1809 }
 0x2a6   : > { %13297 = vst [vmem:[#allocation201_spill] sm:$0xff] %v9887_v58  ;;  %8253 = vset.pattern.permute.xlu1 %v13290_v14  ;;  %2167 = vperm.xlu0 %8339, %v9581_v28   ;;  %v9891_v31 = vpop.permute.xlu0 %3124 }
 0x2a7   : > { %13298 = vst [vmem:[#allocation202_spill] sm:$0xff] %v9891_v31  ;;  %3096 = vperm.xlu1 %8253, %v9457_v6  }
 0x2a9   : > { %v9894_v48 = vpop.permute.xlu1 %1817 }
 0x2aa   : > { %13299 = vst [vmem:[#allocation203_spill] sm:$0xff] %v9894_v48  ;;  %2171 = vperm.xlu0 %8339, %v9646_v32   ;;  %v9897_v56 = vpop.permute.xlu0 %3140 }
 0x2ab   : > { %13300 = vst [vmem:[#allocation204_spill] sm:$0xff] %v9897_v56  ;;  %8254 = vset.pattern.permute.xlu1 %v13301_v15 }
 0x2ac   : > { %2513 = vperm.xlu1 %8254, %v9466_v1  }
 0x2ad   : > { %v9901_v52 = vpop.permute.xlu1 %1825 }
 0x2ae   : > { %13302 = vst [vmem:[#allocation205_spill] sm:$0xff] %v9901_v52  ;;  %2183 = vperm.xlu0 %8339, %v9599_v29  }
 0x2af   : > { %v9904_v58 = vpop.permute.xlu0 %3285 }
 0x2b0   : > { %13303 = vst [vmem:[#allocation206_spill] sm:$0xff] %v9904_v58  ;;  %8255 = vset.pattern.permute.xlu1 %v13304_v8 }
 0x2b1   : > { %3281 = vperm.xlu1 %8255, %v9436_v39  }
 0x2b2   : > { %v9908_v31 = vpop.permute.xlu1 %1902  ;;  %2187 = vperm.xlu0 %8339, %v9665_v20  }
 0x2b3   : > { %13305 = vst [vmem:[#allocation207_spill] sm:$0xff] %v9908_v31  ;;  %v9911_v48 = vpop.permute.xlu0 %3289 }
 0x2b4   : > { %13306 = vst [vmem:[#allocation208_spill] sm:$0xff] %v9911_v48 }
 0x2b5   : > { %8256 = vset.pattern.permute.xlu1 %v13301_v15 }
 0x2b6   : > { %2517 = vperm.xlu1 %8256, %v9419_v53   ;;  %v9915_v56 = vpop.permute.xlu1 %1910  ;;  %2199 = vperm.xlu0 %8339, %v9617_v25  }
 0x2b7   : > { %13307 = vst [vmem:[#allocation209_spill] sm:$0xff] %v9915_v56  ;;  %v9918_v52 = vpop.permute.xlu0 %3305 }
 0x2b8   : > { %13308 = vst [vmem:[#allocation210_spill] sm:$0xff] %v9918_v52  ;;  %v13314_v52 = vmov 12  }
 0x2ba   : > { %2521 = vperm.xlu1 %8256, %v9475_v45   ;;  %v9921_v58 = vpop.permute.xlu1 %1914  ;;  %2203 = vperm.xlu0 %8339, %v9680_v18  }
 0x2bb   : > { %13309 = vst [vmem:[#allocation211_spill] sm:$0xff] %v9921_v58  ;;  %v9924_v31 = vpop.permute.xlu0 %3321 }
 0x2bc   : > { %13310 = vst [vmem:[#allocation212_spill] sm:$0xff] %v9924_v31 }
 0x2be   : > { %8257 = vset.pattern.permute.xlu1 %v13304_v8  ;;  %v9927_v48 = vpop.permute.xlu1 %1922  ;;  %2215 = vperm.xlu0 %8339, %v9638_v21  }
 0x2bf   : > { %13311 = vst [vmem:[#allocation213_spill] sm:$0xff] %v9927_v48  ;;  %3293 = vperm.xlu1 %8257, %v9457_v6   ;;  %v9931_v56 = vpop.permute.xlu0 %3337 }
 0x2c0   : > { %13312 = vst [vmem:[#allocation214_spill] sm:$0xff] %v9931_v56 }
 0x2c2   : > { %v9933_v37 = vpop.permute.xlu1 %1930  ;;  %2219 = vperm.xlu0 %8339, %v9698_v63  }
 0x2c3   : > { %13313 = vst [vmem:[#allocation215_spill] sm:$0xff] %v9933_v37  ;;  %8258 = vset.pattern.permute.xlu1 %v13314_v52  ;;  %v9937_v58 = vpop.permute.xlu0 %3353 }
 0x2c4   : > { %13315 = vst [vmem:[#allocation216_spill] sm:$0xff] %v9937_v58  ;;  %2710 = vperm.xlu1 %8258, %v9466_v1  }
 0x2c6   : > { %v9940_v31 = vpop.permute.xlu1 %1938  ;;  %8344 = vset.pattern.permute.xlu0 %v13287_v16 }
 0x2c7   : > { %13316 = vst [vmem:[#allocation217_spill] sm:$0xff] %v9940_v31  ;;  %2300 = vperm.xlu0 %8344, %v9403_v49   ;;  %v9944_v48 = vpop.permute.xlu0 %3369 }
 0x2c8   : > { %13317 = vst [vmem:[#allocation218_spill] sm:$0xff] %v9944_v48  ;;  %2714 = vperm.xlu1 %8258, %v9419_v53  }
 0x2ca   : > { %v9947_v56 = vpop.permute.xlu1 %1946 }
 0x2cb   : > { %13318 = vst [vmem:[#allocation219_spill] sm:$0xff] %v9947_v56  ;;  %2312 = vperm.xlu0 %8344, %v9412_v12  }
 0x2cc   : > { %8259 = vset.pattern.permute.xlu1 %v13273_v26  ;;  %v9951_v37 = vpop.permute.xlu0 %1906 }
 0x2cd   : > { %13319 = vst [vmem:[#allocation220_spill] sm:$0xff] %v9951_v37  ;;  %2131 = vperm.xlu1 %8259, %v9428_v42  }
 0x2cf   : > { %v9954_v58 = vpop.permute.xlu1 %2103  ;;  %2332 = vperm.xlu0 %8344, %v9484_v60  }
 0x2d0   : > { %13320 = vst [vmem:[#allocation221_spill] sm:$0xff] %v9954_v58  ;;  %v9957_v31 = vpop.permute.xlu0 %1918 }
 0x2d1   : > { %13321 = vst [vmem:[#allocation222_spill] sm:$0xff] %v9957_v31  ;;  %8260 = vset.pattern.permute.xlu1 %v13284_v34 }
 0x2d2   : > { %2903 = vperm.xlu1 %8260, %v9412_v12  }
 0x2d3   : > { %v9961_v53 = vpop.permute.xlu1 %2107  ;;  %2336 = vperm.xlu0 %8344, %v9440_v62  }
 0x2d4   : > { %13322 = vst [vmem:[#allocation223_spill] sm:$0xff] %v9961_v53  ;;  %v9964_v48 = vpop.permute.xlu0 %1926 }
 0x2d5   : > { %13323 = vst [vmem:[#allocation224_spill] sm:$0xff] %v9964_v48 }
 0x2d6   : > { %2907 = vperm.xlu1 %8260, %v9466_v1  }
 0x2d7   : > { %2348 = vperm.xlu0 %8344, %v9502_v11  }
 0x2d8   : > { %v9968_v56 = vpop.permute.xlu1 %2296  ;;  %v9970_v58 = vpop.permute.xlu0 %1934 }
 0x2d9   : > { %13324 = vst [vmem:[#allocation225_spill] sm:$0xff] %v9968_v56  ;;  %13325 = vst [vmem:[#allocation226_spill] sm:$0xff] %v9970_v58 }
 0x2da   : > { %8261 = vset.pattern.permute.xlu1 %v13273_v26 }
 0x2db   : > { %2143 = vperm.xlu1 %8261, %v9493_v4   ;;  %2352 = vperm.xlu0 %8344, %v9625_v22  }
 0x2dc   : > { %v9975_v31 = vpop.permute.xlu1 %2304  ;;  %v9977_v53 = vpop.permute.xlu0 %1942 }
 0x2dd   : > { %13326 = vst [vmem:[#allocation227_spill] sm:$0xff] %v9975_v31  ;;  %13327 = vst [vmem:[#allocation228_spill] sm:$0xff] %v9977_v53 }
 0x2df   : > { %8262 = vset.pattern.permute.xlu1 %v13284_v34  ;;  %2364 = vperm.xlu0 %8344, %v9581_v28  }
 0x2e0   : > { %2915 = vperm.xlu1 %8262, %v9475_v45   ;;  %v9982_v48 = vpop.permute.xlu1 %2308  ;;  %v9984_v56 = vpop.permute.xlu0 %1954 }
 0x2e1   : > { %13328 = vst [vmem:[#allocation229_spill] sm:$0xff] %v9982_v48  ;;  %13329 = vst [vmem:[#allocation230_spill] sm:$0xff] %v9984_v56 }
 0x2e3   : > { %2368 = vperm.xlu0 %8344, %v9646_v32  }
 0x2e4   : > { %8263 = vset.pattern.permute.xlu1 %v13287_v16  ;;  %v9988_v58 = vpop.permute.xlu0 %1958 }
 0x2e5   : > { %13330 = vst [vmem:[#allocation231_spill] sm:$0xff] %v9988_v58  ;;  %2328 = vperm.xlu1 %8263, %v9428_v42   ;;  %v9991_v31 = vpop.permute.xlu1 %2497 }
 0x2e6   : > { %13331 = vst [vmem:[#allocation232_spill] sm:$0xff] %v9991_v31 }
 0x2e7   : > { %2380 = vperm.xlu0 %8344, %v9599_v29  }
 0x2e8   : > { %v9994_v53 = vpop.permute.xlu0 %1970 }
 0x2e9   : > { %13332 = vst [vmem:[#allocation233_spill] sm:$0xff] %v9994_v53  ;;  %8264 = vset.pattern.permute.xlu1 %v13290_v14  ;;  %v9997_v37 = vpop.permute.xlu1 %2501 }
 0x2ea   : > { %13333 = vst [vmem:[#allocation234_spill] sm:$0xff] %v9997_v37  ;;  %3100 = vperm.xlu1 %8264, %v9412_v12  }
 0x2eb   : > { %2384 = vperm.xlu0 %8344, %v9665_v20  }
 0x2ec   : > { %v10001_v56 = vpop.permute.xlu0 %1974 }
 0x2ed   : > { %13334 = vst [vmem:[#allocation235_spill] sm:$0xff] %v10001_v56 }
 0x2ee   : > { %3104 = vperm.xlu1 %8264, %v9466_v1   ;;  %v10004_v58 = vpop.permute.xlu1 %2690 }
 0x2ef   : > { %13335 = vst [vmem:[#allocation236_spill] sm:$0xff] %v10004_v58  ;;  %2396 = vperm.xlu0 %8344, %v9617_v25  }
 0x2f0   : > { %v10007_v31 = vpop.permute.xlu0 %1986 }
 0x2f1   : > { %13336 = vst [vmem:[#allocation237_spill] sm:$0xff] %v10007_v31 }
 0x2f2   : > { %8265 = vset.pattern.permute.xlu1 %v13287_v16  ;;  %v10010_v53 = vpop.permute.xlu1 %2698 }
 0x2f3   : > { %13337 = vst [vmem:[#allocation238_spill] sm:$0xff] %v10010_v53  ;;  %2340 = vperm.xlu1 %8265, %v9493_v4   ;;  %2400 = vperm.xlu0 %8344, %v9680_v18   ;;  %v10294_v53 = vld [vmem:[%s8721_s15 + $0x78] sm:$0xff] }
 0x2f4   : > { %v10014_v48 = vpop.permute.xlu0 %1990 }
 0x2f5   : > { %13338 = vst [vmem:[#allocation239_spill] sm:$0xff] %v10014_v48 }
 0x2f6   : > { %v10016_v37 = vpop.permute.xlu1 %2702 }
 0x2f7   : > { %13339 = vst [vmem:[#allocation240_spill] sm:$0xff] %v10016_v37  ;;  %8266 = vset.pattern.permute.xlu1 %v13290_v14  ;;  %2412 = vperm.xlu0 %8344, %v9638_v21  }
 0x2f8   : > { %3112 = vperm.xlu1 %8266, %v9475_v45   ;;  %v10021_v56 = vpop.permute.xlu0 %2002 }
 0x2f9   : > { %13340 = vst [vmem:[#allocation241_spill] sm:$0xff] %v10021_v56 }
 0x2fb   : > { %v10023_v31 = vpop.permute.xlu1 %2119  ;;  %2416 = vperm.xlu0 %8344, %v9698_v63  }
 0x2fc   : > { %13341 = vst [vmem:[#allocation242_spill] sm:$0xff] %v10023_v31  ;;  %8267 = vset.pattern.permute.xlu1 %v13301_v15  ;;  %v10027_v58 = vpop.permute.xlu0 %2006 }
 0x2fd   : > { %13342 = vst [vmem:[#allocation243_spill] sm:$0xff] %v10027_v58  ;;  %2525 = vperm.xlu1 %8267, %v9428_v42  }
 0x2ff   : > { %8349 = vset.pattern.permute.xlu0 %v13301_v15 }
 0x300   : > { %v10031_v37 = vpop.permute.xlu1 %2887  ;;  %2493 = vperm.xlu0 %8349, %v9436_v39   ;;  %v10034_v48 = vpop.permute.xlu0 %2018 }
 0x301   : > { %13343 = vst [vmem:[#allocation244_spill] sm:$0xff] %v10031_v37  ;;  %13344 = vst [vmem:[#allocation245_spill] sm:$0xff] %v10034_v48  ;;  %8268 = vset.pattern.permute.xlu1 %v13304_v8 }
 0x302   : > { %3297 = vperm.xlu1 %8268, %v9412_v12  }
 0x304   : > { %2505 = vperm.xlu0 %8349, %v9457_v6   ;;  %v10039_v56 = vpop.permute.xlu0 %2022 }
 0x305   : > { %13345 = vst [vmem:[#allocation246_spill] sm:$0xff] %v10039_v56  ;;  %v10041_v31 = vpop.permute.xlu1 %2123 }
 0x306   : > { %13346 = vst [vmem:[#allocation247_spill] sm:$0xff] %v10041_v31  ;;  %3301 = vperm.xlu1 %8268, %v9466_v1  }
 0x308   : > { %2509 = vperm.xlu0 %8349, %v9412_v12  }
 0x309   : > { %v10045_v58 = vpop.permute.xlu1 %2127  ;;  %v10047_v37 = vpop.permute.xlu0 %2099 }
 0x30a   : > { %13347 = vst [vmem:[#allocation248_spill] sm:$0xff] %v10045_v58  ;;  %13348 = vst [vmem:[#allocation249_spill] sm:$0xff] %v10047_v37  ;;  %8269 = vset.pattern.permute.xlu1 %v13301_v15 }
 0x30b   : > { %2537 = vperm.xlu1 %8269, %v9493_v4  }
 0x30c   : > { %2529 = vperm.xlu0 %8349, %v9484_v60  }
 0x30d   : > { %v10052_v39 = vpop.permute.xlu0 %2111 }
 0x30e   : > { %13349 = vst [vmem:[#allocation250_spill] sm:$0xff] %v10052_v39  ;;  %v10054_v6 = vpop.permute.xlu1 %2899  ;;  %v13420_v39 = vld [vmem:[#allocation20_spill] sm:$0xff] }
 0x30f   : > { %13350 = vst [vmem:[#allocation251_spill] sm:$0xff] %v10054_v6  ;;  %8270 = vset.pattern.permute.xlu1 %v13304_v8 }
 0x310   : > { %3309 = vperm.xlu1 %8270, %v9475_v45   ;;  %2533 = vperm.xlu0 %8349, %v9440_v62  }
 0x311   : > { %v10059_v1 = vpop.permute.xlu0 %2115 }
 0x312   : > { %13351 = vst [vmem:[#allocation252_spill] sm:$0xff] %v10059_v1 }
 0x313   : > { %v10061_v56 = vpop.permute.xlu1 %2316 }
 0x314   : > { %13352 = vst [vmem:[#allocation253_spill] sm:$0xff] %v10061_v56  ;;  %8271 = vset.pattern.permute.xlu1 %v13249_v17  ;;  %2545 = vperm.xlu0 %8349, %v9502_v11  }
 0x315   : > { %1950 = vperm.xlu1 %8271, %v9613_v27   ;;  %v10066_v58 = vpop.permute.xlu0 %2135 }
 0x316   : > { %13353 = vst [vmem:[#allocation254_spill] sm:$0xff] %v10066_v58 }
 0x318   : > { %v10068_v31 = vpop.permute.xlu1 %3084  ;;  %2549 = vperm.xlu0 %8349, %v9625_v22  }
 0x319   : > { %13354 = vst [vmem:[#allocation255_spill] sm:$0xff] %v10068_v31  ;;  %8272 = vset.pattern.permute.xlu1 %v13314_v52  ;;  %v10072_v6 = vpop.permute.xlu0 %2139 }
 0x31a   : > { %13355 = vst [vmem:[#allocation256_spill] sm:$0xff] %v10072_v6  ;;  %2722 = vperm.xlu1 %8272, %v9428_v42  }
 0x31c   : > { %2561 = vperm.xlu0 %8349, %v9581_v28  }
 0x31d   : > { %v10076_v56 = vpop.permute.xlu1 %2320  ;;  %v10078_v1 = vpop.permute.xlu0 %2151 }
 0x31e   : > { %13356 = vst [vmem:[#allocation257_spill] sm:$0xff] %v10076_v56  ;;  %13357 = vst [vmem:[#allocation258_spill] sm:$0xff] %v10078_v1  ;;  %2726 = vperm.xlu1 %8272, %v9484_v60   ;;  %v13418_v56 = vld [vmem:[#allocation19_spill] sm:$0xff] }
 0x320   : > { %2565 = vperm.xlu0 %8349, %v9646_v32  }
 0x321   : > { %v10082_v58 = vpop.permute.xlu1 %2324  ;;  %v10084_v31 = vpop.permute.xlu0 %2155 }
 0x322   : > { %13358 = vst [vmem:[#allocation259_spill] sm:$0xff] %v10082_v58  ;;  %13359 = vst [vmem:[#allocation260_spill] sm:$0xff] %v10084_v31  ;;  %8273 = vset.pattern.permute.xlu1 %v13249_v17 }
 0x323   : > { %1962 = vperm.xlu1 %8273, %v9511_v13  }
 0x324   : > { %2577 = vperm.xlu0 %8349, %v9599_v29  }
 0x325   : > { %v10089_v6 = vpop.permute.xlu0 %2167 }
 0x326   : > { %13360 = vst [vmem:[#allocation261_spill] sm:$0xff] %v10089_v6  ;;  %v10091_v28 = vpop.permute.xlu1 %3096 }
 0x327   : > { %13361 = vst [vmem:[#allocation262_spill] sm:$0xff] %v10091_v28  ;;  %8274 = vset.pattern.permute.xlu1 %v13314_v52 }
 0x328   : > { %2734 = vperm.xlu1 %8274, %v9493_v4   ;;  %2581 = vperm.xlu0 %8349, %v9665_v20  }
 0x329   : > { %v10096_v1 = vpop.permute.xlu0 %2171 }
 0x32a   : > { %13362 = vst [vmem:[#allocation263_spill] sm:$0xff] %v10096_v1 }
 0x32b   : > { %v10098_v58 = vpop.permute.xlu1 %2513 }
 0x32c   : > { %13363 = vst [vmem:[#allocation264_spill] sm:$0xff] %v10098_v58  ;;  %8275 = vset.pattern.permute.xlu1 %v13273_v26  ;;  %2593 = vperm.xlu0 %8349, %v9617_v25   ;;  %v13417_v58 = vld [vmem:[#allocation18_spill] sm:$0xff] }
 0x32d   : > { %2147 = vperm.xlu1 %8275, %v9613_v27   ;;  %v10103_v29 = vpop.permute.xlu0 %2183 }
 0x32e   : > { %13364 = vst [vmem:[#allocation265_spill] sm:$0xff] %v10103_v29 }
 0x330   : > { %v10105_v6 = vpop.permute.xlu1 %3281  ;;  %2597 = vperm.xlu0 %8349, %v9680_v18  }
 0x331   : > { %13365 = vst [vmem:[#allocation266_spill] sm:$0xff] %v10105_v6  ;;  %8276 = vset.pattern.permute.xlu1 %v13284_v34  ;;  %v10109_v31 = vpop.permute.xlu0 %2187 }
 0x332   : > { %13366 = vst [vmem:[#allocation267_spill] sm:$0xff] %v10109_v31  ;;  %2919 = vperm.xlu1 %8276, %v9428_v42  }
 0x334   : > { %2609 = vperm.xlu0 %8349, %v9638_v21  }
 0x335   : > { %v10113_v1 = vpop.permute.xlu1 %2517  ;;  %v10115_v28 = vpop.permute.xlu0 %2199 }
 0x336   : > { %13367 = vst [vmem:[#allocation268_spill] sm:$0xff] %v10113_v1  ;;  %13368 = vst [vmem:[#allocation269_spill] sm:$0xff] %v10115_v28  ;;  %2923 = vperm.xlu1 %8276, %v9484_v60  }
 0x338   : > { %2613 = vperm.xlu0 %8349, %v9698_v63  }
 0x339   : > { %v10119_v25 = vpop.permute.xlu1 %2521  ;;  %v10121_v29 = vpop.permute.xlu0 %2203 }
 0x33a   : > { %13369 = vst [vmem:[#allocation270_spill] sm:$0xff] %v10119_v25  ;;  %13370 = vst [vmem:[#allocation271_spill] sm:$0xff] %v10121_v29  ;;  %8277 = vset.pattern.permute.xlu1 %v13273_v26 }
 0x33b   : > { %2159 = vperm.xlu1 %8277, %v9511_v13  }
 0x33c   : > { %8354 = vset.pattern.permute.xlu0 %v13314_v52 }
 0x33d   : > { %2694 = vperm.xlu0 %8354, %v9403_v49   ;;  %v10127_v6 = vpop.permute.xlu0 %2215 }
 0x33e   : > { %13371 = vst [vmem:[#allocation272_spill] sm:$0xff] %v10127_v6  ;;  %v10129_v1 = vpop.permute.xlu1 %3293 }
 0x33f   : > { %13372 = vst [vmem:[#allocation273_spill] sm:$0xff] %v10129_v1  ;;  %8278 = vset.pattern.permute.xlu1 %v13284_v34 }
 0x340   : > { %2931 = vperm.xlu1 %8278, %v9493_v4  }
 0x341   : > { %2706 = vperm.xlu0 %8354, %v9412_v12   ;;  %v10134_v63 = vpop.permute.xlu0 %2219 }
 0x342   : > { %13373 = vst [vmem:[#allocation274_spill] sm:$0xff] %v10134_v63 }
 0x343   : > { %v10136_v28 = vpop.permute.xlu1 %2710 }
 0x344   : > { %13374 = vst [vmem:[#allocation275_spill] sm:$0xff] %v10136_v28  ;;  %8279 = vset.pattern.permute.xlu1 %v13287_v16 }
 0x345   : > { %2344 = vperm.xlu1 %8279, %v9613_v27   ;;  %2718 = vperm.xlu0 %8354, %v9475_v45   ;;  %v8366_v45 = vld [vmem:[%s13045_s2] sm:$0xff]  }
 0x346   : > { %v10141_v29 = vpop.permute.xlu0 %2300  ;;  %7976 = vmatprep.subr.bf16.mxu0 %v8366_v45 }
 0x347   : > { %13375 = vst [vmem:[#allocation276_spill] sm:$0xff] %v10141_v29  ;;  %v10143_v6 = vpop.permute.xlu1 %2714  ;;  %7977 = vmatpush3.bf16.msra.mxu0 %v8366_v45  ;;  %v8368_v45 = vld [vmem:[%s13045_s2 + $0x10] sm:$0xff]  }
 0x348   : > { %13376 = vst [vmem:[#allocation277_spill] sm:$0xff] %v10143_v6 }
 0x349   : > { %8280 = vset.pattern.permute.xlu1 %v13290_v14  ;;  %2730 = vperm.xlu0 %8354, %v9440_v62  }
 0x34a   : > { %3116 = vperm.xlu1 %8280, %v9428_v42   ;;  %v10148_v12 = vpop.permute.xlu0 %2312 }
 0x34b   : > { %13377 = vst [vmem:[#allocation278_spill] sm:$0xff] %v10148_v12 }
 0x34c   : > { %v10150_v63 = vpop.permute.xlu1 %2131 }
 0x34d   : > { %13378 = vst [vmem:[#allocation279_spill] sm:$0xff] %v10150_v63  ;;  %2746 = vperm.xlu0 %8354, %v9625_v22  }
 0x34e   : > { %3120 = vperm.xlu1 %8280, %v9484_v60   ;;  %v10154_v1 = vpop.permute.xlu0 %2332 }
 0x34f   : > { %13379 = vst [vmem:[#allocation280_spill] sm:$0xff] %v10154_v1  ;;  %v8367_v1 = vld [vmem:[%s13045_s2 + $0x8] sm:$0xff]  }
 0x350   : > { %7978 = vmatprep.subr.bf16.mxu0 %v8367_v1 }
 0x351   : > { %v10159_v6 = vpop.permute.xlu1 %2903  ;;  %2762 = vperm.xlu0 %8354, %v9646_v32   ;;  %7979 = vmatpush3.bf16.msra.mxu0 %v8367_v1  ;;  %v8369_v1 = vld [vmem:[%s13045_s2 + $0x18] sm:$0xff]  }
 0x352   : > { %13380 = vst [vmem:[#allocation281_spill] sm:$0xff] %v10159_v6  ;;  %8281 = vset.pattern.permute.xlu1 %v13287_v16  ;;  %v10163_v62 = vpop.permute.xlu0 %2336  ;;  %7980 = vmatprep.subr.bf16.mxu0 %v8368_v45 }
 0x353   : > { %13381 = vst [vmem:[#allocation282_spill] sm:$0xff] %v10163_v62  ;;  %2356 = vperm.xlu1 %8281, %v9511_v13  }
 0x355   : > { %v10169_v63 = vpop.permute.xlu1 %2907  ;;  %2778 = vperm.xlu0 %8354, %v9665_v20   ;;  %7981 = vmatpush3.bf16.msra.mxu0 %v8368_v45  ;;  %v8370_v45 = vld [vmem:[%s13045_s2 + $0x20] sm:$0xff]  }
 0x356   : > { %13382 = vst [vmem:[#allocation283_spill] sm:$0xff] %v10169_v63  ;;  %v10172_v12 = vpop.permute.xlu0 %2348  ;;  %7982 = vmatprep.subr.bf16.mxu0 %v8369_v1 }
 0x357   : > { %13383 = vst [vmem:[#allocation284_spill] sm:$0xff] %v10172_v12  ;;  %8282 = vset.pattern.permute.xlu1 %v13290_v14 }
 0x358   : > { %3128 = vperm.xlu1 %8282, %v9493_v4  }
 0x359   : > { %2794 = vperm.xlu0 %8354, %v9680_v18   ;;  %7983 = vmatpush3.bf16.msra.mxu0 %v8369_v1  ;;  %v8371_v1 = vld [vmem:[%s13045_s2 + $0x28] sm:$0xff]  }
 0x35a   : > { %v10180_v6 = vpop.permute.xlu1 %2143  ;;  %v10182_v62 = vpop.permute.xlu0 %2352  ;;  %7984 = vmatprep.subr.bf16.mxu0 %v8370_v45 }
 0x35b   : > { %13384 = vst [vmem:[#allocation285_spill] sm:$0xff] %v10180_v6  ;;  %13385 = vst [vmem:[#allocation286_spill] sm:$0xff] %v10182_v62 }
 0x35c   : > { %8283 = vset.pattern.permute.xlu1 %v13301_v15 }
 0x35d   : > { %2541 = vperm.xlu1 %8283, %v9613_v27   ;;  %2806 = vperm.xlu0 %8354, %v9638_v21  }
 0x35e   : > { %v10190_v12 = vpop.permute.xlu0 %2364  ;;  %7985 = vmatpush3.bf16.msra.mxu0 %v8370_v45  ;;  %v8494_v45 = vld [vmem:[%s8721_s15 + $0x30] sm:$0xff] }
 0x35f   : > { %13386 = vst [vmem:[#allocation287_spill] sm:$0xff] %v10190_v12  ;;  %v10192_v63 = vpop.permute.xlu1 %2915  ;;  %7986 = vmatprep.subr.bf16.mxu0 %v8371_v1 }
 0x360   : > { %13387 = vst [vmem:[#allocation288_spill] sm:$0xff] %v10192_v63 }
 0x361   : > { %8284 = vset.pattern.permute.xlu1 %v13304_v8  ;;  %8358 = vset.pattern.permute.xlu0 %v13284_v34 }
 0x362   : > { %3313 = vperm.xlu1 %8284, %v9428_v42   ;;  %2891 = vperm.xlu0 %8358, %v9403_v49   ;;  %v10201_v21 = vpop.permute.xlu0 %2368  ;;  %v8372_v42 = vld [vmem:[%s13045_s2 + $0x30] sm:$0xff]  }
 0x363   : > { %13388 = vst [vmem:[#allocation289_spill] sm:$0xff] %v10201_v21  ;;  %7987 = vmatpush3.bf16.msra.mxu0 %v8371_v1  ;;  %v8495_v1 = vld [vmem:[%s8721_s15 + $0x50] sm:$0xff] }
 0x364   : > { %v10203_v12 = vpop.permute.xlu1 %2328  ;;  %7988 = vmatprep.subr.bf16.mxu0 %v8372_v42 }
 0x365   : > { %13389 = vst [vmem:[#allocation290_spill] sm:$0xff] %v10203_v12  ;;  %v13406_v12 = vld [vmem:[#allocation9_spill] sm:$0xff] }
 0x366   : > { %3317 = vperm.xlu1 %8284, %v9484_v60   ;;  %2895 = vperm.xlu0 %8358, %v9448_v41   ;;  %v10210_v62 = vpop.permute.xlu0 %2380  ;;  %v8373_v60 = vld [vmem:[%s13045_s2 + $0x38] sm:$0xff]   ;;  %13421 = vst [vmem:[#allocation9_spill] sm:$0xff] %v10294_v53 }
 0x367   : > { %13390 = vst [vmem:[#allocation291_spill] sm:$0xff] %v10210_v62  ;;  %7989 = vmatpush3.bf16.msra.mxu0 %v8372_v42 }
 0x368   : > { %7990 = vmatprep.subr.bf16.mxu0 %v8373_v60 }
 0x369   : > { %v10215_v49 = vpop.permute.xlu1 %3100 }
 0x36a   : > { %13391 = vst [vmem:[#allocation292_spill] sm:$0xff] %v10215_v49  ;;  %8285 = vset.pattern.permute.xlu1 %v13301_v15  ;;  %2911 = vperm.xlu0 %8358, %v8494_v45   ;;  %v10219_v21 = vpop.permute.xlu0 %2384  ;;  %v13422_v15 = vld [vmem:[#allocation21_spill] sm:$0xff] }
 0x36b   : > { %13392 = vst [vmem:[#allocation293_spill] sm:$0xff] %v10219_v21  ;;  %2553 = vperm.xlu1 %8285, %v9511_v13   ;;  %7991 = vmatpush3.bf16.msra.mxu0 %v8373_v60 }
 0x36d   : > { %v10225_v41 = vpop.permute.xlu1 %3104 }
 0x36e   : > { %13393 = vst [vmem:[#allocation294_spill] sm:$0xff] %v10225_v41  ;;  %2927 = vperm.xlu0 %8358, %v8495_v1   ;;  %v10228_v62 = vpop.permute.xlu0 %2396 }
 0x36f   : > { %13394 = vst [vmem:[#allocation295_spill] sm:$0xff] %v10228_v62  ;;  %8286 = vset.pattern.permute.xlu1 %v13304_v8  ;;  %v8496_v62 = vld [vmem:[%s13044_s1] ss:$0 sm:$0xff] }
 0x370   : > { %3325 = vperm.xlu1 %8286, %v9493_v4   ;;  %v458_v41 = vmul.f32 %v8496_v62, %v13406_v12  ;;  %v13413_v12 = vld [vmem:[#allocation15_spill] sm:$0xff] }
 0x371   : > { %v464_v21 = vmul.f32 %v8496_v62, %v13413_v12 }
 0x372   : > { %v10232_v45 = vpop.permute.xlu1 %2340  ;;  %2943 = vperm.xlu0 %8358, %v9625_v22   ;;  %v10235_v13 = vpop.permute.xlu0 %2400 }
 0x373   : > { %13395 = vst [vmem:[#allocation296_spill] sm:$0xff] %v10232_v45  ;;  %13396 = vst [vmem:[#allocation297_spill] sm:$0xff] %v10235_v13 }
 0x374   : > { %8287 = vset.pattern.permute.xlu1 %v13249_v17 }
 0x375   : > { %1966 = vperm.xlu1 %8287, %v9634_v23  }
 0x376   : > { %2959 = vperm.xlu0 %8358, %v9646_v32   ;;  %v10240_v42 = vpop.permute.xlu0 %2412 }
 0x377   : > { %13397 = vst [vmem:[#allocation298_spill] sm:$0xff] %v10240_v42  ;;  %v10242_v1 = vpop.permute.xlu1 %3112 }
 0x378   : > { %13398 = vst [vmem:[#allocation299_spill] sm:$0xff] %v10242_v1  ;;  %v453_v1 = vmul.f32 %v8496_v62, %v8885_v35  ;;  %v8497_v35 = vld [vmem:[%s13046_s3] ss:$0 sm:$0xff] }
 0x379   : > { %8288 = vset.pattern.permute.xlu1 %v13314_v52  ;;  %v494_v48 = vadd.f32 %v8497_v35, %v458_v41 }
 0x37a   : > { %2738 = vperm.xlu1 %8288, %v9613_v27   ;;  %2975 = vperm.xlu0 %8358, %v9665_v20   ;;  %v10247_v4 = vpop.permute.xlu0 %2416  ;;  %v13403_v27 = vld [vmem:[#allocation8_spill] sm:$0xff] }
 0x37b   : > { %13399 = vst [vmem:[#allocation300_spill] sm:$0xff] %v10247_v4  ;;  %v454_v63 = vmul.f32 %v8496_v62, %v13403_v27  ;;  %v13404_v4 = vld [vmem:[#allocation6_spill] sm:$0xff] }
 0x37c   : > { %v10249_v22 = vpop.permute.xlu1 %2525  ;;  %v13408_v27 = vld [vmem:[#allocation10_spill] sm:$0xff] }
 0x37d   : > { %13400 = vst [vmem:[#allocation301_spill] sm:$0xff] %v10249_v22  ;;  %v13405_v22 = vld [vmem:[#allocation7_spill] sm:$0xff]  ;;  %v457_v42 = vmul.f32 %v8496_v62, %v13408_v27  ;;  %v490_v31 = vadd.f32 %v8497_v35, %v454_v63  ;;  %v13416_v27 = vld [vmem:[#allocation17_spill] sm:$0xff] }
 0x37e   : > { %2742 = vperm.xlu1 %8288, %v9502_v11   ;;  %2991 = vperm.xlu0 %8358, %v9680_v18   ;;  %v455_v11 = vmul.f32 %v8496_v62, %v13404_v4  ;;  %v456_v45 = vmul.f32 %v8496_v62, %v13405_v22  ;;  %v13411_v4 = vld [vmem:[#allocation13_spill] sm:$0xff]  ;;  %v13412_v22 = vld [vmem:[#allocation14_spill] sm:$0xff] }
 0x37f   : > { %v10253_v60 = vpop.permute.xlu0 %2493  ;;  %v462_v29 = vmul.f32 %v8496_v62, %v13411_v4  ;;  %v493_v63 = vadd.f32 %v8497_v35, %v457_v42 }
 0x380   : > { %13401 = vst [vmem:[#allocation302_spill] sm:$0xff] %v10253_v60  ;;  %v461_v60 = vmul.f32 %v8496_v62, %v13412_v22  ;;  %v491_v22 = vadd.f32 %v8497_v35, %v455_v11  ;;  %v492_v12 = vadd.f32 %v8497_v35, %v456_v45 }
 0x381   : > { %v10259_v49 = vpop.permute.xlu1 %3297 }
 0x382   : > { %13402 = vst [vmem:[#allocation303_spill] sm:$0xff] %v10259_v49  ;;  %8289 = vset.pattern.permute.xlu1 %v13249_v17  ;;  %2999 = vperm.xlu0 %8358, %v9689_v19   ;;  %v489_v49 = vadd.f32 %v8497_v35, %v453_v1  ;;  %v13409_v17 = vld [vmem:[#allocation11_spill] sm:$0xff]  ;;  %v13410_v19 = vld [vmem:[#allocation12_spill] sm:$0xff]  ;;  %v8498_v1 = vld [vmem:[%s13044_s1 + $0x1] ss:$0 sm:$0xff] }
 0x383   : > { %1978 = vperm.xlu1 %8289, %v9590_v30   ;;  %v10268_v6 = vpop.permute.xlu0 %2505  ;;  %v460_v28 = vmul.f32 %v8496_v62, %v13409_v17  ;;  %v459_v13 = vmul.f32 %v8496_v62, %v13410_v19  ;;  %v13414_v30 = vld [vmem:[#allocation16_spill] sm:$0xff]  ;;  %v655_v17 = vmul.f32 %v8498_v1, %v13416_v27  ;;  %v654_v19 = vmul.f32 %v8498_v1, %v13417_v58 }
 0x384   : > { %13407 = vst [vmem:[#allocation8_spill] sm:$0xff] %v10268_v6  ;;  %v463_v25 = vmul.f32 %v8496_v62, %v13414_v30  ;;  %v656_v4 = vmul.f32 %v8498_v1, %v13418_v56  ;;  %v657_v37 = vmul.f32 %v8498_v1, %v13420_v39  ;;  %v498_v58 = vadd.f32 %v8497_v35, %v462_v29  ;;  %v13425_v39 = vld [vmem:[#allocation23_spill] sm:$0xff] }
 0x385   : > { %v10280_v6 = vpop.permute.xlu1 %3301  ;;  %v496_v30 = vadd.f32 %v8497_v35, %v460_v28  ;;  %v497_v56 = vadd.f32 %v8497_v35, %v461_v60  ;;  %v500_v27 = vadd.f32 %v8497_v35, %v464_v21  ;;  %v687_v11 = vadd.f32 %v655_v17, %v490_v31  ;;  %v13424_v28 = vld [vmem:[#allocation22_spill] sm:$0xff] }
 0x386   : > { %13415 = vst [vmem:[#allocation6_spill] sm:$0xff] %v10280_v6  ;;  %3011 = vperm.xlu0 %8358, %v9650_v24   ;;  %v495_v6 = vadd.f32 %v8497_v35, %v459_v13  ;;  %v499_v24 = vadd.f32 %v8497_v35, %v463_v25  ;;  %v686_v45 = vadd.f32 %v654_v19, %v489_v49  ;;  %v13429_v21 = vld [vmem:[#allocation26_spill] sm:$0xff]  ;;  %v13431_v35 = vld [vmem:[#allocation28_spill] sm:$0xff]  ;;  %v8500_v19 = vld [vmem:[%s13044_s1 + $0x2] ss:$0 sm:$0xff] }
 0x387   : > { %8290 = vset.pattern.permute.xlu1 %v13314_v52  ;;  %v10290_v62 = vpop.permute.xlu0 %2509  ;;  %v688_v41 = vadd.f32 %v656_v4, %v491_v22  ;;  %v658_v52 = vmul.f32 %v8498_v1, %v13422_v15  ;;  %v659_v13 = vmul.f32 %v8498_v1, %v13424_v28  ;;  %v660_v42 = vmul.f32 %v8498_v1, %v13425_v39  ;;  %v13430_v15 = vld [vmem:[#allocation27_spill] sm:$0xff] }
 0x388   : > { %13419 = vst [vmem:[#allocation7_spill] sm:$0xff] %v10290_v62  ;;  %2750 = vperm.xlu1 %8290, %v10294_v53   ;;  %v13426_v62 = vld [vmem:[#allocation24_spill] sm:$0xff]  ;;  %v13427_v53 = vld [vmem:[#allocation25_spill] sm:$0xff]  ;;  %v689_v31 = vadd.f32 %v657_v37, %v492_v12  ;;  %v663_v49 = vmul.f32 %v8498_v1, %v13429_v21  ;;  %v664_v60 = vmul.f32 %v8498_v1, %v13430_v15  ;;  %v13434_v28 = vld [vmem:[#allocation31_spill] sm:$0xff] }
 0x389   : > { %v661_v10 = vmul.f32 %v8498_v1, %v13426_v62  ;;  %v662_v29 = vmul.f32 %v8498_v1, %v13427_v53  ;;  %v665_v17 = vmul.f32 %v8498_v1, %v13431_v35  ;;  %v851_v4 = vmul.f32 %v8500_v19, %v9170_v55  ;;  %v13433_v62 = vld [vmem:[#allocation30_spill] sm:$0xff]  ;;  %v13435_v1 = vld [vmem:[#allocation32_spill] sm:$0xff]  ;;  %v13436_v15 = vld [vmem:[#allocation33_spill] sm:$0xff] }
 0x38a   : > { %v10298_v16 = vpop.permute.xlu1 %2537  ;;  %8360 = vset.pattern.permute.xlu0 %v13290_v14  ;;  %v852_v53 = vmul.f32 %v8500_v19, %v9172_v47  ;;  %v855_v37 = vmul.f32 %v8500_v19, %v13433_v62  ;;  %v690_v12 = vadd.f32 %v658_v52, %v493_v63  ;;  %v854_v39 = vmul.f32 %v8500_v19, %v13434_v28  ;;  %v13438_v63 = vld [vmem:[#allocation34_spill] sm:$0xff]  ;;  %v7776_v28 = vld [vmem:[%s13044_s1 + $0x3] ss:$0 sm:$0xff] }
 0x38b   : > { %13423 = vst [vmem:[#allocation10_spill] sm:$0xff] %v10298_v16  ;;  %3156 = vperm.xlu0 %8360, %v9646_v32   ;;  %v10306_v25 = vpop.permute.xlu0 %2529  ;;  %v13432_v32 = vld [vmem:[#allocation29_spill] sm:$0xff]  ;;  %v857_v21 = vmul.f32 %v8500_v19, %v13435_v1  ;;  %v856_v35 = vmul.f32 %v8500_v19, %v13436_v15  ;;  %v691_v16 = vadd.f32 %v659_v13, %v494_v48 }
 0x38c   : > { %13428 = vst [vmem:[#allocation11_spill] sm:$0xff] %v10306_v25  ;;  %8291 = vset.pattern.permute.xlu1 %v13273_v26  ;;  %v853_v22 = vmul.f32 %v8500_v19, %v13432_v32  ;;  %v692_v25 = vadd.f32 %v660_v42, %v495_v6  ;;  %v693_v14 = vadd.f32 %v661_v10, %v496_v30  ;;  %v13439_v42 = vld [vmem:[#allocation35_spill] sm:$0xff] }
 0x38d   : > { %2163 = vperm.xlu1 %8291, %v9634_v23   ;;  %v694_v46 = vadd.f32 %v662_v29, %v497_v56  ;;  %v695_v32 = vadd.f32 %v663_v49, %v498_v58  ;;  %v696_v23 = vadd.f32 %v664_v60, %v499_v24  ;;  %v697_v52 = vadd.f32 %v665_v17, %v500_v27  ;;  %v10335_v58 = vld [vmem:[%s8721_s15 + $0x60] sm:$0xff]  ;;  %v13440_v27 = vld [vmem:[#allocation36_spill] sm:$0xff]  ;;  %v13442_v17 = vld [vmem:[#allocation39_spill] sm:$0xff] }
 0x38e   : > { %v859_v62 = vmul.f32 %v8500_v19, %v13438_v63  ;;  %v883_v48 = vadd.f32 %v851_v4, %v686_v45  ;;  %v884_v6 = vadd.f32 %v852_v53, %v687_v11  ;;  %v885_v10 = vadd.f32 %v853_v22, %v688_v41  ;;  %v13441_v49 = vld [vmem:[#allocation37_spill] sm:$0xff] }
 0x38f   : > { %v10323_v55 = vpop.permute.xlu1 %3309  ;;  %3172 = vperm.xlu0 %8360, %v9665_v20   ;;  %v10326_v47 = vpop.permute.xlu0 %2533  ;;  %v887_v30 = vadd.f32 %v855_v37, %v690_v12  ;;  %v886_v56 = vadd.f32 %v854_v39, %v689_v31  ;;  %v889_v20 = vadd.f32 %v857_v21, %v692_v25  ;;  %v888_v13 = vadd.f32 %v856_v35, %v691_v16  ;;  %v10358_v12 = vld [vmem:[%s8721_s15 + $0x68] sm:$0xff] }
 0x390   : > { %13437 = vst [vmem:[#allocation12_spill] sm:$0xff] %v10323_v55  ;;  %v858_v29 = vmul.f32 %v8500_v19, %v13439_v42  ;;  %v861_v24 = vmul.f32 %v8500_v19, %v13440_v27  ;;  %v860_v60 = vmul.f32 %v8500_v19, %v13441_v49  ;;  %v862_v45 = vmul.f32 %v8500_v19, %v13442_v17  ;;  %v13448_v42 = vld [vmem:[#allocation76_spill] sm:$0xff] }
 0x391   : > { %8292 = vset.pattern.permute.xlu1 %v13284_v34  ;;  %v1048_v11 = vmul.f32 %v7776_v28, %v9302_v40  ;;  %v891_v16 = vadd.f32 %v859_v62, %v694_v46  ;;  %v1051_v25 = vmul.f32 %v7776_v28, %v9310_v33  ;;  %v1049_v31 = vmul.f32 %v7776_v28, %v9317_v2 }
 0x392   : > { %2935 = vperm.xlu1 %8292, %v10335_v58   ;;  %v1053_v4 = vmul.f32 %v7776_v28, %v9319_v61  ;;  %v1050_v22 = vmul.f32 %v7776_v28, %v9323_v3  ;;  %v1055_v19 = vmul.f32 %v7776_v28, %v9325_v0  ;;  %v1052_v40 = vmul.f32 %v7776_v28, %v9329_v51  ;;  %v8503_v0 = vld [vmem:[%s8721_s15 + $0xe8] sm:$0xff] }
 0x393   : > { %3188 = vperm.xlu0 %8360, %v9680_v18   ;;  %v10343_v41 = vpop.permute.xlu0 %2545  ;;  %v1057_v18 = vmul.f32 %v7776_v28, %v9331_v5  ;;  %v890_v37 = vadd.f32 %v858_v29, %v693_v14  ;;  %v1054_v46 = vmul.f32 %v7776_v28, %v9335_v59  ;;  %v1059_v33 = vmul.f32 %v7776_v28, %v9337_v7  ;;  %v7777_v7 = vld [vmem:[%s13044_s1 + $0x4] ss:$0 sm:$0xff] }
 0x394   : > { %13443 = vst [vmem:[#allocation13_spill] sm:$0xff] %v10343_v41  ;;  %v10348_v53 = vpop.permute.xlu1 %1950  ;;  %v1056_v2 = vmul.f32 %v7776_v28, %v9341_v57  ;;  %v893_v61 = vadd.f32 %v861_v24, %v696_v23  ;;  %v892_v39 = vadd.f32 %v860_v60, %v695_v32  ;;  %v894_v3 = vadd.f32 %v862_v45, %v697_v52  ;;  %v13451_v24 = vld [vmem:[#allocation79_spill] sm:$0xff]  ;;  %v13452_v60 = vld [vmem:[#allocation80_spill] sm:$0xff]  ;;  %v13520_v41 = vld [vmem:[#allocation197_spill] sm:$0xff] }
 0x395   : > { %13444 = vst [vmem:[#allocation14_spill] sm:$0xff] %v10348_v53  ;;  %v1080_v1 = vadd.f32 %v1048_v11, %v883_v48  ;;  %v1083_v5 = vadd.f32 %v1051_v25, %v886_v56  ;;  %v1081_v14 = vadd.f32 %v1049_v31, %v884_v6  ;;  %v1085_v21 = vadd.f32 %v1053_v4, %v888_v13  ;;  %v13453_v11 = vld [vmem:[#allocation48_spill] sm:$0xff]  ;;  %v13456_v4 = vld [vmem:[#allocation85_spill] sm:$0xff] }
 0x396   : > { %2939 = vperm.xlu1 %8292, %v10358_v12   ;;  %v1058_v59 = vmul.f32 %v7776_v28, %v9347_v9  ;;  %v1082_v57 = vadd.f32 %v1050_v22, %v885_v10  ;;  %v1087_v15 = vadd.f32 %v1055_v19, %v890_v37  ;;  %v1084_v35 = vadd.f32 %v1052_v40, %v887_v30  ;;  %v10376_v10 = vld [vmem:[%s8721_s15 + $0x98] sm:$0xff] }
 0x397   : > { %3200 = vperm.xlu0 %8360, %v8503_v0   ;;  %v10362_v51 = vpop.permute.xlu0 %2549  ;;  %v1089_v32 = vadd.f32 %v1057_v18, %v892_v39  ;;  %v1086_v52 = vadd.f32 %v1054_v46, %v889_v20  ;;  %v1091_v63 = vadd.f32 %v1059_v33, %v894_v3  ;;  %v1088_v62 = vadd.f32 %v1056_v2, %v891_v16  ;;  %v13457_v19 = vld [vmem:[#allocation57_spill] sm:$0xff]  ;;  %v13458_v18 = vld [vmem:[#allocation52_spill] sm:$0xff]  ;;  %v13459_v33 = vld [vmem:[#allocation87_spill] sm:$0xff] }
 0x398   : > { %13445 = vst [vmem:[#allocation15_spill] sm:$0xff] %v10362_v51  ;;  %v1070_v48 = vmul.f32 %v7776_v28, %v9383_v50  ;;  %v1077_v9 = vmul.f32 %v7776_v28, %v9391_v36  ;;  %v1074_v6 = vmul.f32 %v7776_v28, %v9395_v38  ;;  %v1246_v56 = vmul.f32 %v7777_v7, %v9406_v44  ;;  %v8505_v36 = vld [vmem:[%s8721_s15 + $0xd0] sm:$0xff]  ;;  %v13449_v38 = vld [vmem:[#allocation77_spill] sm:$0xff]  ;;  %v13450_v44 = vld [vmem:[#allocation78_spill] sm:$0xff] }
 0x399   : > { %v10368_v23 = vpop.permute.xlu1 %2722  ;;  %13446 = vst [vmem:[#allocation16_spill] sm:$0xff] %v10376_v10  ;;  %v1090_v20 = vadd.f32 %v1058_v59, %v893_v61  ;;  %v1249_v13 = vmul.f32 %v7777_v7, %v9415_v54  ;;  %v1245_v50 = vmul.f32 %v7777_v7, %v9422_v43  ;;  %v1251_v29 = vmul.f32 %v7777_v7, %v13448_v42  ;;  %v13454_v54 = vld [vmem:[#allocation81_spill] sm:$0xff]  ;;  %v13455_v43 = vld [vmem:[#allocation83_spill] sm:$0xff]  ;;  %v10405_v59 = vld [vmem:[%s13044_s1 + $0x5] ss:$0 sm:$0xff] }
 0x39a   : > { %8293 = vset.pattern.permute.xlu1 %v13273_v26  ;;  %v1247_v28 = vmul.f32 %v7777_v7, %v13449_v38  ;;  %v1253_v27 = vmul.f32 %v7777_v7, %v13450_v44  ;;  %v1248_v49 = vmul.f32 %v7777_v7, %v13451_v24  ;;  %v1255_v17 = vmul.f32 %v7777_v7, %v13452_v60  ;;  %v13466_v24 = vld [vmem:[#allocation102_spill] sm:$0xff]  ;;  %v13571_v26 = vld [vmem:[#allocation240_spill] sm:$0xff] }
 0x39b   : > { %2175 = vperm.xlu1 %8293, %v10376_v10   ;;  %8362 = vset.pattern.permute.xlu0 %v13304_v8  ;;  %v10380_v30 = vpop.permute.xlu0 %2561  ;;  %v1102_v16 = vadd.f32 %v1070_v48, %v13453_v11  ;;  %v1250_v25 = vmul.f32 %v7777_v7, %v13454_v54  ;;  %v1252_v31 = vmul.f32 %v7777_v7, %v13455_v43  ;;  %v13462_v48 = vld [vmem:[#allocation9_spill] sm:$0xff]  ;;  %v13467_v11 = vld [vmem:[#allocation104_spill] sm:$0xff]  ;;  %v13474_v54 = vld [vmem:[#allocation110_spill] sm:$0xff] }
 0x39c   : > { %13447 = vst [vmem:[#allocation17_spill] sm:$0xff] %v10380_v30  ;;  %3385 = vperm.xlu0 %8362, %v8505_v36   ;;  %v1254_v22 = vmul.f32 %v7777_v7, %v13456_v4  ;;  %v1109_v40 = vadd.f32 %v1077_v9, %v13457_v19  ;;  %v1106_v37 = vadd.f32 %v1074_v6, %v13458_v18  ;;  %13461 = vst [vmem:[#allocation19_spill] sm:$0xff] %v10405_v59  ;;  %v8506_v9 = vld [vmem:[%s8721_s15 + $0xe0] sm:$0xff]  ;;  %v13475_v43 = vld [vmem:[#allocation111_spill] sm:$0xff] }
 0x39d   : > { %v10390_v45 = vpop.permute.xlu1 %2726  ;;  %v1278_v46 = vadd.f32 %v1246_v56, %v1081_v14  ;;  %v1256_v2 = vmul.f32 %v7777_v7, %v13459_v33  ;;  %v1281_v39 = vadd.f32 %v1249_v13, %v1084_v35  ;;  %v1277_v3 = vadd.f32 %v1245_v50, %v1080_v1  ;;  %v13463_v35 = vld [vmem:[#allocation92_spill] sm:$0xff]  ;;  %v13477_v18 = vld [vmem:[#allocation113_spill] sm:$0xff] }
 0x39e   : > { %v1283_v0 = vadd.f32 %v1251_v29, %v1086_v52  ;;  %v1279_v6 = vadd.f32 %v1247_v28, %v1082_v57  ;;  %v1285_v14 = vadd.f32 %v1253_v27, %v1088_v62  ;;  %v1280_v56 = vadd.f32 %v1248_v49, %v1083_v5  ;;  %v13465_v50 = vld [vmem:[#allocation96_spill] sm:$0xff]  ;;  %v13469_v62 = vld [vmem:[#allocation105_spill] sm:$0xff] }
 0x39f   : > { %8294 = vset.pattern.permute.xlu1 %v13284_v34  ;;  %v10400_v61 = vpop.permute.xlu0 %2565  ;;  %v1287_v42 = vadd.f32 %v1255_v17, %v1090_v20  ;;  %v1282_v36 = vadd.f32 %v1250_v25, %v1085_v21  ;;  %v1284_v38 = vadd.f32 %v1252_v31, %v1087_v15  ;;  %v1286_v44 = vadd.f32 %v1254_v22, %v1089_v32  ;;  %v13470_v15 = vld [vmem:[#allocation106_spill] sm:$0xff]  ;;  %v13471_v20 = vld [vmem:[#allocation108_spill] sm:$0xff]  ;;  %v13473_v49 = vld [vmem:[#allocation109_spill] sm:$0xff] }
 0x3a0   : > { %13460 = vst [vmem:[#allocation18_spill] sm:$0xff] %v10400_v61  ;;  %2947 = vperm.xlu1 %8294, %v13462_v48   ;;  %3393 = vperm.xlu0 %8362, %v8506_v9   ;;  %v1267_v1 = vmul.f32 %v7777_v7, %v13463_v35  ;;  %v1288_v13 = vadd.f32 %v1256_v2, %v1091_v63  ;;  %v13472_v27 = vmov 10   ;;  %v8507_v63 = vld [vmem:[%s8721_s15 + $0xf8] sm:$0xff]  ;;  %v10435_v22 = vld [vmem:[%s8721_s15 + $0x80] sm:$0xff]  ;;  %v13478_v2 = vld [vmem:[#allocation115_spill] sm:$0xff] }
 0x3a1   : > { %v1271_v29 = vmul.f32 %v7777_v7, %v13465_v50  ;;  %v1442_v60 = vmul.f32 %v10405_v59, %v13466_v24  ;;  %v1445_v57 = vmul.f32 %v10405_v59, %v13467_v11  ;;  %v1274_v21 = vmul.f32 %v7777_v7, %v13469_v62  ;;  %v13476_v7 = vld [vmem:[#allocation112_spill] sm:$0xff]  ;;  %v13479_v35 = vld [vmem:[#allocation117_spill] sm:$0xff]  ;;  %v13504_v61 = vld [vmem:[#allocation158_spill] sm:$0xff] }
 0x3a2   : > { %v10410_v52 = vpop.permute.xlu1 %1962  ;;  %v1447_v32 = vmul.f32 %v10405_v59, %v13470_v15  ;;  %v1449_v28 = vmul.f32 %v10405_v59, %v13471_v20  ;;  %v1443_v17 = vmul.f32 %v10405_v59, %v13473_v49  ;;  %v1451_v25 = vmul.f32 %v10405_v59, %v13474_v54  ;;  %v13480_v15 = vld [vmem:[#allocation119_spill] sm:$0xff] }
 0x3a3   : > { %13464 = vst [vmem:[#allocation20_spill] sm:$0xff] %v10410_v52  ;;  %v10417_v5 = vpop.permute.xlu0 %2577  ;;  %v1444_v31 = vmul.f32 %v10405_v59, %v13475_v43  ;;  %v1453_v4 = vmul.f32 %v10405_v59, %v13476_v7  ;;  %v1299_v19 = vadd.f32 %v1267_v1, %v1102_v16  ;;  %v1446_v33 = vmul.f32 %v10405_v59, %v13477_v18  ;;  %v13482_v43 = vld [vmem:[#allocation130_spill] sm:$0xff]  ;;  %v13506_v52 = vld [vmem:[#allocation164_spill] sm:$0xff] }
 0x3a4   : > { %13468 = vst [vmem:[#allocation21_spill] sm:$0xff] %v10417_v5  ;;  %8295 = vset.pattern.permute.xlu1 %v13472_v27  ;;  %3405 = vperm.xlu0 %8362, %v8507_v63   ;;  %v1448_v9 = vmul.f32 %v10405_v59, %v13478_v2  ;;  %v1450_v50 = vmul.f32 %v10405_v59, %v13479_v35  ;;  %v10455_v18 = vld [vmem:[%s13044_s1 + $0x6] ss:$0 sm:$0xff] }
 0x3a5   : > { %2360 = vperm.xlu1 %8295, %v10435_v22   ;;  %v1303_v24 = vadd.f32 %v1271_v29, %v1106_v37  ;;  %v1474_v11 = vadd.f32 %v1442_v60, %v1277_v3  ;;  %v1477_v62 = vadd.f32 %v1445_v57, %v1280_v56  ;;  %v1452_v20 = vmul.f32 %v10405_v59, %v13480_v15  ;;  %v13488_v15 = vld [vmem:[#allocation135_spill] sm:$0xff]  ;;  %v13502_v5 = vld [vmem:[#allocation154_spill] sm:$0xff] }
 0x3a6   : > { %v1306_v16 = vadd.f32 %v1274_v21, %v1109_v40  ;;  %v1479_v1 = vadd.f32 %v1447_v32, %v1282_v36  ;;  %v1481_v54 = vadd.f32 %v1449_v28, %v1284_v38  ;;  %v1471_v7 = vmul.f32 %v10405_v59, %v13482_v43  ;;  %13483 = vst [vmem:[#allocation23_spill] sm:$0xff] %v10455_v18  ;;  %v13486_v38 = vld [vmem:[#allocation131_spill] sm:$0xff]  ;;  %v13487_v28 = vld [vmem:[#allocation134_spill] sm:$0xff]  ;;  %v13497_v43 = vld [vmem:[#allocation145_spill] sm:$0xff] }
 0x3a7   : > { %v10446_v63 = vpop.permute.xlu1 %2734  ;;  %v10448_v49 = vpop.permute.xlu0 %2581  ;;  %v13484_v37 = vmov 0   ;;  %v1475_v3 = vadd.f32 %v1443_v17, %v1278_v46  ;;  %v1483_v56 = vadd.f32 %v1451_v25, %v1286_v44  ;;  %v1476_v29 = vadd.f32 %v1444_v31, %v1279_v6  ;;  %v13489_v44 = vld [vmem:[#allocation136_spill] sm:$0xff]  ;;  %v13493_v31 = vld [vmem:[#allocation141_spill] sm:$0xff] }
 0x3a8   : > { %13481 = vst [vmem:[#allocation22_spill] sm:$0xff] %v10446_v63  ;;  %8364 = vset.pattern.permute.xlu0 %v13484_v37  ;;  %v1485_v60 = vadd.f32 %v1453_v4, %v1288_v13  ;;  %v13485_v57 = vmov 14   ;;  %v1478_v2 = vadd.f32 %v1446_v33, %v1281_v39  ;;  %v1480_v40 = vadd.f32 %v1448_v9, %v1283_v0  ;;  %v13491_v0 = vld [vmem:[#allocation138_spill] sm:$0xff]  ;;  %v13492_v17 = vld [vmem:[#allocation140_spill] sm:$0xff] }
 0x3a9   : > { %8296 = vset.pattern.permute.xlu1 %v13485_v57  ;;  %v1482_v36 = vadd.f32 %v1450_v50, %v1285_v14  ;;  %v1464_v21 = vmul.f32 %v10405_v59, %v13486_v38  ;;  %v1484_v32 = vadd.f32 %v1452_v20, %v1287_v42  ;;  %v1640_v35 = vmul.f32 %v10455_v18, %v13487_v28  ;;  %v13495_v33 = vld [vmem:[#allocation142_spill] sm:$0xff]  ;;  %v13496_v50 = vld [vmem:[#allocation143_spill] sm:$0xff] }
 0x3aa   : > { %3132 = vperm.xlu1 %8296, %v10335_v58   ;;  %v1468_v46 = vmul.f32 %v10405_v59, %v13488_v15  ;;  %v1643_v6 = vmul.f32 %v10455_v18, %v13489_v44  ;;  %v1503_v39 = vadd.f32 %v1471_v7, %v1306_v16  ;;  %v1645_v14 = vmul.f32 %v10455_v18, %v13491_v0  ;;  %v13498_v7 = vld [vmem:[#allocation147_spill] sm:$0xff]  ;;  %v13499_v15 = vld [vmem:[#allocation149_spill] sm:$0xff] }
 0x3ab   : > { %v10468_v13 = vpop.permute.xlu0 %2593  ;;  %v1647_v25 = vmul.f32 %v10455_v18, %v13492_v17  ;;  %v1639_v42 = vmul.f32 %v10455_v18, %v13493_v31  ;;  %v1649_v9 = vmul.f32 %v10455_v18, %v13495_v33  ;;  %v1641_v20 = vmul.f32 %v10455_v18, %v13496_v50  ;;  %v13500_v0 = vld [vmem:[#allocation151_spill] sm:$0xff]  ;;  %v13501_v31 = vld [vmem:[#allocation153_spill] sm:$0xff] }
 0x3ac   : > { %13490 = vst [vmem:[#allocation24_spill] sm:$0xff] %v10468_v13  ;;  %v10476_v4 = vpop.permute.xlu1 %2147  ;;  %v1642_v16 = vmul.f32 %v10455_v18, %v13497_v43  ;;  %v1644_v38 = vmul.f32 %v10455_v18, %v13498_v7  ;;  %v1496_v28 = vadd.f32 %v1464_v21, %v1299_v19  ;;  %v1646_v44 = vmul.f32 %v10455_v18, %v13499_v15  ;;  %v10498_v19 = vld [vmem:[%s13044_s1 + $0x7] ss:$0 sm:$0xff] }
 0x3ad   : > { %13494 = vst [vmem:[#allocation25_spill] sm:$0xff] %v10476_v4  ;;  %v1648_v17 = vmul.f32 %v10455_v18, %v13500_v0  ;;  %v1650_v13 = vmul.f32 %v10455_v18, %v13501_v31  ;;  %v1672_v33 = vadd.f32 %v1640_v35, %v1475_v3  ;;  %v1500_v50 = vadd.f32 %v1468_v46, %v1303_v24 }
 0x3ae   : > { %3136 = vperm.xlu1 %8296, %v10358_v12   ;;  %v1675_v37 = vadd.f32 %v1643_v6, %v1478_v2  ;;  %v1661_v43 = vmul.f32 %v10455_v18, %v13502_v5  ;;  %13503 = vst [vmem:[#allocation26_spill] sm:$0xff] %v10498_v19  ;;  %v1677_v7 = vadd.f32 %v1645_v14, %v1480_v40  ;;  %v13508_v14 = vld [vmem:[#allocation168_spill] sm:$0xff] }
 0x3af   : > { %v10500_v21 = vpop.permute.xlu0 %2597  ;;  %v1679_v15 = vadd.f32 %v1647_v25, %v1482_v36  ;;  %v1671_v0 = vadd.f32 %v1639_v42, %v1474_v11  ;;  %v1665_v31 = vmul.f32 %v10455_v18, %v13504_v61  ;;  %v1681_v30 = vadd.f32 %v1649_v9, %v1484_v32  ;;  %v13507_v36 = vld [vmem:[#allocation166_spill] sm:$0xff]  ;;  %v13513_v42 = vld [vmem:[#allocation175_spill] sm:$0xff] }
 0x3b0   : > { %v1673_v3 = vadd.f32 %v1641_v20, %v1476_v29  ;;  %v1674_v24 = vadd.f32 %v1642_v16, %v1477_v62  ;;  %v1676_v2 = vadd.f32 %v1644_v38, %v1479_v1  ;;  %v1678_v5 = vadd.f32 %v1646_v44, %v1481_v54  ;;  %v13509_v29 = vld [vmem:[#allocation170_spill] sm:$0xff]  ;;  %v13514_v20 = vld [vmem:[#allocation177_spill] sm:$0xff]  ;;  %v13515_v38 = vld [vmem:[#allocation179_spill] sm:$0xff] }
 0x3b1   : > { %v10504_v35 = vpop.permute.xlu1 %2919  ;;  %v1680_v46 = vadd.f32 %v1648_v17, %v1483_v56  ;;  %v1682_v6 = vadd.f32 %v1650_v13, %v1485_v60  ;;  %v1836_v51 = vmul.f32 %v10498_v19, %v13506_v52  ;;  %v1693_v40 = vadd.f32 %v1661_v43, %v1496_v28  ;;  %v13510_v56 = vld [vmem:[#allocation171_spill] sm:$0xff]  ;;  %v13511_v60 = vld [vmem:[#allocation172_spill] sm:$0xff]  ;;  %v13512_v13 = vld [vmem:[#allocation174_spill] sm:$0xff] }
 0x3b2   : > { %13505 = vst [vmem:[#allocation27_spill] sm:$0xff] %v10504_v35  ;;  %8297 = vset.pattern.permute.xlu1 %v13472_v27  ;;  %v1839_v11 = vmul.f32 %v10498_v19, %v13507_v36  ;;  %v1841_v61 = vmul.f32 %v10498_v19, %v13508_v14  ;;  %v1843_v62 = vmul.f32 %v10498_v19, %v13509_v29  ;;  %v13516_v44 = vld [vmem:[#allocation181_spill] sm:$0xff]  ;;  %v13548_v27 = vld [vmem:[#allocation224_spill] sm:$0xff] }
 0x3b3   : > { %2372 = vperm.xlu1 %8297, %v10376_v10   ;;  %v10516_v1 = vpop.permute.xlu0 %2609  ;;  %v1697_v54 = vadd.f32 %v1665_v31, %v1500_v50  ;;  %v1668_v52 = vmul.f32 %v10455_v18, %v13510_v56  ;;  %v1845_v32 = vmul.f32 %v10498_v19, %v13511_v60  ;;  %v1847_v25 = vmul.f32 %v10498_v19, %v13512_v13  ;;  %v13517_v31 = vld [vmem:[#allocation183_spill] sm:$0xff]  ;;  %v13518_v14 = vld [vmem:[#allocation185_spill] sm:$0xff]  ;;  %v13519_v56 = vld [vmem:[#allocation192_spill] sm:$0xff] }
 0x3b4   : > { %v1837_v9 = vmul.f32 %v10498_v19, %v13513_v42  ;;  %v1838_v16 = vmul.f32 %v10498_v19, %v13514_v20  ;;  %v1840_v28 = vmul.f32 %v10498_v19, %v13515_v38  ;;  %v1842_v17 = vmul.f32 %v10498_v19, %v13516_v44  ;;  %v13572_v35 = vld [vmem:[#allocation252_spill] sm:$0xff] }
 0x3b5   : > { %v10532_v50 = vpop.permute.xlu1 %2923  ;;  %v1868_v43 = vadd.f32 %v1836_v51, %v1671_v0  ;;  %v1844_v36 = vmul.f32 %v10498_v19, %v13517_v31  ;;  %v1846_v29 = vmul.f32 %v10498_v19, %v13518_v14  ;;  %v1865_v60 = vmul.f32 %v10498_v19, %v13519_v56  ;;  %v13522_v31 = vld [vmem:[#allocation201_spill] sm:$0xff] }
 0x3b6   : > { %v1871_v13 = vadd.f32 %v1839_v11, %v1674_v24  ;;  %v1873_v42 = vadd.f32 %v1841_v61, %v1676_v2  ;;  %v1875_v20 = vadd.f32 %v1843_v62, %v1678_v5  ;;  %v1858_v38 = vmul.f32 %v10498_v19, %v13520_v41  ;;  %v10551_v41 = vld [vmem:[%s13044_s1 + $0xe] ss:$0 sm:$0xff]  ;;  %v13524_v11 = vld [vmem:[#allocation196_spill] sm:$0xff] }
 0x3b7   : > { %8299 = vset.pattern.permute.xlu1 %v13485_v57  ;;  %v10543_v44 = vpop.permute.xlu0 %2613  ;;  %v1700_v51 = vadd.f32 %v1668_v52, %v1503_v39  ;;  %v1877_v0 = vadd.f32 %v1845_v32, %v1680_v46  ;;  %v1879_v4 = vadd.f32 %v1847_v25, %v1682_v6  ;;  %v1862_v53 = vmul.f32 %v10498_v19, %v13522_v31  ;;  %v10556_v39 = vld [vmem:[%s13044_s1 + $0x8] ss:$0 sm:$0xff]  ;;  %v13528_v62 = vld [vmem:[#allocation200_spill] sm:$0xff]  ;;  %v13545_v19 = vld [vmem:[#allocation223_spill] sm:$0xff] }
 0x3b8   : > { %13521 = vst [vmem:[#allocation28_spill] sm:$0xff] %v10543_v44  ;;  %3144 = vperm.xlu1 %8299, %v13462_v48   ;;  %v1869_v14 = vadd.f32 %v1837_v9, %v1672_v33  ;;  %v1870_v56 = vadd.f32 %v1838_v16, %v1673_v3  ;;  %v1872_v24 = vadd.f32 %v1840_v28, %v1675_v37  ;;  %13523 = vst [vmem:[#allocation29_spill] sm:$0xff] %v10556_v39  ;;  %v13526_v3 = vld [vmem:[#allocation198_spill] sm:$0xff]  ;;  %v13533_v16 = vld [vmem:[#allocation207_spill] sm:$0xff] }
 0x3b9   : > { %v1874_v2 = vadd.f32 %v1842_v17, %v1677_v7  ;;  %v1876_v5 = vadd.f32 %v1844_v36, %v1679_v15  ;;  %v1878_v46 = vadd.f32 %v1846_v29, %v1681_v30  ;;  %v10558_v6 = vadd.f32 %v1865_v60, %v1700_v51  ;;  %v13530_v15 = vld [vmem:[#allocation220_spill] sm:$0xff]  ;;  %v13531_v25 = vld [vmem:[#allocation202_spill] sm:$0xff]  ;;  %v13534_v17 = vld [vmem:[#allocation209_spill] sm:$0xff] }
 0x3ba   : > { %v10562_v33 = vmul.f32 %v10551_v41, %v13524_v11  ;;  %v10564_v37 = vpop.permute.xlu1 %2159  ;;  %v10566_v7 = vadd.f32 %v1858_v38, %v1693_v40  ;;  %v10570_v61 = vmul.f32 %v10551_v41, %v13526_v3  ;;  %v10574_v52 = vmul.f32 %v10551_v41, %v13528_v62  ;;  %v10587_v40 = vld [vmem:[%s13044_s1 + $0xf] ss:$0 sm:$0xff]  ;;  %v13536_v60 = vld [vmem:[#allocation206_spill] sm:$0xff]  ;;  %v13539_v11 = vld [vmem:[#allocation213_spill] sm:$0xff] }
 0x3bb   : > { %13525 = vst [vmem:[#allocation30_spill] sm:$0xff] %v10564_v37  ;;  %v2034_v30 = vmul.f32 %v10556_v39, %v13530_v15  ;;  %v10578_v32 = vadd.f32 %v1862_v53, %v1697_v54  ;;  %v10582_v9 = vmul.f32 %v10551_v41, %v13531_v25  ;;  %v2033_v28 = vmul.f32 %v10556_v39, %v13533_v16  ;;  %v10596_v53 = vld [vmem:[%s13044_s1 + $0x9] ss:$0 sm:$0xff]  ;;  %v13538_v51 = vld [vmem:[#allocation211_spill] sm:$0xff]  ;;  %v13541_v25 = vld [vmem:[#allocation208_spill] sm:$0xff] }
 0x3bc   : > { %13527 = vst [vmem:[#allocation31_spill] sm:$0xff] %v10570_v61  ;;  %13529 = vst [vmem:[#allocation32_spill] sm:$0xff] %v10574_v52  ;;  %v2035_v36 = vmul.f32 %v10556_v39, %v13534_v17  ;;  %v13535_v54 = vmov 11   ;;  %v10599_v29 = vpop.permute.xlu0 %2694  ;;  %v10603_v38 = vmul.f32 %v10587_v40, %v13536_v60  ;;  %v2036_v31 = vmul.f32 %v10556_v39, %v13538_v51  ;;  %v13540_v62 = vld [vmem:[#allocation215_spill] sm:$0xff]  ;;  %v13543_v17 = vld [vmem:[#allocation217_spill] sm:$0xff] }
 0x3bd   : > { %13532 = vst [vmem:[#allocation33_spill] sm:$0xff] %v10582_v9  ;;  %8300 = vset.pattern.permute.xlu1 %v13535_v54  ;;  %v2038_v3 = vmul.f32 %v10556_v39, %v13539_v11  ;;  %v2040_v15 = vmul.f32 %v10556_v39, %v13540_v62  ;;  %v10614_v16 = vmul.f32 %v10587_v40, %v13541_v25  ;;  %v13544_v60 = vld [vmem:[#allocation219_spill] sm:$0xff]  ;;  %v13546_v11 = vld [vmem:[#allocation221_spill] sm:$0xff]  ;;  %v13547_v62 = vld [vmem:[#allocation222_spill] sm:$0xff] }
 0x3be   : > { %13537 = vst [vmem:[#allocation34_spill] sm:$0xff] %v10603_v38  ;;  %2557 = vperm.xlu1 %8300, %v10435_v22   ;;  %v2042_v44 = vmul.f32 %v10556_v39, %v13543_v17  ;;  %v2044_v37 = vmul.f32 %v10556_v39, %v13544_v60  ;;  %v2232_v51 = vmul.f32 %v10596_v53, %v13545_v19  ;;  %v10631_v17 = vld [vmem:[%s13044_s1 + $0xa] ss:$0 sm:$0xff] }
 0x3bf   : > { %13542 = vst [vmem:[#allocation35_spill] sm:$0xff] %v10614_v16  ;;  %v2066_v18 = vadd.f32 %v2034_v30, %v1869_v14  ;;  %v2231_v59 = vmul.f32 %v10596_v53, %v13546_v11  ;;  %v2037_v57 = vmul.f32 %v10556_v39, %v13547_v62  ;;  %v2039_v25 = vmul.f32 %v10556_v39, %v13548_v27  ;;  %v10633_v9 = vpop.permute.xlu1 %2931  ;;  %v13550_v19 = vld [vmem:[#allocation210_spill] sm:$0xff]  ;;  %v13552_v30 = vld [vmem:[#allocation227_spill] sm:$0xff] }
 0x3c0   : > { %13549 = vst [vmem:[#allocation36_spill] sm:$0xff] %v10633_v9  ;;  %v2065_v60 = vadd.f32 %v2033_v28, %v1868_v43  ;;  %v2067_v34 = vadd.f32 %v2035_v36, %v1870_v56  ;;  %v10637_v14 = vmul.f32 %v10587_v40, %v13550_v19  ;;  %v2429_v11 = vmul.f32 %v10631_v17, %v13552_v30  ;;  %v10641_v62 = vpop.permute.xlu0 %2706  ;;  %v13553_v52 = vld [vmem:[#allocation226_spill] sm:$0xff]  ;;  %v13554_v36 = vld [vmem:[#allocation228_spill] sm:$0xff] }
 0x3c1   : > { %v2068_v63 = vadd.f32 %v2036_v31, %v1871_v13  ;;  %v2070_v27 = vadd.f32 %v2038_v3, %v1873_v42  ;;  %v2072_v55 = vadd.f32 %v2040_v15, %v1875_v20  ;;  %v2041_v16 = vmul.f32 %v10556_v39, %v13553_v52  ;;  %v10648_v43 = vld [vmem:[%s13044_s1 + $0xb] ss:$0 sm:$0xff]  ;;  %v10663_v3 = vld [vmem:[%s13044_s1 + $0xc] ss:$0 sm:$0xff]  ;;  %v13565_v9 = vld [vmem:[#allocation232_spill] sm:$0xff] }
 0x3c2   : > { %13551 = vst [vmem:[#allocation37_spill] sm:$0xff] %v10637_v14  ;;  %8301 = vset.pattern.permute.xlu1 %v13304_v8  ;;  %v2074_v56 = vadd.f32 %v2042_v44, %v1877_v0  ;;  %v2264_v28 = vadd.f32 %v2232_v51, %v2067_v34  ;;  %v2043_v19 = vmul.f32 %v10556_v39, %v13554_v36  ;;  %v13555_v30 = vld [vmem:[#allocation234_spill] sm:$0xff]  ;;  %v13557_v15 = vld [vmem:[#allocation239_spill] sm:$0xff]  ;;  %v13558_v36 = vld [vmem:[#allocation249_spill] sm:$0xff] }
 0x3c3   : > { %v2626_v13 = vmul.f32 %v10648_v43, %v13555_v30  ;;  %3329 = vperm.xlu1 %8301, %v10335_v58   ;;  %v10656_v42 = vadd.f32 %v2044_v37, %v1879_v4  ;;  %v10658_v20 = vadd.f32 %v2231_v59, %v2066_v18  ;;  %v2069_v52 = vadd.f32 %v2037_v57, %v1872_v24  ;;  %v13556_v44 = vld [vmem:[#allocation238_spill] sm:$0xff]  ;;  %v13560_v18 = vld [vmem:[#allocation225_spill] sm:$0xff] }
 0x3c4   : > { %v2071_v31 = vadd.f32 %v2039_v25, %v1874_v2  ;;  %v2461_v34 = vadd.f32 %v2429_v11, %v2264_v28  ;;  %v2823_v0 = vmul.f32 %v10663_v3, %v13556_v44  ;;  %v2055_v51 = vmul.f32 %v10556_v39, %v13557_v15  ;;  %v10671_v4 = vpop.permute.xlu1 %2344  ;;  %v10673_v59 = vpop.permute.xlu0 %2718  ;;  %v13561_v2 = vld [vmem:[#allocation242_spill] sm:$0xff]  ;;  %v13563_v30 = vld [vmem:[#allocation229_spill] sm:$0xff] }
 0x3c5   : > { %v2230_v58 = vmul.f32 %v10596_v53, %v13558_v36  ;;  %13559 = vst [vmem:[#allocation39_spill] sm:$0xff] %v10671_v4  ;;  %v2427_v57 = vmul.f32 %v10631_v17, %v13560_v18  ;;  %v10677_v24 = vadd.f32 %v2041_v16, %v1876_v5  ;;  %v2235_v37 = vmul.f32 %v10596_v53, %v13561_v2  ;;  %v13562_v25 = vld [vmem:[#allocation250_spill] sm:$0xff]  ;;  %v13564_v36 = vld [vmem:[#allocation243_spill] sm:$0xff]  ;;  %v13566_v18 = vld [vmem:[#allocation245_spill] sm:$0xff] }
 0x3c6   : > { %v2233_v11 = vmul.f32 %v10596_v53, %v13562_v25  ;;  %v2075_v28 = vadd.f32 %v2043_v19, %v1878_v46  ;;  %v2430_v44 = vmul.f32 %v10631_v17, %v13563_v30  ;;  %v2658_v15 = vadd.f32 %v2626_v13, %v2461_v34  ;;  %v10695_v16 = vld [vmem:[%s13044_s1 + $0xd] ss:$0 sm:$0xff]  ;;  %v13568_v34 = vld [vmem:[#allocation248_spill] sm:$0xff] }
 0x3c7   : > { %v2059_v4 = vmul.f32 %v10556_v39, %v13564_v36  ;;  %3333 = vperm.xlu1 %8301, %v10358_v12   ;;  %v10690_v5 = vmul.f32 %v10648_v43, %v13565_v9  ;;  %v2062_v46 = vmul.f32 %v10556_v39, %v13566_v18  ;;  %v13567_v19 = vld [vmem:[#allocation247_spill] sm:$0xff]  ;;  %v2237_v2 = vmul.f32 %v10596_v53, %v13568_v34  ;;  %v13569_v25 = vld [vmem:[#allocation236_spill] sm:$0xff] }
 0x3c8   : > { %v2236_v13 = vmul.f32 %v10596_v53, %v13567_v19  ;;  %v10705_v12 = vmul.f32 %v10663_v3, %v13569_v25  ;;  %v10707_v9 = vadd.f32 %v2823_v0, %v2658_v15  ;;  %v2087_v30 = vadd.f32 %v2055_v51, %v10566_v7  ;;  %v10710_v14 = vpop.permute.xlu0 %2730  ;;  %v13574_v0 = vld [vmem:[#allocation244_spill] sm:$0xff]  ;;  %v13575_v7 = vld [vmem:[#allocation253_spill] sm:$0xff]  ;;  %v13576_v51 = vld [vmem:[#allocation254_spill] sm:$0xff] }
 0x3c9   : > { %v2262_v36 = vadd.f32 %v2230_v58, %v2065_v60  ;;  %13570 = vst [vmem:[#allocation76_spill] sm:$0xff] %v10710_v14  ;;  %v10714_v18 = vmul.f32 %v10663_v3, %v13571_v26  ;;  %v2267_v39 = vadd.f32 %v2235_v37, %v2070_v27  ;;  %v2265_v19 = vadd.f32 %v2233_v11, %v2068_v63  ;;  %v10718_v61 = vpop.permute.xlu1 %3116  ;;  %v13577_v58 = vld [vmem:[#allocation256_spill] sm:$0xff]  ;;  %v13579_v11 = vld [vmem:[#allocation257_spill] sm:$0xff] }
 0x3ca   : > { %v2234_v34 = vmul.f32 %v10596_v53, %v13572_v35  ;;  %13573 = vst [vmem:[#allocation77_spill] sm:$0xff] %v10718_v61  ;;  %v2091_v25 = vadd.f32 %v2059_v4, %v10578_v32  ;;  %v10723_v15 = vmul.f32 %v10695_v16, %v13574_v0  ;;  %v2432_v60 = vmul.f32 %v10631_v17, %v13575_v7  ;;  %v13578_v32 = vld [vmem:[#allocation251_spill] sm:$0xff] }
 0x3cb   : > { %v2239_v26 = vmul.f32 %v10596_v53, %v13576_v51  ;;  %8302 = vset.pattern.permute.xlu1 %v13535_v54  ;;  %v2094_v63 = vadd.f32 %v2062_v46, %v10558_v6  ;;  %v2268_v27 = vadd.f32 %v2236_v13, %v2071_v31  ;;  %v2269_v35 = vadd.f32 %v2237_v2, %v2072_v55  ;;  %v13580_v7 = vld [vmem:[#allocation259_spill] sm:$0xff]  ;;  %v13582_v55 = vld [vmem:[#allocation264_spill] sm:$0xff] }
 0x3cc   : > { %v2240_v37 = vmul.f32 %v10596_v53, %v13577_v58  ;;  %2569 = vperm.xlu1 %8302, %v10376_v10   ;;  %v10736_v4 = vmul.f32 %v10695_v16, %v13578_v32  ;;  %v2433_v0 = vmul.f32 %v10631_v17, %v13579_v11  ;;  %v2434_v51 = vmul.f32 %v10631_v17, %v13580_v7  ;;  %v10742_v61 = vpop.permute.xlu0 %2746  ;;  %v13583_v46 = vld [vmem:[#allocation267_spill] sm:$0xff]  ;;  %v13602_v10 = vld [vmem:[#allocation273_spill] sm:$0xff] }
 0x3cd   : > { %v2459_v54 = vadd.f32 %v2427_v57, %v2262_v36  ;;  %13581 = vst [vmem:[#allocation78_spill] sm:$0xff] %v10742_v61  ;;  %v2266_v6 = vadd.f32 %v2234_v34, %v2069_v52  ;;  %v2629_v31 = vmul.f32 %v10648_v43, %v13582_v55  ;;  %v2252_v13 = vmul.f32 %v10596_v53, %v13583_v46  ;;  %v10748_v58 = vpop.permute.xlu1 %3120  ;;  %v13585_v11 = vld [vmem:[#allocation255_spill] sm:$0xff]  ;;  %v13586_v57 = vld [vmem:[#allocation268_spill] sm:$0xff]  ;;  %v13587_v34 = vld [vmem:[#allocation270_spill] sm:$0xff] }
 0x3ce   : > { %v2462_v2 = vadd.f32 %v2430_v44, %v2265_v19  ;;  %13584 = vst [vmem:[#allocation79_spill] sm:$0xff] %v10748_v58  ;;  %v2464_v32 = vadd.f32 %v2432_v60, %v2267_v39  ;;  %v10750_v14 = vadd.f32 %v2239_v26, %v2074_v56  ;;  %v10754_v38 = vmul.f32 %v10551_v41, %v13585_v11  ;;  %v13588_v55 = vld [vmem:[#allocation271_spill] sm:$0xff]  ;;  %v13589_v19 = vld [vmem:[#allocation293_spill] sm:$0xff]  ;;  %v13590_v26 = vld [vmem:[#allocation302_spill] sm:$0xff] }
 0x3cf   : > { %v2630_v36 = vmul.f32 %v10648_v43, %v13586_v57  ;;  %v10758_v52 = vadd.f32 %v2240_v37, %v2075_v28  ;;  %v2631_v7 = vmul.f32 %v10648_v43, %v13587_v34  ;;  %v2256_v44 = vmul.f32 %v10596_v53, %v13588_v55  ;;  %v13591_v11 = vld [vmem:[#allocation8_spill] sm:$0xff]  ;;  %v13593_v57 = vld [vmem:[#allocation262_spill] sm:$0xff] }
 0x3d0   : > { %v2449_v39 = vmul.f32 %v10631_v17, %v13589_v19  ;;  %8303 = vset.pattern.permute.xlu1 %v13304_v8  ;;  %v2465_v56 = vadd.f32 %v2433_v0, %v2268_v27  ;;  %v2466_v60 = vadd.f32 %v2434_v51, %v2269_v35  ;;  %v2624_v46 = vmul.f32 %v10648_v43, %v13590_v26  ;;  %v10772_v37 = vpop.permute.xlu0 %2762  ;;  %v13594_v35 = vld [vmem:[#allocation266_spill] sm:$0xff]  ;;  %v13595_v26 = vld [vmem:[#allocation272_spill] sm:$0xff] }
 0x3d1   : > { %v2627_v28 = vmul.f32 %v10648_v43, %v13591_v11  ;;  %3341 = vperm.xlu1 %8303, %v13462_v48   ;;  %13592 = vst [vmem:[#allocation80_spill] sm:$0xff] %v10772_v37  ;;  %v10776_v34 = vmul.f32 %v10551_v41, %v13593_v57  ;;  %v2661_v55 = vadd.f32 %v2629_v31, %v2464_v32  ;;  %v13596_v48 = vld [vmem:[#allocation276_spill] sm:$0xff]  ;;  %v13599_v32 = vld [vmem:[#allocation275_spill] sm:$0xff]  ;;  %v13601_v58 = vmov 8  }
 0x3d2   : > { %v2284_v19 = vadd.f32 %v2252_v13, %v2087_v30  ;;  %v2646_v27 = vmul.f32 %v10648_v43, %v10448_v49  ;;  %v10782_v0 = vmul.f32 %v10587_v40, %v13594_v35  ;;  %v2662_v51 = vadd.f32 %v2630_v36, %v2465_v56  ;;  %v10788_v61 = vpop.permute.xlu1 %2356  ;;  %v13598_v13 = vld [vmem:[#allocation297_spill] sm:$0xff]  ;;  %v13600_v36 = vld [vmem:[#allocation278_spill] sm:$0xff] }
 0x3d3   : > { %v2259_v11 = vmul.f32 %v10596_v53, %v13595_v26  ;;  %v2428_v37 = vmul.f32 %v10631_v17, %v13596_v48  ;;  %13597 = vst [vmem:[#allocation48_spill] sm:$0xff] %v10788_v61  ;;  %v10790_v57 = vadd.f32 %v2631_v7, %v2466_v60  ;;  %v2288_v30 = vadd.f32 %v2256_v44, %v2091_v25  ;;  %v10807_v60 = vld [vmem:[%s8721_s15 + $0xa0] sm:$0xff] }
 0x3d4   : > { %v2481_v31 = vadd.f32 %v2449_v39, %v2284_v19  ;;  %v2453_v49 = vmul.f32 %v10631_v17, %v13598_v13  ;;  %v2826_v35 = vmul.f32 %v10663_v3, %v13599_v32  ;;  %v2431_v56 = vmul.f32 %v10631_v17, %v13600_v36  ;;  %v2779_v48 = vpop.permute.xlu0 %2778 }
 0x3d5   : > { %v2656_v26 = vadd.f32 %v2624_v46, %v2459_v54  ;;  %v2659_v8 = vadd.f32 %v2627_v28, %v2462_v2  ;;  %8304 = vset.pattern.permute.xlu1 %v13601_v58  ;;  %v10801_v7 = vmul.f32 %v10587_v40, %v13602_v10  ;;  %v2650_v44 = vmul.f32 %v10648_v43, %v10500_v21  ;;  %v13603_v2 = vld [vmem:[#allocation277_spill] sm:$0xff]  ;;  %v13604_v28 = vld [vmem:[#allocation279_spill] sm:$0xff] }
 0x3d6   : > { %v2678_v25 = vadd.f32 %v2646_v27, %v2481_v31  ;;  %v2843_v39 = vmul.f32 %v10663_v3, %v2779_v48  ;;  %1982 = vperm.xlu1 %8304, %v10807_v60   ;;  %v2291_v19 = vadd.f32 %v2259_v11, %v2094_v63  ;;  %v2460_v54 = vadd.f32 %v2428_v37, %v10658_v20  ;;  %v13605_v27 = vld [vmem:[#allocation298_spill] sm:$0xff]  ;;  %v13606_v21 = vld [vmem:[#allocation7_spill] sm:$0xff] }
 0x3d7   : > { %v2827_v46 = vmul.f32 %v10663_v3, %v13603_v2  ;;  %v2238_v10 = vmul.f32 %v10596_v53, %v13604_v28  ;;  %v2485_v13 = vadd.f32 %v2453_v49, %v2288_v30  ;;  %v2456_v31 = vmul.f32 %v10631_v17, %v13605_v27  ;;  %v10821_v48 = vpop.permute.xlu1 %3128 }
 0x3d8   : > { %v2628_v32 = vmul.f32 %v10648_v43, %v13606_v21  ;;  %v10819_v36 = vadd.f32 %v2843_v39, %v2678_v25  ;;  %v2858_v63 = vadd.f32 %v2826_v35, %v2661_v55  ;;  %v2463_v11 = vadd.f32 %v2431_v56, %v2266_v6  ;;  %v2795_v2 = vpop.permute.xlu0 %2794  ;;  %v13608_v55 = vld [vmem:[#allocation283_spill] sm:$0xff] }
 0x3d9   : > { %v2853_v20 = vadd.f32 %v10705_v12, %v2656_v26  ;;  %v2856_v37 = vadd.f32 %v10714_v18, %v2659_v8  ;;  %v2682_v61 = vadd.f32 %v2650_v44, %v2485_v13  ;;  %v2653_v30 = vmul.f32 %v10648_v43, %v10516_v1  ;;  %v13609_v18 = vld [vmem:[#allocation280_spill] sm:$0xff]  ;;  %v13610_v26 = vld [vmem:[#allocation282_spill] sm:$0xff]  ;;  %v13611_v44 = vld [vmem:[#allocation285_spill] sm:$0xff] }
 0x3da   : > { %v2825_v49 = vmul.f32 %v10663_v3, %v10641_v62  ;;  %v2847_v28 = vmul.f32 %v10663_v3, %v2795_v2  ;;  %v13607_v25 = vmov 12   ;;  %v10831_v39 = vadd.f32 %v2827_v46, %v2662_v51  ;;  %v13612_v46 = vld [vmem:[#allocation294_spill] sm:$0xff] }
 0x3db   : > { %8305 = vset.pattern.permute.xlu1 %v13607_v25  ;;  %v2270_v6 = vadd.f32 %v2238_v10, %v10677_v24  ;;  %v3023_v12 = vmul.f32 %v10695_v16, %v13608_v55  ;;  %v2657_v8 = vadd.f32 %v10690_v5, %v2460_v54  ;;  %v2436_v1 = vmul.f32 %v10631_v17, %v13609_v18  ;;  %v13614_v2 = vld [vmem:[#allocation6_spill] sm:$0xff] }
 0x3dc   : > { %2754 = vperm.xlu1 %8305, %v10435_v22   ;;  %v2488_v35 = vadd.f32 %v2456_v31, %v2291_v19  ;;  %v2660_v62 = vadd.f32 %v2628_v32, %v2463_v11  ;;  %v10840_v56 = vadd.f32 %v2847_v28, %v2682_v61  ;;  %v2437_v51 = vmul.f32 %v10631_v17, %v13610_v26  ;;  %v10848_v5 = vpop.permute.xlu1 %2541  ;;  %v2807_v54 = vpop.permute.xlu0 %2806  ;;  %v13613_v32 = vld [vmem:[#allocation290_spill] sm:$0xff] }
 0x3dd   : > { %v2241_v24 = vmul.f32 %v10596_v53, %v13611_v44  ;;  %v3220_v10 = vmul.f32 %v10551_v41, %v13612_v46  ;;  %v3050_v13 = vadd.f32 %v10723_v15, %v2853_v20  ;;  %v3053_v19 = vadd.f32 %v10736_v4, %v2856_v37  ;;  %v10860_v18 = vld [vmem:[%s8721_s15 + $0x88] sm:$0xff]  ;;  %v13615_v4 = vld [vmem:[#allocation281_spill] sm:$0xff]  ;;  %v13616_v37 = vld [vmem:[#allocation296_spill] sm:$0xff] }
 0x3de   : > { %v2685_v27 = vadd.f32 %v2653_v30, %v2488_v35  ;;  %v2857_v31 = vadd.f32 %v2825_v49, %v2660_v62  ;;  %v2850_v61 = vmul.f32 %v10663_v3, %v2807_v54  ;;  %v3055_v21 = vadd.f32 %v3023_v12, %v2858_v63  ;;  %v13618_v35 = vld [vmem:[#allocation301_spill] sm:$0xff] }
 0x3df   : > { %v2435_v11 = vmul.f32 %v10631_v17, %v13613_v32  ;;  %v3417_v28 = vmul.f32 %v10587_v40, %v13614_v2  ;;  %v2822_v55 = vmul.f32 %v10663_v3, %v10599_v29  ;;  %v2468_v15 = vadd.f32 %v2436_v1, %v10750_v14 }
 0x3e0   : > { %2758 = vperm.xlu1 %8305, %v10860_v18   ;;  %v3022_v20 = vmul.f32 %v10695_v16, %v13615_v4  ;;  %v2438_v63 = vmul.f32 %v10631_v17, %v13616_v37  ;;  %v10868_v30 = vadd.f32 %v2850_v61, %v2685_v27  ;;  %v2469_v49 = vadd.f32 %v2437_v51, %v10758_v52  ;;  %v13623_v37 = vld [vmem:[#allocation303_spill] sm:$0xff] }
 0x3e1   : > { %v3252_v12 = vadd.f32 %v3220_v10, %v3055_v21  ;;  %v2632_v29 = vmul.f32 %v10648_v43, %v13618_v35  ;;  %v3247_v62 = vadd.f32 %v10754_v38, %v3050_v13  ;;  %v2273_v26 = vadd.f32 %v2241_v24, %v10656_v42  ;;  %v10877_v44 = vpop.permute.xlu1 %3313  ;;  %v2892_v46 = vpop.permute.xlu0 %2891  ;;  %v13619_v38 = vld [vmem:[#allocation288_spill] sm:$0xff] }
 0x3e2   : > { %13617 = vst [vmem:[#allocation81_spill] sm:$0xff] %v10868_v30  ;;  %v3054_v14 = vadd.f32 %v3022_v20, %v2857_v31  ;;  %v2828_v1 = vmul.f32 %v10663_v3, %v10673_v59  ;;  %v3250_v54 = vadd.f32 %v10776_v34, %v3053_v19  ;;  %v2467_v27 = vadd.f32 %v2435_v11, %v2270_v6  ;;  %v13620_v24 = vld [vmem:[#allocation292_spill] sm:$0xff]  ;;  %v13621_v31 = vld [vmem:[#allocation11_spill] sm:$0xff] }
 0x3e3   : > { %v10880_v52 = vadd.f32 %v3417_v28, %v3252_v12  ;;  %v2854_v51 = vadd.f32 %v2822_v55, %v2657_v8  ;;  %v3019_v10 = vmul.f32 %v10695_v16, %v2892_v46  ;;  %v3025_v42 = vmul.f32 %v10695_v16, %v13619_v38  ;;  %v10893_v34 = vld [vmem:[%s8721_s15 + $0xb8] sm:$0xff]  ;;  %v13622_v6 = vld [vmem:[#allocation299_spill] sm:$0xff] }
 0x3e4   : > { %8306 = vset.pattern.permute.xlu1 %v13601_v58  ;;  %v3219_v13 = vmul.f32 %v10551_v41, %v13620_v24  ;;  %v10888_v59 = vadd.f32 %v2438_v63, %v2273_v26  ;;  %v2633_v61 = vmul.f32 %v10648_v43, %v13621_v31  ;;  %v3222_v8 = vmul.f32 %v10551_v41, %v13622_v6  ;;  %v13628_v38 = vld [vmem:[#allocation31_spill] sm:$0xff] }
 0x3e5   : > { %1994 = vperm.xlu1 %8306, %v10893_v34   ;;  %v2664_v19 = vadd.f32 %v2632_v29, %v2467_v27  ;;  %v3051_v21 = vadd.f32 %v3019_v10, %v2854_v51  ;;  %v3444_v32 = vadd.f32 %v10782_v0, %v3247_v62  ;;  %v2830_v11 = vmul.f32 %v10663_v3, %v10390_v45  ;;  %v3318_v55 = vpop.permute.xlu1 %3317  ;;  %v2896_v4 = vpop.permute.xlu0 %2895  ;;  %v13624_v0 = vld [vmem:[#allocation10_spill] sm:$0xff]  ;;  %v13627_v10 = vld [vmem:[#allocation76_spill] sm:$0xff]  ;;  %v13629_v6 = vld [vmem:[#allocation27_spill] sm:$0xff] }
 0x3e6   : > { %v3251_v2 = vadd.f32 %v3219_v13, %v3054_v14  ;;  %v2860_v28 = vadd.f32 %v2828_v1, %v10790_v57  ;;  %v3447_v20 = vadd.f32 %v10801_v7, %v3250_v54  ;;  %v3416_v63 = vmul.f32 %v10587_v40, %v13623_v37  ;;  %v13625_v1 = vld [vmem:[#allocation16_spill] sm:$0xff] }
 0x3e7   : > { %v3481_v12 = vmax.f32 %v10880_v52, 0.0  ;;  %v3020_v35 = vmul.f32 %v10695_v16, %v2896_v4  ;;  %v3248_v29 = vadd.f32 %v10562_v33, %v3051_v21  ;;  %v2635_v62 = vmul.f32 %v10648_v43, %v13624_v0  ;;  %v13626_v33 = vld [vmem:[#allocation34_spill] sm:$0xff] }
 0x3e8   : > { %v2665_v45 = vadd.f32 %v2633_v61, %v2468_v15  ;;  %v2634_v57 = vmul.f32 %v10648_v43, %v10326_v47  ;;  %v2829_v26 = vmul.f32 %v10663_v3, %v10368_v23  ;;  %v3027_v7 = vmul.f32 %v10695_v16, %v10532_v50 }
 0x3e9   : > { %8307 = vset.pattern.permute.xlu1 %v13607_v25  ;;  %v3052_v14 = vadd.f32 %v3020_v35, %v10707_v9  ;;  %v3445_v46 = vadd.f32 %v13626_v33, %v3248_v29  ;;  %v3476_v54 = vmax.f32 %v3444_v32, 0.0  ;;  %v3057_v15 = vadd.f32 %v3025_v42, %v2860_v28  ;;  %v2912_v52 = vpop.permute.xlu0 %2911  ;;  %v13630_v32 = vld [vmem:[#allocation79_spill] sm:$0xff]  ;;  %v13633_v35 = vld [vmem:[#allocation77_spill] sm:$0xff] }
 0x3ea   : > { %2766 = vperm.xlu1 %8307, %v13625_v1   ;;  %v2862_v27 = vadd.f32 %v2830_v11, %v2665_v45  ;;  %v3479_v51 = vmax.f32 %v3447_v20, 0.0  ;;  %v3448_v47 = vadd.f32 %v3416_v63, %v3251_v2  ;;  %v2831_v23 = vmul.f32 %v10663_v3, %v13627_v10  ;;  %v10924_v50 = vpop.permute.xlu1 %2553  ;;  %v13632_v20 = vld [vmem:[#allocation35_spill] sm:$0xff]  ;;  %v13637_v10 = vld [vmem:[#allocation37_spill] sm:$0xff] }
 0x3eb   : > { %v3249_v24 = vadd.f32 %v13628_v38, %v3052_v14  ;;  %v3024_v13 = vmul.f32 %v10695_v16, %v2912_v52  ;;  %v3477_v9 = vmax.f32 %v3445_v46, 0.0  ;;  %v2666_v31 = vadd.f32 %v2634_v57, %v2469_v49  ;;  %v13634_v57 = vld [vmem:[#allocation32_spill] sm:$0xff] }
 0x3ec   : > { %v2861_v61 = vadd.f32 %v2829_v26, %v2664_v19  ;;  %v3026_v21 = vmul.f32 %v10695_v16, %v13629_v6  ;;  %v3224_v42 = vmul.f32 %v10551_v41, %v13630_v32  ;;  %v3059_v11 = vadd.f32 %v3027_v7, %v2862_v27  ;;  %v13635_v14 = vld [vmem:[#allocation12_spill] sm:$0xff]  ;;  %v13636_v27 = vld [vmem:[#allocation22_spill] sm:$0xff] }
 0x3ed   : > { %v3056_v2 = vadd.f32 %v3024_v13, %v10831_v39  ;;  %v13631_v28 = vmov 9   ;;  %v3508_v4 = vpack.c.bf16 %v3477_v9, %v3476_v54  ;;  %v3446_v37 = vadd.f32 %v13632_v20, %v3249_v24  ;;  %v2928_v19 = vpop.permute.xlu0 %2927  ;;  %v13639_v6 = vld [vmem:[#allocation36_spill] sm:$0xff] }
 0x3ee   : > { %8308 = vset.pattern.permute.xlu1 %v13631_v28  ;;  %v3254_v63 = vadd.f32 %v3222_v8, %v3057_v15  ;;  %v3223_v29 = vmul.f32 %v10551_v41, %v13633_v35  ;;  %v3421_v49 = vmul.f32 %v10587_v40, %v3318_v55  ;;  %v3480_v0 = vmax.f32 %v3448_v47, 0.0  ;;  %v13640_v32 = vld [vmem:[#allocation212_spill] sm:$0xff] }
 0x3ef   : > { %2179 = vperm.xlu1 %8308, %v10807_v60   ;;  %v2863_v45 = vadd.f32 %v2831_v23, %v2666_v31  ;;  %v3253_v26 = vadd.f32 %v13634_v57, %v3056_v2  ;;  %v3028_v39 = vmul.f32 %v10695_v16, %v2928_v19  ;;  %7992 = vmatprep.mubr.bf16.mxu0 %v3508_v4  ;;  %v3478_v7 = vmax.f32 %v3446_v37, 0.0  ;;  %v3326_v55 = vpop.permute.xlu1 %3325  ;;  %v13641_v4 = vld [vmem:[#allocation33_spill] sm:$0xff] }
 0x3f0   : > { %v3419_v33 = vmul.f32 %v10587_v40, %v13635_v14  ;;  %v3058_v8 = vadd.f32 %v3026_v21, %v2861_v61  ;;  %v3256_v46 = vadd.f32 %v3224_v42, %v3059_v11  ;;  %v3420_v54 = vmul.f32 %v10587_v40, %v10877_v44 }
 0x3f1   : > { %v2832_v15 = vmul.f32 %v10663_v3, %v13636_v27  ;;  %v3060_v52 = vadd.f32 %v3028_v39, %v2863_v45  ;;  %v3509_v47 = vpack.c.bf16 %v3479_v51, %v3478_v7  ;;  %v3450_v23 = vadd.f32 %v13637_v10, %v3253_v26  ;;  %v10947_v9 = vpop.permute.xlu0 %2943 }
 0x3f2   : > { %v3255_v38 = vadd.f32 %v3223_v29, %v3058_v8  ;;  %v3453_v24 = vadd.f32 %v3421_v49, %v3256_v46  ;;  %v13638_v13 = vmov 13   ;;  %v3510_v31 = vpack.c.bf16 %v3481_v12, %v3480_v0 }
 0x3f3   : > { %8309 = vset.pattern.permute.xlu1 %v13638_v13  ;;  %v2667_v61 = vadd.f32 %v2635_v62, %v10888_v59  ;;  %v3029_v44 = vmul.f32 %v10695_v16, %v13639_v6  ;;  %7993 = vmatmul.mubr.bf16.vlgmr.msra.gmra.mrb[0].mxu0 %v3509_v47  ;;  %v3451_v21 = vadd.f32 %v3419_v33, %v3254_v63  ;;  %v3482_v59 = vmax.f32 %v3450_v23, 0.0 }
 0x3f4   : > { %2951 = vperm.xlu1 %8309, %v10435_v22   ;;  %v3422_v51 = vmul.f32 %v10587_v40, %v13640_v32  ;;  %v3452_v42 = vadd.f32 %v3420_v54, %v3255_v38  ;;  %7996 = vmatprep.mubr.bf16.mxu0 %v3510_v31  ;;  %v3226_v2 = vmul.f32 %v10551_v41, %v10821_v48  ;;  %v10958_v20 = vpop.permute.xlu1 %1966  ;;  %v3485_v62 = vmax.f32 %v3453_v24, 0.0  ;;  %v13650_v32 = vld [vmem:[#allocation61_spill] sm:$0xff] }
 0x3f5   : > { %v2864_v11 = vadd.f32 %v2832_v15, %v2667_v61  ;;  %v3257_v12 = vadd.f32 %v13641_v4, %v3060_v52  ;;  %v10960_v37 = vpop.permute.xlu0 %2959  ;;  %v3423_v63 = vmul.f32 %v10587_v40, %v3326_v55  ;;  %v3483_v29 = vmax.f32 %v3451_v21, 0.0  ;;  %v13653_v4 = vld [vmem:[#allocation89_spill] sm:$0xff] }
 0x3f6   : > { %13642 = vst [vmem:[#allocation83_spill] sm:$0xff] %v10960_v37  ;;  %v3484_v49 = vmax.f32 %v3452_v42, 0.0  ;;  %v13646_v10 = vmov 14   ;;  %v13648_v31 = vmov 11   ;;  %v13649_v6 = vmov 15   ;;  %v13651_v42 = vld [vmem:[#allocation59_spill] sm:$0xff] }
 0x3f7   : > { %v3061_v35 = vadd.f32 %v3029_v44, %v2864_v11  ;;  %v3511_v0 = vpack.c.bf16 %v3483_v29, %v3482_v59  ;;  %v3454_v45 = vadd.f32 %v3422_v51, %v3257_v12  ;;  %v13652_v11 = vld [vmem:[#allocation82_spill] sm:$0xff]  ;;  %v13656_v29 = vld [vmem:[#allocation19_spill] sm:$0xff] }
 0x3f8   : > { %2955 = vperm.xlu1 %8309, %v10860_v18   ;;  %v3512_v26 = vpack.c.bf16 %v3485_v62, %v3484_v49  ;;  %v13654_v62 = vld [vmem:[#allocation38_spill] sm:$0xff] }
 0x3f9   : > { %v3258_v19 = vadd.f32 %v3226_v2, %v3061_v35  ;;  %v10964_v57 = vpop.permute.xlu1 %2738  ;;  %v2976_v48 = vpop.permute.xlu0 %2975  ;;  %v3486_v33 = vmax.f32 %v3454_v45, 0.0  ;;  %v11073_v37 = vld [vmem:[%s8721_s15 + $0xc0] sm:$0xff] }
 0x3fa   : > { %v3040_v7 = vmul.f32 %v10695_v16, %v2976_v48  ;;  %v13658_v48 = vld [vmem:[#allocation63_spill] sm:$0xff] }
 0x3fb   : > { %v3455_v39 = vadd.f32 %v3423_v63, %v3258_v19  ;;  %7997 = vmatmul.mubr.bf16.gmra.mrb[4].mxu0 %v3511_v0  ;;  %v13655_v63 = vld [vmem:[#allocation121_spill] sm:$0xff] }
 0x3fc   : > { %8310 = vset.pattern.permute.xlu1 %v13631_v28  ;;  %8000 = vmatprep.mubr.bf16.mxu0 %v3512_v26  ;;  %v10970_v14 = vadd.f32 %v3040_v7, %v10819_v36  ;;  %v13645_v36 = vmov 10   ;;  %v1454_v49 = vmul.f32 %v13656_v29, %v13655_v63  ;;  %v8374_v19 = vld [vmem:[%s13045_s2 + $0x40] sm:$0xff]  }
 0x3fd   : > { %2191 = vperm.xlu1 %8310, %v10893_v34   ;;  %v10972_v8 = vpop.permute.xlu1 %2742  ;;  %v2992_v46 = vpop.permute.xlu0 %2991  ;;  %v3487_v54 = vmax.f32 %v3455_v39, 0.0  ;;  %v13657_v0 = vld [vmem:[#allocation41_spill] sm:$0xff]  ;;  %v13659_v39 = vld [vmem:[#allocation114_spill] sm:$0xff]  ;;  %8024 = vmatprep.subr.bf16.mxu1 %v8374_v19 }
 0x3fe   : > { %13643 = vst [vmem:[#allocation85_spill] sm:$0xff] %v10970_v14  ;;  %v3044_v55 = vmul.f32 %v10695_v16, %v2992_v46  ;;  %v1455_v7 = vmul.f32 %v13656_v29, %v13659_v39  ;;  %v13660_v46 = vld [vmem:[#allocation144_spill] sm:$0xff]  ;;  %8025 = vmatpush3.bf16.msra.mxu1 %v8374_v19  ;;  %v13665_v63 = vld [vmem:[#allocation26_spill] sm:$0xff] }
 0x3ff   : > { %v3513_v15 = vpack.c.bf16 %v3487_v54, %v3486_v33  ;;  %v13661_v54 = vld [vmem:[#allocation23_spill] sm:$0xff]  ;;  %v13673_v14 = vld [vmem:[#allocation146_spill] sm:$0xff] }
 0x400   : > { %v10977_v27 = vadd.f32 %v3044_v55, %v10840_v56  ;;  %v1651_v55 = vmul.f32 %v13661_v54, %v13660_v46  ;;  %v13668_v46 = vld [vmem:[#allocation40_spill] sm:$0xff] }
 0x401   : > { %8311 = vset.pattern.permute.xlu1 %v13638_v13 }
 0x402   : > { %13644 = vst [vmem:[#allocation57_spill] sm:$0xff] %v10977_v27  ;;  %2963 = vperm.xlu1 %8311, %v13625_v1   ;;  %v10980_v52 = vpop.permute.xlu1 %1978 }
 0x403   : > { %8001 = vmatmul.mubr.bf16.gmra.mrb[8].mxu0 %v3513_v15  ;;  %v8514_v15 = vld [vmem:[%s8721_s15 + $0x98] sm:$0xff] }
 0x406   : > { %8312 = vset.pattern.permute.xlu1 %v13645_v36 }
 0x407   : > { %2376 = vperm.xlu1 %8312, %v10807_v60   ;;  %v10984_v47 = vpop.permute.xlu1 %2750 }
 0x40b   : > { %8313 = vset.pattern.permute.xlu1 %v13646_v10 }
 0x40c   : > { %3148 = vperm.xlu1 %8313, %v10435_v22   ;;  %v10988_v23 = vpop.permute.xlu1 %2163 }
 0x410   : > { %3152 = vperm.xlu1 %8313, %v10860_v18  }
 0x411   : > { %v10991_v56 = vpop.permute.xlu1 %2935 }
 0x414   : > { %8314 = vset.pattern.permute.xlu1 %v13645_v36 }
 0x415   : > { %2388 = vperm.xlu1 %8314, %v10893_v34   ;;  %v10995_v38 = vpop.permute.xlu1 %2939 }
 0x419   : > { %8315 = vset.pattern.permute.xlu1 %v13646_v10 }
 0x41a   : > { %3160 = vperm.xlu1 %8315, %v13625_v1   ;;  %v10999_v24 = vpop.permute.xlu1 %2175  ;;  %v11015_v1 = vld [vmem:[%s13044_s1 + $0x3] ss:$0 sm:$0xff] }
 0x41b   : > { %13647 = vst [vmem:[#allocation52_spill] sm:$0xff] %v10999_v24  ;;  %v1060_v51 = vmul.f32 %v11015_v1, %v13650_v32  ;;  %v1062_v26 = vmul.f32 %v11015_v1, %v13658_v48  ;;  %v13662_v32 = vld [vmem:[#allocation84_spill] sm:$0xff] }
 0x41c   : > { %v13667_v48 = vld [vmem:[#allocation60_spill] sm:$0xff] }
 0x41d   : > { %v1092_v35 = vadd.f32 %v1060_v51, %v13654_v62  ;;  %v13664_v62 = vld [vmem:[#allocation187_spill] sm:$0xff]  ;;  %v1063_v39 = vmul.f32 %v11015_v1, %v13667_v48  ;;  %v1653_v48 = vmul.f32 %v13661_v54, %v13673_v14 }
 0x41e   : > { %8316 = vset.pattern.permute.xlu1 %v13648_v31  ;;  %v13677_v14 = vld [vmem:[#allocation91_spill] sm:$0xff] }
 0x41f   : > { %2573 = vperm.xlu1 %8316, %v10807_v60   ;;  %v11003_v61 = vpop.permute.xlu1 %2947 }
 0x423   : > { %8317 = vset.pattern.permute.xlu1 %v13649_v6 }
 0x424   : > { %3345 = vperm.xlu1 %8317, %v10435_v22   ;;  %v11007_v44 = vpop.permute.xlu1 %2360  ;;  %v1061_v22 = vmul.f32 %v11015_v1, %v13651_v42 }
 0x426   : > { %v1093_v45 = vadd.f32 %v1061_v22, %v13657_v0  ;;  %v1848_v0 = vmul.f32 %v13665_v63, %v13664_v62  ;;  %v13672_v62 = vld [vmem:[#allocation29_spill] sm:$0xff] }
 0x428   : > { %3349 = vperm.xlu1 %8317, %v10860_v18   ;;  %v11026_v18 = vld [vmem:[%s13044_s1 + $0x4] ss:$0 sm:$0xff] }
 0x429   : > { %v11010_v21 = vpop.permute.xlu1 %3132  ;;  %v1257_v2 = vmul.f32 %v11026_v18, %v13652_v11  ;;  %v1258_v12 = vmul.f32 %v11026_v18, %v13653_v4  ;;  %v1259_v51 = vmul.f32 %v11026_v18, %v13662_v32  ;;  %v13663_v11 = vld [vmem:[#allocation155_spill] sm:$0xff] }
 0x42a   : > { %v1652_v4 = vmul.f32 %v13661_v54, %v13663_v11  ;;  %v13671_v11 = vld [vmem:[#allocation14_spill] sm:$0xff] }
 0x42b   : > { %v1289_v33 = vadd.f32 %v1257_v2, %v1092_v35  ;;  %v1290_v42 = vadd.f32 %v1258_v12, %v1093_v45  ;;  %v8375_v35 = vld [vmem:[%s13045_s2 + $0x48] sm:$0xff]   ;;  %v1094_v12 = vadd.f32 %v1062_v26, %v13668_v46  ;;  %v2045_v30 = vmul.f32 %v13672_v62, %v13671_v11  ;;  %v13678_v11 = vld [vmem:[#allocation189_spill] sm:$0xff] }
 0x42c   : > { %8318 = vset.pattern.permute.xlu1 %v13648_v31  ;;  %8026 = vmatprep.subr.bf16.mxu1 %v8375_v35  ;;  %v13676_v46 = vld [vmem:[#allocation43_spill] sm:$0xff] }
 0x42d   : > { %2585 = vperm.xlu1 %8318, %v10893_v34   ;;  %v11032_v59 = vpop.permute.xlu1 %3136  ;;  %v1486_v22 = vadd.f32 %v1454_v49, %v1289_v33  ;;  %v1487_v19 = vadd.f32 %v1455_v7, %v1290_v42  ;;  %v13669_v49 = vld [vmem:[#allocation123_spill] sm:$0xff]  ;;  %v1291_v27 = vadd.f32 %v1259_v51, %v1094_v12  ;;  %8027 = vmatpush3.bf16.msra.mxu1 %v8375_v35  ;;  %v13674_v7 = vld [vmem:[#allocation230_spill] sm:$0xff]  ;;  %v13675_v42 = vld [vmem:[#allocation25_spill] sm:$0xff] }
 0x42e   : > { %v1456_v45 = vmul.f32 %v13656_v29, %v13669_v49  ;;  %v8376_v51 = vld [vmem:[%s13045_s2 + $0x50] sm:$0xff]   ;;  %v1095_v12 = vadd.f32 %v1063_v39, %v13676_v46  ;;  %v1260_v49 = vmul.f32 %v11026_v18, %v13677_v14  ;;  %v11097_v39 = vld [vmem:[%s13044_s1 + $0x5] ss:$0 sm:$0xff] }
 0x42f   : > { %v1683_v33 = vadd.f32 %v1651_v55, %v1486_v22  ;;  %v1684_v29 = vadd.f32 %v1652_v4, %v1487_v19  ;;  %v2046_v55 = vmul.f32 %v13672_v62, %v13674_v7  ;;  %v2242_v22 = vmul.f32 %v10596_v53, %v13675_v42  ;;  %v13679_v19 = vld [vmem:[#allocation258_spill] sm:$0xff]  ;;  %v13680_v42 = vld [vmem:[#allocation39_spill] sm:$0xff]  ;;  %8028 = vmatprep.subr.bf16.mxu1 %v8376_v51 }
 0x430   : > { %v1850_v4 = vmul.f32 %v13665_v63, %v13678_v11  ;;  %v13682_v14 = vld [vmem:[#allocation231_spill] sm:$0xff] }
 0x431   : > { %8319 = vset.pattern.permute.xlu1 %v13649_v6  ;;  %v1880_v26 = vadd.f32 %v1848_v0, %v1683_v33  ;;  %v2243_v33 = vmul.f32 %v10596_v53, %v13679_v19  ;;  %8029 = vmatpush3.bf16.msra.mxu1 %v8376_v51  ;;  %v2636_v19 = vmul.f32 %v10648_v43, %v10848_v5  ;;  %v13685_v51 = vld [vmem:[#allocation260_spill] sm:$0xff] }
 0x432   : > { %3357 = vperm.xlu1 %8319, %v8514_v15   ;;  %v11055_v2 = vpop.permute.xlu1 %2372  ;;  %v13670_v15 = vld [vmem:[#allocation176_spill] sm:$0xff] }
 0x433   : > { %13666 = vst [vmem:[#allocation87_spill] sm:$0xff] %v11055_v2  ;;  %v1849_v32 = vmul.f32 %v13665_v63, %v13670_v15  ;;  %v1488_v15 = vadd.f32 %v1456_v45, %v1291_v27  ;;  %v2077_v7 = vadd.f32 %v2045_v30, %v1880_v26  ;;  %v2439_v2 = vmul.f32 %v10631_v17, %v13680_v42  ;;  %v13681_v27 = vld [vmem:[#allocation116_spill] sm:$0xff]  ;;  %v13684_v42 = vld [vmem:[#allocation157_spill] sm:$0xff] }
 0x434   : > { %v1457_v45 = vmul.f32 %v11097_v39, %v13681_v27  ;;  %v1654_v27 = vmul.f32 %v13661_v54, %v13684_v42 }
 0x435   : > { %v1881_v35 = vadd.f32 %v1849_v32, %v1684_v29  ;;  %v1685_v46 = vadd.f32 %v1653_v48, %v1488_v15  ;;  %v2047_v32 = vmul.f32 %v13672_v62, %v13682_v14  ;;  %v13683_v29 = vld [vmem:[#allocation284_spill] sm:$0xff]  ;;  %v2274_v11 = vadd.f32 %v2242_v22, %v2077_v7  ;;  %v13686_v22 = vld [vmem:[#allocation13_spill] sm:$0xff] }
 0x436   : > { %8320 = vset.pattern.permute.xlu1 %v13601_v58  ;;  %v2440_v26 = vmul.f32 %v10631_v17, %v13683_v29  ;;  %v8377_v48 = vld [vmem:[%s13045_s2 + $0x58] sm:$0xff]   ;;  %v1292_v15 = vadd.f32 %v1260_v49, %v1095_v12  ;;  %v2637_v7 = vmul.f32 %v10648_v43, %v13686_v22  ;;  %v2833_v29 = vmul.f32 %v10663_v3, %v10964_v57  ;;  %v13687_v49 = vld [vmem:[#allocation178_spill] sm:$0xff] }
 0x437   : > { %1998 = vperm.xlu1 %8320, %v11073_v37   ;;  %v11088_v0 = vpop.permute.xlu1 %3144  ;;  %v2078_v30 = vadd.f32 %v2046_v55, %v1881_v35  ;;  %v1882_v14 = vadd.f32 %v1850_v4, %v1685_v46  ;;  %v2244_v55 = vmul.f32 %v10596_v53, %v13685_v51  ;;  %v2471_v5 = vadd.f32 %v2439_v2, %v2274_v11  ;;  %v13688_v46 = vld [vmem:[#allocation286_spill] sm:$0xff] }
 0x438   : > { %8030 = vmatprep.subr.bf16.mxu1 %v8377_v48  ;;  %v1489_v12 = vadd.f32 %v1457_v45, %v1292_v15  ;;  %v1851_v54 = vmul.f32 %v13665_v63, %v13687_v49  ;;  %v2441_v42 = vmul.f32 %v10631_v17, %v13688_v46  ;;  %v2834_v2 = vmul.f32 %v10663_v3, %v10972_v8  ;;  %v11131_v11 = vld [vmem:[%s8721_s15 + $0xa8] sm:$0xff]  ;;  %v8378_v63 = vld [vmem:[%s13045_s2 + $0x60] sm:$0xff]   ;;  %v11159_v46 = vld [vmem:[%s8721_s15 + $0xd8] sm:$0xff] }
 0x439   : > { %v2275_v35 = vadd.f32 %v2243_v33, %v2078_v30  ;;  %v2079_v4 = vadd.f32 %v2047_v32, %v1882_v14  ;;  %8031 = vmatpush3.bf16.msra.mxu1 %v8377_v48  ;;  %v2668_v30 = vadd.f32 %v2636_v19, %v2471_v5  ;;  %v3030_v57 = vmul.f32 %v10695_v16, %v10991_v56  ;;  %v13689_v15 = vld [vmem:[#allocation15_spill] sm:$0xff]  ;;  %v13690_v19 = vld [vmem:[#allocation20_spill] sm:$0xff]  ;;  %v13692_v5 = vld [vmem:[#allocation78_spill] sm:$0xff] }
 0x43a   : > { %v1686_v45 = vadd.f32 %v1654_v27, %v1489_v12  ;;  %v2048_v48 = vmul.f32 %v13672_v62, %v13690_v19  ;;  %v3031_v56 = vmul.f32 %v10695_v16, %v10995_v38  ;;  %v3227_v51 = vmul.f32 %v10551_v41, %v11010_v21  ;;  %8032 = vmatprep.subr.bf16.mxu1 %v8378_v63  ;;  %v13691_v27 = vld [vmem:[#allocation30_spill] sm:$0xff]  ;;  %v13694_v19 = vld [vmem:[#allocation204_spill] sm:$0xff] }
 0x43b   : > { %8321 = vset.pattern.permute.xlu1 %v13607_v25  ;;  %v2472_v33 = vadd.f32 %v2440_v26, %v2275_v35  ;;  %v2276_v32 = vadd.f32 %v2244_v55, %v2079_v4  ;;  %v2638_v26 = vmul.f32 %v10648_v43, %v13689_v15  ;;  %v2865_v14 = vadd.f32 %v2833_v29, %v2668_v30  ;;  %v8379_v21 = vld [vmem:[%s13045_s2 + $0x68] sm:$0xff]  }
 0x43c   : > { %2770 = vperm.xlu1 %8321, %v10807_v60   ;;  %v1883_v35 = vadd.f32 %v1851_v54, %v1686_v45  ;;  %v2245_v55 = vmul.f32 %v10596_v53, %v13691_v27  ;;  %v2835_v12 = vmul.f32 %v10663_v3, %v13692_v5  ;;  %v3228_v38 = vmul.f32 %v10551_v41, %v11032_v59  ;;  %v8381_v27 = vld [vmem:[%s13045_s2 + $0x78] sm:$0xff]  }
 0x43d   : > { %v11120_v24 = vpop.permute.xlu1 %2557  ;;  %v2669_v8 = vadd.f32 %v2637_v7, %v2472_v33  ;;  %v2473_v22 = vadd.f32 %v2441_v42, %v2276_v32  ;;  %8033 = vmatpush3.bf16.msra.mxu1 %v8378_v63  ;;  %v3062_v7 = vadd.f32 %v3030_v57, %v2865_v14  ;;  %v3032_v4 = vmul.f32 %v10695_v16, %v10947_v9  ;;  %v13693_v42 = vld [vmem:[#allocation48_spill] sm:$0xff] }
 0x43e   : > { %v2080_v53 = vadd.f32 %v2048_v48, %v1883_v35  ;;  %v2442_v59 = vmul.f32 %v10631_v17, %v13693_v42  ;;  %8034 = vmatprep.subr.bf16.mxu1 %v8379_v21  ;;  %v2639_v45 = vmul.f32 %v10648_v43, %v10924_v50  ;;  %v3229_v17 = vmul.f32 %v10551_v41, %v13694_v19  ;;  %v13698_v19 = vld [vmem:[#allocation86_spill] sm:$0xff] }
 0x43f   : > { %v2866_v62 = vadd.f32 %v2834_v2, %v2669_v8  ;;  %v2670_v54 = vadd.f32 %v2638_v26, %v2473_v22  ;;  %v3259_v30 = vadd.f32 %v3227_v51, %v3062_v7  ;;  %v8380_v26 = vld [vmem:[%s13045_s2 + $0x70] sm:$0xff]   ;;  %v2836_v14 = vmul.f32 %v10663_v3, %v10984_v47 }
 0x440   : > { %2774 = vperm.xlu1 %8321, %v11131_v11   ;;  %v2277_v2 = vadd.f32 %v2245_v55, %v2080_v53  ;;  %v3033_v50 = vmul.f32 %v10695_v16, %v11003_v61  ;;  %v13695_v55 = vld [vmem:[#allocation214_spill] sm:$0xff] }
 0x441   : > { %v3063_v33 = vadd.f32 %v3031_v56, %v2866_v62  ;;  %v2867_v57 = vadd.f32 %v2835_v12, %v2670_v54  ;;  %8035 = vmatpush3.bf16.msra.mxu1 %v8379_v21  ;;  %v3426_v3 = vmul.f32 %v10587_v40, %v13695_v55  ;;  %v3230_v12 = vmul.f32 %v10551_v41, %v11088_v0 }
 0x442   : > { %v3330_v49 = vpop.permute.xlu1 %3329  ;;  %v2474_v8 = vadd.f32 %v2442_v59, %v2277_v2  ;;  %8036 = vmatprep.subr.bf16.mxu1 %v8380_v26 }
 0x443   : > { %v3424_v29 = vmul.f32 %v10587_v40, %v3330_v49  ;;  %v3260_v32 = vadd.f32 %v3228_v38, %v3063_v33  ;;  %v3064_v48 = vadd.f32 %v3032_v4, %v2867_v57 }
 0x444   : > { %8322 = vset.pattern.permute.xlu1 %v13601_v58  ;;  %v2671_v43 = vadd.f32 %v2639_v45, %v2474_v8 }
 0x445   : > { %2010 = vperm.xlu1 %8322, %v11159_v46   ;;  %v3456_v15 = vadd.f32 %v3424_v29, %v3259_v30  ;;  %8037 = vmatpush3.bf16.msra.mxu1 %v8380_v26  ;;  %v3261_v47 = vadd.f32 %v3229_v17, %v3064_v48  ;;  %v1261_v17 = vmul.f32 %v11026_v18, %v13698_v19  ;;  %v13699_v48 = vld [vmem:[#allocation42_spill] sm:$0xff] }
 0x446   : > { %v3334_v63 = vpop.permute.xlu1 %3333  ;;  %v2868_v5 = vadd.f32 %v2836_v14, %v2671_v43  ;;  %8038 = vmatprep.subr.bf16.mxu1 %v8381_v27  ;;  %v11282_v19 = vld [vmem:[%s13044_s1 + $0x8] ss:$0 sm:$0xff] }
 0x447   : > { %v3425_v9 = vmul.f32 %v10587_v40, %v3334_v63  ;;  %v3488_v51 = vmax.f32 %v3456_v15, 0.0  ;;  %v3458_v38 = vadd.f32 %v3426_v3, %v3261_v47  ;;  %v11257_v3 = vld [vmem:[%s13044_s1 + $0x6] ss:$0 sm:$0xff]  ;;  %v13704_v47 = vld [vmem:[#allocation148_spill] sm:$0xff] }
 0x448   : > { %v3065_v16 = vadd.f32 %v3033_v50, %v2868_v5  ;;  %v13702_v50 = vld [vmem:[#allocation45_spill] sm:$0xff]  ;;  %v1655_v5 = vmul.f32 %v11257_v3, %v13704_v47 }
 0x449   : > { %8323 = vset.pattern.permute.xlu1 %v13607_v25  ;;  %v3457_v56 = vadd.f32 %v3425_v9, %v3260_v32  ;;  %8039 = vmatpush3.bf16.msra.mxu1 %v8381_v27  ;;  %v3490_v21 = vmax.f32 %v3458_v38, 0.0  ;;  %v13696_v32 = vld [vmem:[#allocation65_spill] sm:$0xff]  ;;  %v13697_v9 = vld [vmem:[#allocation62_spill] sm:$0xff] }
 0x44a   : > { %2782 = vperm.xlu1 %8323, %v10893_v34   ;;  %v3262_v62 = vadd.f32 %v3230_v12, %v3065_v16  ;;  %v1064_v15 = vmul.f32 %v11015_v1, %v13696_v32  ;;  %v1065_v26 = vmul.f32 %v11015_v1, %v13697_v9  ;;  %v13703_v27 = vld [vmem:[#allocation118_spill] sm:$0xff]  ;;  %v13705_v12 = vld [vmem:[#allocation67_spill] sm:$0xff]  ;;  %v13709_v9 = vld [vmem:[#allocation180_spill] sm:$0xff] }
 0x44b   : > { %v3489_v35 = vmax.f32 %v3457_v56, 0.0  ;;  %v11178_v22 = vpop.permute.xlu1 %2569  ;;  %v13701_v56 = vld [vmem:[#allocation125_spill] sm:$0xff]  ;;  %v1459_v55 = vmul.f32 %v11097_v39, %v13703_v27  ;;  %v11269_v38 = vld [vmem:[%s13044_s1 + $0x7] ss:$0 sm:$0xff] }
 0x44c   : > { %v1096_v8 = vadd.f32 %v1064_v15, %v13699_v48  ;;  %v1458_v43 = vmul.f32 %v11097_v39, %v13701_v56  ;;  %v13710_v48 = vld [vmem:[#allocation64_spill] sm:$0xff]  ;;  %v13712_v56 = vld [vmem:[#allocation127_spill] sm:$0xff]  ;;  %v13713_v27 = vld [vmem:[#allocation233_spill] sm:$0xff] }
 0x44d   : > { %v3514_v49 = vpack.c.bf16 %v3489_v35, %v3488_v51  ;;  %v1097_v51 = vadd.f32 %v1065_v26, %v13702_v50  ;;  %v1853_v26 = vmul.f32 %v11269_v38, %v13709_v9  ;;  %v11293_v50 = vld [vmem:[%s8721_s15 + $0xe0] sm:$0xff]  ;;  %v13718_v9 = vld [vmem:[#allocation120_spill] sm:$0xff] }
 0x44e   : > { %8324 = vset.pattern.permute.xlu1 %v13631_v28  ;;  %v1293_v35 = vadd.f32 %v1261_v17, %v1096_v8  ;;  %v2049_v17 = vmul.f32 %v11282_v19, %v10958_v20  ;;  %v1067_v8 = vmul.f32 %v11015_v1, %v13710_v48  ;;  %v11301_v20 = vld [vmem:[%s13044_s1 + $0x9] ss:$0 sm:$0xff]  ;;  %v1461_v48 = vmul.f32 %v11097_v39, %v13718_v9 }
 0x44f   : > { %2195 = vperm.xlu1 %8324, %v11073_v37   ;;  %8004 = vmatprep.mubr.bf16.mxu0 %v3514_v49  ;;  %v1066_v49 = vmul.f32 %v11015_v1, %v13705_v12  ;;  %v2246_v47 = vmul.f32 %v11301_v20, %v10988_v23  ;;  %v13714_v12 = vld [vmem:[#allocation95_spill] sm:$0xff]  ;;  %v13724_v9 = vld [vmem:[#allocation182_spill] sm:$0xff] }
 0x450   : > { %v3342_v61 = vpop.permute.xlu1 %3341 }
 0x451   : > { %v3427_v7 = vmul.f32 %v10587_v40, %v3342_v61  ;;  %v1490_v61 = vadd.f32 %v1458_v43, %v1293_v35  ;;  %v1460_v43 = vmul.f32 %v11097_v39, %v13712_v56  ;;  %v11325_v56 = vpop.permute.xlu0 %2999 }
 0x453   : > { %8325 = vset.pattern.permute.xlu1 %v13638_v13  ;;  %v3459_v29 = vadd.f32 %v3427_v7, %v3262_v62  ;;  %v13706_v62 = vld [vmem:[#allocation159_spill] sm:$0xff]  ;;  %v1687_v15 = vadd.f32 %v1655_v5, %v1490_v61 }
 0x454   : > { %2967 = vperm.xlu1 %8325, %v10807_v60   ;;  %v1656_v7 = vmul.f32 %v11257_v3, %v13706_v62 }
 0x455   : > { %v3491_v41 = vmax.f32 %v3459_v29, 0.0  ;;  %v11192_v0 = vpop.permute.xlu1 %1982  ;;  %v13707_v29 = vld [vmem:[#allocation191_spill] sm:$0xff] }
 0x457   : > { %v3515_v54 = vpack.c.bf16 %v3491_v41, %v3490_v21  ;;  %v1852_v41 = vmul.f32 %v11269_v38, %v13707_v29  ;;  %v13716_v29 = vld [vmem:[#allocation261_spill] sm:$0xff] }
 0x458   : > { %2971 = vperm.xlu1 %8325, %v11131_v11  }
 0x459   : > { %8005 = vmatmul.mubr.bf16.gmra.mrb[12].mxu0 %v3515_v54  ;;  %v1884_v35 = vadd.f32 %v1852_v41, %v1687_v15  ;;  %v2247_v41 = vmul.f32 %v11301_v20, %v13716_v29  ;;  %v13723_v29 = vld [vmem:[#allocation17_spill] sm:$0xff] }
 0x45b   : > { %v11195_v53 = vpop.permute.xlu1 %2754 }
 0x45c   : > { %8326 = vset.pattern.permute.xlu1 %v13631_v28 }
 0x45d   : > { %2207 = vperm.xlu1 %8326, %v11159_v46  }
 0x45f   : > { %v11199_v40 = vpop.permute.xlu1 %2758 }
 0x461   : > { %8327 = vset.pattern.permute.xlu1 %v13638_v13 }
 0x462   : > { %2979 = vperm.xlu1 %8327, %v10893_v34  }
 0x464   : > { %v11203_v4 = vpop.permute.xlu1 %1994 }
 0x466   : > { %8328 = vset.pattern.permute.xlu1 %v13645_v36 }
 0x467   : > { %2392 = vperm.xlu1 %8328, %v11073_v37  }
 0x469   : > { %v11207_v42 = vpop.permute.xlu1 %2766 }
 0x46b   : > { %8329 = vset.pattern.permute.xlu1 %v13646_v10 }
 0x46c   : > { %3164 = vperm.xlu1 %8329, %v10807_v60  }
 0x46e   : > { %v11211_v59 = vpop.permute.xlu1 %2179 }
 0x470   : > { %3168 = vperm.xlu1 %8329, %v11131_v11  }
 0x473   : > { %v11214_v33 = vpop.permute.xlu1 %2951 }
 0x474   : > { %8330 = vset.pattern.permute.xlu1 %v13645_v36 }
 0x475   : > { %2404 = vperm.xlu1 %8330, %v11159_v46  }
 0x477   : > { %v11218_v30 = vpop.permute.xlu1 %2955 }
 0x479   : > { %8331 = vset.pattern.permute.xlu1 %v13646_v10 }
 0x47a   : > { %3176 = vperm.xlu1 %8331, %v10893_v34  }
 0x47c   : > { %v11222_v2 = vpop.permute.xlu1 %2191 }
 0x47e   : > { %8332 = vset.pattern.permute.xlu1 %v13648_v31 }
 0x47f   : > { %2589 = vperm.xlu1 %8332, %v11073_v37  }
 0x481   : > { %v11226_v57 = vpop.permute.xlu1 %2963 }
 0x483   : > { %8333 = vset.pattern.permute.xlu1 %v13649_v6 }
 0x484   : > { %3361 = vperm.xlu1 %8333, %v10807_v60  }
 0x486   : > { %v11230_v63 = vpop.permute.xlu1 %2376 }
 0x488   : > { %3365 = vperm.xlu1 %8333, %v11131_v11   ;;  %v13700_v11 = vld [vmem:[#allocation93_spill] sm:$0xff] }
 0x489   : > { %v1262_v14 = vmul.f32 %v11026_v18, %v13700_v11  ;;  %v13711_v11 = vld [vmem:[#allocation44_spill] sm:$0xff] }
 0x48b   : > { %v11233_v45 = vpop.permute.xlu1 %3148  ;;  %v1294_v16 = vadd.f32 %v1262_v14, %v1097_v51  ;;  %v1098_v14 = vadd.f32 %v1066_v49, %v13711_v11  ;;  %v1264_v49 = vmul.f32 %v11026_v18, %v13714_v12  ;;  %v13721_v12 = vld [vmem:[#allocation161_spill] sm:$0xff] }
 0x48c   : > { %8334 = vset.pattern.permute.xlu1 %v13648_v31 }
 0x48d   : > { %2601 = vperm.xlu1 %8334, %v11159_v46   ;;  %v1491_v32 = vadd.f32 %v1459_v55, %v1294_v16  ;;  %v2050_v55 = vmul.f32 %v11282_v19, %v13713_v27  ;;  %v13715_v16 = vld [vmem:[#allocation150_spill] sm:$0xff] }
 0x48e   : > { %v1657_v61 = vmul.f32 %v11257_v3, %v13715_v16  ;;  %v1658_v16 = vmul.f32 %v11257_v3, %v13721_v12  ;;  %v11362_v12 = vld [vmem:[%s13044_s1 + $0xd] ss:$0 sm:$0xff] }
 0x48f   : > { %v11243_v60 = vpop.permute.xlu1 %3152  ;;  %v1688_v51 = vadd.f32 %v1656_v7, %v1491_v32  ;;  %v11316_v32 = vld [vmem:[%s13044_s1 + $0xa] ss:$0 sm:$0xff] }
 0x490   : > { %v2443_v23 = vmul.f32 %v11316_v32, %v11007_v44  ;;  %v11333_v44 = vld [vmem:[%s13044_s1 + $0xb] ss:$0 sm:$0xff] }
 0x491   : > { %8336 = vset.pattern.permute.xlu1 %v13649_v6  ;;  %v1885_v7 = vadd.f32 %v1853_v26, %v1688_v51  ;;  %v13720_v51 = vld [vmem:[#allocation287_spill] sm:$0xff] }
 0x492   : > { %3373 = vperm.xlu1 %8336, %v10893_v34   ;;  %v13708_v34 = vld [vmem:[#allocation88_spill] sm:$0xff] }
 0x493   : > { %v1263_v54 = vmul.f32 %v11026_v18, %v13708_v34  ;;  %v2081_v34 = vadd.f32 %v2049_v17, %v1884_v35  ;;  %v2082_v17 = vadd.f32 %v2050_v55, %v1885_v7  ;;  %v2444_v35 = vmul.f32 %v11316_v32, %v13720_v51  ;;  %v13722_v55 = vld [vmem:[#allocation235_spill] sm:$0xff] }
 0x494   : > { %v11273_v21 = vpop.permute.xlu1 %2388  ;;  %v2051_v7 = vmul.f32 %v11282_v19, %v13722_v55 }
 0x495   : > { %v1295_v5 = vadd.f32 %v1263_v54, %v1098_v14  ;;  %v13717_v54 = vld [vmem:[#allocation47_spill] sm:$0xff]  ;;  %v13719_v14 = vld [vmem:[#allocation193_spill] sm:$0xff]  ;;  %v2278_v27 = vadd.f32 %v2246_v47, %v2081_v34  ;;  %v2279_v47 = vadd.f32 %v2247_v41, %v2082_v17  ;;  %v2641_v34 = vmul.f32 %v11333_v44, %v13723_v29 }
 0x496   : > { %8337 = vset.pattern.permute.xlu1 %v13601_v58  ;;  %v1099_v15 = vadd.f32 %v1067_v8, %v13717_v54  ;;  %v1854_v26 = vmul.f32 %v11269_v38, %v13719_v14  ;;  %v2640_v8 = vmul.f32 %v11333_v44, %v11120_v24  ;;  %v11347_v24 = vld [vmem:[%s13044_s1 + $0xc] ss:$0 sm:$0xff]  ;;  %v3035_v29 = vmul.f32 %v11362_v12, %v11218_v30 }
 0x497   : > { %2014 = vperm.xlu1 %8337, %v11293_v50   ;;  %v1492_v11 = vadd.f32 %v1460_v43, %v1295_v5  ;;  %v2475_v54 = vadd.f32 %v2443_v23, %v2278_v27  ;;  %v13725_v41 = vld [vmem:[#allocation263_spill] sm:$0xff]  ;;  %v2476_v51 = vadd.f32 %v2444_v35, %v2279_v47  ;;  %v2838_v27 = vmul.f32 %v11347_v24, %v11199_v40 }
 0x498   : > { %v1296_v43 = vadd.f32 %v1264_v49, %v1099_v15  ;;  %v2837_v49 = vmul.f32 %v11347_v24, %v11195_v53  ;;  %v2248_v17 = vmul.f32 %v11301_v20, %v13725_v41  ;;  %v3034_v53 = vmul.f32 %v11362_v12, %v11214_v33  ;;  %v11381_v33 = vld [vmem:[%s13044_s1 + $0xe] ss:$0 sm:$0xff] }
 0x499   : > { %v11309_v62 = vpop.permute.xlu1 %3160  ;;  %v1689_v5 = vadd.f32 %v1657_v61, %v1492_v11  ;;  %v1855_v11 = vmul.f32 %v11269_v38, %v13724_v9  ;;  %v2672_v23 = vadd.f32 %v2640_v8, %v2475_v54  ;;  %v2052_v40 = vmul.f32 %v11282_v19, %v10980_v52  ;;  %v11374_v8 = vpop.permute.xlu0 %3011  ;;  %v13728_v9 = vld [vmem:[#allocation52_spill] sm:$0xff] }
 0x49a   : > { %v1493_v15 = vadd.f32 %v1461_v48, %v1296_v43  ;;  %v11367_v48 = vld [vmem:[%s8721_s15 + $0xc8] sm:$0xff]  ;;  %v2673_v55 = vadd.f32 %v2641_v34, %v2476_v51  ;;  %v2249_v34 = vmul.f32 %v11301_v20, %v13728_v9  ;;  %v3232_v41 = vmul.f32 %v11381_v33, %v11243_v60 }
 0x49b   : > { %8338 = vset.pattern.permute.xlu1 %v13607_v25  ;;  %v1886_v14 = vadd.f32 %v1854_v26, %v1689_v5  ;;  %v13726_v5 = vld [vmem:[#allocation289_spill] sm:$0xff]  ;;  %v2869_v47 = vadd.f32 %v2837_v49, %v2672_v23  ;;  %v11394_v51 = vld [vmem:[%s13044_s1 + $0xf] ss:$0 sm:$0xff] }
 0x49c   : > { %2786 = vperm.xlu1 %8338, %v11073_v37   ;;  %v1690_v26 = vadd.f32 %v1658_v16, %v1493_v15  ;;  %v2445_v35 = vmul.f32 %v11316_v32, %v13726_v5  ;;  %v3231_v16 = vmul.f32 %v11381_v33, %v11233_v45  ;;  %v13727_v15 = vld [vmem:[#allocation18_spill] sm:$0xff] }
 0x49d   : > { %v2083_v43 = vadd.f32 %v2051_v7, %v1886_v14  ;;  %v2642_v52 = vmul.f32 %v11333_v44, %v13727_v15  ;;  %v2870_v14 = vadd.f32 %v2838_v27, %v2673_v55  ;;  %v3066_v30 = vadd.f32 %v3034_v53, %v2869_v47  ;;  %v13730_v27 = vld [vmem:[#allocation87_spill] sm:$0xff]  ;;  %v3157_v9 = vpop.permute.xlu0 %3156 }
 0x49e   : > { %v11351_v61 = vpop.permute.xlu1 %2573  ;;  %v1887_v7 = vadd.f32 %v1855_v11, %v1690_v26  ;;  %v2446_v60 = vmul.f32 %v11316_v32, %v13730_v27  ;;  %v13731_v47 = vld [vmem:[#allocation83_spill] sm:$0xff] }
 0x49f   : > { %v2280_v54 = vadd.f32 %v2248_v17, %v2083_v43  ;;  %v13729_v17 = vld [vmem:[#allocation80_spill] sm:$0xff]  ;;  %v3067_v53 = vadd.f32 %v3035_v29, %v2870_v14  ;;  %v3263_v5 = vadd.f32 %v3231_v16, %v3066_v30  ;;  %v3036_v15 = vmul.f32 %v11362_v12, %v13731_v47 }
 0x4a0   : > { %2790 = vperm.xlu1 %8338, %v11367_v48   ;;  %v2839_v23 = vmul.f32 %v11347_v24, %v13729_v17  ;;  %v2084_v26 = vadd.f32 %v2052_v40, %v1887_v7  ;;  %v11401_v43 = vld [vmem:[%s8721_s15 + $0xf8] sm:$0xff]  ;;  %v3233_v29 = vmul.f32 %v11381_v33, %v3157_v9 }
 0x4a1   : > { %v2477_v11 = vadd.f32 %v2445_v35, %v2280_v54  ;;  %v2643_v54 = vmul.f32 %v11333_v44, %v11178_v22  ;;  %v3264_v40 = vadd.f32 %v3232_v41, %v3067_v53  ;;  %v3037_v22 = vmul.f32 %v11362_v12, %v11226_v57 }
 0x4a3   : > { %v3346_v49 = vpop.permute.xlu1 %3345  ;;  %v2674_v55 = vadd.f32 %v2642_v52, %v2477_v11  ;;  %v2840_v52 = vmul.f32 %v11347_v24, %v11207_v42  ;;  %v3234_v42 = vmul.f32 %v11381_v33, %v11309_v62 }
 0x4a4   : > { %v3428_v45 = vmul.f32 %v11394_v51, %v3346_v49  ;;  %8340 = vset.pattern.permute.xlu1 %v13601_v58  ;;  %v2281_v58 = vadd.f32 %v2249_v34, %v2084_v26 }
 0x4a5   : > { %2026 = vperm.xlu1 %8340, %v11401_v43   ;;  %v2871_v17 = vadd.f32 %v2839_v23, %v2674_v55  ;;  %v13732_v23 = vld [vmem:[#allocation216_spill] sm:$0xff] }
 0x4a6   : > { %v3460_v7 = vadd.f32 %v3428_v45, %v3263_v5  ;;  %v2478_v16 = vadd.f32 %v2446_v60, %v2281_v58  ;;  %v3430_v26 = vmul.f32 %v11394_v51, %v13732_v23 }
 0x4a7   : > { %v3350_v35 = vpop.permute.xlu1 %3349  ;;  %v3068_v34 = vadd.f32 %v3036_v15, %v2871_v17  ;;  %v11445_v17 = vld [vmem:[%s13046_s3 + $0x1] ss:$0 sm:$0xff] }
 0x4a8   : > { %v3429_v49 = vmul.f32 %v11394_v51, %v3350_v35  ;;  %v2675_v30 = vadd.f32 %v2643_v54, %v2478_v16  ;;  %v3492_v41 = vmax.f32 %v3460_v7, 0.0 }
 0x4a9   : > { %8341 = vset.pattern.permute.xlu1 %v13607_v25  ;;  %v3265_v27 = vadd.f32 %v3233_v29, %v3068_v34 }
 0x4aa   : > { %v3461_v14 = vadd.f32 %v3429_v49, %v3264_v40  ;;  %2798 = vperm.xlu1 %8341, %v11159_v46   ;;  %v2872_v60 = vadd.f32 %v2840_v52, %v2675_v30 }
 0x4ab   : > { %v3462_v55 = vadd.f32 %v3430_v26, %v3265_v27 }
 0x4ac   : > { %v3493_v45 = vmax.f32 %v3461_v14, 0.0  ;;  %v11418_v11 = vpop.permute.xlu1 %2585  ;;  %v3069_v5 = vadd.f32 %v3037_v22, %v2872_v60 }
 0x4ad   : > { %v3494_v58 = vmax.f32 %v3462_v55, 0.0 }
 0x4ae   : > { %8342 = vset.pattern.permute.xlu1 %v13631_v28  ;;  %v3516_v53 = vpack.c.bf16 %v3493_v45, %v3492_v41  ;;  %v3266_v47 = vadd.f32 %v3234_v42, %v3069_v5 }
 0x4af   : > { %2211 = vperm.xlu1 %8342, %v11293_v50  }
 0x4b0   : > { %8008 = vmatprep.mubr.bf16.mxu0 %v3516_v53 }
 0x4b1   : > { %v3358_v57 = vpop.permute.xlu1 %3357 }
 0x4b2   : > { %v3431_v15 = vmul.f32 %v11394_v51, %v3358_v57 }
 0x4b3   : > { %8343 = vset.pattern.permute.xlu1 %v13638_v13 }
 0x4b4   : > { %v3463_v9 = vadd.f32 %v3431_v15, %v3266_v47  ;;  %2983 = vperm.xlu1 %8343, %v11073_v37  }
 0x4b6   : > { %v3495_v35 = vmax.f32 %v3463_v9, 0.0  ;;  %v11429_v62 = vpop.permute.xlu1 %1998 }
 0x4b8   : > { %2987 = vperm.xlu1 %8343, %v11367_v48   ;;  %v3517_v54 = vpack.c.bf16 %v3495_v35, %v3494_v58 }
 0x4ba   : > { %8009 = vmatmul.mubr.bf16.gmra.mrb[16].mxu0 %v3517_v54 }
 0x4bb   : > { %v11432_v40 = vpop.permute.xlu1 %2770 }
 0x4bc   : > { %8345 = vset.pattern.permute.xlu1 %v13631_v28 }
 0x4bd   : > { %2223 = vperm.xlu1 %8345, %v11401_v43  }
 0x4bf   : > { %v11436_v7 = vpop.permute.xlu1 %2774 }
 0x4c1   : > { %8346 = vset.pattern.permute.xlu1 %v13638_v13 }
 0x4c2   : > { %2995 = vperm.xlu1 %8346, %v11159_v46  }
 0x4c4   : > { %v11440_v49 = vpop.permute.xlu1 %2010 }
 0x4c6   : > { %8347 = vset.pattern.permute.xlu1 %v13645_v36  ;;  %v7994_v28 = vpop.f32.mrb[0].mxu0 }
 0x4c7   : > { %2408 = vperm.xlu1 %8347, %v11293_v50   ;;  %v3636_v29 = vadd.f32 %v7994_v28, %v11445_v17  ;;  %v3627_v16 = vpop.f32.mrb[1].mxu0 }
 0x4c8   : > { %v3628_v52 = vadd.f32 %v11445_v17, %v3627_v16  ;;  %v7995_v34 = vpop.f32.mrb[2].mxu0 }
 0x4c9   : > { %v11451_v14 = vpop.permute.xlu1 %2782  ;;  %v3639_v30 = vadd.f32 %v7995_v34, %v11445_v17  ;;  %v3630_v22 = vpop.f32.mrb[3].mxu0  ;;  %v3756_v45 = vmax.f32 %v3636_v29, 0.0 }
 0x4ca   : > { %v3631_v41 = vadd.f32 %v11445_v17, %v3630_v22  ;;  %v3754_v26 = vmax.f32 %v3628_v52, 0.0 }
 0x4cb   : > { %8348 = vset.pattern.permute.xlu1 %v13646_v10  ;;  %v3757_v23 = vmax.f32 %v3639_v30, 0.0 }
 0x4cc   : > { %3180 = vperm.xlu1 %8348, %v11073_v37   ;;  %v3755_v27 = vmax.f32 %v3631_v41, 0.0 }
 0x4cd   : > { %v3787_v60 = vpack.c.bf16 %v3757_v23, %v3756_v45 }
 0x4ce   : > { %v11457_v42 = vpop.permute.xlu1 %2195  ;;  %v7998_v53 = vpop.f32.mrb[4].mxu0  ;;  %v3786_v5 = vpack.c.bf16 %v3755_v27, %v3754_v26 }
 0x4cf   : > { %v3652_v57 = vadd.f32 %v7998_v53, %v11445_v17  ;;  %v3643_v55 = vpop.f32.mrb[5].mxu0 }
 0x4d0   : > { %3184 = vperm.xlu1 %8348, %v11367_v48   ;;  %v3644_v47 = vadd.f32 %v11445_v17, %v3643_v55  ;;  %v7999_v15 = vpop.f32.mrb[6].mxu0  ;;  %8040 = vmatprep.mubr.bf16.mxu1 %v3786_v5 }
 0x4d1   : > { %v3655_v9 = vadd.f32 %v7999_v15, %v11445_v17  ;;  %v3646_v58 = vpop.f32.mrb[7].mxu0  ;;  %8041 = vmatmul.mubr.bf16.vlgmr.msra.gmra.mrb[0].mxu1 %v3787_v60  ;;  %v3760_v28 = vmax.f32 %v3652_v57, 0.0 }
 0x4d2   : > { %v3647_v35 = vadd.f32 %v11445_v17, %v3646_v58  ;;  %v3758_v16 = vmax.f32 %v3644_v47, 0.0 }
 0x4d3   : > { %v11464_v54 = vpop.permute.xlu1 %2967  ;;  %v3761_v29 = vmax.f32 %v3655_v9, 0.0 }
 0x4d4   : > { %8350 = vset.pattern.permute.xlu1 %v13645_v36  ;;  %v3759_v52 = vmax.f32 %v3647_v35, 0.0 }
 0x4d5   : > { %2420 = vperm.xlu1 %8350, %v11401_v43   ;;  %v3789_v34 = vpack.c.bf16 %v3761_v29, %v3760_v28 }
 0x4d6   : > { %v3788_v30 = vpack.c.bf16 %v3759_v52, %v3758_v16  ;;  %v8002_v41 = vpop.f32.mrb[8].mxu0  ;;  %v13733_v16 = vld [vmem:[#allocation69_spill] sm:$0xff] }
 0x4d7   : > { %v11468_v22 = vpop.permute.xlu1 %2971  ;;  %v3668_v45 = vadd.f32 %v8002_v41, %v11445_v17  ;;  %v3659_v23 = vpop.f32.mrb[9].mxu0  ;;  %v1068_v52 = vmul.f32 %v11015_v1, %v13733_v16  ;;  %v13735_v41 = vld [vmem:[#allocation90_spill] sm:$0xff] }
 0x4d8   : > { %v3660_v26 = vadd.f32 %v11445_v17, %v3659_v23  ;;  %v8003_v27 = vpop.f32.mrb[10].mxu0  ;;  %8044 = vmatprep.mubr.bf16.mxu1 %v3788_v30  ;;  %v13736_v23 = vld [vmem:[#allocation46_spill] sm:$0xff] }
 0x4d9   : > { %8351 = vset.pattern.permute.xlu1 %v13646_v10  ;;  %v3671_v36 = vadd.f32 %v8003_v27, %v11445_v17  ;;  %v3662_v60 = vpop.f32.mrb[11].mxu0  ;;  %8045 = vmatmul.mubr.bf16.gmra.mrb[4].mxu1 %v3789_v34  ;;  %v3764_v5 = vmax.f32 %v3668_v45, 0.0  ;;  %v13734_v34 = vld [vmem:[#allocation66_spill] sm:$0xff]  ;;  %v1265_v45 = vmul.f32 %v11026_v18, %v13735_v41  ;;  %v13743_v41 = vld [vmem:[#allocation195_spill] sm:$0xff] }
 0x4da   : > { %3192 = vperm.xlu1 %8351, %v11159_v46   ;;  %v3663_v53 = vadd.f32 %v11445_v17, %v3662_v60  ;;  %v3762_v47 = vmax.f32 %v3660_v26, 0.0  ;;  %v1069_v30 = vmul.f32 %v11015_v1, %v13734_v34  ;;  %v1100_v26 = vadd.f32 %v1068_v52, %v13736_v23  ;;  %v13742_v52 = vld [vmem:[#allocation163_spill] sm:$0xff] }
 0x4db   : > { %v3765_v57 = vmax.f32 %v3671_v36, 0.0  ;;  %v13738_v36 = vld [vmem:[#allocation129_spill] sm:$0xff]  ;;  %v1660_v34 = vmul.f32 %v11257_v3, %v13742_v52  ;;  %v1856_v23 = vmul.f32 %v11269_v38, %v13743_v41  ;;  %v2447_v52 = vmul.f32 %v11316_v32, %v11230_v63 }
 0x4dc   : > { %v11476_v55 = vpop.permute.xlu1 %2207  ;;  %v3763_v15 = vmax.f32 %v3663_v53, 0.0  ;;  %v1462_v60 = vmul.f32 %v11097_v39, %v13738_v36 }
 0x4dd   : > { %v3791_v9 = vpack.c.bf16 %v3765_v57, %v3764_v5  ;;  %v1297_v5 = vadd.f32 %v1265_v45, %v1100_v26  ;;  %v13740_v57 = vld [vmem:[#allocation122_spill] sm:$0xff]  ;;  %v13744_v26 = vld [vmem:[#allocation184_spill] sm:$0xff] }
 0x4de   : > { %8352 = vset.pattern.permute.xlu1 %v13648_v31  ;;  %v3790_v58 = vpack.c.bf16 %v3763_v15, %v3762_v47  ;;  %v1463_v47 = vmul.f32 %v11097_v39, %v13740_v57  ;;  %v13741_v15 = vld [vmem:[#allocation152_spill] sm:$0xff]  ;;  %v1857_v36 = vmul.f32 %v11269_v38, %v13744_v26 }
 0x4df   : > { %2605 = vperm.xlu1 %8352, %v11293_v50   ;;  %v1494_v16 = vadd.f32 %v1462_v60, %v1297_v5  ;;  %v13746_v5 = vld [vmem:[#allocation237_spill] sm:$0xff] }
 0x4e0   : > { %8048 = vmatprep.mubr.bf16.mxu1 %v3790_v58  ;;  %v2054_v57 = vmul.f32 %v11282_v19, %v13746_v5 }
 0x4e1   : > { %v11480_v35 = vpop.permute.xlu1 %2979  ;;  %8049 = vmatmul.mubr.bf16.gmra.mrb[8].mxu1 %v3791_v9  ;;  %v1659_v9 = vmul.f32 %v11257_v3, %v13741_v15  ;;  %v13747_v15 = vld [vmem:[#allocation99_spill] sm:$0xff] }
 0x4e3   : > { %8353 = vset.pattern.permute.xlu1 %v13649_v6  ;;  %v1691_v45 = vadd.f32 %v1659_v9, %v1494_v16  ;;  %v1268_v9 = vmul.f32 %v11026_v18, %v13747_v15  ;;  %v2841_v15 = vmul.f32 %v11347_v24, %v11432_v40  ;;  %v2056_v40 = vmul.f32 %v11282_v19, %v11203_v4 }
 0x4e4   : > { %3377 = vperm.xlu1 %8353, %v11073_v37  }
 0x4e6   : > { %v11484_v28 = vpop.permute.xlu1 %2392 }
 0x4e8   : > { %3381 = vperm.xlu1 %8353, %v11367_v48   ;;  %v13737_v48 = vld [vmem:[#allocation97_spill] sm:$0xff] }
 0x4e9   : > { %v1266_v27 = vmul.f32 %v11026_v18, %v13737_v48 }
 0x4eb   : > { %v11487_v29 = vpop.permute.xlu1 %3164 }
 0x4ec   : > { %8355 = vset.pattern.permute.xlu1 %v13648_v31  ;;  %v13739_v31 = vld [vmem:[#allocation49_spill] sm:$0xff] }
 0x4ed   : > { %2617 = vperm.xlu1 %8355, %v11401_v43   ;;  %v1101_v53 = vadd.f32 %v1069_v30, %v13739_v31  ;;  %v2053_v31 = vmul.f32 %v11282_v19, %v11192_v0 }
 0x4ef   : > { %v11497_v37 = vpop.permute.xlu1 %3168  ;;  %v1298_v58 = vadd.f32 %v1266_v27, %v1101_v53  ;;  %v1888_v53 = vadd.f32 %v1856_v23, %v1691_v45  ;;  %v13750_v23 = vld [vmem:[#allocation124_spill] sm:$0xff] }
 0x4f0   : > { %v11541_v45 = vld [vmem:[%s8721_s15 + $0xf0] sm:$0xff]  ;;  %v3236_v4 = vmul.f32 %v11381_v33, %v11497_v37 }
 0x4f1   : > { %8356 = vset.pattern.permute.xlu1 %v13649_v6  ;;  %v1495_v30 = vadd.f32 %v1463_v47, %v1298_v58  ;;  %v2250_v47 = vmul.f32 %v11301_v20, %v11211_v59  ;;  %v13751_v59 = vld [vmem:[#allocation291_spill] sm:$0xff] }
 0x4f2   : > { %3389 = vperm.xlu1 %8356, %v11159_v46   ;;  %v13745_v46 = vld [vmem:[#allocation68_spill] sm:$0xff]  ;;  %v2448_v26 = vmul.f32 %v11316_v32, %v13751_v59 }
 0x4f3   : > { %v1071_v27 = vmul.f32 %v11015_v1, %v13745_v46  ;;  %v1692_v60 = vadd.f32 %v1660_v34, %v1495_v30  ;;  %v2085_v1 = vadd.f32 %v2053_v31, %v1888_v53  ;;  %v13749_v34 = vld [vmem:[#allocation51_spill] sm:$0xff]  ;;  %v1465_v30 = vmul.f32 %v11097_v39, %v13750_v23  ;;  %v13753_v53 = vld [vmem:[#allocation21_spill] sm:$0xff] }
 0x4f4   : > { %v11515_v48 = vpop.permute.xlu1 %2404  ;;  %v2644_v31 = vmul.f32 %v11333_v44, %v11351_v61  ;;  %v2645_v39 = vmul.f32 %v11333_v44, %v13753_v53  ;;  %v3039_v23 = vmul.f32 %v11362_v12, %v11468_v22 }
 0x4f5   : > { %v1889_v58 = vadd.f32 %v1857_v36, %v1692_v60  ;;  %v1103_v41 = vadd.f32 %v1071_v27, %v13749_v34  ;;  %v2282_v36 = vadd.f32 %v2250_v47, %v2085_v1  ;;  %v13752_v60 = vld [vmem:[#allocation165_spill] sm:$0xff]  ;;  %v3038_v1 = vmul.f32 %v11362_v12, %v11464_v54 }
 0x4f6   : > { %8357 = vset.pattern.permute.xlu1 %v13607_v25  ;;  %v13748_v25 = vld [vmem:[#allocation265_spill] sm:$0xff]  ;;  %v1662_v63 = vmul.f32 %v11257_v3, %v13752_v60 }
 0x4f7   : > { %2802 = vperm.xlu1 %8357, %v11293_v50   ;;  %v2251_v16 = vmul.f32 %v11301_v20, %v13748_v25  ;;  %v2086_v18 = vadd.f32 %v2054_v57, %v1889_v58  ;;  %v1300_v46 = vadd.f32 %v1268_v9, %v1103_v41  ;;  %v2479_v5 = vadd.f32 %v2447_v52, %v2282_v36  ;;  %v13754_v25 = vld [vmem:[#allocation186_spill] sm:$0xff] }
 0x4f8   : > { %v1859_v47 = vmul.f32 %v11269_v38, %v13754_v25 }
 0x4f9   : > { %v11531_v0 = vpop.permute.xlu1 %3176  ;;  %v2283_v27 = vadd.f32 %v2251_v16, %v2086_v18  ;;  %v1497_v58 = vadd.f32 %v1465_v30, %v1300_v46  ;;  %v2676_v9 = vadd.f32 %v2644_v31, %v2479_v5  ;;  %v2842_v16 = vmul.f32 %v11347_v24, %v11436_v7  ;;  %v8533_v31 = vld [vmem:[%s8721_s15 + $0xe8] sm:$0xff] }
 0x4fa   : > { %v3235_v30 = vmul.f32 %v11381_v33, %v11487_v29  ;;  %v2253_v7 = vmul.f32 %v11301_v20, %v11222_v2  ;;  %v2450_v29 = vmul.f32 %v11316_v32, %v11273_v21  ;;  %v2844_v21 = vmul.f32 %v11347_v24, %v11451_v14 }
 0x4fb   : > { %2810 = vperm.xlu1 %8357, %v11541_v45   ;;  %v2480_v61 = vadd.f32 %v2448_v26, %v2283_v27  ;;  %v1694_v52 = vadd.f32 %v1662_v63, %v1497_v58  ;;  %v2873_v41 = vadd.f32 %v2841_v15, %v2676_v9  ;;  %v3173_v63 = vpop.permute.xlu0 %3172  ;;  %v3238_v14 = vmul.f32 %v11381_v33, %v11531_v0  ;;  %v8383_v0 = vld [vmem:[%s13045_s2 + $0x88] sm:$0xff]  }
 0x4fc   : > { %v3237_v5 = vmul.f32 %v11381_v33, %v3173_v63 }
 0x4fd   : > { %v2677_v34 = vadd.f32 %v2645_v39, %v2480_v61  ;;  %v1891_v18 = vadd.f32 %v1859_v47, %v1694_v52  ;;  %v3070_v26 = vadd.f32 %v3038_v1, %v2873_v41  ;;  %v3041_v47 = vmul.f32 %v11362_v12, %v11480_v35  ;;  %v13756_v52 = vld [vmem:[#allocation85_spill] sm:$0xff] }
 0x4fe   : > { %v11554_v57 = vpop.permute.xlu1 %2589  ;;  %v8382_v35 = vld [vmem:[%s13045_s2 + $0x80] sm:$0xff]  }
 0x4ff   : > { %2814 = vperm.xlu1 %8357, %v11401_v43   ;;  %v2874_v54 = vadd.f32 %v2842_v16, %v2677_v34  ;;  %v2088_v22 = vadd.f32 %v2056_v40, %v1891_v18  ;;  %v3267_v60 = vadd.f32 %v3235_v30, %v3070_v26  ;;  %v13755_v16 = vld [vmem:[#allocation218_spill] sm:$0xff]  ;;  %v3269_v40 = vadd.f32 %v3237_v5, %v13756_v52 }
 0x500   : > { %v3434_v1 = vmul.f32 %v11394_v51, %v13755_v16  ;;  %8072 = vmatprep.subr.bf16.mxu0 %v8382_v35 }
 0x501   : > { %v3071_v46 = vadd.f32 %v3039_v23, %v2874_v54  ;;  %v2285_v2 = vadd.f32 %v2253_v7, %v2088_v22  ;;  %8073 = vmatpush3.bf16.msra.mxu0 %v8382_v35 }
 0x502   : > { %v3466_v30 = vadd.f32 %v3434_v1, %v3269_v40  ;;  %8074 = vmatprep.subr.bf16.mxu0 %v8383_v0 }
 0x503   : > { %8359 = vset.pattern.permute.xlu1 %v13638_v13  ;;  %v3362_v59 = vpop.permute.xlu1 %3361  ;;  %v2647_v13 = vmul.f32 %v11333_v44, %v11418_v11  ;;  %v3268_v53 = vadd.f32 %v3236_v4, %v3071_v46  ;;  %v2482_v15 = vadd.f32 %v2450_v29, %v2285_v2  ;;  %v8384_v4 = vld [vmem:[%s13045_s2 + $0x90] sm:$0xff]   ;;  %v8386_v29 = vld [vmem:[%s13045_s2 + $0xa0] sm:$0xff]   ;;  %v8389_v2 = vld [vmem:[%s13045_s2 + $0xb8] sm:$0xff]  }
 0x504   : > { %v3432_v36 = vmul.f32 %v11394_v51, %v3362_v59  ;;  %3003 = vperm.xlu1 %8359, %v8533_v31   ;;  %v3498_v59 = vmax.f32 %v3466_v30, 0.0 }
 0x505   : > { %v2679_v25 = vadd.f32 %v2647_v13, %v2482_v15  ;;  %8075 = vmatpush3.bf16.msra.mxu0 %v8383_v0  ;;  %v11664_v0 = vld [vmem:[%s13044_s1 + $0x4] ss:$0 sm:$0xff] }
 0x506   : > { %v3464_v39 = vadd.f32 %v3432_v36, %v3267_v60  ;;  %8076 = vmatprep.subr.bf16.mxu0 %v8384_v4 }
 0x507   : > { %v3366_v27 = vpop.permute.xlu1 %3365  ;;  %v2876_v34 = vadd.f32 %v2844_v21, %v2679_v25 }
 0x508   : > { %v3433_v37 = vmul.f32 %v11394_v51, %v3366_v27  ;;  %3007 = vperm.xlu1 %8359, %v11541_v45   ;;  %v3496_v61 = vmax.f32 %v3464_v39, 0.0 }
 0x509   : > { %v3073_v23 = vadd.f32 %v3041_v47, %v2876_v34  ;;  %8077 = vmatpush3.bf16.msra.mxu0 %v8384_v4  ;;  %v13761_v4 = vld [vmem:[#allocation50_spill] sm:$0xff] }
 0x50a   : > { %v3465_v58 = vadd.f32 %v3433_v37, %v3268_v53 }
 0x50c   : > { %v3497_v9 = vmax.f32 %v3465_v58, 0.0  ;;  %8361 = vset.pattern.permute.xlu1 %v13646_v10  ;;  %v11588_v11 = vpop.permute.xlu1 %2601 }
 0x50d   : > { %3196 = vperm.xlu1 %8361, %v11293_v50   ;;  %v3270_v50 = vadd.f32 %v3238_v14, %v3073_v23  ;;  %v11655_v23 = vld [vmem:[%s13044_s1 + $0x3] ss:$0 sm:$0xff] }
 0x50e   : > { %v3518_v41 = vpack.c.bf16 %v3497_v9, %v3496_v61 }
 0x510   : > { %8012 = vmatprep.mubr.bf16.mxu0 %v3518_v41 }
 0x511   : > { %3204 = vperm.xlu1 %8361, %v11541_v45   ;;  %v3374_v10 = vpop.permute.xlu1 %3373 }
 0x512   : > { %v3435_v18 = vmul.f32 %v11394_v51, %v3374_v10  ;;  %v13758_v10 = vld [vmem:[#allocation72_spill] sm:$0xff] }
 0x513   : > { %v1072_v30 = vmul.f32 %v11655_v23, %v13758_v10 }
 0x514   : > { %v3467_v7 = vadd.f32 %v3435_v18, %v3270_v50  ;;  %v13759_v50 = vld [vmem:[#allocation70_spill] sm:$0xff] }
 0x515   : > { %3208 = vperm.xlu1 %8361, %v11401_v43   ;;  %v8385_v43 = vld [vmem:[%s13045_s2 + $0x98] sm:$0xff]   ;;  %v1073_v18 = vmul.f32 %v11655_v23, %v13759_v50 }
 0x516   : > { %v3499_v54 = vmax.f32 %v3467_v7, 0.0  ;;  %v11605_v26 = vpop.permute.xlu1 %2014  ;;  %8078 = vmatprep.subr.bf16.mxu0 %v8385_v43  ;;  %v13760_v7 = vld [vmem:[#allocation94_spill] sm:$0xff] }
 0x517   : > { %8079 = vmatpush3.bf16.msra.mxu0 %v8385_v43  ;;  %v13762_v43 = vld [vmem:[#allocation101_spill] sm:$0xff] }
 0x518   : > { %v3519_v36 = vpack.c.bf16 %v3499_v54, %v3498_v59  ;;  %8080 = vmatprep.subr.bf16.mxu0 %v8386_v29  ;;  %v1269_v59 = vmul.f32 %v11664_v0, %v13760_v7  ;;  %v13770_v7 = vld [vmem:[#allocation71_spill] sm:$0xff] }
 0x519   : > { %8363 = vset.pattern.permute.xlu1 %v13649_v6  ;;  %v8387_v6 = vld [vmem:[%s13045_s2 + $0xa8] sm:$0xff]  }
 0x51a   : > { %3397 = vperm.xlu1 %8363, %v8533_v31   ;;  %8013 = vmatmul.mubr.bf16.gmra.mrb[20].mxu0 %v3519_v36  ;;  %v13757_v31 = vmov 0   ;;  %v1104_v36 = vadd.f32 %v1072_v30, %v13761_v4  ;;  %v13769_v30 = vld [vmem:[#allocation188_spill] sm:$0xff] }
 0x51b   : > { %v11614_v22 = vpop.permute.xlu1 %2786  ;;  %8081 = vmatpush3.bf16.msra.mxu0 %v8386_v29  ;;  %v1270_v29 = vmul.f32 %v11664_v0, %v13762_v43  ;;  %v1861_v50 = vmul.f32 %v11269_v38, %v13769_v30  ;;  %v13771_v43 = vld [vmem:[#allocation241_spill] sm:$0xff] }
 0x51c   : > { %8082 = vmatprep.subr.bf16.mxu0 %v8387_v6  ;;  %v13777_v30 = vld [vmem:[#allocation169_spill] sm:$0xff] }
 0x51e   : > { %3401 = vperm.xlu1 %8363, %v11541_v45   ;;  %v8388_v45 = vld [vmem:[%s13045_s2 + $0xb0] sm:$0xff]  }
 0x51f   : > { %v11620_v46 = vpop.permute.xlu1 %2790  ;;  %8083 = vmatpush3.bf16.msra.mxu0 %v8387_v6  ;;  %v11674_v6 = vld [vmem:[%s13044_s1 + $0x5] ss:$0 sm:$0xff] }
 0x520   : > { %8084 = vmatprep.subr.bf16.mxu0 %v8388_v45 }
 0x522   : > { %8365 = vset.pattern.permute.xlu1 %v13757_v31  ;;  %v13763_v31 = vld [vmem:[#allocation133_spill] sm:$0xff] }
 0x523   : > { %8085 = vmatpush3.bf16.msra.mxu0 %v8388_v45  ;;  %v1466_v45 = vmul.f32 %v11674_v6, %v13763_v31  ;;  %v2254_v31 = vmul.f32 %v11301_v20, %v11457_v42  ;;  %v13776_v42 = vld [vmem:[#allocation295_spill] sm:$0xff] }
 0x524   : > { %v11626_v60 = vpop.permute.xlu1 %2026  ;;  %8086 = vmatprep.subr.bf16.mxu0 %v8389_v2 }
 0x527   : > { %8087 = vmatpush3.bf16.msra.mxu0 %v8389_v2  ;;  %v13764_v2 = vld [vmem:[#allocation53_spill] sm:$0xff] }
 0x529   : > { %v11631_v63 = vpop.permute.xlu1 %2798 }
 0x52c   : > { %v8006_v27 = vpop.f32.mrb[12].mxu0 }
 0x52d   : > { %v3684_v13 = vadd.f32 %v8006_v27, %v11445_v17  ;;  %v3675_v39 = vpop.f32.mrb[13].mxu0  ;;  %v1105_v27 = vadd.f32 %v1073_v18, %v13764_v2  ;;  %v2057_v18 = vmul.f32 %v11282_v19, %v11429_v62 }
 0x52e   : > { %v11637_v53 = vpop.permute.xlu1 %2211  ;;  %v3676_v37 = vadd.f32 %v11445_v17, %v3675_v39  ;;  %v8007_v5 = vpop.f32.mrb[14].mxu0  ;;  %v13765_v39 = vld [vmem:[#allocation126_spill] sm:$0xff] }
 0x52f   : > { %v3687_v15 = vadd.f32 %v8007_v5, %v11445_v17  ;;  %v3678_v21 = vpop.f32.mrb[15].mxu0  ;;  %v3768_v25 = vmax.f32 %v3684_v13, 0.0  ;;  %v1301_v13 = vadd.f32 %v1269_v59, %v1104_v36  ;;  %v13766_v5 = vld [vmem:[#allocation156_spill] sm:$0xff]  ;;  %v1075_v59 = vmul.f32 %v11655_v23, %v13770_v7 }
 0x530   : > { %v3679_v58 = vadd.f32 %v11445_v17, %v3678_v21  ;;  %v3766_v61 = vmax.f32 %v3676_v37, 0.0  ;;  %v1467_v37 = vmul.f32 %v11674_v6, %v13765_v39  ;;  %v1302_v21 = vadd.f32 %v1270_v29, %v1105_v27  ;;  %v13773_v39 = vld [vmem:[#allocation269_spill] sm:$0xff]  ;;  %v13778_v7 = vld [vmem:[#allocation24_spill] sm:$0xff] }
 0x531   : > { %v3769_v47 = vmax.f32 %v3687_v15, 0.0  ;;  %v1663_v15 = vmul.f32 %v11257_v3, %v13766_v5  ;;  %v2058_v29 = vmul.f32 %v11282_v19, %v13771_v43  ;;  %v2255_v62 = vmul.f32 %v11301_v20, %v13773_v39 }
 0x532   : > { %v3767_v9 = vmax.f32 %v3679_v58, 0.0  ;;  %v1498_v58 = vadd.f32 %v1466_v45, %v1301_v13  ;;  %v13772_v45 = vld [vmem:[#allocation103_spill] sm:$0xff]  ;;  %v2451_v5 = vmul.f32 %v11316_v32, %v11484_v28  ;;  %v2649_v28 = vmul.f32 %v11333_v44, %v13778_v7  ;;  %v13782_v7 = vld [vmem:[#allocation54_spill] sm:$0xff] }
 0x533   : > { %v11642_v16 = vpop.permute.xlu1 %2983  ;;  %v3793_v1 = vpack.c.bf16 %v3769_v47, %v3768_v25  ;;  %v13767_v25 = vld [vmem:[#allocation167_spill] sm:$0xff]  ;;  %v1272_v2 = vmul.f32 %v11664_v0, %v13772_v45  ;;  %v3189_v45 = vpop.permute.xlu0 %3188 }
 0x534   : > { %v3792_v52 = vpack.c.bf16 %v3767_v9, %v3766_v61  ;;  %v1664_v47 = vmul.f32 %v11257_v3, %v13767_v25  ;;  %v13768_v61 = vld [vmem:[#allocation199_spill] sm:$0xff]  ;;  %v1695_v10 = vadd.f32 %v1663_v15, %v1498_v58  ;;  %v13775_v58 = vld [vmem:[#allocation128_spill] sm:$0xff]  ;;  %v3042_v39 = vmul.f32 %v11362_v12, %v11642_v16 }
 0x535   : > { %v1860_v9 = vmul.f32 %v11269_v38, %v13768_v61  ;;  %v13774_v15 = vld [vmem:[#allocation55_spill] sm:$0xff]  ;;  %v1469_v25 = vmul.f32 %v11674_v6, %v13775_v58  ;;  %v2452_v61 = vmul.f32 %v11316_v32, %v13776_v42  ;;  %v13780_v58 = vld [vmem:[#allocation74_spill] sm:$0xff] }
 0x536   : > { %8052 = vmatprep.mubr.bf16.mxu1 %v3792_v52  ;;  %v1499_v52 = vadd.f32 %v1467_v37, %v1302_v21  ;;  %v1107_v21 = vadd.f32 %v1075_v59, %v13774_v15 }
 0x537   : > { %v11644_v40 = vpop.permute.xlu1 %2987  ;;  %8053 = vmatmul.mubr.bf16.gmra.mrb[12].mxu1 %v3793_v1  ;;  %v1892_v36 = vadd.f32 %v1860_v9, %v1695_v10 }
 0x538   : > { %v1696_v4 = vadd.f32 %v1664_v47, %v1499_v52  ;;  %v2648_v52 = vmul.f32 %v11333_v44, %v11554_v57  ;;  %v1304_v10 = vadd.f32 %v1272_v2, %v1107_v21  ;;  %v3043_v15 = vmul.f32 %v11362_v12, %v11644_v40  ;;  %v11741_v40 = vpop.permute.xlu0 %3200 }
 0x539   : > { %v2089_v37 = vadd.f32 %v2057_v18, %v1892_v36 }
 0x53a   : > { %v1893_v13 = vadd.f32 %v1861_v50, %v1696_v4  ;;  %v1666_v50 = vmul.f32 %v11257_v3, %v13777_v30  ;;  %v2845_v4 = vmul.f32 %v11347_v24, %v11614_v22  ;;  %v1501_v43 = vadd.f32 %v1469_v25, %v1304_v10 }
 0x53b   : > { %v2286_v9 = vadd.f32 %v2254_v31, %v2089_v37  ;;  %v2060_v37 = vmul.f32 %v11282_v19, %v11440_v49  ;;  %v1076_v25 = vmul.f32 %v11655_v23, %v13780_v58  ;;  %v2454_v30 = vmul.f32 %v11316_v32, %v11515_v48 }
 0x53c   : > { %v11646_v34 = vpop.permute.xlu1 %2223  ;;  %v2090_v47 = vadd.f32 %v2058_v29, %v1893_v13  ;;  %v13779_v29 = vld [vmem:[#allocation190_spill] sm:$0xff]  ;;  %v2846_v13 = vmul.f32 %v11347_v24, %v11620_v46  ;;  %v2257_v46 = vmul.f32 %v11301_v20, %v11476_v55  ;;  %v3241_v58 = vmul.f32 %v11381_v33, %v3189_v45 }
 0x53d   : > { %v2483_v59 = vadd.f32 %v2451_v5, %v2286_v9  ;;  %v1863_v31 = vmul.f32 %v11269_v38, %v13779_v29  ;;  %v1108_v55 = vadd.f32 %v1076_v25, %v13782_v7  ;;  %v3386_v25 = vpop.permute.xlu0 %3385 }
 0x53e   : > { %v2287_v18 = vadd.f32 %v2255_v62, %v2090_v47  ;;  %v1698_v62 = vadd.f32 %v1666_v50, %v1501_v43  ;;  %v2651_v43 = vmul.f32 %v11333_v44, %v11588_v11 }
 0x53f   : > { %v2680_v2 = vadd.f32 %v2648_v52, %v2483_v59  ;;  %v13781_v52 = vld [vmem:[#allocation98_spill] sm:$0xff] }
 0x540   : > { %v2484_v57 = vadd.f32 %v2452_v61, %v2287_v18  ;;  %v1895_v47 = vadd.f32 %v1863_v31, %v1698_v62  ;;  %v1273_v10 = vmul.f32 %v11664_v0, %v13781_v52  ;;  %v2848_v62 = vmul.f32 %v11347_v24, %v11631_v63 }
 0x541   : > { %v11648_v14 = vpop.permute.xlu1 %2995  ;;  %v2877_v5 = vadd.f32 %v2845_v4, %v2680_v2  ;;  %v2061_v52 = vmul.f32 %v11282_v19, %v11605_v26 }
 0x542   : > { %v2681_v22 = vadd.f32 %v2649_v28, %v2484_v57  ;;  %v13783_v28 = vld [vmem:[#allocation137_spill] sm:$0xff]  ;;  %v1305_v2 = vadd.f32 %v1273_v10, %v1108_v55  ;;  %v3438_v10 = vmul.f32 %v11394_v51, %v3386_v25 }
 0x543   : > { %v3074_v61 = vadd.f32 %v3042_v39, %v2877_v5  ;;  %v1470_v59 = vmul.f32 %v11674_v6, %v13783_v28  ;;  %v2258_v28 = vmul.f32 %v11301_v20, %v11637_v53 }
 0x544   : > { %v2878_v16 = vadd.f32 %v2846_v13, %v2681_v22  ;;  %v13784_v13 = vld [vmem:[#allocation160_spill] sm:$0xff]  ;;  %v13785_v22 = vld [vmem:[#allocation73_spill] sm:$0xff] }
 0x545   : > { %v1667_v48 = vmul.f32 %v11257_v3, %v13784_v13  ;;  %v1079_v5 = vmul.f32 %v11655_v23, %v13785_v22 }
 0x546   : > { %v11650_v41 = vpop.permute.xlu1 %2408  ;;  %v3075_v50 = vadd.f32 %v3043_v15, %v2878_v16  ;;  %v1502_v15 = vadd.f32 %v1470_v59, %v1305_v2  ;;  %v13790_v59 = vld [vmem:[#allocation57_spill] sm:$0xff] }
 0x54b   : > { %v3181_v35 = vpop.permute.xlu1 %3180 }
 0x54c   : > { %v3239_v21 = vmul.f32 %v11381_v33, %v3181_v35  ;;  %v2092_v35 = vadd.f32 %v2060_v37, %v1895_v47 }
 0x54e   : > { %v3271_v18 = vadd.f32 %v3239_v21, %v3074_v61  ;;  %v2289_v4 = vadd.f32 %v2257_v46, %v2092_v35  ;;  %v13786_v21 = vld [vmem:[#allocation203_spill] sm:$0xff]  ;;  %v3045_v46 = vmul.f32 %v11362_v12, %v11648_v14  ;;  %v13789_v14 = vld [vmem:[#allocation132_spill] sm:$0xff] }
 0x54f   : > { %v3185_v54 = vpop.permute.xlu1 %3184  ;;  %v1864_v11 = vmul.f32 %v11269_v38, %v13786_v21  ;;  %v1473_v7 = vmul.f32 %v11674_v6, %v13789_v14 }
 0x550   : > { %v3240_v9 = vmul.f32 %v11381_v33, %v3185_v54  ;;  %v2486_v39 = vadd.f32 %v2454_v30, %v2289_v4  ;;  %v3273_v4 = vadd.f32 %v3241_v58, %v13790_v59 }
 0x552   : > { %v3272_v29 = vadd.f32 %v3240_v9, %v3075_v50  ;;  %v2683_v47 = vadd.f32 %v2651_v43, %v2486_v39  ;;  %v13787_v9 = vld [vmem:[#allocation107_spill] sm:$0xff]  ;;  %v13788_v50 = vld [vmem:[#allocation58_spill] sm:$0xff]  ;;  %v13791_v43 = vld [vmem:[#allocation173_spill] sm:$0xff]  ;;  %v3470_v2 = vadd.f32 %v3438_v10, %v3273_v4 }
 0x553   : > { %v1276_v63 = vmul.f32 %v11664_v0, %v13787_v9 }
 0x554   : > { %v11687_v1 = vpop.permute.xlu1 %2420  ;;  %v2880_v35 = vadd.f32 %v2848_v62, %v2683_v47  ;;  %v13792_v62 = vld [vmem:[#allocation194_spill] sm:$0xff]  ;;  %v2261_v47 = vmul.f32 %v11301_v20, %v11646_v34 }
 0x555   : > { %v1867_v53 = vmul.f32 %v11269_v38, %v13792_v62  ;;  %v2458_v9 = vmul.f32 %v11316_v32, %v11687_v1 }
 0x559   : > { %v11701_v27 = vpop.permute.xlu1 %3192 }
 0x55a   : > { %v3242_v45 = vmul.f32 %v11381_v33, %v11701_v27  ;;  %v2455_v27 = vmul.f32 %v11316_v32, %v11650_v41  ;;  %v3502_v41 = vmax.f32 %v3470_v2, 0.0 }
 0x55e   : > { %v11720_v36 = vpop.permute.xlu1 %2605 }
 0x55f   : > { %v2652_v22 = vmul.f32 %v11333_v44, %v11720_v36  ;;  %v3046_v36 = vmul.f32 %v11362_v12, %v11325_v56 }
 0x563   : > { %v3378_v42 = vpop.permute.xlu1 %3377 }
 0x564   : > { %v3436_v49 = vmul.f32 %v11394_v51, %v3378_v42 }
 0x566   : > { %v3468_v31 = vadd.f32 %v3436_v49, %v3271_v18  ;;  %v1699_v49 = vadd.f32 %v1667_v48, %v1502_v15  ;;  %v1111_v18 = vadd.f32 %v1079_v5, %v13788_v50 }
 0x567   : > { %v3382_v54 = vpop.permute.xlu1 %3381 }
 0x568   : > { %v3437_v57 = vmul.f32 %v11394_v51, %v3382_v54  ;;  %v3500_v42 = vmax.f32 %v3468_v31, 0.0  ;;  %v1896_v55 = vadd.f32 %v1864_v11, %v1699_v49  ;;  %v3077_v54 = vadd.f32 %v3045_v46, %v2880_v35 }
 0x569   : > { %v1308_v26 = vadd.f32 %v1276_v63, %v1111_v18  ;;  %v13794_v18 = vld [vmem:[#allocation100_spill] sm:$0xff] }
 0x56a   : > { %v3469_v37 = vadd.f32 %v3437_v57, %v3272_v29  ;;  %v1670_v29 = vmul.f32 %v11257_v3, %v13791_v43  ;;  %v2093_v31 = vadd.f32 %v2061_v52, %v1896_v55  ;;  %v3274_v13 = vadd.f32 %v3242_v45, %v3077_v54 }
 0x56b   : > { %v1505_v39 = vadd.f32 %v1473_v7, %v1308_v26  ;;  %v2064_v3 = vmul.f32 %v11282_v19, %v11626_v60  ;;  %v3049_v45 = vmul.f32 %v11362_v12, %v11374_v8  ;;  %v1275_v14 = vmul.f32 %v11664_v0, %v13794_v18  ;;  %v13795_v7 = vld [vmem:[#allocation56_spill] sm:$0xff]  ;;  %v13797_v8 = vld [vmem:[#allocation162_spill] sm:$0xff]  ;;  %v13798_v26 = vld [vmem:[#allocation205_spill] sm:$0xff] }
 0x56c   : > { %v3501_v16 = vmax.f32 %v3469_v37, 0.0  ;;  %v2618_v61 = vpop.permute.xlu1 %2617  ;;  %v2290_v37 = vadd.f32 %v2258_v28, %v2093_v31 }
 0x56d   : > { %v1702_v15 = vadd.f32 %v1670_v29, %v1505_v39  ;;  %v2655_v49 = vmul.f32 %v11333_v44, %v2618_v61  ;;  %v13796_v61 = vld [vmem:[#allocation139_spill] sm:$0xff]  ;;  %v13799_v29 = vld [vmem:[#allocation246_spill] sm:$0xff] }
 0x56e   : > { %v3520_v30 = vpack.c.bf16 %v3501_v16, %v3500_v42  ;;  %v2487_v21 = vadd.f32 %v2455_v27, %v2290_v37  ;;  %v1472_v55 = vmul.f32 %v11674_v6, %v13796_v61  ;;  %v8539_v6 = vld [vmem:[%s13044_s1 + $0x8] ss:$0 sm:$0xff] }
 0x56f   : > { %v1899_v25 = vadd.f32 %v1867_v53, %v1702_v15  ;;  %v2063_v31 = vmul.f32 %v8539_v6, %v13799_v29  ;;  %v8541_v15 = vld [vmem:[%s13044_s1 + $0xa] ss:$0 sm:$0xff] }
 0x570   : > { %8016 = vmatprep.mubr.bf16.mxu0 %v3520_v30  ;;  %v2684_v46 = vadd.f32 %v2652_v22, %v2487_v21  ;;  %v13793_v30 = vld [vmem:[#allocation75_spill] sm:$0xff] }
 0x571   : > { %v3390_v57 = vpop.permute.xlu1 %3389  ;;  %v2096_v16 = vadd.f32 %v2064_v3, %v1899_v25  ;;  %v1078_v50 = vmul.f32 %v11655_v23, %v13793_v30  ;;  %v8538_v23 = vld [vmem:[%s13044_s1 + $0x7] ss:$0 sm:$0xff]  ;;  %v13801_v3 = vld [vmem:[#allocation300_spill] sm:$0xff] }
 0x572   : > { %v3439_v48 = vmul.f32 %v11394_v51, %v3390_v57  ;;  %v1866_v0 = vmul.f32 %v8538_v23, %v13798_v26  ;;  %v2457_v21 = vmul.f32 %v8541_v15, %v13801_v3 }
 0x573   : > { %v2293_v63 = vadd.f32 %v2261_v47, %v2096_v16  ;;  %v1110_v44 = vadd.f32 %v1078_v50, %v13795_v7  ;;  %v8542_v16 = vld [vmem:[%s13044_s1 + $0xb] ss:$0 sm:$0xff]  ;;  %v13803_v50 = vld [vmem:[#allocation81_spill] sm:$0xff]  ;;  %v3244_v7 = vmul.f32 %v11381_v33, %v11741_v40 }
 0x574   : > { %v3471_v5 = vadd.f32 %v3439_v48, %v3274_v13  ;;  %v8540_v13 = vld [vmem:[%s13044_s1 + $0x9] ss:$0 sm:$0xff] }
 0x575   : > { %v2490_v10 = vadd.f32 %v2458_v9, %v2293_v63  ;;  %v1307_v59 = vadd.f32 %v1275_v14, %v1110_v44  ;;  %v13800_v48 = vld [vmem:[#allocation274_spill] sm:$0xff]  ;;  %v13802_v9 = vld [vmem:[#allocation28_spill] sm:$0xff]  ;;  %v3394_v63 = vpop.permute.xlu0 %3393  ;;  %v8544_v44 = vld [vmem:[%s13044_s1 + $0xd] ss:$0 sm:$0xff] }
 0x576   : > { %v3503_v11 = vmax.f32 %v3471_v5, 0.0  ;;  %v2803_v58 = vpop.permute.xlu1 %2802  ;;  %v2260_v39 = vmul.f32 %v8540_v13, %v13800_v48 }
 0x577   : > { %v2849_v38 = vmul.f32 %v11347_v24, %v2803_v58  ;;  %v2687_v34 = vadd.f32 %v2655_v49, %v2490_v10  ;;  %v1504_v54 = vadd.f32 %v1472_v55, %v1307_v59 }
 0x578   : > { %v3521_v42 = vpack.c.bf16 %v3503_v11, %v3502_v41 }
 0x579   : > { %v2881_v19 = vadd.f32 %v2849_v38, %v2684_v46  ;;  %v3406_v59 = vpop.permute.xlu0 %3405 }
 0x57a   : > { %v2811_v60 = vpop.permute.xlu1 %2810  ;;  %8017 = vmatmul.mubr.bf16.gmra.mrb[24].mxu0 %v3521_v42  ;;  %v3443_v26 = vmul.f32 %v11394_v51, %v3406_v59  ;;  %v8390_v59 = vld [vmem:[%s13045_s2 + $0xc0] sm:$0xff]  }
 0x57b   : > { %v3078_v52 = vadd.f32 %v3046_v36, %v2881_v19  ;;  %v2654_v19 = vmul.f32 %v8542_v16, %v13802_v9  ;;  %8120 = vmatprep.subr.bf16.mxu1 %v8390_v59 }
 0x57c   : > { %8121 = vmatpush3.bf16.msra.mxu1 %v8390_v59 }
 0x57e   : > { %v2815_v20 = vpop.permute.xlu1 %2814 }
 0x57f   : > { %v2852_v35 = vmul.f32 %v11347_v24, %v2815_v20  ;;  %v8537_v24 = vld [vmem:[%s13044_s1 + $0x6] ss:$0 sm:$0xff] }
 0x580   : > { %v1669_v4 = vmul.f32 %v8537_v24, %v13797_v8 }
 0x581   : > { %v2884_v56 = vadd.f32 %v2852_v35, %v2687_v34 }
 0x582   : > { %v1701_v43 = vadd.f32 %v1669_v4, %v1504_v54 }
 0x583   : > { %v3004_v32 = vpop.permute.xlu1 %3003  ;;  %v3081_v1 = vadd.f32 %v3049_v45, %v2884_v56 }
 0x584   : > { %v1898_v2 = vadd.f32 %v1866_v0, %v1701_v43  ;;  %v3047_v38 = vmul.f32 %v11362_v12, %v3004_v32  ;;  %v3440_v12 = vmul.f32 %v11394_v51, %v3394_v63 }
 0x586   : > { %v2095_v5 = vadd.f32 %v2063_v31, %v1898_v2  ;;  %v3079_v32 = vadd.f32 %v3047_v38, %v13803_v50  ;;  %v8545_v31 = vld [vmem:[%s13044_s1 + $0xf] ss:$0 sm:$0xff] }
 0x587   : > { %v3008_v28 = vpop.permute.xlu1 %3007 }
 0x588   : > { %v2292_v46 = vadd.f32 %v2260_v39, %v2095_v5  ;;  %v3048_v61 = vmul.f32 %v8544_v44, %v3008_v28  ;;  %v3276_v4 = vadd.f32 %v3244_v7, %v3079_v32 }
 0x58a   : > { %v2489_v20 = vadd.f32 %v2457_v21, %v2292_v46 }
 0x58c   : > { %v3197_v27 = vpop.permute.xlu1 %3196  ;;  %v2686_v14 = vadd.f32 %v2654_v19, %v2489_v20 }
 0x58d   : > { %v8010_v57 = vpop.f32.mrb[16].mxu0  ;;  %v3243_v25 = vmul.f32 %v11381_v33, %v3197_v27 }
 0x58e   : > { %v3700_v62 = vadd.f32 %v8010_v57, %v11445_v17  ;;  %v3691_v53 = vpop.f32.mrb[17].mxu0 }
 0x58f   : > { %v3692_v37 = vadd.f32 %v11445_v17, %v3691_v53  ;;  %v8011_v22 = vpop.f32.mrb[18].mxu0  ;;  %v3275_v56 = vadd.f32 %v3243_v25, %v3078_v52 }
 0x590   : > { %v3703_v41 = vadd.f32 %v8011_v22, %v11445_v17  ;;  %v3205_v11 = vpop.permute.xlu1 %3204  ;;  %v3694_v58 = vpop.f32.mrb[19].mxu0  ;;  %v3772_v42 = vmax.f32 %v3700_v62, 0.0 }
 0x591   : > { %v3695_v47 = vadd.f32 %v11445_v17, %v3694_v58  ;;  %v3770_v49 = vmax.f32 %v3692_v37, 0.0  ;;  %v8543_v17 = vld [vmem:[%s13044_s1 + $0xc] ss:$0 sm:$0xff]  ;;  %v3472_v55 = vadd.f32 %v3440_v12, %v3275_v56  ;;  %v3245_v24 = vmul.f32 %v11381_v33, %v3205_v11 }
 0x592   : > { %v3773_v36 = vmax.f32 %v3703_v41, 0.0  ;;  %v2851_v45 = vmul.f32 %v8543_v17, %v2811_v60 }
 0x593   : > { %v3771_v10 = vmax.f32 %v3695_v47, 0.0  ;;  %v3504_v0 = vmax.f32 %v3472_v55, 0.0 }
 0x594   : > { %v3795_v34 = vpack.c.bf16 %v3773_v36, %v3772_v42  ;;  %v3209_v35 = vpop.permute.xlu1 %3208  ;;  %v2883_v60 = vadd.f32 %v2851_v45, %v2686_v14 }
 0x595   : > { %v3794_v30 = vpack.c.bf16 %v3771_v10, %v3770_v49  ;;  %v3246_v18 = vmul.f32 %v11381_v33, %v3209_v35 }
 0x596   : > { %v3080_v23 = vadd.f32 %v3048_v61, %v2883_v60 }
 0x597   : > { %8056 = vmatprep.mubr.bf16.mxu1 %v3794_v30  ;;  %v3278_v8 = vadd.f32 %v3246_v18, %v3081_v1 }
 0x598   : > { %8057 = vmatmul.mubr.bf16.gmra.mrb[16].mxu1 %v3795_v34  ;;  %v3277_v6 = vadd.f32 %v3245_v24, %v3080_v23  ;;  %v11874_v24 = vld [vmem:[%s13046_s3 + $0x1] ss:$0 sm:$0xff] }
 0x599   : > { %v3398_v52 = vpop.permute.xlu1 %3397  ;;  %v3475_v29 = vadd.f32 %v3443_v26, %v3278_v8 }
 0x59a   : > { %v3441_v54 = vmul.f32 %v11394_v51, %v3398_v52  ;;  %v11854_v51 = vld [vmem:[%s13046_s3 + $0x2] ss:$0 sm:$0xff] }
 0x59b   : > { %v3507_v1 = vmax.f32 %v3475_v29, 0.0 }
 0x59c   : > { %v3473_v40 = vadd.f32 %v3441_v54, %v3276_v4 }
 0x59d   : > { %v3402_v43 = vpop.permute.xlu1 %3401 }
 0x59e   : > { %v3505_v28 = vmax.f32 %v3473_v40, 0.0  ;;  %v3442_v27 = vmul.f32 %v8545_v31, %v3402_v43 }
 0x5a0   : > { %v3474_v57 = vadd.f32 %v3442_v27, %v3277_v6  ;;  %v3522_v33 = vpack.c.bf16 %v3505_v28, %v3504_v0  ;;  %v8391_v0 = vld [vmem:[%s13045_s2 + $0xc8] sm:$0xff]  }
 0x5a1   : > { %8122 = vmatprep.subr.bf16.mxu1 %v8391_v0 }
 0x5a2   : > { %v3506_v2 = vmax.f32 %v3474_v57, 0.0  ;;  %8020 = vmatprep.mubr.bf16.mxu0 %v3522_v33  ;;  %8123 = vmatpush3.bf16.msra.mxu1 %v8391_v0  ;;  %v8392_v57 = vld [vmem:[%s13045_s2 + $0xd0] sm:$0xff]  }
 0x5a3   : > { %8124 = vmatprep.subr.bf16.mxu1 %v8392_v57 }
 0x5a4   : > { %v3523_v13 = vpack.c.bf16 %v3507_v1, %v3506_v2  ;;  %v8042_v48 = vpop.f32.mrb[0].mxu1  ;;  %v8393_v1 = vld [vmem:[%s13045_s2 + $0xd8] sm:$0xff]   ;;  %v8394_v2 = vld [vmem:[%s13045_s2 + $0xe0] sm:$0xff]  }
 0x5a5   : > { %v3915_v39 = vadd.f32 %v8042_v48, %v11854_v51  ;;  %v3906_v62 = vpop.f32.mrb[1].mxu1  ;;  %v8396_v48 = vld [vmem:[%s13045_s2 + $0xf0] sm:$0xff]  }
 0x5a6   : > { %8021 = vmatmul.mubr.bf16.gmra.mrb[28].mxu0 %v3523_v13  ;;  %v3907_v53 = vadd.f32 %v11854_v51, %v3906_v62  ;;  %v8043_v37 = vpop.f32.mrb[2].mxu1  ;;  %8125 = vmatpush3.bf16.msra.mxu1 %v8392_v57  ;;  %v8395_v13 = vld [vmem:[%s13045_s2 + $0xe8] sm:$0xff]  }
 0x5a7   : > { %v3918_v22 = vadd.f32 %v8043_v37, %v11854_v51  ;;  %v3909_v5 = vpop.f32.mrb[3].mxu1  ;;  %v4035_v3 = vmax.f32 %v3915_v39, 0.0  ;;  %8126 = vmatprep.subr.bf16.mxu1 %v8393_v1  ;;  %v8397_v39 = vld [vmem:[%s13045_s2 + $0xf8] sm:$0xff]  }
 0x5a8   : > { %v3910_v15 = vadd.f32 %v11854_v51, %v3909_v5  ;;  %v4033_v41 = vmax.f32 %v3907_v53, 0.0 }
 0x5a9   : > { %v4036_v21 = vmax.f32 %v3918_v22, 0.0 }
 0x5aa   : > { %v4034_v11 = vmax.f32 %v3910_v15, 0.0  ;;  %8127 = vmatpush3.bf16.msra.mxu1 %v8393_v1 }
 0x5ab   : > { %v4066_v58 = vpack.c.bf16 %v4036_v21, %v4035_v3  ;;  %8128 = vmatprep.subr.bf16.mxu1 %v8394_v2 }
 0x5ac   : > { %v4065_v25 = vpack.c.bf16 %v4034_v11, %v4033_v41  ;;  %v8046_v47 = vpop.f32.mrb[4].mxu1 }
 0x5ad   : > { %v3931_v46 = vadd.f32 %v8046_v47, %v11854_v51  ;;  %v3922_v38 = vpop.f32.mrb[5].mxu1 }
 0x5ae   : > { %v3923_v42 = vadd.f32 %v11854_v51, %v3922_v38  ;;  %v8047_v36 = vpop.f32.mrb[6].mxu1  ;;  %8088 = vmatprep.mubr.bf16.mxu0 %v4065_v25  ;;  %8129 = vmatpush3.bf16.msra.mxu1 %v8394_v2 }
 0x5af   : > { %v3934_v16 = vadd.f32 %v8047_v36, %v11854_v51  ;;  %v3925_v9 = vpop.f32.mrb[7].mxu1  ;;  %8089 = vmatmul.mubr.bf16.vlgmr.msra.gmra.mrb[32].mxu0 %v4066_v58  ;;  %v4039_v63 = vmax.f32 %v3931_v46, 0.0  ;;  %8130 = vmatprep.subr.bf16.mxu1 %v8395_v13 }
 0x5b0   : > { %v3926_v19 = vadd.f32 %v11854_v51, %v3925_v9  ;;  %v4037_v10 = vmax.f32 %v3923_v42, 0.0 }
 0x5b1   : > { %v4040_v49 = vmax.f32 %v3934_v16, 0.0 }
 0x5b2   : > { %v4038_v20 = vmax.f32 %v3926_v19, 0.0  ;;  %8131 = vmatpush3.bf16.msra.mxu1 %v8395_v13 }
 0x5b3   : > { %v4068_v34 = vpack.c.bf16 %v4040_v49, %v4039_v63  ;;  %8132 = vmatprep.subr.bf16.mxu1 %v8396_v48 }
 0x5b4   : > { %v4067_v35 = vpack.c.bf16 %v4038_v20, %v4037_v10  ;;  %v8050_v17 = vpop.f32.mrb[8].mxu1 }
 0x5b5   : > { %v3947_v45 = vadd.f32 %v8050_v17, %v11854_v51  ;;  %v3938_v12 = vpop.f32.mrb[9].mxu1 }
 0x5b6   : > { %v3939_v56 = vadd.f32 %v11854_v51, %v3938_v12  ;;  %v8051_v30 = vpop.f32.mrb[10].mxu1  ;;  %8092 = vmatprep.mubr.bf16.mxu0 %v4067_v35  ;;  %8133 = vmatpush3.bf16.msra.mxu1 %v8396_v48 }
 0x5b7   : > { %v3950_v50 = vadd.f32 %v8051_v30, %v11854_v51  ;;  %v3941_v32 = vpop.f32.mrb[11].mxu1  ;;  %8093 = vmatmul.mubr.bf16.gmra.mrb[36].mxu0 %v4068_v34  ;;  %v4043_v14 = vmax.f32 %v3947_v45, 0.0  ;;  %8134 = vmatprep.subr.bf16.mxu1 %v8397_v39 }
 0x5b8   : > { %v3942_v18 = vadd.f32 %v11854_v51, %v3941_v32  ;;  %v4041_v44 = vmax.f32 %v3939_v56, 0.0 }
 0x5b9   : > { %v4044_v7 = vmax.f32 %v3950_v50, 0.0 }
 0x5ba   : > { %v4042_v61 = vmax.f32 %v3942_v18, 0.0  ;;  %8135 = vmatpush3.bf16.msra.mxu1 %v8397_v39 }
 0x5bb   : > { %v4070_v60 = vpack.c.bf16 %v4044_v7, %v4043_v14 }
 0x5bc   : > { %v4069_v55 = vpack.c.bf16 %v4042_v61, %v4041_v44 }
 0x5be   : > { %8096 = vmatprep.mubr.bf16.mxu0 %v4069_v55 }
 0x5bf   : > { %8097 = vmatmul.mubr.bf16.gmra.mrb[40].mxu0 %v4070_v60 }
 0x5ed   : > { %v8014_v52 = vpop.f32.mrb[20].mxu0 }
 0x5ee   : > { %v3716_v8 = vadd.f32 %v11874_v24, %v8014_v52  ;;  %v3707_v4 = vpop.f32.mrb[21].mxu0 }
 0x5ef   : > { %v3708_v54 = vadd.f32 %v11874_v24, %v3707_v4  ;;  %v8015_v23 = vpop.f32.mrb[22].mxu0 }
 0x5f0   : > { %v3719_v26 = vadd.f32 %v11874_v24, %v8015_v23  ;;  %v3710_v40 = vpop.f32.mrb[23].mxu0  ;;  %v3776_v6 = vmax.f32 %v3716_v8, 0.0 }
 0x5f1   : > { %v3711_v43 = vadd.f32 %v11874_v24, %v3710_v40  ;;  %v3774_v28 = vmax.f32 %v3708_v54, 0.0 }
 0x5f2   : > { %v3777_v29 = vmax.f32 %v3719_v26, 0.0 }
 0x5f3   : > { %v3775_v31 = vmax.f32 %v3711_v43, 0.0 }
 0x5f4   : > { %v3797_v27 = vpack.c.bf16 %v3777_v29, %v3776_v6 }
 0x5f5   : > { %v3796_v33 = vpack.c.bf16 %v3775_v31, %v3774_v28 }
 0x5f7   : > { %8060 = vmatprep.mubr.bf16.mxu1 %v3796_v33  ;;  %v11920_v33 = vld [vmem:[%s13046_s3 + $0x3] ss:$0 sm:$0xff] }
 0x5f8   : > { %8061 = vmatmul.mubr.bf16.gmra.mrb[20].mxu1 %v3797_v27 }
 0x60a   : > { %v8054_v62 = vpop.f32.mrb[12].mxu1 }
 0x60b   : > { %v3963_v53 = vadd.f32 %v8054_v62, %v11854_v51  ;;  %v3954_v37 = vpop.f32.mrb[13].mxu1 }
 0x60c   : > { %v3955_v22 = vadd.f32 %v11854_v51, %v3954_v37  ;;  %v8055_v5 = vpop.f32.mrb[14].mxu1 }
 0x60d   : > { %v3966_v15 = vadd.f32 %v8055_v5, %v11854_v51  ;;  %v3957_v3 = vpop.f32.mrb[15].mxu1  ;;  %v4047_v41 = vmax.f32 %v3963_v53, 0.0 }
 0x60e   : > { %v3958_v21 = vadd.f32 %v11854_v51, %v3957_v3  ;;  %v4045_v58 = vmax.f32 %v3955_v22, 0.0 }
 0x60f   : > { %v4048_v11 = vmax.f32 %v3966_v15, 0.0 }
 0x610   : > { %v4046_v25 = vmax.f32 %v3958_v21, 0.0 }
 0x611   : > { %v4072_v47 = vpack.c.bf16 %v4048_v11, %v4047_v41 }
 0x612   : > { %v4071_v46 = vpack.c.bf16 %v4046_v25, %v4045_v58 }
 0x614   : > { %8100 = vmatprep.mubr.bf16.mxu0 %v4071_v46 }
 0x615   : > { %8101 = vmatmul.mubr.bf16.gmra.mrb[44].mxu0 %v4072_v47 }
 0x64d   : > { %v8018_v38 = vpop.f32.mrb[24].mxu0 }
 0x64e   : > { %v3732_v42 = vadd.f32 %v11874_v24, %v8018_v38  ;;  %v3723_v36 = vpop.f32.mrb[25].mxu0 }
 0x64f   : > { %v3724_v16 = vadd.f32 %v11874_v24, %v3723_v36  ;;  %v8019_v9 = vpop.f32.mrb[26].mxu0 }
 0x650   : > { %v3735_v19 = vadd.f32 %v11874_v24, %v8019_v9  ;;  %v3726_v63 = vpop.f32.mrb[27].mxu0  ;;  %v3780_v10 = vmax.f32 %v3732_v42, 0.0 }
 0x651   : > { %v3727_v49 = vadd.f32 %v11874_v24, %v3726_v63  ;;  %v3778_v34 = vmax.f32 %v3724_v16, 0.0 }
 0x652   : > { %v3781_v20 = vmax.f32 %v3735_v19, 0.0 }
 0x653   : > { %v3779_v35 = vmax.f32 %v3727_v49, 0.0 }
 0x654   : > { %v3799_v17 = vpack.c.bf16 %v3781_v20, %v3780_v10 }
 0x655   : > { %v3798_v45 = vpack.c.bf16 %v3779_v35, %v3778_v34 }
 0x657   : > { %8064 = vmatprep.mubr.bf16.mxu1 %v3798_v45 }
 0x658   : > { %8065 = vmatmul.mubr.bf16.gmra.mrb[24].mxu1 %v3799_v17 }
 0x66b   : > { %v8058_v12 = vpop.f32.mrb[16].mxu1 }
 0x66c   : > { %v3979_v56 = vadd.f32 %v8058_v12, %v11854_v51  ;;  %v3970_v30 = vpop.f32.mrb[17].mxu1 }
 0x66d   : > { %v3971_v50 = vadd.f32 %v11854_v51, %v3970_v30  ;;  %v8059_v32 = vpop.f32.mrb[18].mxu1 }
 0x66e   : > { %v3982_v18 = vadd.f32 %v8059_v32, %v11854_v51  ;;  %v3973_v14 = vpop.f32.mrb[19].mxu1  ;;  %v4051_v44 = vmax.f32 %v3979_v56, 0.0 }
 0x66f   : > { %v3974_v7 = vadd.f32 %v11854_v51, %v3973_v14  ;;  %v4049_v60 = vmax.f32 %v3971_v50, 0.0 }
 0x670   : > { %v4052_v61 = vmax.f32 %v3982_v18, 0.0 }
 0x671   : > { %v4050_v55 = vmax.f32 %v3974_v7, 0.0 }
 0x672   : > { %v4074_v59 = vpack.c.bf16 %v4052_v61, %v4051_v44 }
 0x673   : > { %v4073_v52 = vpack.c.bf16 %v4050_v55, %v4049_v60 }
 0x675   : > { %8104 = vmatprep.mubr.bf16.mxu0 %v4073_v52 }
 0x676   : > { %8105 = vmatmul.mubr.bf16.gmra.mrb[48].mxu0 %v4074_v59 }
 0x679   : > { %v8022_v8 = vpop.f32.mrb[28].mxu0 }
 0x67a   : > { %v3748_v4 = vadd.f32 %v11874_v24, %v8022_v8  ;;  %v3739_v54 = vpop.f32.mrb[29].mxu0 }
 0x67b   : > { %v3740_v23 = vadd.f32 %v11874_v24, %v3739_v54  ;;  %v8023_v26 = vpop.f32.mrb[30].mxu0 }
 0x67c   : > { %v3751_v40 = vadd.f32 %v11874_v24, %v8023_v26  ;;  %v3742_v0 = vpop.f32.mrb[31].mxu0  ;;  %v3784_v6 = vmax.f32 %v3748_v4, 0.0 }
 0x67d   : > { %v3743_v43 = vadd.f32 %v11874_v24, %v3742_v0  ;;  %v3782_v28 = vmax.f32 %v3740_v23, 0.0 }
 0x67e   : > { %v3785_v29 = vmax.f32 %v3751_v40, 0.0 }
 0x67f   : > { %v3783_v31 = vmax.f32 %v3743_v43, 0.0 }
 0x680   : > { %v3801_v27 = vpack.c.bf16 %v3785_v29, %v3784_v6 }
 0x681   : > { %v3800_v57 = vpack.c.bf16 %v3783_v31, %v3782_v28 }
 0x682   : > { %v8090_v1 = vpop.f32.mrb[32].mxu0 }
 0x683   : > { %8068 = vmatprep.mubr.bf16.mxu1 %v3800_v57  ;;  %v4194_v2 = vadd.f32 %v8090_v1, %v11920_v33  ;;  %v4185_v13 = vpop.f32.mrb[33].mxu0 }
 0x684   : > { %8069 = vmatmul.mubr.bf16.gmra.mrb[28].mxu1 %v3801_v27  ;;  %v4186_v48 = vadd.f32 %v11920_v33, %v4185_v13  ;;  %v8091_v24 = vpop.f32.mrb[34].mxu0 }
 0x685   : > { %v4197_v39 = vadd.f32 %v8091_v24, %v11920_v33  ;;  %v4188_v62 = vpop.f32.mrb[35].mxu0  ;;  %v4314_v37 = vmax.f32 %v4194_v2, 0.0 }
 0x686   : > { %v4189_v53 = vadd.f32 %v11920_v33, %v4188_v62  ;;  %v4312_v5 = vmax.f32 %v4186_v48, 0.0 }
 0x687   : > { %v4315_v22 = vmax.f32 %v4197_v39, 0.0 }
 0x688   : > { %v4313_v15 = vmax.f32 %v4189_v53, 0.0 }
 0x689   : > { %v4345_v3 = vpack.c.bf16 %v4315_v22, %v4314_v37 }
 0x68a   : > { %v4344_v21 = vpack.c.bf16 %v4313_v15, %v4312_v5  ;;  %v8094_v41 = vpop.f32.mrb[36].mxu0 }
 0x68b   : > { %v4210_v11 = vadd.f32 %v8094_v41, %v11920_v33  ;;  %v4201_v58 = vpop.f32.mrb[37].mxu0 }
 0x68c   : > { %v4202_v25 = vadd.f32 %v11920_v33, %v4201_v58  ;;  %v8095_v47 = vpop.f32.mrb[38].mxu0  ;;  %8136 = vmatprep.mubr.bf16.mxu1 %v4344_v21 }
 0x68d   : > { %v4213_v46 = vadd.f32 %v8095_v47, %v11920_v33  ;;  %v4204_v38 = vpop.f32.mrb[39].mxu0  ;;  %8137 = vmatmul.mubr.bf16.vlgmr.msra.gmra.mrb[32].mxu1 %v4345_v3  ;;  %v4318_v36 = vmax.f32 %v4210_v11, 0.0 }
 0x68e   : > { %v4205_v42 = vadd.f32 %v11920_v33, %v4204_v38  ;;  %v4316_v9 = vmax.f32 %v4202_v25, 0.0 }
 0x68f   : > { %v4319_v16 = vmax.f32 %v4213_v46, 0.0 }
 0x690   : > { %v4317_v19 = vmax.f32 %v4205_v42, 0.0 }
 0x691   : > { %v4347_v63 = vpack.c.bf16 %v4319_v16, %v4318_v36 }
 0x692   : > { %v4346_v49 = vpack.c.bf16 %v4317_v19, %v4316_v9  ;;  %v8098_v10 = vpop.f32.mrb[40].mxu0 }
 0x693   : > { %v4226_v20 = vadd.f32 %v8098_v10, %v11920_v33  ;;  %v4217_v34 = vpop.f32.mrb[41].mxu0 }
 0x694   : > { %v4218_v35 = vadd.f32 %v11920_v33, %v4217_v34  ;;  %v8099_v17 = vpop.f32.mrb[42].mxu0  ;;  %8140 = vmatprep.mubr.bf16.mxu1 %v4346_v49 }
 0x695   : > { %v4229_v45 = vadd.f32 %v8099_v17, %v11920_v33  ;;  %v4220_v12 = vpop.f32.mrb[43].mxu0  ;;  %8141 = vmatmul.mubr.bf16.gmra.mrb[36].mxu1 %v4347_v63  ;;  %v4322_v30 = vmax.f32 %v4226_v20, 0.0 }
 0x696   : > { %v4221_v56 = vadd.f32 %v11920_v33, %v4220_v12  ;;  %v4320_v32 = vmax.f32 %v4218_v35, 0.0 }
 0x697   : > { %v4323_v50 = vmax.f32 %v4229_v45, 0.0 }
 0x698   : > { %v4321_v18 = vmax.f32 %v4221_v56, 0.0 }
 0x699   : > { %v4349_v14 = vpack.c.bf16 %v4323_v50, %v4322_v30 }
 0x69a   : > { %v4348_v7 = vpack.c.bf16 %v4321_v18, %v4320_v32 }
 0x69c   : > { %8144 = vmatprep.mubr.bf16.mxu1 %v4348_v7 }
 0x69d   : > { %8145 = vmatmul.mubr.bf16.gmra.mrb[40].mxu1 %v4349_v14 }
 0x6cb   : > { %v8062_v44 = vpop.f32.mrb[20].mxu1 }
 0x6cc   : > { %v3995_v61 = vadd.f32 %v8062_v44, %v11854_v51  ;;  %v3986_v60 = vpop.f32.mrb[21].mxu1 }
 0x6cd   : > { %v3987_v55 = vadd.f32 %v11854_v51, %v3986_v60  ;;  %v8063_v59 = vpop.f32.mrb[22].mxu1 }
 0x6ce   : > { %v3998_v52 = vadd.f32 %v8063_v59, %v11854_v51  ;;  %v3989_v8 = vpop.f32.mrb[23].mxu1  ;;  %v4055_v54 = vmax.f32 %v3995_v61, 0.0 }
 0x6cf   : > { %v3990_v4 = vadd.f32 %v11854_v51, %v3989_v8  ;;  %v4053_v26 = vmax.f32 %v3987_v55, 0.0 }
 0x6d0   : > { %v4056_v23 = vmax.f32 %v3998_v52, 0.0 }
 0x6d1   : > { %v4054_v40 = vmax.f32 %v3990_v4, 0.0 }
 0x6d2   : > { %v4076_v0 = vpack.c.bf16 %v4056_v23, %v4055_v54  ;;  %v11957_v54 = vld [vmem:[%s13046_s3 + $0x4] ss:$0 sm:$0xff] }
 0x6d3   : > { %v4075_v43 = vpack.c.bf16 %v4054_v40, %v4053_v26 }
 0x6d5   : > { %8108 = vmatprep.mubr.bf16.mxu0 %v4075_v43 }
 0x6d6   : > { %8109 = vmatmul.mubr.bf16.gmra.mrb[52].mxu0 %v4076_v0 }
 0x6e8   : > { %v8102_v6 = vpop.f32.mrb[44].mxu0 }
 0x6e9   : > { %v4242_v29 = vadd.f32 %v8102_v6, %v11920_v33  ;;  %v4233_v28 = vpop.f32.mrb[45].mxu0 }
 0x6ea   : > { %v4234_v31 = vadd.f32 %v11920_v33, %v4233_v28  ;;  %v8103_v27 = vpop.f32.mrb[46].mxu0 }
 0x6eb   : > { %v4245_v57 = vadd.f32 %v8103_v27, %v11920_v33  ;;  %v4236_v1 = vpop.f32.mrb[47].mxu0  ;;  %v4326_v13 = vmax.f32 %v4242_v29, 0.0 }
 0x6ec   : > { %v4237_v2 = vadd.f32 %v11920_v33, %v4236_v1  ;;  %v4324_v24 = vmax.f32 %v4234_v31, 0.0 }
 0x6ed   : > { %v4327_v48 = vmax.f32 %v4245_v57, 0.0 }
 0x6ee   : > { %v4325_v39 = vmax.f32 %v4237_v2, 0.0 }
 0x6ef   : > { %v4351_v62 = vpack.c.bf16 %v4327_v48, %v4326_v13 }
 0x6f0   : > { %v4350_v53 = vpack.c.bf16 %v4325_v39, %v4324_v24  ;;  %v11970_v24 = vld [vmem:[%s13047_s4] ss:$0 sm:$0xff] }
 0x6f2   : > { %8148 = vmatprep.mubr.bf16.mxu1 %v4350_v53 }
 0x6f3   : > { %8149 = vmatmul.mubr.bf16.gmra.mrb[44].mxu1 %v4351_v62 }
 0x72b   : > { %v8066_v37 = vpop.f32.mrb[24].mxu1 }
 0x72c   : > { %v4011_v22 = vadd.f32 %v8066_v37, %v11854_v51  ;;  %v4002_v5 = vpop.f32.mrb[25].mxu1 }
 0x72d   : > { %v4003_v15 = vadd.f32 %v11854_v51, %v4002_v5  ;;  %v8067_v3 = vpop.f32.mrb[26].mxu1 }
 0x72e   : > { %v4014_v21 = vadd.f32 %v8067_v3, %v11854_v51  ;;  %v4005_v41 = vpop.f32.mrb[27].mxu1  ;;  %v4059_v58 = vmax.f32 %v4011_v22, 0.0 }
 0x72f   : > { %v4006_v11 = vadd.f32 %v11854_v51, %v4005_v41  ;;  %v4057_v47 = vmax.f32 %v4003_v15, 0.0 }
 0x730   : > { %v4060_v25 = vmax.f32 %v4014_v21, 0.0 }
 0x731   : > { %v4058_v46 = vmax.f32 %v4006_v11, 0.0 }
 0x732   : > { %v4078_v38 = vpack.c.bf16 %v4060_v25, %v4059_v58 }
 0x733   : > { %v4077_v42 = vpack.c.bf16 %v4058_v46, %v4057_v47 }
 0x735   : > { %8112 = vmatprep.mubr.bf16.mxu0 %v4077_v42 }
 0x736   : > { %8113 = vmatmul.mubr.bf16.gmra.mrb[56].mxu0 %v4078_v38 }
 0x749   : > { %v8106_v36 = vpop.f32.mrb[48].mxu0 }
 0x74a   : > { %v4258_v16 = vadd.f32 %v8106_v36, %v11920_v33  ;;  %v4249_v9 = vpop.f32.mrb[49].mxu0 }
 0x74b   : > { %v4250_v19 = vadd.f32 %v11920_v33, %v4249_v9  ;;  %v8107_v63 = vpop.f32.mrb[50].mxu0 }
 0x74c   : > { %v4261_v49 = vadd.f32 %v8107_v63, %v11920_v33  ;;  %v4252_v10 = vpop.f32.mrb[51].mxu0  ;;  %v4330_v34 = vmax.f32 %v4258_v16, 0.0 }
 0x74d   : > { %v4253_v20 = vadd.f32 %v11920_v33, %v4252_v10  ;;  %v4328_v17 = vmax.f32 %v4250_v19, 0.0 }
 0x74e   : > { %v4331_v35 = vmax.f32 %v4261_v49, 0.0 }
 0x74f   : > { %v4329_v45 = vmax.f32 %v4253_v20, 0.0 }
 0x750   : > { %v4353_v12 = vpack.c.bf16 %v4331_v35, %v4330_v34 }
 0x751   : > { %v4352_v56 = vpack.c.bf16 %v4329_v45, %v4328_v17 }
 0x753   : > { %8152 = vmatprep.mubr.bf16.mxu1 %v4352_v56 }
 0x754   : > { %8153 = vmatmul.mubr.bf16.gmra.mrb[48].mxu1 %v4353_v12 }
 0x757   : > { %v8070_v30 = vpop.f32.mrb[28].mxu1 }
 0x758   : > { %v4027_v50 = vadd.f32 %v8070_v30, %v11854_v51  ;;  %v4018_v32 = vpop.f32.mrb[29].mxu1 }
 0x759   : > { %v4019_v18 = vadd.f32 %v11854_v51, %v4018_v32  ;;  %v8071_v14 = vpop.f32.mrb[30].mxu1 }
 0x75a   : > { %v4030_v7 = vadd.f32 %v8071_v14, %v11854_v51  ;;  %v4021_v44 = vpop.f32.mrb[31].mxu1  ;;  %v4063_v60 = vmax.f32 %v4027_v50, 0.0 }
 0x75b   : > { %v4022_v61 = vadd.f32 %v11854_v51, %v4021_v44  ;;  %v4061_v59 = vmax.f32 %v4019_v18, 0.0 }
 0x75c   : > { %v4064_v55 = vmax.f32 %v4030_v7, 0.0 }
 0x75d   : > { %v4062_v52 = vmax.f32 %v4022_v61, 0.0 }
 0x75e   : > { %v4080_v8 = vpack.c.bf16 %v4064_v55, %v4063_v60 }
 0x75f   : > { %v4079_v4 = vpack.c.bf16 %v4062_v52, %v4061_v59 }
 0x760   : > { %v8138_v23 = vpop.f32.mrb[32].mxu1 }
 0x761   : > { %8116 = vmatprep.mubr.bf16.mxu0 %v4079_v4  ;;  %v4464_v26 = vpop.f32.mrb[33].mxu1  ;;  %v4473_v6 = vadd.f32 %v8138_v23, %v11957_v54 }
 0x762   : > { %8117 = vmatmul.mubr.bf16.gmra.mrb[60].mxu0 %v4080_v8  ;;  %v4465_v40 = vadd.f32 %v11957_v54, %v4464_v26  ;;  %v8139_v0 = vpop.f32.mrb[34].mxu1 }
 0x763   : > { %v4476_v51 = vadd.f32 %v8139_v0, %v11957_v54  ;;  %v4467_v43 = vpop.f32.mrb[35].mxu1 }
 0x764   : > { %8398 = vtanh.f32 %v4465_v40  ;;  %v4468_v29 = vadd.f32 %v11957_v54, %v4467_v43 }
 0x765   : > { %8400 = vtanh.f32 %v4476_v51 }
 0x766   : > { %8402 = vtanh.f32 %v4468_v29 }
 0x767   : > { %8404 = vtanh.f32 %v4473_v6 }
 0x768   : > { %v8142_v28 = vpop.f32.mrb[36].mxu1 }
 0x769   : > { %v4480_v31 = vpop.f32.mrb[37].mxu1  ;;  %v4489_v1 = vadd.f32 %v8142_v28, %v11957_v54 }
 0x76a   : > { %v4481_v27 = vadd.f32 %v11957_v54, %v4480_v31  ;;  %v8143_v57 = vpop.f32.mrb[38].mxu1 }
 0x76b   : > { %v4483_v2 = vpop.f32.mrb[39].mxu1  ;;  %v4492_v13 = vadd.f32 %v8143_v57, %v11957_v54 }
 0x76c   : > { %8406 = vtanh.f32 %v4481_v27  ;;  %v4484_v48 = vadd.f32 %v11957_v54, %v4483_v2 }
 0x76e   : > { %v8399_v39 = vpop.eup %8398  ;;  %8408 = vtanh.f32 %v4484_v48 }
 0x76f   : > { %v8401_v62 = vpop.eup %8400  ;;  %8410 = vtanh.f32 %v4489_v1  ;;  %v4630_v53 = vmul.f32 %v8399_v39, %v11970_v24 }
 0x770   : > { %v8403_v37 = vpop.eup %8402  ;;  %8412 = vtanh.f32 %v4492_v13  ;;  %v8146_v22 = vpop.f32.mrb[40].mxu1  ;;  %v4633_v25 = vmul.f32 %v8401_v62, %v11970_v24 }
 0x771   : > { %v4496_v5 = vpop.f32.mrb[41].mxu1  ;;  %4662 = vadd.xlane.f32.xlu1 %v4630_v53  ;;  %v4631_v15 = vmul.f32 %v8403_v37, %v11970_v24  ;;  %v8405_v3 = vpop.eup %8404  ;;  %v4505_v11 = vadd.f32 %v8146_v22, %v11957_v54 }
 0x772   : > { %v4497_v21 = vadd.f32 %v11957_v54, %v4496_v5  ;;  %v8147_v41 = vpop.f32.mrb[42].mxu1  ;;  %v4632_v38 = vmul.f32 %v8405_v3, %v11970_v24 }
 0x773   : > { %v4499_v58 = vpop.f32.mrb[43].mxu1  ;;  %4664 = vadd.xlane.f32.xlu0 %v4631_v15  ;;  %v4508_v47 = vadd.f32 %v8147_v41, %v11957_v54 }
 0x774   : > { %8414 = vtanh.f32 %v4497_v21  ;;  %v4500_v46 = vadd.f32 %v11957_v54, %v4499_v58 }
 0x775   : > { %4668 = vadd.xlane.f32.xlu1 %v4633_v25 }
 0x776   : > { %v8407_v42 = vpop.eup %8406  ;;  %8416 = vtanh.f32 %v4500_v46 }
 0x777   : > { %8418 = vtanh.f32 %v4505_v11  ;;  %4666 = vadd.xlane.f32.xlu0 %v4632_v38  ;;  %v4634_v9 = vmul.f32 %v8407_v42, %v11970_v24 }
 0x778   : > { %v8409_v36 = vpop.eup %8408  ;;  %8420 = vtanh.f32 %v4508_v47 }
 0x779   : > { %v8411_v16 = vpop.eup %8410  ;;  %v4635_v19 = vmul.f32 %v8409_v36, %v11970_v24 }
 0x77a   : > { %v8413_v63 = vpop.eup %8412  ;;  %v4636_v49 = vmul.f32 %v8411_v16, %v11970_v24 }
 0x77b   : > { %4670 = vadd.xlane.f32.xlu0 %v4634_v9  ;;  %4672 = vadd.xlane.f32.xlu1 %v4635_v19  ;;  %v4637_v10 = vmul.f32 %v8413_v63, %v11970_v24 }
 0x77e   : > { %v8415_v20 = vpop.eup %8414 }
 0x77f   : > { %4674 = vadd.xlane.f32.xlu0 %v4636_v49  ;;  %4676 = vadd.xlane.f32.xlu1 %v4637_v10  ;;  %v4638_v17 = vmul.f32 %v8415_v20, %v11970_v24 }
 0x780   : > { %v8417_v34 = vpop.eup %8416 }
 0x781   : > { %v8419_v35 = vpop.eup %8418  ;;  %v4639_v45 = vmul.f32 %v8417_v34, %v11970_v24 }
 0x782   : > { %v8421_v12 = vpop.eup %8420  ;;  %v4640_v56 = vmul.f32 %v8419_v35, %v11970_v24 }
 0x783   : > { %4678 = vadd.xlane.f32.xlu0 %v4638_v17  ;;  %4680 = vadd.xlane.f32.xlu1 %v4639_v45  ;;  %v4641_v30 = vmul.f32 %v8421_v12, %v11970_v24 }
 0x787   : > { %4682 = vadd.xlane.f32.xlu0 %v4640_v56  ;;  %4684 = vadd.xlane.f32.xlu1 %v4641_v30 }
 0x7a9   : > { %v8110_v50 = vpop.f32.mrb[52].mxu0 }
 0x7aa   : > { %v4274_v32 = vadd.f32 %v8110_v50, %v11920_v33  ;;  %v4265_v18 = vpop.f32.mrb[53].mxu0 }
 0x7ab   : > { %v4266_v14 = vadd.f32 %v11920_v33, %v4265_v18  ;;  %v8111_v7 = vpop.f32.mrb[54].mxu0 }
 0x7ac   : > { %v4277_v44 = vadd.f32 %v8111_v7, %v11920_v33  ;;  %v4268_v61 = vpop.f32.mrb[55].mxu0  ;;  %v4334_v55 = vmax.f32 %v4274_v32, 0.0 }
 0x7ad   : > { %v4269_v60 = vadd.f32 %v11920_v33, %v4268_v61  ;;  %v4332_v52 = vmax.f32 %v4266_v14, 0.0 }
 0x7ae   : > { %v4335_v59 = vmax.f32 %v4277_v44, 0.0 }
 0x7af   : > { %v4333_v8 = vmax.f32 %v4269_v60, 0.0 }
 0x7b0   : > { %v4355_v4 = vpack.c.bf16 %v4335_v59, %v4334_v55 }
 0x7b1   : > { %v4354_v23 = vpack.c.bf16 %v4333_v8, %v4332_v52 }
 0x7b3   : > { %8156 = vmatprep.mubr.bf16.mxu1 %v4354_v23 }
 0x7b4   : > { %8157 = vmatmul.mubr.bf16.gmra.mrb[52].mxu1 %v4355_v4 }
 0x7c6   : > { %v8150_v26 = vpop.f32.mrb[44].mxu1 }
 0x7c7   : > { %v4521_v40 = vadd.f32 %v8150_v26, %v11957_v54  ;;  %v4512_v0 = vpop.f32.mrb[45].mxu1 }
 0x7c8   : > { %v4513_v51 = vadd.f32 %v11957_v54, %v4512_v0  ;;  %v8151_v43 = vpop.f32.mrb[46].mxu1 }
 0x7c9   : > { %v4515_v6 = vpop.f32.mrb[47].mxu1  ;;  %v4524_v29 = vadd.f32 %v8151_v43, %v11957_v54 }
 0x7ca   : > { %8422 = vtanh.f32 %v4513_v51  ;;  %v4516_v28 = vadd.f32 %v11957_v54, %v4515_v6 }
 0x7cb   : > { %8424 = vtanh.f32 %v4521_v40 }
 0x7cc   : > { %8426 = vtanh.f32 %v4516_v28 }
 0x7cd   : > { %8428 = vtanh.f32 %v4524_v29 }
 0x7d4   : > { %v8423_v31 = vpop.eup %8422 }
 0x7d5   : > { %v8425_v27 = vpop.eup %8424  ;;  %v4642_v57 = vmul.f32 %v8423_v31, %v11970_v24 }
 0x7d6   : > { %v8427_v1 = vpop.eup %8426  ;;  %v4644_v48 = vmul.f32 %v8425_v27, %v11970_v24 }
 0x7d7   : > { %4686 = vadd.xlane.f32.xlu0 %v4642_v57  ;;  %v4643_v2 = vmul.f32 %v8427_v1, %v11970_v24  ;;  %v8429_v13 = vpop.eup %8428 }
 0x7d8   : > { %v4645_v39 = vmul.f32 %v8429_v13, %v11970_v24 }
 0x7d9   : > { %4688 = vadd.xlane.f32.xlu1 %v4643_v2 }
 0x7db   : > { %4690 = vadd.xlane.f32.xlu0 %v4644_v48 }
 0x7dd   : > { %4692 = vadd.xlane.f32.xlu1 %v4645_v39  ;;  %v13091_v39 = vlaneseq }
 0x7fe   : > { %v4663_v48 = vpop.xlane.xlu1 %4662 }
 0x809   : > { %v8114_v62 = vpop.f32.mrb[56].mxu0 }
 0x80a   : > { %v4290_v53 = vadd.f32 %v8114_v62, %v11920_v33  ;;  %v4281_v37 = vpop.f32.mrb[57].mxu0  ;;  %v4669_v62 = vpop.xlane.xlu1 %4668 }
 0x80b   : > { %v4282_v22 = vadd.f32 %v11920_v33, %v4281_v37  ;;  %v8115_v5 = vpop.f32.mrb[58].mxu0 }
 0x80c   : > { %v4293_v15 = vadd.f32 %v8115_v5, %v11920_v33  ;;  %v4284_v3 = vpop.f32.mrb[59].mxu0  ;;  %v4338_v41 = vmax.f32 %v4290_v53, 0.0 }
 0x80d   : > { %v4285_v21 = vadd.f32 %v11920_v33, %v4284_v3  ;;  %v4336_v58 = vmax.f32 %v4282_v22, 0.0  ;;  %v4665_v3 = vpop.xlane.xlu0 %4664 }
 0x80e   : > { %v4339_v11 = vmax.f32 %v4293_v15, 0.0 }
 0x80f   : > { %v4337_v25 = vmax.f32 %v4285_v21, 0.0 }
 0x810   : > { %v4357_v47 = vpack.c.bf16 %v4339_v11, %v4338_v41  ;;  %v12027_v41 = vshrl.u32 %v13091_v39, 7  ;;  %v12029_v11 = vpop.xlane.xlu1 %4672 }
 0x811   : > { %v4356_v46 = vpack.c.bf16 %v4337_v25, %v4336_v58 }
 0x812   : > { %13804 = vst [vmem:[#allocation9_spill] sm:$0xff] %v12027_v41 }
 0x813   : > { %8160 = vmatprep.mubr.bf16.mxu1 %v4356_v46  ;;  %v8627_v46 = vmov 1966171168  }
 0x814   : > { %8161 = vmatmul.mubr.bf16.gmra.mrb[56].mxu1 %v4357_v47  ;;  %v12033_v47 = vstv %s4726_s13 }
 0x827   : > { %v8154_v38 = vpop.f32.mrb[48].mxu1 }
 0x828   : > { %v4537_v42 = vadd.f32 %v8154_v38, %v11957_v54  ;;  %v4528_v36 = vpop.f32.mrb[49].mxu1  ;;  %v5821_v38 = vunpack.c.l.s4 %v8627_v46 }
 0x829   : > { %v4529_v16 = vadd.f32 %v11957_v54, %v4528_v36  ;;  %v8155_v9 = vpop.f32.mrb[50].mxu1  ;;  %v12037_v36 = vsub.s32 0, %v12027_v41 }
 0x82a   : > { %v4531_v19 = vpop.f32.mrb[51].mxu1  ;;  %v4540_v63 = vadd.f32 %v8155_v9, %v11957_v54  ;;  %v12043_v9 = vsub.s32 2, %v12027_v41 }
 0x82b   : > { %8430 = vtanh.f32 %v4529_v16  ;;  %v4532_v49 = vadd.f32 %v11957_v54, %v4531_v19  ;;  %v12040_v16 = vsub.s32 1, %v12027_v41  ;;  %v12046_v19 = vsub.s32 3, %v12027_v41 }
 0x82c   : > { %8432 = vtanh.f32 %v4537_v42  ;;  %v4729_v42 = vadd.f32 %v12033_v47, %v4665_v3 }
 0x82d   : > { %8434 = vtanh.f32 %v4532_v49  ;;  %v12050_v49 = vsub.s32 4, %v12027_v41 }
 0x82e   : > { %8436 = vtanh.f32 %v4540_v63  ;;  %v4728_v63 = vadd.f32 %v12033_v47, %v4663_v48 }
 0x835   : > { %v8431_v10 = vpop.eup %8430  ;;  %v8118_v20 = vpop.f32.mrb[60].mxu0 }
 0x836   : > { %v8433_v34 = vpop.eup %8432  ;;  %v4306_v35 = vadd.f32 %v8118_v20, %v11920_v33  ;;  %v4297_v17 = vpop.f32.mrb[61].mxu0  ;;  %v4646_v45 = vmul.f32 %v8431_v10, %v11970_v24  ;;  %v12053_v10 = vsub.s32 5, %v12027_v41  ;;  %v5822_v20 = vunpack.c.0.s8 %v5821_v38 }
 0x837   : > { %v8435_v12 = vpop.eup %8434  ;;  %v4298_v56 = vadd.f32 %v11920_v33, %v4297_v17  ;;  %v8119_v30 = vpop.f32.mrb[62].mxu0  ;;  %v4648_v60 = vmul.f32 %v8433_v34, %v11970_v24  ;;  %v12061_v17 = vsub.s32 7, %v12027_v41 }
 0x838   : > { %v4309_v50 = vadd.f32 %v8119_v30, %v11920_v33  ;;  %4694 = vadd.xlane.f32.xlu0 %v4646_v45  ;;  %v4300_v32 = vpop.f32.mrb[63].mxu0  ;;  %v4647_v18 = vmul.f32 %v8435_v12, %v11970_v24  ;;  %v8437_v14 = vpop.eup %8436  ;;  %v4342_v44 = vmax.f32 %v4306_v35, 0.0  ;;  %v12058_v35 = vsub.s32 6, %v12027_v41 }
 0x839   : > { %v4301_v7 = vadd.f32 %v11920_v33, %v4300_v32  ;;  %v4340_v55 = vmax.f32 %v4298_v56, 0.0  ;;  %v4649_v8 = vmul.f32 %v8437_v14, %v11970_v24  ;;  %v12055_v34 = vpop.xlane.xlu1 %4676  ;;  %v4827_v45 = vrot.slane %v4729_v42, %v12037_v36 }
 0x83a   : > { %v4343_v61 = vmax.f32 %v4309_v50, 0.0  ;;  %4696 = vadd.xlane.f32.xlu1 %v4647_v18  ;;  %v4831_v12 = vrot.slane %v4729_v42, %v12040_v16  ;;  %v4835_v56 = vrot.slane %v4729_v42, %v12043_v9  ;;  %v4839_v30 = vrot.slane %v4729_v42, %v12046_v19 }
 0x83b   : > { %v4341_v59 = vmax.f32 %v4301_v7, 0.0  ;;  %v4843_v50 = vrot.slane %v4729_v42, %v12050_v49  ;;  %v4847_v32 = vrot.slane %v4729_v42, %v12053_v10  ;;  %v4851_v18 = vrot.slane %v4729_v42, %v12058_v35  ;;  %v4667_v7 = vpop.xlane.xlu0 %4666 }
 0x83c   : > { %v4359_v52 = vpack.c.bf16 %v4343_v61, %v4342_v44  ;;  %4698 = vadd.xlane.f32.xlu0 %v4648_v60  ;;  %v4855_v14 = vrot.slane %v4729_v42, %v12061_v17  ;;  %v12072_v44 = vsub.s32 %v5822_v20, %v12027_v41  ;;  %v4795_v61 = vrot.slane %v4728_v63, %v12037_v36 }
 0x83d   : > { %v4358_v4 = vpack.c.bf16 %v4341_v59, %v4340_v55  ;;  %v4799_v60 = vrot.slane %v4728_v63, %v12040_v16  ;;  %v12076_v59 = vcombine.low %v4827_v45, %v4831_v12 }
 0x83e   : > { %4700 = vadd.xlane.f32.xlu1 %v4649_v8  ;;  %v4807_v8 = vrot.slane %v4728_v63, %v12046_v19 }
 0x83f   : > { %8164 = vmatprep.mubr.bf16.mxu1 %v4358_v4  ;;  %v4811_v4 = vrot.slane %v4728_v63, %v12050_v49  ;;  %v4671_v12 = vpop.xlane.xlu0 %4670 }
 0x840   : > { %8165 = vmatmul.mubr.bf16.gmra.mrb[60].mxu1 %v4359_v52  ;;  %v4803_v52 = vrot.slane %v4728_v63, %v12043_v9 }
 0x842   : > { %v5817_v48 = vcombine.low %v4803_v52, %v4807_v8  ;;  %v12119_v8 = vadd.f32 %v12033_v47, %v4671_v12 }
 0x844   : > { %v4923_v12 = vrot.slane %v12119_v8, %v12037_v36 }
 0x887   : > { %v8158_v23 = vpop.f32.mrb[52].mxu1 }
 0x888   : > { %v4553_v26 = vadd.f32 %v8158_v23, %v11957_v54  ;;  %v4544_v40 = vpop.f32.mrb[53].mxu1 }
 0x889   : > { %v4545_v33 = vadd.f32 %v11957_v54, %v4544_v40  ;;  %v8159_v0 = vpop.f32.mrb[54].mxu1  ;;  %v4815_v40 = vrot.slane %v4728_v63, %v12053_v10 }
 0x88a   : > { %v4547_v51 = vpop.f32.mrb[55].mxu1  ;;  %v4556_v43 = vadd.f32 %v8159_v0, %v11957_v54  ;;  %v4823_v0 = vrot.slane %v4728_v63, %v12061_v17 }
 0x88b   : > { %8438 = vtanh.f32 %v4545_v33  ;;  %v4548_v6 = vadd.f32 %v11957_v54, %v4547_v51  ;;  %v4819_v33 = vrot.slane %v4728_v63, %v12058_v35 }
 0x88c   : > { %8440 = vtanh.f32 %v4553_v26 }
 0x88d   : > { %8442 = vtanh.f32 %v4548_v6  ;;  %v4681_v6 = vpop.xlane.xlu1 %4680 }
 0x88e   : > { %8444 = vtanh.f32 %v4556_v43  ;;  %v4730_v43 = vadd.f32 %v12033_v47, %v4667_v7 }
 0x890   : > { %v4867_v46 = vrot.slane %v4730_v43, %v12043_v9  ;;  %v4871_v38 = vrot.slane %v4730_v43, %v12046_v19  ;;  %v4875_v42 = vrot.slane %v4730_v43, %v12050_v49  ;;  %v4879_v63 = vrot.slane %v4730_v43, %v12053_v10 }
 0x891   : > { %v4883_v20 = vrot.slane %v4730_v43, %v12058_v35  ;;  %v4887_v45 = vrot.slane %v4730_v43, %v12061_v17 }
 0x895   : > { %v8439_v29 = vpop.eup %8438 }
 0x896   : > { %v8441_v28 = vpop.eup %8440  ;;  %v4650_v31 = vmul.f32 %v8439_v29, %v11970_v24  ;;  %v5866_v29 = vcombine.low %v4835_v56, %v4839_v30 }
 0x897   : > { %v8443_v27 = vpop.eup %8442  ;;  %v4652_v2 = vmul.f32 %v8441_v28, %v11970_v24  ;;  %v5867_v28 = vcombine.low %v4843_v50, %v4847_v32 }
 0x898   : > { %4702 = vadd.xlane.f32.xlu0 %v4650_v31  ;;  %v4651_v57 = vmul.f32 %v8443_v27, %v11970_v24  ;;  %v8445_v1 = vpop.eup %8444  ;;  %v5868_v31 = vcombine.low %v4851_v18, %v4855_v14 }
 0x899   : > { %v4653_v13 = vmul.f32 %v8445_v1, %v11970_v24  ;;  %v12088_v1 = vadd.f32 %v12033_v47, %v4669_v62  ;;  %v5889_v3 = vrot.slane %v5867_v28, %v12072_v44  ;;  %v4859_v62 = vrot.slane %v4730_v43, %v12037_v36 }
 0x89a   : > { %4704 = vadd.xlane.f32.xlu1 %v4651_v57 }
 0x89c   : > { %4706 = vadd.xlane.f32.xlu0 %v4652_v2  ;;  %v5875_v2 = vrot.slane %v12076_v59, %v12072_v44 }
 0x89e   : > { %4708 = vadd.xlane.f32.xlu1 %v4653_v13  ;;  %v5816_v13 = vcombine.low %v4795_v61, %v4799_v60 }
 0x8a0   : > { %v5826_v60 = vrot.slane %v5816_v13, %v12072_v44  ;;  %v4895_v13 = vrot.slane %v12088_v1, %v12040_v16 }
 0x8e7   : > { %v8162_v53 = vpop.f32.mrb[56].mxu1 }
 0x8e8   : > { %v4569_v37 = vadd.f32 %v8162_v53, %v11957_v54  ;;  %v4560_v22 = vpop.f32.mrb[57].mxu1  ;;  %v4737_v53 = vadd.f32 %v12033_v47, %v4681_v6 }
 0x8e9   : > { %v4561_v5 = vadd.f32 %v11957_v54, %v4560_v22  ;;  %v8163_v15 = vpop.f32.mrb[58].mxu1  ;;  %v5818_v22 = vcombine.low %v4811_v4, %v4815_v40  ;;  %v12123_v40 = vadd.f32 %v12033_v47, %v12029_v11 }
 0x8ea   : > { %v4563_v21 = vpop.f32.mrb[59].mxu1  ;;  %v4572_v58 = vadd.f32 %v8163_v15, %v11957_v54  ;;  %v5882_v15 = vrot.slane %v5866_v29, %v12072_v44  ;;  %v5083_v56 = vrot.slane %v4737_v53, %v12037_v36  ;;  %v5087_v30 = vrot.slane %v4737_v53, %v12040_v16 }
 0x8eb   : > { %8446 = vtanh.f32 %v4561_v5  ;;  %v4564_v25 = vadd.f32 %v11957_v54, %v4563_v21  ;;  %v5819_v5 = vcombine.low %v4819_v33, %v4823_v0  ;;  %v5896_v21 = vrot.slane %v5868_v31, %v12072_v44 }
 0x8ec   : > { %8448 = vtanh.f32 %v4569_v37  ;;  %v5091_v50 = vrot.slane %v4737_v53, %v12043_v9  ;;  %v5095_v32 = vrot.slane %v4737_v53, %v12046_v19  ;;  %v5099_v18 = vrot.slane %v4737_v53, %v12050_v49 }
 0x8ed   : > { %8450 = vtanh.f32 %v4564_v25  ;;  %v4863_v25 = vrot.slane %v4730_v43, %v12040_v16  ;;  %v5103_v14 = vrot.slane %v4737_v53, %v12053_v10  ;;  %v5107_v7 = vrot.slane %v4737_v53, %v12058_v35 }
 0x8ee   : > { %8452 = vtanh.f32 %v4572_v58  ;;  %v5111_v61 = vrot.slane %v4737_v53, %v12061_v17  ;;  %v5840_v59 = vrot.slane %v5818_v22, %v12072_v44  ;;  %v5847_v52 = vrot.slane %v5819_v5, %v12072_v44 }
 0x8ef   : > { %v5914_v4 = vcombine.low %v4859_v62, %v4863_v25  ;;  %v5917_v33 = vcombine.low %v4883_v20, %v4887_v45  ;;  %v6257_v0 = vcombine.low %v5083_v56, %v5087_v30  ;;  %v5897_v43 = vcombine.low %v5875_v2, %v5882_v15 }
 0x8f0   : > { %v5898_v6 = vcombine.low %v5889_v3, %v5896_v21  ;;  %v6259_v29 = vcombine.low %v5099_v18, %v5103_v14  ;;  %v6260_v28 = vcombine.low %v5107_v7, %v5111_v61  ;;  %v4899_v2 = vrot.slane %v12088_v1, %v12043_v9 }
 0x8f1   : > { %v5924_v53 = vrot.slane %v5914_v4, %v12072_v44  ;;  %v5945_v22 = vrot.slane %v5917_v33, %v12072_v44  ;;  %v6267_v5 = vrot.slane %v6257_v0, %v12072_v44  ;;  %v4903_v3 = vrot.slane %v12088_v1, %v12046_v19 }
 0x8f2   : > { %v6281_v21 = vrot.slane %v6259_v29, %v12072_v44  ;;  %v6288_v62 = vrot.slane %v6260_v28, %v12072_v44  ;;  %v4911_v25 = vrot.slane %v12088_v1, %v12053_v10  ;;  %v5912_v20 = vrot.slane %v5898_v6, %v12072_v44 }
 0x8f3   : > { %v4927_v56 = vrot.slane %v12119_v8, %v12040_v16  ;;  %v12170_v7 = vcombine.low %v4899_v2, %v4903_v3  ;;  %v4943_v4 = vrot.slane %v12119_v8, %v12053_v10  ;;  %v12192_v0 = vadd.f32 %v12033_v47, %v12055_v34 }
 0x8f4   : > { %v12166_v14 = vcombine.low %v6281_v21, %v6288_v62  ;;  %v4959_v2 = vrot.slane %v12123_v40, %v12040_v16  ;;  %v4975_v21 = vrot.slane %v12123_v40, %v12053_v10  ;;  %v4979_v62 = vrot.slane %v12123_v40, %v12058_v35 }
 0x8f5   : > { %v8447_v55 = vpop.eup %8446  ;;  %v12188_v33 = vcombine.low %v4923_v12, %v4927_v56  ;;  %v5980_v34 = vrot.slane %v12170_v7, %v12072_v44 }
 0x8f6   : > { %v8449_v23 = vpop.eup %8448  ;;  %v4654_v26 = vmul.f32 %v8447_v55, %v11970_v24  ;;  %v5833_v55 = vrot.slane %v5817_v48, %v12072_v44  ;;  %v4675_v48 = vpop.xlane.xlu0 %4674 }
 0x8f7   : > { %v8451_v51 = vpop.eup %8450  ;;  %v4656_v37 = vmul.f32 %v8449_v23, %v11970_v24  ;;  %v5915_v23 = vcombine.low %v4867_v46, %v4871_v38  ;;  %v12146_v46 = vadd.f32 %v12033_v47, %v4675_v48  ;;  %v5905_v38 = vrot.slane %v5897_v43, %v12072_v44 }
 0x8f8   : > { %4710 = vadd.xlane.f32.xlu0 %v4654_v26  ;;  %v4655_v27 = vmul.f32 %v8451_v51, %v11970_v24  ;;  %v8453_v57 = vpop.eup %8452  ;;  %v5916_v26 = vcombine.low %v4875_v42, %v4879_v63  ;;  %v6258_v51 = vcombine.low %v5091_v50, %v5095_v32  ;;  %v5848_v31 = vcombine.low %v5826_v60, %v5833_v55 }
 0x8f9   : > { %v4657_v58 = vmul.f32 %v8453_v57, %v11970_v24  ;;  %v4891_v57 = vrot.slane %v12088_v1, %v12037_v36  ;;  %v5931_v11 = vrot.slane %v5915_v23, %v12072_v44  ;;  %v4915_v42 = vrot.slane %v12088_v1, %v12058_v35 }
 0x8fa   : > { %4712 = vadd.xlane.f32.xlu1 %v4655_v27  ;;  %v5849_v27 = vcombine.low %v5840_v59, %v5847_v52  ;;  %v6274_v15 = vrot.slane %v6258_v51, %v12072_v44  ;;  %v4919_v63 = vrot.slane %v12088_v1, %v12061_v17  ;;  %v5856_v45 = vrot.slane %v5848_v31, %v12072_v44 }
 0x8fb   : > { %v12160_v50 = vcombine.low %v5924_v53, %v5931_v11  ;;  %v4931_v55 = vrot.slane %v12119_v8, %v12043_v9  ;;  %v4935_v59 = vrot.slane %v12119_v8, %v12046_v19  ;;  %v4939_v52 = vrot.slane %v12119_v8, %v12050_v49 }
 0x8fc   : > { %4714 = vadd.xlane.f32.xlu0 %v4656_v37  ;;  %v5938_v37 = vrot.slane %v5916_v26, %v12072_v44  ;;  %v5863_v30 = vrot.slane %v5849_v27, %v12072_v44  ;;  %v12164_v18 = vcombine.low %v6267_v5, %v6274_v15  ;;  %v12174_v60 = vcombine.low %v4915_v42, %v4919_v63 }
 0x8fd   : > { %v4947_v23 = vrot.slane %v12119_v8, %v12058_v35  ;;  %v4951_v26 = vrot.slane %v12119_v8, %v12061_v17  ;;  %v12194_v51 = vcombine.low %v5905_v38, %v5912_v20  ;;  %v12216_v48 = vcombine.low %v4939_v52, %v4943_v4  ;;  %v12240_v38 = vpop.xlane.xlu1 %4684  ;;  %v4679_v52 = vpop.xlane.xlu0 %4678 }
 0x8fe   : > { %4716 = vadd.xlane.f32.xlu1 %v4657_v58  ;;  %v4907_v58 = vrot.slane %v12088_v1, %v12050_v49  ;;  %v12162_v32 = vcombine.low %v5938_v37, %v5945_v22  ;;  %v12168_v1 = vcombine.low %v4891_v57, %v4895_v13  ;;  %v12196_v43 = vcombine.low %v5856_v45, %v5863_v30 }
 0x8ff   : > { %v5994_v57 = vrot.slane %v12174_v60, %v12072_v44  ;;  %v12214_v13 = vcombine.low %v4931_v55, %v4935_v59  ;;  %v12218_v53 = vcombine.low %v4947_v23, %v4951_v26  ;;  %v4955_v37 = vrot.slane %v12123_v40, %v12037_v36 }
 0x900   : > { %v12172_v61 = vcombine.low %v4907_v58, %v4911_v25  ;;  %v5973_v8 = vrot.slane %v12168_v1, %v12072_v44  ;;  %v4963_v22 = vrot.slane %v12123_v40, %v12043_v9  ;;  %v4967_v5 = vrot.slane %v12123_v40, %v12046_v19 }
 0x901   : > { %v4971_v15 = vrot.slane %v12123_v40, %v12050_v49  ;;  %v4983_v58 = vrot.slane %v12123_v40, %v12061_v17  ;;  %v4987_v25 = vrot.slane %v12146_v46, %v12037_v36  ;;  %v4991_v20 = vrot.slane %v12146_v46, %v12040_v16  ;;  %v12262_v31 = vpop.xlane.xlu1 %4688 }
 0x902   : > { %v5987_v27 = vrot.slane %v12172_v61, %v12072_v44  ;;  %v4995_v45 = vrot.slane %v12146_v46, %v12043_v9  ;;  %v4999_v12 = vrot.slane %v12146_v46, %v12046_v19  ;;  %v6029_v30 = vrot.slane %v12214_v13, %v12072_v44 }
 0x903   : > { %v5003_v55 = vrot.slane %v12146_v46, %v12050_v49  ;;  %v5007_v59 = vrot.slane %v12146_v46, %v12053_v10  ;;  %v6061_v23 = vcombine.low %v4955_v37, %v4959_v2  ;;  %v6062_v26 = vcombine.low %v4963_v22, %v4967_v5 }
 0x904   : > { %v6063_v28 = vcombine.low %v4971_v15, %v4975_v21  ;;  %v6064_v6 = vcombine.low %v4979_v62, %v4983_v58  ;;  %v6110_v29 = vcombine.low %v4987_v25, %v4991_v20  ;;  %v6111_v11 = vcombine.low %v4995_v45, %v4999_v12  ;;  %v12280_v25 = vpop.xlane.xlu0 %4682 }
 0x905   : > { %v6112_v37 = vcombine.low %v5003_v55, %v5007_v59  ;;  %v5019_v2 = vrot.slane %v12192_v0, %v12037_v36  ;;  %v5027_v5 = vrot.slane %v12192_v0, %v12043_v9  ;;  %v5035_v15 = vrot.slane %v12192_v0, %v12050_v49  ;;  %v12292_v55 = vpop.xlane.xlu1 %4692 }
 0x906   : > { %v5039_v21 = vrot.slane %v12192_v0, %v12053_v10  ;;  %v5043_v62 = vrot.slane %v12192_v0, %v12058_v35  ;;  %v5047_v58 = vrot.slane %v12192_v0, %v12061_v17  ;;  %v6043_v20 = vrot.slane %v12218_v53, %v12072_v44  ;;  %13805 = vst [vmem:[#allocation92_spill] sm:$0xff] %v12292_v55 }
 0x907   : > { %v6071_v45 = vrot.slane %v6061_v23, %v12072_v44  ;;  %v6085_v12 = vrot.slane %v6063_v28, %v12072_v44  ;;  %v6134_v59 = vrot.slane %v6112_v37, %v12072_v44  ;;  %v12302_v28 = vcombine.low %v5973_v8, %v5980_v34 }
 0x908   : > { %v12311_v23 = vadd.f32 %v12033_v47, %v4679_v52  ;;  %v13806_v7 = vrot.slane %v12188_v33, %v12072_v44  ;;  %v13807_v60 = vrot.slane %v12162_v32, %v12072_v44  ;;  %v13808_v61 = vrot.slane %v12160_v50, %v12072_v44 }
 0x909   : > { %v13810_v52 = vrot.slane %v12164_v18, %v12072_v44  ;;  %v4697_v37 = vpop.xlane.xlu1 %4696 }
 0x90a   : > { %v6044_v1 = vcombine.low %v13806_v7, %v6029_v30  ;;  %v5071_v7 = vrot.slane %v12311_v23, %v12053_v10 }
 0x913   : > { %v8166_v3 = vpop.f32.mrb[60].mxu1 }
 0x914   : > { %v4585_v42 = vadd.f32 %v8166_v3, %v11957_v54  ;;  %v4576_v63 = vpop.f32.mrb[61].mxu1  ;;  %v5011_v3 = vrot.slane %v12146_v46, %v12058_v35 }
 0x915   : > { %v4577_v56 = vadd.f32 %v11957_v54, %v4576_v63  ;;  %v8167_v40 = vpop.f32.mrb[62].mxu1  ;;  %v5015_v63 = vrot.slane %v12146_v46, %v12061_v17  ;;  %v5023_v46 = vrot.slane %v12192_v0, %v12040_v16 }
 0x916   : > { %v4579_v4 = vpop.f32.mrb[63].mxu1  ;;  %v4588_v39 = vadd.f32 %v8167_v40, %v11957_v54  ;;  %v6120_v40 = vrot.slane %v6110_v29, %v12072_v44  ;;  %v6161_v29 = vcombine.low %v5035_v15, %v5039_v21  ;;  %v6052_v21 = vrot.slane %v6044_v1, %v12072_v44 }
 0x917   : > { %8454 = vtanh.f32 %v4577_v56  ;;  %v4580_v13 = vadd.f32 %v11957_v54, %v4579_v4  ;;  %v6113_v22 = vcombine.low %v5011_v3, %v5015_v63  ;;  %v5031_v54 = vrot.slane %v12192_v0, %v12046_v19 }
 0x918   : > { %8456 = vtanh.f32 %v4585_v42  ;;  %v6036_v42 = vrot.slane %v12216_v48, %v12072_v44  ;;  %v6092_v56 = vrot.slane %v6064_v6, %v12072_v44  ;;  %v6127_v0 = vrot.slane %v6111_v11, %v12072_v44 }
 0x919   : > { %8458 = vtanh.f32 %v4580_v13  ;;  %v6141_v48 = vrot.slane %v6113_v22, %v12072_v44  ;;  %v6159_v4 = vcombine.low %v5019_v2, %v5023_v46  ;;  %v6160_v53 = vcombine.low %v5027_v5, %v5031_v54 }
 0x91a   : > { %8460 = vtanh.f32 %v4588_v39  ;;  %v6078_v39 = vrot.slane %v6062_v26, %v12072_v44  ;;  %v5996_v6 = vcombine.low %v5987_v27, %v5994_v57  ;;  %v6162_v11 = vcombine.low %v5043_v62, %v5047_v58  ;;  %v12313_v26 = vpop.xlane.xlu0 %4686 }
 0x91b   : > { %v6045_v8 = vcombine.low %v6036_v42, %v6043_v20  ;;  %v12324_v27 = vcombine.low %v13808_v61, %v13807_v60  ;;  %v13809_v57 = vrot.slane %v12166_v14, %v12072_v44  ;;  %v6094_v33 = vcombine.low %v6085_v12, %v6092_v56 }
 0x91c   : > { %v6093_v34 = vcombine.low %v6071_v45, %v6078_v39  ;;  %v6142_v30 = vcombine.low %v6120_v40, %v6127_v0  ;;  %v6143_v32 = vcombine.low %v6134_v59, %v6141_v48  ;;  %v6169_v46 = vrot.slane %v6159_v4, %v12072_v44 }
 0x91d   : > { %v12332_v63 = vcombine.low %v13810_v52, %v13809_v57  ;;  %v6176_v50 = vrot.slane %v6160_v53, %v12072_v44  ;;  %v6003_v14 = vrot.slane %v12302_v28, %v12072_v44  ;;  %v6010_v5 = vrot.slane %v5996_v6, %v12072_v44 }
 0x91e   : > { %v6183_v18 = vrot.slane %v6161_v29, %v12072_v44  ;;  %v6190_v54 = vrot.slane %v6162_v11, %v12072_v44  ;;  %v6059_v62 = vrot.slane %v6045_v8, %v12072_v44  ;;  %v6101_v58 = vrot.slane %v6093_v34, %v12072_v44  ;;  %v12351_v56 = vpop.xlane.xlu0 %4690  ;;  %v4701_v29 = vpop.xlane.xlu1 %4700 }
 0x91f   : > { %v4745_v20 = vadd.f32 %v12033_v47, %v4697_v37  ;;  %v6108_v45 = vrot.slane %v6094_v33, %v12072_v44  ;;  %v6150_v39 = vrot.slane %v6142_v30, %v12072_v44  ;;  %v5051_v12 = vrot.slane %v12311_v23, %v12037_v36  ;;  %13811 = vst [vmem:[#allocation96_spill] sm:$0xff] %v12351_v56 }
 0x920   : > { %v6157_v0 = vrot.slane %v6143_v32, %v12072_v44  ;;  %v6191_v59 = vcombine.low %v6169_v46, %v6176_v50  ;;  %v5055_v48 = vrot.slane %v12311_v23, %v12040_v16  ;;  %v6192_v4 = vcombine.low %v6183_v18, %v6190_v54 }
 0x921   : > { %v8455_v3 = vpop.eup %8454  ;;  %v5059_v53 = vrot.slane %v12311_v23, %v12043_v9  ;;  %v5063_v28 = vrot.slane %v12311_v23, %v12046_v19  ;;  %v5067_v6 = vrot.slane %v12311_v23, %v12050_v49  ;;  %v5075_v1 = vrot.slane %v12311_v23, %v12058_v35 }
 0x922   : > { %v8457_v13 = vpop.eup %8456  ;;  %v4658_v2 = vmul.f32 %v8455_v3, %v11970_v24  ;;  %v5079_v8 = vrot.slane %v12311_v23, %v12061_v17  ;;  %v5339_v34 = vrot.slane %v4745_v20, %v12037_v36  ;;  %v5343_v3 = vrot.slane %v4745_v20, %v12040_v16  ;;  %v4695_v57 = vpop.xlane.xlu0 %4694 }
 0x923   : > { %v8459_v22 = vpop.eup %8458  ;;  %v4660_v40 = vmul.f32 %v8457_v13, %v11970_v24  ;;  %v5347_v60 = vrot.slane %v4745_v20, %v12043_v9  ;;  %v5351_v61 = vrot.slane %v4745_v20, %v12046_v19  ;;  %v5359_v52 = vrot.slane %v4745_v20, %v12053_v10 }
 0x924   : > { %4718 = vadd.xlane.f32.xlu0 %v4658_v2  ;;  %v4659_v15 = vmul.f32 %v8459_v22, %v11970_v24  ;;  %v8461_v42 = vpop.eup %8460  ;;  %v5363_v33 = vrot.slane %v4745_v20, %v12058_v35  ;;  %v5367_v30 = vrot.slane %v4745_v20, %v12061_v17  ;;  %v4747_v23 = vadd.f32 %v12033_v47, %v4701_v29 }
 0x925   : > { %v4661_v11 = vmul.f32 %v8461_v42, %v11970_v24  ;;  %v5355_v24 = vrot.slane %v4745_v20, %v12050_v49  ;;  %v12379_v13 = vcombine.low %v6003_v14, %v6010_v5  ;;  %v12381_v37 = vcombine.low %v6052_v21, %v6059_v62 }
 0x926   : > { %4720 = vadd.xlane.f32.xlu1 %v4659_v15  ;;  %v12383_v2 = vcombine.low %v6101_v58, %v6108_v45  ;;  %v12385_v32 = vcombine.low %v6150_v39, %v6157_v0  ;;  %v6199_v46 = vrot.slane %v6191_v59, %v12072_v44  ;;  %v6206_v50 = vrot.slane %v6192_v4, %v12072_v44 }
 0x927   : > { %v12389_v22 = vcombine.low %v5051_v12, %v5055_v48  ;;  %v12392_v18 = vadd.f32 %v12033_v47, %v4695_v57  ;;  %v12394_v54 = vcombine.low %v5059_v53, %v5063_v28  ;;  %v12396_v15 = vcombine.low %v5067_v6, %v5071_v7  ;;  %v4705_v5 = vpop.xlane.xlu1 %4704 }
 0x928   : > { %4722 = vadd.xlane.f32.xlu0 %v4660_v40  ;;  %v12398_v14 = vcombine.low %v5075_v1, %v5079_v8  ;;  %v6649_v21 = vcombine.low %v5339_v34, %v5343_v3  ;;  %v6650_v62 = vcombine.low %v5347_v60, %v5351_v61  ;;  %v6651_v58 = vcombine.low %v5355_v24, %v5359_v52 }
 0x929   : > { %v6652_v42 = vcombine.low %v5363_v33, %v5367_v30  ;;  %v5403_v20 = vrot.slane %v4747_v23, %v12037_v36  ;;  %v5407_v45 = vrot.slane %v4747_v23, %v12040_v16  ;;  %v5411_v39 = vrot.slane %v4747_v23, %v12043_v9 }
 0x92a   : > { %4724 = vadd.xlane.f32.xlu1 %v4661_v11  ;;  %v5415_v12 = vrot.slane %v4747_v23, %v12046_v19  ;;  %v5419_v40 = vrot.slane %v4747_v23, %v12050_v49  ;;  %v5423_v0 = vrot.slane %v4747_v23, %v12053_v10  ;;  %v5427_v59 = vrot.slane %v4747_v23, %v12058_v35  ;;  %v4699_v11 = vpop.xlane.xlu0 %4698 }
 0x92b   : > { %v5431_v48 = vrot.slane %v4747_v23, %v12061_v17  ;;  %v4749_v4 = vadd.f32 %v12033_v47, %v4705_v5  ;;  %v12409_v53 = vcombine.low %v6199_v46, %v6206_v50  ;;  %v5307_v7 = vrot.slane %v12392_v18, %v12037_v36  ;;  %v4709_v61 = vpop.xlane.xlu1 %4708 }
 0x92c   : > { %v5311_v1 = vrot.slane %v12392_v18, %v12040_v16  ;;  %v6659_v8 = vrot.slane %v6649_v21, %v12072_v44  ;;  %v6666_v34 = vrot.slane %v6650_v62, %v12072_v44  ;;  %v6673_v3 = vrot.slane %v6651_v58, %v12072_v44 }
 0x92d   : > { %v6680_v60 = vrot.slane %v6652_v42, %v12072_v44  ;;  %v6747_v57 = vcombine.low %v5403_v20, %v5407_v45  ;;  %v6748_v24 = vcombine.low %v5411_v39, %v5415_v12  ;;  %v6749_v52 = vcombine.low %v5419_v40, %v5423_v0 }
 0x92e   : > { %v6750_v33 = vcombine.low %v5427_v59, %v5431_v48  ;;  %v5467_v30 = vrot.slane %v4749_v4, %v12037_v36  ;;  %v5471_v23 = vrot.slane %v4749_v4, %v12040_v16  ;;  %v5475_v46 = vrot.slane %v4749_v4, %v12043_v9 }
 0x92f   : > { %v5479_v50 = vrot.slane %v4749_v4, %v12046_v19  ;;  %v5483_v5 = vrot.slane %v4749_v4, %v12050_v49  ;;  %v5487_v21 = vrot.slane %v4749_v4, %v12053_v10  ;;  %v5491_v62 = vrot.slane %v4749_v4, %v12058_v35 }
 0x930   : > { %v5495_v58 = vrot.slane %v4749_v4, %v12061_v17  ;;  %v4751_v42 = vadd.f32 %v12033_v47, %v4709_v61  ;;  %v5315_v20 = vrot.slane %v12392_v18, %v12043_v9  ;;  %v5319_v45 = vrot.slane %v12392_v18, %v12046_v19 }
 0x931   : > { %v5323_v39 = vrot.slane %v12392_v18, %v12050_v49  ;;  %v6681_v12 = vcombine.low %v6659_v8, %v6666_v34  ;;  %v6682_v40 = vcombine.low %v6673_v3, %v6680_v60  ;;  %v5327_v0 = vrot.slane %v12392_v18, %v12053_v10 }
 0x932   : > { %v5331_v59 = vrot.slane %v12392_v18, %v12058_v35  ;;  %v6757_v48 = vrot.slane %v6747_v57, %v12072_v44  ;;  %v6764_v4 = vrot.slane %v6748_v24, %v12072_v44  ;;  %v6771_v61 = vrot.slane %v6749_v52, %v12072_v44 }
 0x933   : > { %v6778_v29 = vrot.slane %v6750_v33, %v12072_v44  ;;  %v6845_v28 = vcombine.low %v5467_v30, %v5471_v23  ;;  %v6846_v6 = vcombine.low %v5475_v46, %v5479_v50  ;;  %v6847_v41 = vcombine.low %v5483_v5, %v5487_v21 }
 0x934   : > { %v6848_v8 = vcombine.low %v5491_v62, %v5495_v58  ;;  %v5531_v34 = vrot.slane %v4751_v42, %v12037_v36  ;;  %v5535_v3 = vrot.slane %v4751_v42, %v12040_v16  ;;  %v5539_v60 = vrot.slane %v4751_v42, %v12043_v9 }
 0x935   : > { %v5543_v57 = vrot.slane %v4751_v42, %v12046_v19  ;;  %v5547_v24 = vrot.slane %v4751_v42, %v12050_v49  ;;  %v5551_v52 = vrot.slane %v4751_v42, %v12053_v10  ;;  %v5555_v33 = vrot.slane %v4751_v42, %v12058_v35 }
 0x936   : > { %v5559_v30 = vrot.slane %v4751_v42, %v12061_v17  ;;  %v4746_v23 = vadd.f32 %v12033_v47, %v4699_v11  ;;  %v6696_v46 = vrot.slane %v6682_v40, %v12072_v44  ;;  %v5335_v50 = vrot.slane %v12392_v18, %v12061_v17 }
 0x937   : > { %v6779_v5 = vcombine.low %v6757_v48, %v6764_v4  ;;  %v6780_v21 = vcombine.low %v6771_v61, %v6778_v29  ;;  %v12465_v62 = vcombine.low %v5307_v7, %v5311_v1  ;;  %v12467_v58 = vcombine.low %v5315_v20, %v5319_v45  ;;  %v4703_v20 = vpop.xlane.xlu0 %4702 }
 0x938   : > { %v6855_v42 = vrot.slane %v6845_v28, %v12072_v44  ;;  %v6862_v11 = vrot.slane %v6846_v6, %v12072_v44  ;;  %v6876_v40 = vrot.slane %v6848_v8, %v12072_v44  ;;  %v6943_v55 = vcombine.low %v5531_v34, %v5535_v3 }
 0x939   : > { %v6944_v18 = vcombine.low %v5539_v60, %v5543_v57  ;;  %v6945_v56 = vcombine.low %v5547_v24, %v5551_v52  ;;  %v6602_v29 = vcombine.low %v5323_v39, %v5327_v0  ;;  %v6603_v7 = vcombine.low %v5331_v59, %v5335_v50 }
 0x93a   : > { %v5371_v1 = vrot.slane %v4746_v23, %v12037_v36  ;;  %v5375_v28 = vrot.slane %v4746_v23, %v12040_v16  ;;  %v5383_v6 = vrot.slane %v4746_v23, %v12046_v19  ;;  %v6794_v45 = vrot.slane %v6780_v21, %v12072_v44 }
 0x93b   : > { %7388 = vperm.xlu1 %8365, %v12194_v51   ;;  %v6689_v51 = vrot.slane %v6681_v12, %v12072_v44  ;;  %v6869_v12 = vrot.slane %v6847_v41, %v12072_v44  ;;  %v5379_v41 = vrot.slane %v4746_v23, %v12043_v9  ;;  %v6877_v4 = vcombine.low %v6855_v42, %v6862_v11  ;;  %v4707_v50 = vpop.xlane.xlu0 %4706 }
 0x93c   : > { %v5387_v0 = vrot.slane %v4746_v23, %v12050_v49  ;;  %v6953_v59 = vrot.slane %v6943_v55, %v12072_v44  ;;  %v6967_v61 = vrot.slane %v6945_v56, %v12072_v44  ;;  %v4748_v34 = vadd.f32 %v12033_v47, %v4703_v20 }
 0x93d   : > { %v6697_v48 = vcombine.low %v6689_v51, %v6696_v46  ;;  %v6878_v39 = vcombine.low %v6869_v12, %v6876_v40  ;;  %v5391_v3 = vrot.slane %v4746_v23, %v12053_v10  ;;  %v5399_v60 = vrot.slane %v4746_v23, %v12061_v17 }
 0x93e   : > { %7385 = vperm.xlu0 %8364, %v12196_v43   ;;  %v6946_v43 = vcombine.low %v5555_v33, %v5559_v30  ;;  %v13812_v57 = vrot.slane %v12394_v54, %v12072_v44  ;;  %v13813_v55 = vrot.slane %v12389_v22, %v12072_v44  ;;  %v13814_v56 = vrot.slane %v12398_v14, %v12072_v44 }
 0x93f   : > { %7391 = vperm.xlu1 %8365, %v12324_v27   ;;  %v6787_v27 = vrot.slane %v6779_v5, %v12072_v44  ;;  %v13815_v52 = vrot.slane %v12396_v15, %v12072_v44  ;;  %v6610_v30 = vrot.slane %v12465_v62, %v12072_v44  ;;  %v6624_v51 = vrot.slane %v6602_v29, %v12072_v44 }
 0x940   : > { %v6974_v8 = vrot.slane %v6946_v43, %v12072_v44  ;;  %v6240_v24 = vcombine.low %v13813_v55, %v13812_v57  ;;  %v6631_v22 = vrot.slane %v6603_v7, %v12072_v44  ;;  %v6698_v46 = vcombine.low %v5371_v1, %v5375_v28 }
 0x941   : > { %v6241_v33 = vcombine.low %v13815_v52, %v13814_v56  ;;  %v6795_v54 = vcombine.low %v6787_v27, %v6794_v45  ;;  %v6885_v14 = vrot.slane %v6877_v4, %v12072_v44  ;;  %v6892_v15 = vrot.slane %v6878_v39, %v12072_v44 }
 0x942   : > { %7412 = vperm.xlu0 %8364, %v12332_v63   ;;  %v6960_v63 = vrot.slane %v6944_v18, %v12072_v44  ;;  %v6976_v21 = vcombine.low %v6967_v61, %v6974_v8  ;;  %v6699_v42 = vcombine.low %v5379_v41, %v5383_v6  ;;  %v6700_v62 = vcombine.low %v5387_v0, %v5391_v3 }
 0x943   : > { %7394 = vperm.xlu1 %8365, %v12379_v13   ;;  %v5395_v13 = vrot.slane %v4746_v23, %v12058_v35  ;;  %v6617_v23 = vrot.slane %v12467_v58, %v12072_v44  ;;  %v5435_v58 = vrot.slane %v4748_v34, %v12037_v36  ;;  %v5443_v12 = vrot.slane %v4748_v34, %v12043_v9 }
 0x944   : > { %v6975_v5 = vcombine.low %v6953_v59, %v6960_v63  ;;  %v5447_v40 = vrot.slane %v4748_v34, %v12046_v19  ;;  %v5451_v18 = vrot.slane %v4748_v34, %v12050_v49  ;;  %v4750_v43 = vadd.f32 %v12033_v47, %v4707_v50 }
 0x945   : > { %v6701_v11 = vcombine.low %v5395_v13, %v5399_v60  ;;  %v5459_v29 = vrot.slane %v4748_v34, %v12058_v35  ;;  %v5463_v7 = vrot.slane %v4748_v34, %v12061_v17  ;;  %v6893_v1 = vcombine.low %v6885_v14, %v6892_v15 }
 0x946   : > { %7436 = vperm.xlu0 %8364, %v6697_v48   ;;  %v5455_v48 = vrot.slane %v4748_v34, %v12053_v10  ;;  %v6983_v20 = vrot.slane %v6975_v5, %v12072_v44  ;;  %v6990_v27 = vrot.slane %v6976_v21, %v12072_v44  ;;  %v6248_v28 = vrot.slane %v6240_v24, %v12072_v44 }
 0x947   : > { %7397 = vperm.xlu1 %8365, %v12381_v37   ;;  %v5439_v37 = vrot.slane %v4748_v34, %v12040_v16  ;;  %v6255_v41 = vrot.slane %v6241_v33, %v12072_v44  ;;  %v6632_v6 = vcombine.low %v6610_v30, %v6617_v23  ;;  %v6633_v45 = vcombine.low %v6624_v51, %v6631_v22 }
 0x948   : > { %v6708_v4 = vrot.slane %v6698_v46, %v12072_v44  ;;  %v6722_v39 = vrot.slane %v6700_v62, %v12072_v44  ;;  %v6729_v0 = vrot.slane %v6701_v11, %v12072_v44  ;;  %v6797_v63 = vcombine.low %v5443_v12, %v5447_v40 }
 0x949   : > { %v6796_v59 = vcombine.low %v5435_v58, %v5439_v37  ;;  %v6798_v61 = vcombine.low %v5451_v18, %v5455_v48  ;;  %v6799_v8 = vcombine.low %v5459_v29, %v5463_v7  ;;  %v5499_v34 = vrot.slane %v4750_v43, %v12037_v36 }
 0x94a   : > { %7442 = vperm.xlu0 %8364, %v6795_v54   ;;  %v6991_v3 = vcombine.low %v6983_v20, %v6990_v27  ;;  %v5503_v13 = vrot.slane %v4750_v43, %v12040_v16  ;;  %v5507_v60 = vrot.slane %v4750_v43, %v12043_v9  ;;  %v5511_v57 = vrot.slane %v4750_v43, %v12046_v19 }
 0x94b   : > { %7400 = vperm.xlu1 %8365, %v12383_v2   ;;  %v6715_v2 = vrot.slane %v6699_v42, %v12072_v44  ;;  %v5515_v55 = vrot.slane %v4750_v43, %v12050_v49  ;;  %v5519_v24 = vrot.slane %v4750_v43, %v12053_v10  ;;  %v5523_v56 = vrot.slane %v4750_v43, %v12058_v35 }
 0x94c   : > { %v6256_v52 = vcombine.low %v6248_v28, %v6255_v41  ;;  %v6640_v33 = vrot.slane %v6632_v6, %v12072_v44  ;;  %v6647_v30 = vrot.slane %v6633_v45, %v12072_v44  ;;  %v6731_v54 = vcombine.low %v6722_v39, %v6729_v0 }
 0x94d   : > { %v6730_v23 = vcombine.low %v6708_v4, %v6715_v2  ;;  %v6806_v51 = vrot.slane %v6796_v59, %v12072_v44  ;;  %v6813_v22 = vrot.slane %v6797_v63, %v12072_v44  ;;  %v6820_v46 = vrot.slane %v6798_v61, %v12072_v44 }
 0x94e   : > { %7448 = vperm.xlu0 %8364, %v6893_v1   ;;  %v6827_v50 = vrot.slane %v6799_v8, %v12072_v44  ;;  %v6894_v14 = vcombine.low %v5499_v34, %v5503_v13  ;;  %v6895_v15 = vcombine.low %v5507_v60, %v5511_v57  ;;  %v6896_v5 = vcombine.low %v5515_v55, %v5519_v24 }
 0x94f   : > { %7403 = vperm.xlu1 %8365, %v12385_v32   ;;  %v5527_v32 = vrot.slane %v4750_v43, %v12061_v17  ;;  %v6738_v42 = vrot.slane %v6730_v23, %v12072_v44  ;;  %v6745_v62 = vrot.slane %v6731_v54, %v12072_v44  ;;  %v6828_v11 = vcombine.low %v6806_v51, %v6813_v22 }
 0x950   : > { %v6829_v58 = vcombine.low %v6820_v46, %v6827_v50  ;;  %v6904_v37 = vrot.slane %v6894_v14, %v12072_v44  ;;  %v6911_v12 = vrot.slane %v6895_v15, %v12072_v44  ;;  %v6918_v40 = vrot.slane %v6896_v5, %v12072_v44 }
 0x951   : > { %v6897_v21 = vcombine.low %v5523_v56, %v5527_v32  ;;  %v6746_v43 = vcombine.low %v6738_v42, %v6745_v62  ;;  %v6836_v48 = vrot.slane %v6828_v11, %v12072_v44  ;;  %v4738_v41 = vadd.f32 %v12033_v47, %v12280_v25 }
 0x952   : > { %7454 = vperm.xlu0 %8364, %v6991_v3   ;;  %v6843_v29 = vrot.slane %v6829_v58, %v12072_v44  ;;  %v6926_v7 = vcombine.low %v6904_v37, %v6911_v12  ;;  %v4739_v45 = vadd.f32 %v12033_v47, %v12240_v38  ;;  %v4740_v24 = vadd.f32 %v12033_v47, %v12313_v26 }
 0x953   : > { %7406 = vperm.xlu1 %8365, %v12409_v53   ;;  %v6648_v53 = vcombine.low %v6640_v33, %v6647_v30  ;;  %v6925_v18 = vrot.slane %v6897_v21, %v12072_v44  ;;  %v5115_v4 = vrot.slane %v4738_v41, %v12037_v36  ;;  %v5119_v2 = vrot.slane %v4738_v41, %v12040_v16 }
 0x954   : > { %v6844_v20 = vcombine.low %v6836_v48, %v6843_v29  ;;  %v6934_v27 = vrot.slane %v6926_v7, %v12072_v44  ;;  %v5123_v39 = vrot.slane %v4738_v41, %v12043_v9  ;;  %v5127_v0 = vrot.slane %v4738_v41, %v12046_v19 }
 0x955   : > { %v6927_v1 = vcombine.low %v6918_v40, %v6925_v18  ;;  %v5131_v59 = vrot.slane %v4738_v41, %v12050_v49  ;;  %v5135_v63 = vrot.slane %v4738_v41, %v12053_v10  ;;  %v5139_v61 = vrot.slane %v4738_v41, %v12058_v35  ;;  %v13816_v40 = vld [vmem:[#allocation96_spill] sm:$0xff] }
 0x956   : > { %v5143_v25 = vrot.slane %v4738_v41, %v12061_v17  ;;  %v5147_v8 = vrot.slane %v4739_v45, %v12037_v36  ;;  %v5151_v38 = vrot.slane %v4739_v45, %v12040_v16  ;;  %v5155_v34 = vrot.slane %v4739_v45, %v12043_v9 }
 0x957   : > { %7409 = vperm.xlu1 %8365, %v6256_v52   ;;  %v6941_v28 = vrot.slane %v6927_v1, %v12072_v44  ;;  %v5159_v3 = vrot.slane %v4739_v45, %v12046_v19  ;;  %v5163_v13 = vrot.slane %v4739_v45, %v12050_v49  ;;  %v5167_v60 = vrot.slane %v4739_v45, %v12053_v10 }
 0x958   : > { %v5171_v57 = vrot.slane %v4739_v45, %v12058_v35  ;;  %v5175_v55 = vrot.slane %v4739_v45, %v12061_v17  ;;  %v6306_v56 = vcombine.low %v5115_v4, %v5119_v2  ;;  %v6307_v32 = vcombine.low %v5123_v39, %v5127_v0 }
 0x959   : > { %v6942_v6 = vcombine.low %v6934_v27, %v6941_v28  ;;  %v6308_v52 = vcombine.low %v5131_v59, %v5135_v63  ;;  %v6309_v33 = vcombine.low %v5139_v61, %v5143_v25  ;;  %v6355_v30 = vcombine.low %v5147_v8, %v5151_v38 }
 0x95a   : > { %v4741_v23 = vadd.f32 %v12033_v47, %v12262_v31  ;;  %v6356_v54 = vcombine.low %v5155_v34, %v5159_v3  ;;  %v6357_v51 = vcombine.low %v5163_v13, %v5167_v60  ;;  %v6358_v22 = vcombine.low %v5171_v57, %v5175_v55 }
 0x95b   : > { %7433 = vperm.xlu1 %8365, %v6648_v53   ;;  %v5179_v46 = vrot.slane %v4740_v24, %v12037_v36  ;;  %v5183_v50 = vrot.slane %v4740_v24, %v12040_v16  ;;  %v5187_v14 = vrot.slane %v4740_v24, %v12043_v9  ;;  %v5191_v15 = vrot.slane %v4740_v24, %v12046_v19 }
 0x95c   : > { %v5195_v26 = vrot.slane %v4740_v24, %v12050_v49  ;;  %v5199_v5 = vrot.slane %v4740_v24, %v12053_v10  ;;  %v5203_v21 = vrot.slane %v4740_v24, %v12058_v35  ;;  %v5207_v53 = vrot.slane %v4740_v24, %v12061_v17 }
 0x95d   : > { %v6316_v31 = vrot.slane %v6306_v56, %v12072_v44  ;;  %v6323_v42 = vrot.slane %v6307_v32, %v12072_v44  ;;  %v6330_v62 = vrot.slane %v6308_v52, %v12072_v44  ;;  %v6337_v11 = vrot.slane %v6309_v33, %v12072_v44 }
 0x95e   : > { %v6365_v58 = vrot.slane %v6355_v30, %v12072_v44  ;;  %v6372_v37 = vrot.slane %v6356_v54, %v12072_v44  ;;  %v6379_v12 = vrot.slane %v6357_v51, %v12072_v44  ;;  %v4742_v18 = vadd.f32 %v12033_v47, %v13816_v40 }
 0x95f   : > { %7439 = vperm.xlu1 %8365, %v6746_v43   ;;  %v6386_v43 = vrot.slane %v6358_v22, %v12072_v44  ;;  %v6404_v48 = vcombine.low %v5179_v46, %v5183_v50  ;;  %v5211_v29 = vrot.slane %v4741_v23, %v12037_v36  ;;  %v6405_v7 = vcombine.low %v5187_v14, %v5191_v15  ;;  %v13817_v22 = vld [vmem:[#allocation92_spill] sm:$0xff] }
 0x960   : > { %v6406_v1 = vcombine.low %v5195_v26, %v5199_v5  ;;  %v5215_v27 = vrot.slane %v4741_v23, %v12040_v16  ;;  %v5219_v28 = vrot.slane %v4741_v23, %v12043_v9  ;;  %v5223_v41 = vrot.slane %v4741_v23, %v12046_v19 }
 0x961   : > { %v5231_v45 = vrot.slane %v4741_v23, %v12053_v10  ;;  %v5235_v4 = vrot.slane %v4741_v23, %v12058_v35  ;;  %v5239_v2 = vrot.slane %v4741_v23, %v12061_v17  ;;  %v6338_v39 = vcombine.low %v6316_v31, %v6323_v42 }
 0x962   : > { %v6339_v0 = vcombine.low %v6330_v62, %v6337_v11  ;;  %v6387_v59 = vcombine.low %v6365_v58, %v6372_v37  ;;  %v6388_v63 = vcombine.low %v6379_v12, %v6386_v43  ;;  %v6414_v61 = vrot.slane %v6404_v48, %v12072_v44 }
 0x963   : > { %7445 = vperm.xlu1 %8365, %v6844_v20   ;;  %v6407_v20 = vcombine.low %v5203_v21, %v5207_v53  ;;  %v6421_v25 = vrot.slane %v6405_v7, %v12072_v44  ;;  %v6428_v8 = vrot.slane %v6406_v1, %v12072_v44  ;;  %v6453_v34 = vcombine.low %v5211_v29, %v5215_v27 }
 0x964   : > { %v6454_v3 = vcombine.low %v5219_v28, %v5223_v41  ;;  %v5243_v60 = vrot.slane %v4742_v18, %v12037_v36  ;;  %v6456_v57 = vcombine.low %v5235_v4, %v5239_v2  ;;  %v5247_v55 = vrot.slane %v4742_v18, %v12040_v16 }
 0x965   : > { %v6435_v38 = vrot.slane %v6407_v20, %v12072_v44  ;;  %v5251_v24 = vrot.slane %v4742_v18, %v12043_v9  ;;  %v5255_v56 = vrot.slane %v4742_v18, %v12046_v19  ;;  %v5259_v32 = vrot.slane %v4742_v18, %v12050_v49 }
 0x966   : > { %v5263_v52 = vrot.slane %v4742_v18, %v12053_v10  ;;  %v5267_v33 = vrot.slane %v4742_v18, %v12058_v35  ;;  %v5271_v30 = vrot.slane %v4742_v18, %v12061_v17  ;;  %v6353_v54 = vrot.slane %v6339_v0, %v12072_v44 }
 0x967   : > { %7451 = vperm.xlu1 %8365, %v6942_v6   ;;  %v5227_v6 = vrot.slane %v4741_v23, %v12050_v49  ;;  %v6346_v23 = vrot.slane %v6338_v39, %v12072_v44  ;;  %v6395_v51 = vrot.slane %v6387_v59, %v12072_v44  ;;  %v12623_v46 = vadd.f32 %v12033_v47, %v13817_v22 }
 0x968   : > { %v6402_v50 = vrot.slane %v6388_v63, %v12072_v44  ;;  %v12626_v14 = vcombine.low %v6414_v61, %v6421_v25  ;;  %v12628_v15 = vcombine.low %v6428_v8, %v6435_v38  ;;  %v6463_v26 = vrot.slane %v6453_v34, %v12072_v44 }
 0x969   : > { %v6455_v13 = vcombine.low %v5227_v6, %v5231_v45  ;;  %v6470_v5 = vrot.slane %v6454_v3, %v12072_v44  ;;  %v6484_v53 = vrot.slane %v6456_v57, %v12072_v44  ;;  %v12634_v31 = vcombine.low %v5243_v60, %v5247_v55 }
 0x96a   : > { %v12636_v42 = vcombine.low %v5251_v24, %v5255_v56  ;;  %v12638_v62 = vcombine.low %v5259_v32, %v5263_v52  ;;  %v12640_v11 = vcombine.low %v5267_v33, %v5271_v30  ;;  %v12642_v58 = vcombine.low %v6346_v23, %v6353_v54 }
 0x96b   : > { %v6477_v21 = vrot.slane %v6455_v13, %v12072_v44  ;;  %v12644_v37 = vcombine.low %v6395_v51, %v6402_v50  ;;  %v5275_v12 = vrot.slane %v12623_v46, %v12037_v36  ;;  %v5279_v40 = vrot.slane %v12623_v46, %v12040_v16 }
 0x96c   : > { %v6444_v18 = vrot.slane %v12626_v14, %v12072_v44  ;;  %v6451_v43 = vrot.slane %v12628_v15, %v12072_v44  ;;  %v12654_v48 = vcombine.low %v6463_v26, %v6470_v5  ;;  %v6512_v1 = vrot.slane %v12634_v31, %v12072_v44 }
 0x96d   : > { %v12656_v29 = vcombine.low %v6477_v21, %v6484_v53  ;;  %v6519_v20 = vrot.slane %v12636_v42, %v12072_v44  ;;  %v6526_v27 = vrot.slane %v12638_v62, %v12072_v44  ;;  %v6533_v28 = vrot.slane %v12640_v11, %v12072_v44 }
 0x96e   : > { %v5283_v6 = vrot.slane %v12623_v46, %v12043_v9  ;;  %v5287_v45 = vrot.slane %v12623_v46, %v12046_v19  ;;  %v5291_v4 = vrot.slane %v12623_v46, %v12050_v49  ;;  %v5295_v39 = vrot.slane %v12623_v46, %v12053_v10 }
 0x96f   : > { %v5299_v0 = vrot.slane %v12623_v46, %v12058_v35  ;;  %v5303_v59 = vrot.slane %v12623_v46, %v12061_v17  ;;  %v12679_v63 = vcombine.low %v5275_v12, %v5279_v40  ;;  %v6500_v46 = vrot.slane %v12656_v29, %v12072_v44 }
 0x970   : > { %v6535_v14 = vcombine.low %v6526_v27, %v6533_v28 }
 0x971   : > { %v6561_v15 = vrot.slane %v12679_v63, %v12072_v44 }
 0x972   : > { %v6549_v62 = vrot.slane %v6535_v14, %v12072_v44 }
 0x985   : > { %v4711_v7 = vpop.xlane.xlu0 %4710 }
 0x986   : > { %v4752_v41 = vadd.f32 %v12033_v47, %v4711_v7 }
 0x987   : > { %v4713_v2 = vpop.xlane.xlu1 %4712 }
 0x988   : > { %v4753_v61 = vadd.f32 %v12033_v47, %v4713_v2  ;;  %v5563_v25 = vrot.slane %v4752_v41, %v12037_v36  ;;  %v5567_v8 = vrot.slane %v4752_v41, %v12040_v16  ;;  %v5571_v38 = vrot.slane %v4752_v41, %v12043_v9 }
 0x989   : > { %v4715_v34 = vpop.xlane.xlu0 %4714  ;;  %v5575_v3 = vrot.slane %v4752_v41, %v12046_v19  ;;  %v5579_v13 = vrot.slane %v4752_v41, %v12050_v49  ;;  %v5583_v60 = vrot.slane %v4752_v41, %v12053_v10  ;;  %v5587_v57 = vrot.slane %v4752_v41, %v12058_v35 }
 0x98a   : > { %v4754_v55 = vadd.f32 %v12033_v47, %v4715_v34  ;;  %v5591_v24 = vrot.slane %v4752_v41, %v12061_v17  ;;  %v6992_v56 = vcombine.low %v5563_v25, %v5567_v8  ;;  %v5595_v32 = vrot.slane %v4753_v61, %v12037_v36 }
 0x98b   : > { %v4717_v52 = vpop.xlane.xlu1 %4716  ;;  %v6993_v33 = vcombine.low %v5571_v38, %v5575_v3  ;;  %v6994_v30 = vcombine.low %v5579_v13, %v5583_v60  ;;  %v5599_v23 = vrot.slane %v4753_v61, %v12040_v16  ;;  %v5603_v54 = vrot.slane %v4753_v61, %v12043_v9 }
 0x98c   : > { %v12695_v51 = vadd.f32 %v12033_v47, %v4717_v52  ;;  %v6995_v22 = vcombine.low %v5587_v57, %v5591_v24  ;;  %v7002_v50 = vrot.slane %v6992_v56, %v12072_v44  ;;  %v5607_v26 = vrot.slane %v4753_v61, %v12046_v19 }
 0x98d   : > { %v7009_v5 = vrot.slane %v6993_v33, %v12072_v44  ;;  %v7016_v21 = vrot.slane %v6994_v30, %v12072_v44  ;;  %v5611_v53 = vrot.slane %v4753_v61, %v12050_v49  ;;  %v5615_v12 = vrot.slane %v4753_v61, %v12053_v10 }
 0x98e   : > { %v7023_v40 = vrot.slane %v6995_v22, %v12072_v44  ;;  %v5619_v7 = vrot.slane %v4753_v61, %v12058_v35  ;;  %v5623_v41 = vrot.slane %v4753_v61, %v12061_v17  ;;  %v7041_v2 = vcombine.low %v5595_v32, %v5599_v23 }
 0x98f   : > { %v7024_v25 = vcombine.low %v7002_v50, %v7009_v5  ;;  %v7042_v8 = vcombine.low %v5603_v54, %v5607_v26  ;;  %v7043_v38 = vcombine.low %v5611_v53, %v5615_v12  ;;  %v5627_v34 = vrot.slane %v4754_v55, %v12037_v36 }
 0x990   : > { %v7025_v3 = vcombine.low %v7016_v21, %v7023_v40  ;;  %v7044_v13 = vcombine.low %v5619_v7, %v5623_v41  ;;  %v7051_v60 = vrot.slane %v7041_v2, %v12072_v44  ;;  %v5631_v57 = vrot.slane %v4754_v55, %v12040_v16 }
 0x991   : > { %v7032_v24 = vrot.slane %v7024_v25, %v12072_v44  ;;  %v7058_v56 = vrot.slane %v7042_v8, %v12072_v44  ;;  %v7065_v52 = vrot.slane %v7043_v38, %v12072_v44  ;;  %v5635_v61 = vrot.slane %v4754_v55, %v12043_v9 }
 0x992   : > { %v7039_v32 = vrot.slane %v7025_v3, %v12072_v44  ;;  %v7072_v33 = vrot.slane %v7044_v13, %v12072_v44  ;;  %v5639_v30 = vrot.slane %v4754_v55, %v12046_v19  ;;  %v5643_v23 = vrot.slane %v4754_v55, %v12050_v49 }
 0x993   : > { %v7073_v54 = vcombine.low %v7051_v60, %v7058_v56  ;;  %v5647_v22 = vrot.slane %v4754_v55, %v12053_v10  ;;  %v5651_v50 = vrot.slane %v4754_v55, %v12058_v35  ;;  %v5655_v26 = vrot.slane %v4754_v55, %v12061_v17 }
 0x994   : > { %v7040_v5 = vcombine.low %v7032_v24, %v7039_v32  ;;  %v7074_v21 = vcombine.low %v7065_v52, %v7072_v33  ;;  %v7090_v53 = vcombine.low %v5627_v34, %v5631_v57  ;;  %v7091_v12 = vcombine.low %v5635_v61, %v5639_v30 }
 0x995   : > { %v7081_v40 = vrot.slane %v7073_v54, %v12072_v44  ;;  %v7092_v7 = vcombine.low %v5643_v23, %v5647_v22  ;;  %v7093_v41 = vcombine.low %v5651_v50, %v5655_v26  ;;  %v5659_v2 = vrot.slane %v12695_v51, %v12037_v36 }
 0x996   : > { %7457 = vperm.xlu1 %8365, %v7040_v5   ;;  %v7088_v25 = vrot.slane %v7074_v21, %v12072_v44  ;;  %v7100_v8 = vrot.slane %v7090_v53, %v12072_v44  ;;  %v7107_v38 = vrot.slane %v7091_v12, %v12072_v44  ;;  %v5663_v55 = vrot.slane %v12695_v51, %v12040_v16 }
 0x997   : > { %v7114_v34 = vrot.slane %v7092_v7, %v12072_v44  ;;  %v7121_v3 = vrot.slane %v7093_v41, %v12072_v44  ;;  %v5667_v13 = vrot.slane %v12695_v51, %v12043_v9  ;;  %v5671_v60 = vrot.slane %v12695_v51, %v12046_v19 }
 0x998   : > { %v7089_v57 = vcombine.low %v7081_v40, %v7088_v25  ;;  %v7122_v24 = vcombine.low %v7100_v8, %v7107_v38  ;;  %v5675_v56 = vrot.slane %v12695_v51, %v12050_v49  ;;  %v5679_v52 = vrot.slane %v12695_v51, %v12053_v10 }
 0x999   : > { %v7123_v61 = vcombine.low %v7114_v34, %v7121_v3  ;;  %v5683_v32 = vrot.slane %v12695_v51, %v12058_v35  ;;  %v5687_v33 = vrot.slane %v12695_v51, %v12061_v17  ;;  %v7139_v30 = vcombine.low %v5659_v2, %v5663_v55 }
 0x99a   : > { %7460 = vperm.xlu0 %8364, %v7089_v57   ;;  %7415 = vperm.xlu1 %8365, %v12642_v58   ;;  %v7130_v23 = vrot.slane %v7122_v24, %v12072_v44  ;;  %v7140_v54 = vcombine.low %v5667_v13, %v5671_v60  ;;  %v7141_v22 = vcombine.low %v5675_v56, %v5679_v52 }
 0x99b   : > { %v7137_v50 = vrot.slane %v7123_v61, %v12072_v44  ;;  %v7142_v26 = vcombine.low %v5683_v32, %v5687_v33  ;;  %v7149_v5 = vrot.slane %v7139_v30, %v12072_v44  ;;  %v6552_v51 = vcombine.low %v5283_v6, %v5287_v45 }
 0x99c   : > { %v7156_v21 = vrot.slane %v7140_v54, %v12072_v44  ;;  %v7163_v58 = vrot.slane %v7141_v22, %v12072_v44  ;;  %v6553_v53 = vcombine.low %v5291_v4, %v5295_v39  ;;  %v6554_v12 = vcombine.low %v5299_v0, %v5303_v59 }
 0x99d   : > { %v7138_v40 = vcombine.low %v7130_v23, %v7137_v50  ;;  %v7170_v6 = vrot.slane %v7142_v26, %v12072_v44  ;;  %v6452_v4 = vcombine.low %v6444_v18, %v6451_v43  ;;  %v6493_v39 = vrot.slane %v12654_v48, %v12072_v44 }
 0x99e   : > { %7418 = vperm.xlu1 %8365, %v12644_v37   ;;  %v7171_v45 = vcombine.low %v7149_v5, %v7156_v21  ;;  %v6534_v37 = vcombine.low %v6512_v1, %v6519_v20  ;;  %v6568_v43 = vrot.slane %v6552_v51, %v12072_v44  ;;  %v6575_v42 = vrot.slane %v6553_v53, %v12072_v44 }
 0x99f   : > { %7463 = vperm.xlu0 %8364, %v7138_v40   ;;  %v7172_v0 = vcombine.low %v7163_v58, %v7170_v6  ;;  %v6582_v48 = vrot.slane %v6554_v12, %v12072_v44  ;;  %v6501_v11 = vcombine.low %v6493_v39, %v6500_v46 }
 0x9a0   : > { %v7179_v18 = vrot.slane %v7171_v45, %v12072_v44  ;;  %v6542_v1 = vrot.slane %v6534_v37, %v12072_v44  ;;  %v6583_v20 = vcombine.low %v6561_v15, %v6568_v43 }
 0x9a1   : > { %v7186_v31 = vrot.slane %v7172_v0, %v12072_v44  ;;  %v6584_v27 = vcombine.low %v6575_v42, %v6582_v48 }
 0x9a2   : > { %7421 = vperm.xlu1 %8365, %v6452_v4   ;;  %v6550_v28 = vcombine.low %v6542_v1, %v6549_v62  ;;  %v6591_v59 = vrot.slane %v6583_v20, %v12072_v44 }
 0x9a3   : > { %v7187_v29 = vcombine.low %v7179_v18, %v7186_v31  ;;  %v6598_v63 = vrot.slane %v6584_v27, %v12072_v44 }
 0x9a5   : > { %7466 = vperm.xlu0 %8364, %v7187_v29   ;;  %v6599_v7 = vcombine.low %v6591_v59, %v6598_v63 }
 0x9a6   : > { %7424 = vperm.xlu1 %8365, %v6501_v11  }
 0x9aa   : > { %7427 = vperm.xlu1 %8365, %v6550_v28  }
 0x9ae   : > { %7430 = vperm.xlu1 %8365, %v6599_v7  }
 0x9b1   : > { %v4719_v41 = vpop.xlane.xlu0 %4718 }
 0x9b2   : > { %v4756_v2 = vadd.f32 %v12033_v47, %v4719_v41 }
 0x9b3   : > { %v4721_v25 = vpop.xlane.xlu1 %4720 }
 0x9b4   : > { %v4757_v8 = vadd.f32 %v12033_v47, %v4721_v25  ;;  %v5691_v38 = vrot.slane %v4756_v2, %v12037_v36  ;;  %v5695_v55 = vrot.slane %v4756_v2, %v12040_v16  ;;  %v5699_v34 = vrot.slane %v4756_v2, %v12043_v9 }
 0x9b5   : > { %v4723_v3 = vpop.xlane.xlu0 %4722  ;;  %v5703_v13 = vrot.slane %v4756_v2, %v12046_v19  ;;  %v5707_v60 = vrot.slane %v4756_v2, %v12050_v49  ;;  %v5711_v57 = vrot.slane %v4756_v2, %v12053_v10  ;;  %v5715_v24 = vrot.slane %v4756_v2, %v12058_v35 }
 0x9b6   : > { %v5719_v56 = vrot.slane %v4756_v2, %v12061_v17  ;;  %v7188_v52 = vcombine.low %v5691_v38, %v5695_v55  ;;  %v5723_v61 = vrot.slane %v4757_v8, %v12037_v36  ;;  %v5727_v30 = vrot.slane %v4757_v8, %v12040_v16 }
 0x9b7   : > { %v7189_v32 = vcombine.low %v5699_v34, %v5703_v13  ;;  %v7190_v33 = vcombine.low %v5707_v60, %v5711_v57  ;;  %v5731_v23 = vrot.slane %v4757_v8, %v12043_v9  ;;  %v4758_v54 = vadd.f32 %v12033_v47, %v4723_v3  ;;  %v4725_v15 = vpop.xlane.xlu1 %4724 }
 0x9b8   : > { %v7191_v22 = vcombine.low %v5715_v24, %v5719_v56  ;;  %v7198_v50 = vrot.slane %v7188_v52, %v12072_v44  ;;  %v5735_v26 = vrot.slane %v4757_v8, %v12046_v19  ;;  %v5739_v21 = vrot.slane %v4757_v8, %v12050_v49 }
 0x9b9   : > { %v7205_v5 = vrot.slane %v7189_v32, %v12072_v44  ;;  %v7212_v51 = vrot.slane %v7190_v33, %v12072_v44  ;;  %v5743_v58 = vrot.slane %v4757_v8, %v12053_v10  ;;  %v5747_v12 = vrot.slane %v4757_v8, %v12058_v35 }
 0x9ba   : > { %v7219_v53 = vrot.slane %v7191_v22, %v12072_v44  ;;  %v5751_v40 = vrot.slane %v4757_v8, %v12061_v17  ;;  %v7237_v6 = vcombine.low %v5723_v61, %v5727_v30  ;;  %v7238_v4 = vcombine.low %v5731_v23, %v5735_v26 }
 0x9bb   : > { %v7220_v45 = vcombine.low %v7198_v50, %v7205_v5  ;;  %v7239_v39 = vcombine.low %v5739_v21, %v5743_v58  ;;  %v5755_v14 = vrot.slane %v4758_v54, %v12037_v36  ;;  %v5759_v48 = vrot.slane %v4758_v54, %v12040_v16 }
 0x9bc   : > { %v7221_v46 = vcombine.low %v7212_v51, %v7219_v53  ;;  %v7240_v0 = vcombine.low %v5747_v12, %v5751_v40  ;;  %v7247_v37 = vrot.slane %v7237_v6, %v12072_v44  ;;  %v7254_v43 = vrot.slane %v7238_v4, %v12072_v44  ;;  %v12861_v40 = vpop.permute.xlu1 %7388 }
 0x9bd   : > { %v7228_v18 = vrot.slane %v7220_v45, %v12072_v44  ;;  %v7261_v42 = vrot.slane %v7239_v39, %v12072_v44  ;;  %v5763_v11 = vrot.slane %v4758_v54, %v12043_v9  ;;  %v5767_v62 = vrot.slane %v4758_v54, %v12046_v19 }
 0x9be   : > { %v7235_v31 = vrot.slane %v7221_v46, %v12072_v44  ;;  %v7268_v29 = vrot.slane %v7240_v0, %v12072_v44  ;;  %v7269_v1 = vcombine.low %v7247_v37, %v7254_v43  ;;  %v5771_v20 = vrot.slane %v4758_v54, %v12050_v49 }
 0x9bf   : > { %v5775_v27 = vrot.slane %v4758_v54, %v12053_v10  ;;  %v4759_v28 = vadd.f32 %v12033_v47, %v4725_v15  ;;  %v5779_v41 = vrot.slane %v4758_v54, %v12058_v35  ;;  %v5783_v2 = vrot.slane %v4758_v54, %v12061_v17 }
 0x9c0   : > { %v7236_v59 = vcombine.low %v7228_v18, %v7235_v31  ;;  %v7270_v63 = vcombine.low %v7261_v42, %v7268_v29  ;;  %v7277_v7 = vrot.slane %v7269_v1, %v12072_v44  ;;  %v7286_v25 = vcombine.low %v5755_v14, %v5759_v48  ;;  %v12863_v6 = vpop.permute.xlu1 %7391  ;;  %v7386_v14 = vpop.permute.xlu0 %7385 }
 0x9c1   : > { %v7287_v38 = vcombine.low %v5763_v11, %v5767_v62  ;;  %v7288_v55 = vcombine.low %v5771_v20, %v5775_v27  ;;  %v7289_v34 = vcombine.low %v5779_v41, %v5783_v2  ;;  %v5787_v60 = vrot.slane %v4759_v28, %v12037_v36 }
 0x9c2   : > { %7469 = vperm.xlu0 %8364, %v7236_v59   ;;  %v7284_v8 = vrot.slane %v7270_v63, %v12072_v44  ;;  %v7296_v3 = vrot.slane %v7286_v25, %v12072_v44  ;;  %v5791_v57 = vrot.slane %v4759_v28, %v12040_v16  ;;  %v5795_v52 = vrot.slane %v4759_v28, %v12043_v9  ;;  %v13819_v25 = vld [vmem:[#allocation9_spill] sm:$0xff] }
 0x9c3   : > { %v7303_v47 = vrot.slane %v7287_v38, %v12072_v44  ;;  %v7310_v24 = vrot.slane %v7288_v55, %v12072_v44  ;;  %v7317_v56 = vrot.slane %v7289_v34, %v12072_v44  ;;  %v5799_v61 = vrot.slane %v4759_v28, %v12046_v19 }
 0x9c4   : > { %v7285_v13 = vcombine.low %v7277_v7, %v7284_v8  ;;  %v5803_v33 = vrot.slane %v4759_v28, %v12050_v49  ;;  %v5807_v23 = vrot.slane %v4759_v28, %v12053_v10  ;;  %v5811_v54 = vrot.slane %v4759_v28, %v12058_v35  ;;  %v12865_v45 = vpop.permute.xlu1 %7394  ;;  %v12877_v18 = vpop.permute.xlu0 %7412 }
 0x9c5   : > { %v7318_v32 = vcombine.low %v7296_v3, %v7303_v47  ;;  %v7319_v30 = vcombine.low %v7310_v24, %v7317_v56  ;;  %v5815_v36 = vrot.slane %v4759_v28, %v12061_v17  ;;  %v7335_v22 = vcombine.low %v5787_v60, %v5791_v57 }
 0x9c6   : > { %7472 = vperm.xlu0 %8364, %v7285_v13   ;;  %v7336_v50 = vcombine.low %v5795_v52, %v5799_v61  ;;  %v7337_v9 = vcombine.low %v5803_v33, %v5807_v23  ;;  %v13818_v28 = vlaneseq }
 0x9c7   : > { %v7326_v16 = vrot.slane %v7318_v32, %v12072_v44  ;;  %v7333_v26 = vrot.slane %v7319_v30, %v12072_v44  ;;  %v7338_v5 = vcombine.low %v5811_v54, %v5815_v36  ;;  %v7345_v19 = vrot.slane %v7335_v22, %v12072_v44 }
 0x9c8   : > { %v7352_v51 = vrot.slane %v7336_v50, %v12072_v44  ;;  %v7359_v21 = vrot.slane %v7337_v9, %v12072_v44  ;;  %v12867_v4 = vpop.permute.xlu1 %7397  ;;  %v7437_v42 = vpop.permute.xlu0 %7436  ;;  %v12892_v59 = vand.u32 127, %v13818_v28  ;;  %vm7688_vm15 = vcmp.lt.s32.totalorder %v13818_v28, 256 }
 0x9c9   : > { %v7334_v49 = vcombine.low %v7326_v16, %v7333_v26  ;;  %v7366_v10 = vrot.slane %v7338_v5, %v12072_v44 }
 0x9ca   : > { %v7367_v35 = vcombine.low %v7345_v19, %v7352_v51  ;;  %v7493_v63 = vadd.s32 4294967280, %v12892_v59  ;;  %v7486_v41 = vadd.s32 4294967288, %v12892_v59  ;;  %v7484_v8 = vsub.s32 %v12892_v59, %v13819_v25 }
 0x9cb   : > { %7475 = vperm.xlu0 %8364, %v7334_v49   ;;  %v7368_v17 = vcombine.low %v7359_v21, %v7366_v10  ;;  %v7542_v38 = vadd.s32 4294967224, %v12892_v59  ;;  %v7500_v55 = vadd.s32 4294967272, %v12892_v59  ;;  %v7507_v3 = vadd.s32 4294967264, %v12892_v59 }
 0x9cc   : > { %v7375_v58 = vrot.slane %v7367_v35, %v12072_v44  ;;  %v12869_v39 = vpop.permute.xlu1 %7400  ;;  %v7443_v31 = vpop.permute.xlu0 %7442  ;;  %v7496_v34 = vsub.s32 %v7493_v63, %v13819_v25  ;;  %v7489_v13 = vsub.s32 %v7486_v41, %v13819_v25  ;;  %v7514_v60 = vadd.s32 4294967256, %v12892_v59 }
 0x9cd   : > { %v7382_v53 = vrot.slane %v7368_v17, %v12072_v44  ;;  %v12911_v56 = vsub.s32 %v7542_v38, %v13819_v25  ;;  %v7503_v52 = vsub.s32 %v7500_v55, %v13819_v25  ;;  %v7510_v33 = vsub.s32 %v7507_v3, %v13819_v25 }
 0x9ce   : > { %v7598_v61 = vrot.slane %v7437_v42, %v7489_v13  ;;  %v7521_v30 = vadd.s32 4294967248, %v12892_v59  ;;  %v7528_v23 = vadd.s32 4294967240, %v12892_v59  ;;  %v7485_v54 = vrot.slane %v7386_v14, %v7484_v8 }
 0x9cf   : > { %v7383_v12 = vcombine.low %v7375_v58, %v7382_v53  ;;  %v7535_v36 = vadd.s32 4294967232, %v12892_v59  ;;  %v7517_v22 = vsub.s32 %v7514_v60, %v13819_v25  ;;  %v7490_v9 = vrot.slane %v12861_v40, %v7489_v13 }
 0x9d0   : > { %v12871_v46 = vpop.permute.xlu1 %7403  ;;  %v12881_v11 = vpop.permute.xlu0 %7448  ;;  %v7608_v5 = vrot.slane %v7443_v31, %v7503_v52  ;;  %v7549_v19 = vadd.s32 4294967216, %v12892_v59  ;;  %v7497_v49 = vrot.slane %v12863_v6, %v7496_v34  ;;  %v7524_v21 = vsub.s32 %v7521_v30, %v13819_v25 }
 0x9d1   : > { %7478 = vperm.xlu0 %8364, %v7383_v12   ;;  %v7531_v10 = vsub.s32 %v7528_v23, %v13819_v25  ;;  %v7492_v17 = vsel %vm7491_vm0, %v7490_v9, %v7485_v54  ;;  %v7504_v58 = vrot.slane %v12865_v45, %v7503_v52  ;;  %v7538_v53 = vsub.s32 %v7535_v36, %v13819_v25 }
 0x9d2   : > { %v7511_v40 = vrot.slane %v12867_v4, %v7510_v33  ;;  %v7552_v42 = vsub.s32 %v7549_v19, %v13819_v25  ;;  %v7556_v45 = vadd.s32 4294967208, %v12892_v59  ;;  %v7525_v31 = vrot.slane %v12871_v46, %v7524_v21 }
 0x9d3   : > { %v7563_v4 = vadd.s32 4294967200, %v12892_v59  ;;  %v7570_v63 = vadd.s32 4294967192, %v12892_v59 }
 0x9d4   : > { %v12873_v0 = vpop.permute.xlu1 %7406  ;;  %v12885_v62 = vpop.permute.xlu0 %7454  ;;  %v7559_v60 = vsub.s32 %v7556_v45, %v13819_v25 }
 0x9d5   : > { %v7566_v52 = vsub.s32 %v7563_v4, %v13819_v25 }
 0x9d8   : > { %v12875_v37 = vpop.permute.xlu1 %7409 }
 0x9d9   : > { %v7539_v55 = vrot.slane %v12875_v37, %v7538_v53  ;;  %v7573_v37 = vsub.s32 %v7570_v63, %v13819_v25 }
 0x9dc   : > { %v7434_v15 = vpop.permute.xlu1 %7433 }
 0x9dd   : > { %v7594_v47 = vrot.slane %v7434_v15, %v7484_v8  ;;  %v7518_v15 = vrot.slane %v12869_v39, %v7517_v22  ;;  %v7532_v39 = vrot.slane %v12873_v0, %v7531_v10  ;;  %v7577_v8 = vadd.s32 4294967184, %v12892_v59 }
 0x9de   : > { %v7584_v0 = vadd.s32 4294967176, %v12892_v59 }
 0x9df   : > { %v7599_v16 = vsel %vm7491_vm0, %v7598_v61, %v7594_v47  ;;  %v7628_v47 = vrot.slane %v12885_v62, %v7531_v10  ;;  %v7580_v62 = vsub.s32 %v7577_v8, %v13819_v25 }
 0x9e0   : > { %v7440_v43 = vpop.permute.xlu1 %7439 }
 0x9e1   : > { %v7603_v57 = vrot.slane %v7440_v43, %v7496_v34  ;;  %v7618_v43 = vrot.slane %v12881_v11, %v7517_v22 }
 0x9e3   : > { %v7604_v50 = vsel %vm7498_vm1, %v7603_v57, %v7599_v16  ;;  %v7546_v16 = vrot.slane %v12877_v18, %v12911_v56 }
 0x9e4   : > { %v7446_v48 = vpop.permute.xlu1 %7445  ;;  %v7609_v12 = vsel %vm7505_vm2, %v7608_v5, %v7604_v50 }
 0x9e5   : > { %v7613_v26 = vrot.slane %v7446_v48, %v7510_v33  ;;  %v7499_v48 = vsel %vm7498_vm1, %v7497_v49, %v7492_v17 }
 0x9e7   : > { %v7614_v14 = vsel %vm7512_vm3, %v7613_v26, %v7609_v12 }
 0x9e8   : > { %v12879_v29 = vpop.permute.xlu1 %7451  ;;  %v7619_v11 = vsel %vm7519_vm4, %v7618_v43, %v7614_v14 }
 0x9e9   : > { %v7623_v6 = vrot.slane %v12879_v29, %v7524_v21  ;;  %v7506_v29 = vsel %vm7505_vm2, %v7504_v58, %v7499_v48 }
 0x9ea   : > { %v7513_v38 = vsel %vm7512_vm3, %v7511_v40, %v7506_v29 }
 0x9eb   : > { %v7624_v34 = vsel %vm7526_vm5, %v7623_v6, %v7619_v11  ;;  %v7520_v13 = vsel %vm7519_vm4, %v7518_v15, %v7513_v38 }
 0x9ec   : > { %v7527_v57 = vsel %vm7526_vm5, %v7525_v31, %v7520_v13 }
 0x9ed   : > { %v7534_v61 = vsel %vm7533_vm6, %v7532_v39, %v7527_v57 }
 0x9ee   : > { %v7541_v30 = vsel %vm7540_vm7, %v7539_v55, %v7534_v61 }
 0x9ef   : > { %v7548_v5 = vsel %vm7547_vm8, %v7546_v16, %v7541_v30 }
 0xa15   : > { %v12883_v1 = vpop.permute.xlu1 %7457 }
 0xa16   : > { %v7633_v46 = vrot.slane %v12883_v1, %v7538_v53  ;;  %v7629_v1 = vsel %vm7533_vm6, %v7628_v47, %v7624_v34 }
 0xa18   : > { %v7634_v59 = vsel %vm7540_vm7, %v7633_v46, %v7629_v1 }
 0xa19   : > { %v12887_v20 = vpop.permute.xlu1 %7415  ;;  %v12889_v27 = vpop.permute.xlu0 %7460 }
 0xa1a   : > { %v7638_v33 = vrot.slane %v12889_v27, %v12911_v56  ;;  %v7553_v23 = vrot.slane %v12887_v20, %v7552_v42  ;;  %v7587_v27 = vsub.s32 %v7584_v0, %v13819_v25 }
 0xa1c   : > { %v7555_v56 = vsel %vm7554_vm9, %v7553_v23, %v7548_v5 }
 0xa1d   : > { %v12895_v7 = vpop.permute.xlu1 %7418 }
 0xa1e   : > { %v12898_v2 = vpop.permute.xlu0 %7463  ;;  %v7560_v22 = vrot.slane %v12895_v7, %v7559_v60 }
 0xa1f   : > { %v7643_v54 = vrot.slane %v12898_v2, %v7552_v42  ;;  %v7639_v2 = vsel %vm7547_vm8, %v7638_v33, %v7634_v59 }
 0xa21   : > { %v12908_v24 = vpop.permute.xlu1 %7421  ;;  %v7644_v25 = vsel %vm7554_vm9, %v7643_v54, %v7639_v2 }
 0xa22   : > { %v7567_v26 = vrot.slane %v12908_v24, %v7566_v52  ;;  %v7562_v24 = vsel %vm7561_vm10, %v7560_v22, %v7555_v56 }
 0xa24   : > { %v12914_v32 = vpop.permute.xlu0 %7466  ;;  %v7569_v21 = vsel %vm7568_vm11, %v7567_v26, %v7562_v24 }
 0xa25   : > { %v12930_v35 = vpop.permute.xlu1 %7424  ;;  %v7648_v50 = vrot.slane %v12914_v32, %v7559_v60 }
 0xa26   : > { %v7574_v18 = vrot.slane %v12930_v35, %v7573_v37 }
 0xa27   : > { %v7649_v49 = vsel %vm7561_vm10, %v7648_v50, %v7644_v25 }
 0xa28   : > { %v7576_v17 = vsel %vm7575_vm12, %v7574_v18, %v7569_v21 }
 0xa29   : > { %v7428_v3 = vpop.permute.xlu1 %7427 }
 0xa2a   : > { %v7581_v32 = vrot.slane %v7428_v3, %v7580_v62 }
 0xa2c   : > { %v7583_v12 = vsel %vm7582_vm13, %v7581_v32, %v7576_v17 }
 0xa2d   : > { %v7431_v9 = vpop.permute.xlu1 %7430 }
 0xa41   : > { %v12925_v51 = vpop.permute.xlu0 %7469 }
 0xa42   : > { %v7653_v20 = vrot.slane %v12925_v51, %v7566_v52  ;;  %v7588_v51 = vrot.slane %v7431_v9, %v7587_v27 }
 0xa44   : > { %v7654_v10 = vsel %vm7568_vm11, %v7653_v20, %v7649_v49  ;;  %v7590_v14 = vsel %vm7589_vm14, %v7588_v51, %v7583_v12 }
 0xa45   : > { %v7473_v41 = vpop.permute.xlu0 %7472 }
 0xa46   : > { %v7658_v7 = vrot.slane %v7473_v41, %v7573_v37 }
 0xa48   : > { %v7659_v58 = vsel %vm7575_vm12, %v7658_v7, %v7654_v10 }
 0xa4a   : > { %v7476_v36 = vpop.permute.xlu0 %7475 }
 0xa4b   : > { %v7663_v19 = vrot.slane %v7476_v36, %v7580_v62 }
 0xa4d   : > { %v7664_v40 = vsel %vm7582_vm13, %v7663_v19, %v7659_v58 }
 0xa50   : > { %v7479_v35 = vpop.permute.xlu0 %7478 }
 0xa51   : > { %v7668_v53 = vrot.slane %v7479_v35, %v7587_v27 }
 0xa53   : > { %v7669_v6 = vsel %vm7589_vm14, %v7668_v53, %v7664_v40 }
 0xa54   : > { %v7670_v15 = vcombine.low %v7590_v14, %v7669_v6 }
 0xa56   : > { %v7677_v43 = vrot.slane %v7670_v15, %v12072_v44 }
 0xa58   : > { %v7684_v42 = vrot.slane %v7677_v43, %v12072_v44 }
 0xa5a   : > { %7690 = vst.msk [vmem:[%s246_s17] sm:$0x3] %vm7688_vm15, %v7684_v42 }
 0xa5b   : > { %8560 = shalt.err (!%p8557_p3)
}
 0xa5c   : > { %s8561_s10 = scalar_lea.hbm %s12999_s21, 32  ;;  %s8565_s12 = scalar_lea.hbm %s13049_s6, 64 }
 0xa5d   : > { %p8562_p4 = scmp.ne.s32.totalorder %s12999_s21, %s8561_s10  ;;  %p8566_p9 = scmp.lt.u32.totalorder %s12999_s21, %s13049_s6 }
 0xa5e   : > { %p8567_p10 = scmp.lt.u32.totalorder %s8565_s12, %s8561_s10  ;;  %p8569_p12 = scmp.lt.u32.totalorder %s8561_s10, %s12999_s21 }
 0xa5f   : > { %p8563_p7 = pnand %p8562_p4, %p8702_p5 }
 0xa60   : > { %p8568_p11 = por %p8567_p10, %p8566_p9 }
 0xa61   : > { %p8564_p8 = pneg %p8563_p7 }
 0xa62   : > { %p8570_p13 = por %p8569_p12, %p8568_p11 }
 0xa64   : > { %p8571_p0 = pnand %p8570_p13, %p8564_p8 }
 0xa66   : > { %8574 = shalt.err (!%p8571_p0)
}
 0xa67   : > { %8168 = dma.vmem_to_hbm [thread:$0]  (%p8702_p5), %s13001_s18, 32, %s12999_s21, %s7692_s22  }
 0xa68 PF: > { %p8174_p1 = scmp.ge.s32.totalorder %s8609_s26, 2  ;;  %s7718_s16 = sand.u32 1, %s8597_s23  }
 0xa69   : > { %s7719_s17 = scalar_lea.sflag [#allocation4], %s7718_s16 }
 0xa6a   : > { %p8171_p2 = pnand %p8174_p1, %p8706_p6 }
 0xa6c   : > { %8592 = dma.done.wait (!%p8171_p2), %s7719_s17, 32  }
 0xa6d   : > { %8594 = vsyncadd (!%p8171_p2), %s7719_s17, 4294967264  ;;  %p17_p3 = scmp.ge.s32.totalorder %s8690_s28, 4   ;;  %s13820_s23 = smov %s8601_s24 }
 0xa6e   : > { %s13821_s24 = smov %s8605_s25  ;;  %s13822_s25 = smov %s8700_s7 }
 0xa6f   : > { %s13823_s26 = smov %s8690_s28  ;;  %19 = sbr.rel (!%p17_p3) target bundleno = 5 (0x5), region = 82 }
 0xa76   :  { %7724 = vsyncpa [#allocation4], 1 }
 0xa77   :  { %7726 = vsyncpa [#allocation4 + $0x1], 1 }

</bundles_post_ra>
